<compile_context>
chip_gen: v7x
topology: tpu7x:2x2x1
jax: 0.10.0
libtpu: 0.0.40
codegen_flags: <defaults>
</compile_context>

<pallas_src>
import functools

import jax
import jax.numpy as jnp
from jax.experimental import pallas as pl
from jax.experimental.pallas import tpu as pltpu

LANE = 128
SUBLANE = 8


def _round_up(x, m):
    return ((x + m - 1) // m) * m


# ----------------------------------------------------------------------------
# Pallas kernel 1: fused  out = act(X @ W + b)   (used for conv1..conv3)
# ----------------------------------------------------------------------------
def _matmul_bias_kernel(x_ref, w_ref, b_ref, o_ref, *, relu):
    acc = jnp.dot(x_ref[...], w_ref[...], preferred_element_type=jnp.float32)
    acc = acc + b_ref[...]                  # (1, N) broadcasts over rows
    if relu:
        acc = jnp.maximum(acc, 0.0)
    o_ref[...] = acc.astype(o_ref.dtype)


def matmul_bias(x, w, b_row, *, relu=False, tm=1024):
    """x: (M, K) f32, w: (K, N) f32 (N lane-dense), b_row: (1, N) f32 -> (M, N)."""
    M, K = x.shape
    Kw, N = w.shape
    assert K == Kw, (K, Kw)

    if M <= tm:
        grid = (1,)
        bm = M          # block == full array: no (8,128) divisibility constraint
    else:
        grid = (pl.cdiv(M, tm),)
        bm = tm         # multiple of 8; partial last block handled by Pallas

    return pl.pallas_call(
        functools.partial(_matmul_bias_kernel, relu=relu),
        out_shape=jax.ShapeDtypeStruct((M, N), jnp.float32),
        grid=grid,
        in_specs=[
            pl.BlockSpec((bm, K), lambda i: (i, 0)),   # row tile of X
            pl.BlockSpec((K, N), lambda i: (0, 0)),    # full weight, resident
            pl.BlockSpec((1, N), lambda i: (0, 0)),    # bias row
        ],
        out_specs=pl.BlockSpec((bm, N), lambda i: (i, 0)),
        compiler_params=pltpu.CompilerParams(
            dimension_semantics=("parallel",)),
    )(x, w, b_row)


# ----------------------------------------------------------------------------
# Pallas kernel 2: fused head  (conv4 GEMM + bias + ReLU + fc_mu/fc_logsigma)
#
# patches4 rows are arranged position-major: row = p * bp + b, with bp a
# multiple of 8 so every in-kernel slice is sublane-aligned.
# fc weight rows are in NHWC-flatten order: row = p * C4 + c.
# ----------------------------------------------------------------------------
def _head_kernel(p4_ref, w4_ref, b4_ref, wfc_ref, bfc_ref, o_ref, *, bp, n_pos):
    c4 = w4_ref.shape[1]                                   # conv4 out channels (256)
    y4 = jnp.dot(p4_ref[...], w4_ref[...], preferred_element_type=jnp.float32)
    y4 = jnp.maximum(y4 + b4_ref[...], 0.0)                # (n_pos*bp, c4), ReLU

    acc = jnp.zeros(o_ref.shape, jnp.float32)
    for p in range(n_pos):                                 # 4 aligned small matmuls
        acc = acc + jnp.dot(y4[p * bp:(p + 1) * bp, :],
                            wfc_ref[p * c4:(p + 1) * c4, :],
                            preferred_element_type=jnp.float32)
    o_ref[...] = (acc + bfc_ref[...]).astype(o_ref.dtype)


def head_forward(patches4_pm, w4, b4_row, wfc, bfc_row, *, bp, n_pos):
    M4, K4 = patches4_pm.shape
    n_fc = wfc.shape[1]
    return pl.pallas_call(
        functools.partial(_head_kernel, bp=bp, n_pos=n_pos),
        out_shape=jax.ShapeDtypeStruct((bp, n_fc), jnp.float32),
        grid=(1,),
        in_specs=[
            pl.BlockSpec((M4, K4), lambda i: (0, 0)),
            pl.BlockSpec(w4.shape, lambda i: (0, 0)),
            pl.BlockSpec(b4_row.shape, lambda i: (0, 0)),
            pl.BlockSpec(wfc.shape, lambda i: (0, 0)),
            pl.BlockSpec(bfc_row.shape, lambda i: (0, 0)),
        ],
        out_specs=pl.BlockSpec((bp, n_fc), lambda i: (0, 0)),
        compiler_params=pltpu.CompilerParams(
            dimension_semantics=("arbitrary",)),
    )(patches4_pm, w4, b4_row, wfc, bfc_row)


# ----------------------------------------------------------------------------
# im2col glue (plain JAX: strided slicing + reshape only)
# ----------------------------------------------------------------------------
def im2col_nhwc(x, ksize=4, stride=2):
    """x: (B, H, W, C) -> patches (B*Ho*Wo, ksize*ksize*C), plus (B, Ho, Wo)."""
    B, H, W, C = x.shape
    Ho = (H - ksize) // stride + 1
    Wo = (W - ksize) // stride + 1
    cols = []
    for ki in range(ksize):
        for kj in range(ksize):
            cols.append(
                x[:, ki:ki + stride * Ho:stride, kj:kj + stride * Wo:stride, :])
    # (B, Ho, Wo, ksize*ksize, C); patch index order = (kh*KW + kw)*C + c
    p = jnp.stack(cols, axis=3)
    return p.reshape(B * Ho * Wo, ksize * ksize * C), (B, Ho, Wo)


# ----------------------------------------------------------------------------
# Parameter construction (deterministic, PyTorch-default-style uniform init)
# ----------------------------------------------------------------------------
def conv_params(key, cin, cout, k=4):
    k1, k2 = jax.random.split(key)
    bound = 1.0 / (cin * k * k) ** 0.5
    w = jax.random.uniform(k1, (cout, cin, k, k), jnp.float32, -bound, bound)
    b = jax.random.uniform(k2, (cout,), jnp.float32, -bound, bound)
    return w, b  # PyTorch OIHW weight layout


def linear_params(key, fin, fout):
    k1, k2 = jax.random.split(key)
    bound = 1.0 / fin ** 0.5
    w = jax.random.uniform(k1, (fout, fin), jnp.float32, -bound, bound)
    b = jax.random.uniform(k2, (fout,), jnp.float32, -bound, bound)
    return w, b  # PyTorch (out, in) weight layout


def init_encoder_params(key, img_channels, latent_size):
    keys = jax.random.split(key, 6)
    return {
        "convs": [
            conv_params(keys[0], img_channels, 32),
            conv_params(keys[1], 32, 64),
            conv_params(keys[2], 64, 128),
            conv_params(keys[3], 128, 256),
        ],
        "fc_mu": linear_params(keys[4], 2 * 2 * 256, latent_size),
        "fc_logsigma": linear_params(keys[5], 2 * 2 * 256, latent_size),
    }


# ----------------------------------------------------------------------------
# One-time weight preparation: layout transforms + lane-dense zero padding.
# ----------------------------------------------------------------------------
def prepare_encoder_params(params, img_channels, latent_size):
    cin_real = img_channels
    cin_pad = _round_up(max(img_channels, 1), SUBLANE)  # 3 -> 8 so conv1 K = 4*4*8 = 128
    cin_pad0 = cin_pad

    convs = []
    for (w, b) in params["convs"]:
        cout, cin_w, kh, kw = w.shape
        assert cin_w == cin_real
        cout_pad = _round_up(cout, LANE)
        # OIHW -> (KH, KW, Cin, Cout); zero-pad Cin (carried padded channels
        # from the previous layer) and Cout (lane-dense stores).
        w_hwio = jnp.transpose(w, (2, 3, 1, 0))
        w_hwio = jnp.pad(w_hwio, ((0, 0), (0, 0),
                                  (0, cin_pad - cin_real),
                                  (0, cout_pad - cout)))
        w_mat = w_hwio.reshape(kh * kw * cin_pad, cout_pad)
        b_row = jnp.pad(b, (0, cout_pad - cout)).reshape(1, cout_pad)
        convs.append((w_mat, b_row))
        cin_real, cin_pad = cout, cout_pad

    # Fused fc head: reorder rows so it consumes the NHWC-flattened features
    # (PyTorch flattens NCHW), concat mu/logsigma along N, pad N to 128.
    feat_c, feat_h, feat_w = 256, 2, 2
    w_mu, b_mu = params["fc_mu"]
    w_ls, b_ls = params["fc_logsigma"]

    def to_nhwc_rows(w_):
        return (w_.reshape(latent_size, feat_c, feat_h, feat_w)
                  .transpose(0, 2, 3, 1)
                  .reshape(latent_size, feat_c * feat_h * feat_w))

    w_fc = jnp.concatenate([to_nhwc_rows(w_mu).T, to_nhwc_rows(w_ls).T], axis=1)
    n_fc = _round_up(2 * latent_size, LANE)
    w_fc = jnp.pad(w_fc, ((0, 0), (0, n_fc - 2 * latent_size)))
    b_fc = jnp.pad(jnp.concatenate([b_mu, b_ls]),
                   (0, n_fc - 2 * latent_size)).reshape(1, n_fc)

    return {
        "cin_pad0": cin_pad0,            # python int (static)
        "latent_size": latent_size,      # python int (static)
        "convs": convs,
        "fc_w": w_fc,
        "fc_b": b_fc,
    }


# ----------------------------------------------------------------------------
# Forward pass (jitted closure over the prepared weights)
# ----------------------------------------------------------------------------
def make_encoder_forward(prep):
    cin_pad0 = prep["cin_pad0"]
    latent_size = prep["latent_size"]
    convs = prep["convs"]
    w_fc, b_fc = prep["fc_w"], prep["fc_b"]

    @jax.jit
    def forward(x_nchw):
        B, C, H, W = x_nchw.shape
        x = jnp.transpose(x_nchw, (0, 2, 3, 1))          # NCHW -> NHWC
        if cin_pad0 > C:
            x = jnp.pad(x, ((0, 0), (0, 0), (0, 0), (0, cin_pad0 - C)))

        # conv1 .. conv3: im2col + fused matmul/bias/ReLU Pallas kernel
        for (w_mat, b_row) in convs[:3]:
            patches, (Bp, Ho, Wo) = im2col_nhwc(x, ksize=4, stride=2)
            y = matmul_bias(patches, w_mat, b_row, relu=True)
            x = y.reshape(Bp, Ho, Wo, w_mat.shape[1])

        # conv4 + fc_mu/fc_logsigma: single fused Pallas kernel.
        w4, b4 = convs[3]
        patches, (Bp, Ho, Wo) = im2col_nhwc(x, ksize=4, stride=2)
        n_pos = Ho * Wo                                  # 4 (2x2 spatial)
        K4 = patches.shape[1]
        bp = _round_up(B, SUBLANE)                       # sublane-aligned batch rows
        patches = patches.reshape(B, n_pos, K4).transpose(1, 0, 2)  # position-major
        if bp > B:
            patches = jnp.pad(patches, ((0, 0), (0, bp - B), (0, 0)))
        patches = patches.reshape(n_pos * bp, K4)

        out = head_forward(patches, w4, b4, w_fc, b_fc, bp=bp, n_pos=n_pos)
        mu = out[:B, :latent_size]
        logsigma = out[:B, latent_size:2 * latent_size]
        return mu, logsigma

    return forward


# ----------------------------------------------------------------------------
# Pure-JAX reference (for correctness check only)
# ----------------------------------------------------------------------------
def encoder_forward_ref(x_nchw, params):
    x = x_nchw
    for (w, b) in params["convs"]:
        x = jax.lax.conv_general_dilated(
            x, w, window_strides=(2, 2), padding="VALID",
            dimension_numbers=("NCHW", "OIHW", "NCHW"))
        x = jax.nn.relu(x + b.reshape(1, -1, 1, 1))
    feat = x.reshape(x.shape[0], -1)
    w_mu, b_mu = params["fc_mu"]
    w_ls, b_ls = params["fc_logsigma"]
    return feat @ w_mu.T + b_mu, feat @ w_ls.T + b_ls


if __name__ == "__main__":
    B, IMG_CHANNELS, LATENT = 2, 3, 32
    key = jax.random.PRNGKey(0)
    k_x, k_p = jax.random.split(key)

    # 64x64 spatial is required by fc_mu/fc_logsigma expecting 2*2*256 features.
    x = jax.random.normal(k_x, (B, IMG_CHANNELS, 64, 64), jnp.float32)
    params = init_encoder_params(k_p, IMG_CHANNELS, LATENT)

    prep = prepare_encoder_params(params, IMG_CHANNELS, LATENT)
    forward = make_encoder_forward(prep)

    mu, logsigma = forward(x)
    mu, logsigma = jax.block_until_ready((mu, logsigma))

    mu_ref, ls_ref = encoder_forward_ref(x, params)
    assert mu.shape == (B, LATENT) and logsigma.shape == (B, LATENT)
    assert jnp.allclose(mu, mu_ref, atol=2e-3, rtol=2e-3)
    assert jnp.allclose(logsigma, ls_ref, atol=2e-3, rtol=2e-3)

    print("KERNEL_OK")
</pallas_src>

<mosaic_0001>
module attributes {stable_mosaic.version = 11 : i64} {
  func.func @_matmul_bias_kernel(%arg0: i32, %arg1: memref<1024x128xf32, #tpu.memory_space<vmem>>, %arg2: memref<128x128xf32, #tpu.memory_space<vmem>>, %arg3: memref<1x128xf32, #tpu.memory_space<vmem>>, %arg4: memref<1024x128xf32, #tpu.memory_space<vmem>>) attributes {dimension_semantics = [#tpu.dimension_semantics<parallel>], iteration_bounds = array<i64: 2>, scalar_prefetch = 0 : i64, scratch_operands = 0 : i64, tpu.core_type = #tpu.core_type<tc>, window_params = [{transform_indices = @transform_0, window_bounds = array<i64: 1024, 128>}, {pipeline_mode = #tpu.pipeline_mode<synchronous>, transform_indices = @transform_1, window_bounds = array<i64: 128, 128>}, {pipeline_mode = #tpu.pipeline_mode<synchronous>, transform_indices = @transform_2, window_bounds = array<i64: 1, 128>}, {transform_indices = @transform_3, window_bounds = array<i64: 1024, 128>}]} {
    %c0 = arith.constant 0 : index
    %c0_0 = arith.constant 0 : index
    %0 = vector.load %arg1[%c0, %c0_0] : memref<1024x128xf32, #tpu.memory_space<vmem>>, vector<1024x128xf32>
    %c0_1 = arith.constant 0 : index
    %c0_2 = arith.constant 0 : index
    %1 = vector.load %arg2[%c0_1, %c0_2] : memref<128x128xf32, #tpu.memory_space<vmem>>, vector<128x128xf32>
    %cst = arith.constant dense<0.000000e+00> : vector<1024x128xf32>
    %2 = tpu.matmul %0, %1, %cst {dimension_numbers = #tpu.dot_dimension_numbers<[1], [0], [0], [1], [0, 0, 1, 1], [], []>} : vector<1024x128xf32>, vector<128x128xf32>, vector<1024x128xf32> -> vector<1024x128xf32>
    %c0_3 = arith.constant 0 : index
    %c0_4 = arith.constant 0 : index
    %3 = vector.load %arg3[%c0_3, %c0_4] : memref<1x128xf32, #tpu.memory_space<vmem>>, vector<1x128xf32>
    %4 = vector.broadcast %3 : vector<1x128xf32> to vector<1024x128xf32>
    %5 = arith.addf %2, %4 : vector<1024x128xf32>
    %cst_5 = arith.constant 0.000000e+00 : f32
    %6 = vector.broadcast %cst_5 : f32 to vector<1024x128xf32>
    %7 = arith.maximumf %5, %6 : vector<1024x128xf32>
    %c0_6 = arith.constant 0 : index
    %c0_7 = arith.constant 0 : index
    %8 = vector.load %arg4[%c0_6, %c0_7] : memref<1024x128xf32, #tpu.memory_space<vmem>>, vector<1024x128xf32>
    tpu.vector_store %arg4[%c0_6, %c0_7], %7 {strides = array<i32>} : memref<1024x128xf32, #tpu.memory_space<vmem>>, vector<1024x128xf32>,
    return
  }
  func.func @transform_0(%arg0: i32) -> (i32, i32) {
    %c0_i32 = arith.constant 0 : i32
    %c0_i32_0 = arith.constant 0 : i32
    return %arg0, %c0_i32 : i32, i32
  }
  func.func @transform_1(%arg0: i32) -> (i32, i32) {
    %c0_i32 = arith.constant 0 : i32
    %c0_i32_0 = arith.constant 0 : i32
    %c0_i32_1 = arith.constant 0 : i32
    return %c0_i32, %c0_i32_0 : i32, i32
  }
  func.func @transform_2(%arg0: i32) -> (i32, i32) {
    %c0_i32 = arith.constant 0 : i32
    %c0_i32_0 = arith.constant 0 : i32
    %c0_i32_1 = arith.constant 0 : i32
    return %c0_i32, %c0_i32_0 : i32, i32
  }
  func.func @transform_3(%arg0: i32) -> (i32, i32) {
    %c0_i32 = arith.constant 0 : i32
    %c0_i32_0 = arith.constant 0 : i32
    return %arg0, %c0_i32 : i32, i32
  }
}

module attributes {stable_mosaic.version = 11 : i64} {
  func.func @_matmul_bias_kernel(%arg0: i32, %arg1: memref<392x2048xf32, #tpu.memory_space<vmem>>, %arg2: memref<2048x128xf32, #tpu.memory_space<vmem>>, %arg3: memref<1x128xf32, #tpu.memory_space<vmem>>, %arg4: memref<392x128xf32, #tpu.memory_space<vmem>>) attributes {dimension_semantics = [#tpu.dimension_semantics<parallel>], iteration_bounds = array<i64: 1>, scalar_prefetch = 0 : i64, scratch_operands = 0 : i64, tpu.core_type = #tpu.core_type<tc>, window_params = [{transform_indices = @transform_0, window_bounds = array<i64: 392, 2048>}, {pipeline_mode = #tpu.pipeline_mode<synchronous>, transform_indices = @transform_1, window_bounds = array<i64: 2048, 128>}, {pipeline_mode = #tpu.pipeline_mode<synchronous>, transform_indices = @transform_2, window_bounds = array<i64: 1, 128>}, {transform_indices = @transform_3, window_bounds = array<i64: 392, 128>}]} {
    %c0 = arith.constant 0 : index
    %c0_0 = arith.constant 0 : index
    %0 = vector.load %arg1[%c0, %c0_0] : memref<392x2048xf32, #tpu.memory_space<vmem>>, vector<392x2048xf32>
    %c0_1 = arith.constant 0 : index
    %c0_2 = arith.constant 0 : index
    %1 = vector.load %arg2[%c0_1, %c0_2] : memref<2048x128xf32, #tpu.memory_space<vmem>>, vector<2048x128xf32>
    %cst = arith.constant dense<0.000000e+00> : vector<392x128xf32>
    %2 = tpu.matmul %0, %1, %cst {dimension_numbers = #tpu.dot_dimension_numbers<[1], [0], [0], [1], [0, 0, 1, 1], [], []>} : vector<392x2048xf32>, vector<2048x128xf32>, vector<392x128xf32> -> vector<392x128xf32>
    %c0_3 = arith.constant 0 : index
    %c0_4 = arith.constant 0 : index
    %3 = vector.load %arg3[%c0_3, %c0_4] : memref<1x128xf32, #tpu.memory_space<vmem>>, vector<1x128xf32>
    %4 = vector.broadcast %3 : vector<1x128xf32> to vector<392x128xf32>
    %5 = arith.addf %2, %4 : vector<392x128xf32>
    %cst_5 = arith.constant 0.000000e+00 : f32
    %6 = vector.broadcast %cst_5 : f32 to vector<392x128xf32>
    %7 = arith.maximumf %5, %6 : vector<392x128xf32>
    %c0_6 = arith.constant 0 : index
    %c0_7 = arith.constant 0 : index
    %8 = vector.load %arg4[%c0_6, %c0_7] : memref<392x128xf32, #tpu.memory_space<vmem>>, vector<392x128xf32>
    tpu.vector_store %arg4[%c0_6, %c0_7], %7 {strides = array<i32>} : memref<392x128xf32, #tpu.memory_space<vmem>>, vector<392x128xf32>,
    return
  }
  func.func @transform_0(%arg0: i32) -> (i32, i32) {
    %c0_i32 = arith.constant 0 : i32
    %c0_i32_0 = arith.constant 0 : i32
    return %arg0, %c0_i32 : i32, i32
  }
  func.func @transform_1(%arg0: i32) -> (i32, i32) {
    %c0_i32 = arith.constant 0 : i32
    %c0_i32_0 = arith.constant 0 : i32
    %c0_i32_1 = arith.constant 0 : i32
    return %c0_i32, %c0_i32_0 : i32, i32
  }
  func.func @transform_2(%arg0: i32) -> (i32, i32) {
    %c0_i32 = arith.constant 0 : i32
    %c0_i32_0 = arith.constant 0 : i32
    %c0_i32_1 = arith.constant 0 : i32
    return %c0_i32, %c0_i32_0 : i32, i32
  }
  func.func @transform_3(%arg0: i32) -> (i32, i32) {
    %c0_i32 = arith.constant 0 : i32
    %c0_i32_0 = arith.constant 0 : i32
    return %arg0, %c0_i32 : i32, i32
  }
}

module attributes {stable_mosaic.version = 11 : i64} {
  func.func @_matmul_bias_kernel(%arg0: i32, %arg1: memref<72x2048xf32, #tpu.memory_space<vmem>>, %arg2: memref<2048x128xf32, #tpu.memory_space<vmem>>, %arg3: memref<1x128xf32, #tpu.memory_space<vmem>>, %arg4: memref<72x128xf32, #tpu.memory_space<vmem>>) attributes {dimension_semantics = [#tpu.dimension_semantics<parallel>], iteration_bounds = array<i64: 1>, scalar_prefetch = 0 : i64, scratch_operands = 0 : i64, tpu.core_type = #tpu.core_type<tc>, window_params = [{transform_indices = @transform_0, window_bounds = array<i64: 72, 2048>}, {pipeline_mode = #tpu.pipeline_mode<synchronous>, transform_indices = @transform_1, window_bounds = array<i64: 2048, 128>}, {pipeline_mode = #tpu.pipeline_mode<synchronous>, transform_indices = @transform_2, window_bounds = array<i64: 1, 128>}, {transform_indices = @transform_3, window_bounds = array<i64: 72, 128>}]} {
    %c0 = arith.constant 0 : index
    %c0_0 = arith.constant 0 : index
    %0 = vector.load %arg1[%c0, %c0_0] : memref<72x2048xf32, #tpu.memory_space<vmem>>, vector<72x2048xf32>
    %c0_1 = arith.constant 0 : index
    %c0_2 = arith.constant 0 : index
    %1 = vector.load %arg2[%c0_1, %c0_2] : memref<2048x128xf32, #tpu.memory_space<vmem>>, vector<2048x128xf32>
    %cst = arith.constant dense<0.000000e+00> : vector<72x128xf32>
    %2 = tpu.matmul %0, %1, %cst {dimension_numbers = #tpu.dot_dimension_numbers<[1], [0], [0], [1], [0, 0, 1, 1], [], []>} : vector<72x2048xf32>, vector<2048x128xf32>, vector<72x128xf32> -> vector<72x128xf32>
    %c0_3 = arith.constant 0 : index
    %c0_4 = arith.constant 0 : index
    %3 = vector.load %arg3[%c0_3, %c0_4] : memref<1x128xf32, #tpu.memory_space<vmem>>, vector<1x128xf32>
    %4 = vector.broadcast %3 : vector<1x128xf32> to vector<72x128xf32>
    %5 = arith.addf %2, %4 : vector<72x128xf32>
    %cst_5 = arith.constant 0.000000e+00 : f32
    %6 = vector.broadcast %cst_5 : f32 to vector<72x128xf32>
    %7 = arith.maximumf %5, %6 : vector<72x128xf32>
    %c0_6 = arith.constant 0 : index
    %c0_7 = arith.constant 0 : index
    %8 = vector.load %arg4[%c0_6, %c0_7] : memref<72x128xf32, #tpu.memory_space<vmem>>, vector<72x128xf32>
    tpu.vector_store %arg4[%c0_6, %c0_7], %7 {strides = array<i32>} : memref<72x128xf32, #tpu.memory_space<vmem>>, vector<72x128xf32>,
    return
  }
  func.func @transform_0(%arg0: i32) -> (i32, i32) {
    %c0_i32 = arith.constant 0 : i32
    %c0_i32_0 = arith.constant 0 : i32
    return %arg0, %c0_i32 : i32, i32
  }
  func.func @transform_1(%arg0: i32) -> (i32, i32) {
    %c0_i32 = arith.constant 0 : i32
    %c0_i32_0 = arith.constant 0 : i32
    %c0_i32_1 = arith.constant 0 : i32
    return %c0_i32, %c0_i32_0 : i32, i32
  }
  func.func @transform_2(%arg0: i32) -> (i32, i32) {
    %c0_i32 = arith.constant 0 : i32
    %c0_i32_0 = arith.constant 0 : i32
    %c0_i32_1 = arith.constant 0 : i32
    return %c0_i32, %c0_i32_0 : i32, i32
  }
  func.func @transform_3(%arg0: i32) -> (i32, i32) {
    %c0_i32 = arith.constant 0 : i32
    %c0_i32_0 = arith.constant 0 : i32
    return %arg0, %c0_i32 : i32, i32
  }
}

module attributes {stable_mosaic.version = 11 : i64} {
  func.func @_head_kernel(%arg0: i32, %arg1: memref<32x2048xf32, #tpu.memory_space<vmem>>, %arg2: memref<2048x256xf32, #tpu.memory_space<vmem>>, %arg3: memref<1x256xf32, #tpu.memory_space<vmem>>, %arg4: memref<1024x128xf32, #tpu.memory_space<vmem>>, %arg5: memref<1x128xf32, #tpu.memory_space<vmem>>, %arg6: memref<8x128xf32, #tpu.memory_space<vmem>>) attributes {dimension_semantics = [#tpu.dimension_semantics<arbitrary>], iteration_bounds = array<i64: 1>, scalar_prefetch = 0 : i64, scratch_operands = 0 : i64, tpu.core_type = #tpu.core_type<tc>, window_params = [{pipeline_mode = #tpu.pipeline_mode<synchronous>, transform_indices = @transform_0, window_bounds = array<i64: 32, 2048>}, {pipeline_mode = #tpu.pipeline_mode<synchronous>, transform_indices = @transform_1, window_bounds = array<i64: 2048, 256>}, {pipeline_mode = #tpu.pipeline_mode<synchronous>, transform_indices = @transform_2, window_bounds = array<i64: 1, 256>}, {pipeline_mode = #tpu.pipeline_mode<synchronous>, transform_indices = @transform_3, window_bounds = array<i64: 1024, 128>}, {pipeline_mode = #tpu.pipeline_mode<synchronous>, transform_indices = @transform_4, window_bounds = array<i64: 1, 128>}, {pipeline_mode = #tpu.pipeline_mode<synchronous>, transform_indices = @transform_5, window_bounds = array<i64: 8, 128>}]} {
    %c0 = arith.constant 0 : index
    %c0_0 = arith.constant 0 : index
    %0 = vector.load %arg1[%c0, %c0_0] : memref<32x2048xf32, #tpu.memory_space<vmem>>, vector<32x2048xf32>
    %c0_1 = arith.constant 0 : index
    %c0_2 = arith.constant 0 : index
    %1 = vector.load %arg2[%c0_1, %c0_2] : memref<2048x256xf32, #tpu.memory_space<vmem>>, vector<2048x256xf32>
    %cst = arith.constant dense<0.000000e+00> : vector<32x256xf32>
    %2 = tpu.matmul %0, %1, %cst {dimension_numbers = #tpu.dot_dimension_numbers<[1], [0], [0], [1], [0, 0, 1, 1], [], []>} : vector<32x2048xf32>, vector<2048x256xf32>, vector<32x256xf32> -> vector<32x256xf32>
    %c0_3 = arith.constant 0 : index
    %c0_4 = arith.constant 0 : index
    %3 = vector.load %arg3[%c0_3, %c0_4] : memref<1x256xf32, #tpu.memory_space<vmem>>, vector<1x256xf32>
    %4 = vector.broadcast %3 : vector<1x256xf32> to vector<32x256xf32>
    %5 = arith.addf %2, %4 : vector<32x256xf32>
    %cst_5 = arith.constant 0.000000e+00 : f32
    %6 = vector.broadcast %cst_5 : f32 to vector<32x256xf32>
    %7 = arith.maximumf %5, %6 : vector<32x256xf32>
    %cst_6 = arith.constant 0.000000e+00 : f32
    %8 = vector.broadcast %cst_6 : f32 to vector<8x128xf32>
    %9 = vector.extract_strided_slice %7 {offsets = [0, 0], sizes = [8, 256], strides = [1, 1]} : vector<32x256xf32> to vector<8x256xf32>
    %c0_7 = arith.constant 0 : index
    %c0_8 = arith.constant 0 : index
    %10 = vector.load %arg4[%c0_7, %c0_8] : memref<1024x128xf32, #tpu.memory_space<vmem>>, vector<256x128xf32>
    %cst_9 = arith.constant dense<0.000000e+00> : vector<8x128xf32>
    %11 = tpu.matmul %9, %10, %cst_9 {dimension_numbers = #tpu.dot_dimension_numbers<[1], [0], [0], [1], [0, 0, 1, 1], [], []>} : vector<8x256xf32>, vector<256x128xf32>, vector<8x128xf32> -> vector<8x128xf32>
    %12 = arith.addf %8, %11 : vector<8x128xf32>
    %13 = vector.extract_strided_slice %7 {offsets = [8, 0], sizes = [8, 256], strides = [1, 1]} : vector<32x256xf32> to vector<8x256xf32>
    %c256 = arith.constant 256 : index
    %c0_10 = arith.constant 0 : index
    %14 = vector.load %arg4[%c256, %c0_10] : memref<1024x128xf32, #tpu.memory_space<vmem>>, vector<256x128xf32>
    %cst_11 = arith.constant dense<0.000000e+00> : vector<8x128xf32>
    %15 = tpu.matmul %13, %14, %cst_11 {dimension_numbers = #tpu.dot_dimension_numbers<[1], [0], [0], [1], [0, 0, 1, 1], [], []>} : vector<8x256xf32>, vector<256x128xf32>, vector<8x128xf32> -> vector<8x128xf32>
    %16 = arith.addf %12, %15 : vector<8x128xf32>
    %17 = vector.extract_strided_slice %7 {offsets = [16, 0], sizes = [8, 256], strides = [1, 1]} : vector<32x256xf32> to vector<8x256xf32>
    %c512 = arith.constant 512 : index
    %c0_12 = arith.constant 0 : index
    %18 = vector.load %arg4[%c512, %c0_12] : memref<1024x128xf32, #tpu.memory_space<vmem>>, vector<256x128xf32>
    %cst_13 = arith.constant dense<0.000000e+00> : vector<8x128xf32>
    %19 = tpu.matmul %17, %18, %cst_13 {dimension_numbers = #tpu.dot_dimension_numbers<[1], [0], [0], [1], [0, 0, 1, 1], [], []>} : vector<8x256xf32>, vector<256x128xf32>, vector<8x128xf32> -> vector<8x128xf32>
    %20 = arith.addf %16, %19 : vector<8x128xf32>
    %21 = vector.extract_strided_slice %7 {offsets = [24, 0], sizes = [8, 256], strides = [1, 1]} : vector<32x256xf32> to vector<8x256xf32>
    %c768 = arith.constant 768 : index
    %c0_14 = arith.constant 0 : index
    %22 = vector.load %arg4[%c768, %c0_14] : memref<1024x128xf32, #tpu.memory_space<vmem>>, vector<256x128xf32>
    %cst_15 = arith.constant dense<0.000000e+00> : vector<8x128xf32>
    %23 = tpu.matmul %21, %22, %cst_15 {dimension_numbers = #tpu.dot_dimension_numbers<[1], [0], [0], [1], [0, 0, 1, 1], [], []>} : vector<8x256xf32>, vector<256x128xf32>, vector<8x128xf32> -> vector<8x128xf32>
    %24 = arith.addf %20, %23 : vector<8x128xf32>
    %c0_16 = arith.constant 0 : index
    %c0_17 = arith.constant 0 : index
    %25 = vector.load %arg5[%c0_16, %c0_17] : memref<1x128xf32, #tpu.memory_space<vmem>>, vector<1x128xf32>
    %26 = vector.broadcast %25 : vector<1x128xf32> to vector<8x128xf32>
    %27 = arith.addf %24, %26 : vector<8x128xf32>
    %c0_18 = arith.constant 0 : index
    %c0_19 = arith.constant 0 : index
    %28 = vector.load %arg6[%c0_18, %c0_19] : memref<8x128xf32, #tpu.memory_space<vmem>>, vector<8x128xf32>
    tpu.vector_store %arg6[%c0_18, %c0_19], %27 {strides = array<i32>} : memref<8x128xf32, #tpu.memory_space<vmem>>, vector<8x128xf32>,
    return
  }
  func.func @transform_0(%arg0: i32) -> (i32, i32) {
    %c0_i32 = arith.constant 0 : i32
    %c0_i32_0 = arith.constant 0 : i32
    %c0_i32_1 = arith.constant 0 : i32
    return %c0_i32, %c0_i32_0 : i32, i32
  }
  func.func @transform_1(%arg0: i32) -> (i32, i32) {
    %c0_i32 = arith.constant 0 : i32
    %c0_i32_0 = arith.constant 0 : i32
    %c0_i32_1 = arith.constant 0 : i32
    return %c0_i32, %c0_i32_0 : i32, i32
  }
  func.func @transform_2(%arg0: i32) -> (i32, i32) {
    %c0_i32 = arith.constant 0 : i32
    %c0_i32_0 = arith.constant 0 : i32
    %c0_i32_1 = arith.constant 0 : i32
    return %c0_i32, %c0_i32_0 : i32, i32
  }
  func.func @transform_3(%arg0: i32) -> (i32, i32) {
    %c0_i32 = arith.constant 0 : i32
    %c0_i32_0 = arith.constant 0 : i32
    %c0_i32_1 = arith.constant 0 : i32
    return %c0_i32, %c0_i32_0 : i32, i32
  }
  func.func @transform_4(%arg0: i32) -> (i32, i32) {
    %c0_i32 = arith.constant 0 : i32
    %c0_i32_0 = arith.constant 0 : i32
    %c0_i32_1 = arith.constant 0 : i32
    return %c0_i32, %c0_i32_0 : i32, i32
  }
  func.func @transform_5(%arg0: i32) -> (i32, i32) {
    %c0_i32 = arith.constant 0 : i32
    %c0_i32_0 = arith.constant 0 : i32
    %c0_i32_1 = arith.constant 0 : i32
    return %c0_i32, %c0_i32_0 : i32, i32
  }
}

</mosaic_0001>

<bundles_post_ra>
// kernel: forward.4
= control target key start
LH: loop header
LB: loop body
LE: loop exit
PB: predicated region body
PF: predicated region fallthrough
CT: control target
= control target key end

     0   :  { %s2411_s12 = smov 0   ;;  %s2413_s13 = smov 0   ;;  %s3096_s0 = inlined_call_operand.vmem [shape: f32[1922,128], index: 0, kind: input, shape index: {}]   ;;  %s3097_s1 = inlined_call_operand.vmem [shape: f32[128,128], index: 1, kind: input, shape index: {}]   ;;  %s3098_s2 = inlined_call_operand.vmem [shape: f32[1,128], index: 2, kind: input, shape index: {}]   ;;  %s3099_s3 = inlined_call_operand.vmem [shape: f32[1922,128], index: 3, kind: output, shape index: {}]  }
   0x1   :  { %s2415_s14 = smov 0  }
   0x2 LB: > { %s2424_s15 = sadd.s32 4294967295, %s2357_s14   ;;  %s2426_s16 = sadd.s32 1, %s2357_s14   ;;  %s2357_s14 = sphi %s2415_s14, %s3108_s14   ;;  %s2353_s13 = sphi %s2413_s13, %s3107_s13   ;;  %s2349_s12 = sphi %s2411_s12, %s3106_s12  }
   0x3   : > { %s85_s17 = ssub.s32 %s2357_s14, %s2426_s16  ;;  %s88_s18 = sadd.s32 1, %s2353_s13 }
   0x4   : > { %p86_p0 = scmp.eq.s32.totalorder %s85_s17, 0  ;;  %p98_p1 = scmp.ne.s32.totalorder %s2353_s13, %s2349_s12 }
   0x5   : > { %p99_p2 = scmp.eq.s32.totalorder %s2424_s15, 1  ;;  %p1774_p3 = scmp.ge.s32.totalorder %s2357_s14, 1 }
   0x6   : > { %s2434_s19 = scalar_select %p86_p0, %s2353_s13, %s88_s18  }
   0x7   : > { %p2436_p4 = por %p99_p2, %p98_p1  ;;  %p146_p5 = scmp.lt.s32.totalorder %s2357_s14, 3 }
   0x9   : > { %p147_p6 = pnand %p1774_p3, %p146_p5 }
   0xa   : > { %v320_v0 = vld [vmem:[%s3097_s1] sm:$0xff] (!%p147_p6)  ;;  %v321_v1 = vld [vmem:[%s3097_s1 + $0x8] sm:$0xff] (!%p147_p6)  ;;  %v322_v2 = vld [vmem:[%s3097_s1 + $0x10] sm:$0xff] (!%p147_p6)  ;;  %s2450_s27 = sshll.u32 (!%p147_p6), %s2424_s15, 7  ;;  %s170_s14 = sand.u32 (!%p147_p6), 1, %s2349_s12  }
   0xb   : > { %150 = sbr.rel (%p147_p6) target bundleno = 459 (0x1cb), region = 32  ;;  %v2167_v3 = vpack.c.bf16 (!%p147_p6), %v321_v1, %v320_v0  ;;  %v323_v4 = vld [vmem:[%s3097_s1 + $0x18] sm:$0xff] (!%p147_p6)  ;;  %p178_p7 = scmp.lt.s32.totalorder (!%p147_p6), %s2450_s27, 240  ;;  %v324_v6 = vld [vmem:[%s3097_s1 + $0x20] sm:$0xff] (!%p147_p6)  ;;  %v325_v7 = vld [vmem:[%s3097_s1 + $0x28] sm:$0xff] (!%p147_p6) }
   0xc   : > { %v2171_v5 = vpack.c.bf16 (!%p147_p6), %v323_v4, %v322_v2  ;;  %v2175_v8 = vpack.c.bf16 (!%p147_p6), %v325_v7, %v324_v6  ;;  %v326_v9 = vld [vmem:[%s3097_s1 + $0x30] sm:$0xff] (!%p147_p6)  ;;  %v327_v10 = vld [vmem:[%s3097_s1 + $0x38] sm:$0xff] (!%p147_p6)  ;;  %v328_v14 = vld [vmem:[%s3097_s1 + $0x40] sm:$0xff] (!%p147_p6)  ;;  %s1775_s22 = sshll.u32 (!%p147_p6), %s170_s14, 10 }
   0xd   : > { %2168 = vmatprep.subr.bf16.mxu0 (!%p147_p6), %v2167_v3  ;;  %2199 = vmatprep.subr.bf16.mxu1 (!%p147_p6), %v2167_v3  ;;  %v2179_v13 = vpack.c.bf16 (!%p147_p6), %v327_v10, %v326_v9  ;;  %v329_v15 = vld [vmem:[%s3097_s1 + $0x48] sm:$0xff] (!%p147_p6)  ;;  %v330_v17 = vld [vmem:[%s3097_s1 + $0x50] sm:$0xff] (!%p147_p6)  ;;  %v331_v18 = vld [vmem:[%s3097_s1 + $0x58] sm:$0xff] (!%p147_p6)  ;;  %s2636_s12 = scalar_lea.vmem (!%p147_p6), [#allocation2], %s1775_s22  }
   0xe   : > { %2170 = vmatpush3.bf16.msra.mxu0 (!%p147_p6), %v2167_v3  ;;  %2207 = vmatpush3.bf16.msra.mxu1 (!%p147_p6), %v2167_v3  ;;  %v2183_v16 = vpack.c.bf16 (!%p147_p6), %v329_v15, %v328_v14  ;;  %v2187_v19 = vpack.c.bf16 (!%p147_p6), %v331_v18, %v330_v17  ;;  %v332_v20 = vld [vmem:[%s3097_s1 + $0x60] sm:$0xff] (!%p147_p6)  ;;  %v333_v21 = vld [vmem:[%s3097_s1 + $0x68] sm:$0xff] (!%p147_p6)  ;;  %v334_v23 = vld [vmem:[%s3097_s1 + $0x70] sm:$0xff] (!%p147_p6) }
   0xf   : > { %2172 = vmatprep.subr.bf16.mxu0 (!%p147_p6), %v2171_v5  ;;  %2200 = vmatprep.subr.bf16.mxu1 (!%p147_p6), %v2171_v5  ;;  %v2191_v22 = vpack.c.bf16 (!%p147_p6), %v333_v21, %v332_v20  ;;  %v335_v24 = vld [vmem:[%s3097_s1 + $0x78] sm:$0xff] (!%p147_p6) }
  0x10   : > { %v2195_v25 = vpack.c.bf16 (!%p147_p6), %v335_v24, %v334_v23 }
  0x12   : > { %s179_s7 = scalar_select %p178_p7, %s2450_s27, 240  ;;  %2174 = vmatpush3.bf16.msra.mxu0 %v2171_v5  ;;  %2208 = vmatpush3.bf16.msra.mxu1 %v2171_v5 }
  0x13   : > { %2176 = vmatprep.subr.bf16.mxu0 %v2175_v8  ;;  %2201 = vmatprep.subr.bf16.mxu1 %v2175_v8  ;;  %s1796_s23 = sshll.u32 (%p2436_p4), %s2424_s15, 10 }
  0x14   : > { %s1777_s8 = sshll.u32 %s179_s7, 3  ;;  %s2897_s26 = scalar_lea.vmem (%p2436_p4), %s3099_s3, %s1796_s23  }
  0x15   : > { %s2472_s21 = scalar_lea.vmem %s3096_s0, %s1777_s8 }
  0x16   : > { %v192_v11 = vld [vmem:[%s2472_s21] sm:$0xff]  ;;  %2178 = vmatpush3.bf16.msra.mxu0 %v2175_v8  ;;  %2209 = vmatpush3.bf16.msra.mxu1 %v2175_v8  ;;  %v193_v26 = vld [vmem:[%s2472_s21 + $0x8] sm:$0xff]  ;;  %v194_v28 = vld [vmem:[%s2472_s21 + $0x10] sm:$0xff] }
  0x17   : > { %v256_v12 = vld [vmem:[%s2472_s21 + $0x200] sm:$0xff]  ;;  %1975 = vmatprep.mubr.f32.mxu0 %v192_v11  ;;  %2180 = vmatprep.subr.bf16.mxu0 %v2179_v13  ;;  %v257_v27 = vld [vmem:[%s2472_s21 + $0x208] sm:$0xff]  ;;  %v258_v29 = vld [vmem:[%s2472_s21 + $0x210] sm:$0xff] }
  0x18   : > { %2071 = vmatprep.mubr.f32.mxu1 %v256_v12  ;;  %2202 = vmatprep.subr.bf16.mxu1 %v2179_v13  ;;  %v195_v30 = vld [vmem:[%s2472_s21 + $0x18] sm:$0xff]  ;;  %v196_v32 = vld [vmem:[%s2472_s21 + $0x20] sm:$0xff]  ;;  %v197_v34 = vld [vmem:[%s2472_s21 + $0x28] sm:$0xff] }
  0x19   : > { %v259_v31 = vld [vmem:[%s2472_s21 + $0x218] sm:$0xff]  ;;  %v260_v33 = vld [vmem:[%s2472_s21 + $0x220] sm:$0xff]  ;;  %v261_v35 = vld [vmem:[%s2472_s21 + $0x228] sm:$0xff] }
  0x1a   : > { %2182 = vmatpush3.bf16.msra.mxu0 %v2179_v13  ;;  %2210 = vmatpush3.bf16.msra.mxu1 %v2179_v13  ;;  %v198_v36 = vld [vmem:[%s2472_s21 + $0x30] sm:$0xff]  ;;  %v199_v38 = vld [vmem:[%s2472_s21 + $0x38] sm:$0xff]  ;;  %v200_v40 = vld [vmem:[%s2472_s21 + $0x40] sm:$0xff] }
  0x1b   : > { %2184 = vmatprep.subr.bf16.mxu0 %v2183_v16  ;;  %2203 = vmatprep.subr.bf16.mxu1 %v2183_v16  ;;  %v262_v37 = vld [vmem:[%s2472_s21 + $0x230] sm:$0xff]  ;;  %v263_v39 = vld [vmem:[%s2472_s21 + $0x238] sm:$0xff]  ;;  %v264_v41 = vld [vmem:[%s2472_s21 + $0x240] sm:$0xff] }
  0x1c   : > { %v201_v42 = vld [vmem:[%s2472_s21 + $0x48] sm:$0xff]  ;;  %v202_v44 = vld [vmem:[%s2472_s21 + $0x50] sm:$0xff]  ;;  %v203_v46 = vld [vmem:[%s2472_s21 + $0x58] sm:$0xff] }
  0x1d   : > { %v265_v43 = vld [vmem:[%s2472_s21 + $0x248] sm:$0xff]  ;;  %v266_v45 = vld [vmem:[%s2472_s21 + $0x250] sm:$0xff]  ;;  %v267_v47 = vld [vmem:[%s2472_s21 + $0x258] sm:$0xff] }
  0x1e   : > { %2186 = vmatpush3.bf16.msra.mxu0 %v2183_v16  ;;  %2211 = vmatpush3.bf16.msra.mxu1 %v2183_v16  ;;  %v204_v48 = vld [vmem:[%s2472_s21 + $0x60] sm:$0xff]  ;;  %v205_v50 = vld [vmem:[%s2472_s21 + $0x68] sm:$0xff]  ;;  %v206_v52 = vld [vmem:[%s2472_s21 + $0x70] sm:$0xff] }
  0x1f   : > { %2188 = vmatprep.subr.bf16.mxu0 %v2187_v19  ;;  %2204 = vmatprep.subr.bf16.mxu1 %v2187_v19  ;;  %v268_v49 = vld [vmem:[%s2472_s21 + $0x260] sm:$0xff]  ;;  %v269_v51 = vld [vmem:[%s2472_s21 + $0x268] sm:$0xff]  ;;  %v270_v53 = vld [vmem:[%s2472_s21 + $0x270] sm:$0xff] }
  0x20   : > { %v207_v54 = vld [vmem:[%s2472_s21 + $0x78] sm:$0xff]  ;;  %v208_v56 = vld [vmem:[%s2472_s21 + $0x80] sm:$0xff]  ;;  %v209_v58 = vld [vmem:[%s2472_s21 + $0x88] sm:$0xff] }
  0x21   : > { %v271_v55 = vld [vmem:[%s2472_s21 + $0x278] sm:$0xff]  ;;  %v272_v57 = vld [vmem:[%s2472_s21 + $0x280] sm:$0xff]  ;;  %v273_v59 = vld [vmem:[%s2472_s21 + $0x288] sm:$0xff] }
  0x22   : > { %2190 = vmatpush3.bf16.msra.mxu0 %v2187_v19  ;;  %2212 = vmatpush3.bf16.msra.mxu1 %v2187_v19  ;;  %v210_v60 = vld [vmem:[%s2472_s21 + $0x90] sm:$0xff]  ;;  %v211_v62 = vld [vmem:[%s2472_s21 + $0x98] sm:$0xff]  ;;  %v212_v0 = vld [vmem:[%s2472_s21 + $0xa0] sm:$0xff] }
  0x23   : > { %2192 = vmatprep.subr.bf16.mxu0 %v2191_v22  ;;  %2205 = vmatprep.subr.bf16.mxu1 %v2191_v22  ;;  %v274_v61 = vld [vmem:[%s2472_s21 + $0x290] sm:$0xff]  ;;  %v275_v63 = vld [vmem:[%s2472_s21 + $0x298] sm:$0xff]  ;;  %v276_v1 = vld [vmem:[%s2472_s21 + $0x2a0] sm:$0xff] }
  0x24   : > { %v213_v2 = vld [vmem:[%s2472_s21 + $0xa8] sm:$0xff]  ;;  %v214_v4 = vld [vmem:[%s2472_s21 + $0xb0] sm:$0xff]  ;;  %v215_v6 = vld [vmem:[%s2472_s21 + $0xb8] sm:$0xff] }
  0x25   : > { %v277_v3 = vld [vmem:[%s2472_s21 + $0x2a8] sm:$0xff]  ;;  %v278_v5 = vld [vmem:[%s2472_s21 + $0x2b0] sm:$0xff]  ;;  %v279_v7 = vld [vmem:[%s2472_s21 + $0x2b8] sm:$0xff] }
  0x26   : > { %2194 = vmatpush3.bf16.msra.mxu0 %v2191_v22  ;;  %2213 = vmatpush3.bf16.msra.mxu1 %v2191_v22  ;;  %v216_v8 = vld [vmem:[%s2472_s21 + $0xc0] sm:$0xff]  ;;  %v217_v10 = vld [vmem:[%s2472_s21 + $0xc8] sm:$0xff]  ;;  %v218_v12 = vld [vmem:[%s2472_s21 + $0xd0] sm:$0xff] }
  0x27   : > { %2196 = vmatprep.subr.bf16.mxu0 %v2195_v25  ;;  %2206 = vmatprep.subr.bf16.mxu1 %v2195_v25  ;;  %v280_v9 = vld [vmem:[%s2472_s21 + $0x2c0] sm:$0xff]  ;;  %v281_v11 = vld [vmem:[%s2472_s21 + $0x2c8] sm:$0xff]  ;;  %v282_v13 = vld [vmem:[%s2472_s21 + $0x2d0] sm:$0xff] }
  0x28   : > { %v219_v14 = vld [vmem:[%s2472_s21 + $0xd8] sm:$0xff]  ;;  %v220_v16 = vld [vmem:[%s2472_s21 + $0xe0] sm:$0xff]  ;;  %v221_v18 = vld [vmem:[%s2472_s21 + $0xe8] sm:$0xff] }
  0x29   : > { %v283_v15 = vld [vmem:[%s2472_s21 + $0x2d8] sm:$0xff]  ;;  %v284_v17 = vld [vmem:[%s2472_s21 + $0x2e0] sm:$0xff]  ;;  %v285_v19 = vld [vmem:[%s2472_s21 + $0x2e8] sm:$0xff] }
  0x2a   : > { %2198 = vmatpush3.bf16.msra.mxu0 %v2195_v25  ;;  %2214 = vmatpush3.bf16.msra.mxu1 %v2195_v25  ;;  %v222_v20 = vld [vmem:[%s2472_s21 + $0xf0] sm:$0xff]  ;;  %v223_v22 = vld [vmem:[%s2472_s21 + $0xf8] sm:$0xff]  ;;  %v224_v24 = vld [vmem:[%s2472_s21 + $0x100] sm:$0xff] }
  0x2b   : > { %v286_v21 = vld [vmem:[%s2472_s21 + $0x2f0] sm:$0xff]  ;;  %v287_v23 = vld [vmem:[%s2472_s21 + $0x2f8] sm:$0xff]  ;;  %v288_v25 = vld [vmem:[%s2472_s21 + $0x300] sm:$0xff] }
  0x2d   : > { %1976 = vmatmul.mubr.f32.vlgmr.msra.gmra.mrb[0].mxu0 %v193_v26  ;;  %2072 = vmatmul.mubr.f32.vlgmr.msra.gmra.mrb[0].mxu1 %v257_v27  ;;  %v225_v26 = vld [vmem:[%s2472_s21 + $0x108] sm:$0xff] }
  0x2e   : > { %1978 = vmatprep.mubr.f32.mxu0 %v194_v28  ;;  %2074 = vmatprep.mubr.f32.mxu1 %v258_v29  ;;  %v289_v27 = vld [vmem:[%s2472_s21 + $0x308] sm:$0xff]  ;;  %v226_v28 = vld [vmem:[%s2472_s21 + $0x110] sm:$0xff] }
  0x2f   : > { %v290_v29 = vld [vmem:[%s2472_s21 + $0x310] sm:$0xff] }
  0x31   : > { %1979 = vmatmul.mubr.f32.gmra.mrb[2].mxu0 %v195_v30  ;;  %2075 = vmatmul.mubr.f32.gmra.mrb[2].mxu1 %v259_v31  ;;  %v227_v30 = vld [vmem:[%s2472_s21 + $0x118] sm:$0xff] }
  0x32   : > { %1981 = vmatprep.mubr.f32.mxu0 %v196_v32  ;;  %2077 = vmatprep.mubr.f32.mxu1 %v260_v33  ;;  %v291_v31 = vld [vmem:[%s2472_s21 + $0x318] sm:$0xff]  ;;  %v228_v32 = vld [vmem:[%s2472_s21 + $0x120] sm:$0xff] }
  0x33   : > { %v292_v33 = vld [vmem:[%s2472_s21 + $0x320] sm:$0xff] }
  0x35   : > { %1982 = vmatmul.mubr.f32.gmra.mrb[4].mxu0 %v197_v34  ;;  %2078 = vmatmul.mubr.f32.gmra.mrb[4].mxu1 %v261_v35  ;;  %v229_v34 = vld [vmem:[%s2472_s21 + $0x128] sm:$0xff] }
  0x36   : > { %1984 = vmatprep.mubr.f32.mxu0 %v198_v36  ;;  %2080 = vmatprep.mubr.f32.mxu1 %v262_v37  ;;  %v293_v35 = vld [vmem:[%s2472_s21 + $0x328] sm:$0xff]  ;;  %v230_v36 = vld [vmem:[%s2472_s21 + $0x130] sm:$0xff] }
  0x37   : > { %v294_v37 = vld [vmem:[%s2472_s21 + $0x330] sm:$0xff] }
  0x39   : > { %1985 = vmatmul.mubr.f32.gmra.mrb[6].mxu0 %v199_v38  ;;  %2081 = vmatmul.mubr.f32.gmra.mrb[6].mxu1 %v263_v39  ;;  %v231_v38 = vld [vmem:[%s2472_s21 + $0x138] sm:$0xff] }
  0x3a   : > { %1987 = vmatprep.mubr.f32.mxu0 %v200_v40  ;;  %2083 = vmatprep.mubr.f32.mxu1 %v264_v41  ;;  %v295_v39 = vld [vmem:[%s2472_s21 + $0x338] sm:$0xff]  ;;  %v232_v40 = vld [vmem:[%s2472_s21 + $0x140] sm:$0xff] }
  0x3b   : > { %v296_v41 = vld [vmem:[%s2472_s21 + $0x340] sm:$0xff] }
  0x3d   : > { %1988 = vmatmul.mubr.f32.gmra.mrb[8].mxu0 %v201_v42  ;;  %2084 = vmatmul.mubr.f32.gmra.mrb[8].mxu1 %v265_v43  ;;  %v233_v42 = vld [vmem:[%s2472_s21 + $0x148] sm:$0xff] }
  0x3e   : > { %1990 = vmatprep.mubr.f32.mxu0 %v202_v44  ;;  %2086 = vmatprep.mubr.f32.mxu1 %v266_v45  ;;  %v297_v43 = vld [vmem:[%s2472_s21 + $0x348] sm:$0xff]  ;;  %v234_v44 = vld [vmem:[%s2472_s21 + $0x150] sm:$0xff] }
  0x3f   : > { %v298_v45 = vld [vmem:[%s2472_s21 + $0x350] sm:$0xff] }
  0x41   : > { %1991 = vmatmul.mubr.f32.gmra.mrb[10].mxu0 %v203_v46  ;;  %2087 = vmatmul.mubr.f32.gmra.mrb[10].mxu1 %v267_v47  ;;  %v235_v46 = vld [vmem:[%s2472_s21 + $0x158] sm:$0xff] }
  0x42   : > { %1993 = vmatprep.mubr.f32.mxu0 %v204_v48  ;;  %2089 = vmatprep.mubr.f32.mxu1 %v268_v49  ;;  %v299_v47 = vld [vmem:[%s2472_s21 + $0x358] sm:$0xff]  ;;  %v236_v48 = vld [vmem:[%s2472_s21 + $0x160] sm:$0xff] }
  0x43   : > { %v300_v49 = vld [vmem:[%s2472_s21 + $0x360] sm:$0xff] }
  0x45   : > { %1994 = vmatmul.mubr.f32.gmra.mrb[12].mxu0 %v205_v50  ;;  %2090 = vmatmul.mubr.f32.gmra.mrb[12].mxu1 %v269_v51  ;;  %v237_v50 = vld [vmem:[%s2472_s21 + $0x168] sm:$0xff] }
  0x46   : > { %1996 = vmatprep.mubr.f32.mxu0 %v206_v52  ;;  %2092 = vmatprep.mubr.f32.mxu1 %v270_v53  ;;  %v301_v51 = vld [vmem:[%s2472_s21 + $0x368] sm:$0xff]  ;;  %v238_v52 = vld [vmem:[%s2472_s21 + $0x170] sm:$0xff] }
  0x47   : > { %v302_v53 = vld [vmem:[%s2472_s21 + $0x370] sm:$0xff] }
  0x49   : > { %1997 = vmatmul.mubr.f32.gmra.mrb[14].mxu0 %v207_v54  ;;  %2093 = vmatmul.mubr.f32.gmra.mrb[14].mxu1 %v271_v55  ;;  %v239_v54 = vld [vmem:[%s2472_s21 + $0x178] sm:$0xff] }
  0x4a   : > { %1999 = vmatprep.mubr.f32.mxu0 %v208_v56  ;;  %2095 = vmatprep.mubr.f32.mxu1 %v272_v57  ;;  %v303_v55 = vld [vmem:[%s2472_s21 + $0x378] sm:$0xff]  ;;  %v240_v56 = vld [vmem:[%s2472_s21 + $0x180] sm:$0xff] }
  0x4b   : > { %v304_v57 = vld [vmem:[%s2472_s21 + $0x380] sm:$0xff] }
  0x4d   : > { %2000 = vmatmul.mubr.f32.gmra.mrb[16].mxu0 %v209_v58  ;;  %2096 = vmatmul.mubr.f32.gmra.mrb[16].mxu1 %v273_v59  ;;  %v241_v58 = vld [vmem:[%s2472_s21 + $0x188] sm:$0xff] }
  0x4e   : > { %2002 = vmatprep.mubr.f32.mxu0 %v210_v60  ;;  %2098 = vmatprep.mubr.f32.mxu1 %v274_v61  ;;  %v305_v59 = vld [vmem:[%s2472_s21 + $0x388] sm:$0xff]  ;;  %v242_v60 = vld [vmem:[%s2472_s21 + $0x190] sm:$0xff] }
  0x4f   : > { %v306_v61 = vld [vmem:[%s2472_s21 + $0x390] sm:$0xff] }
  0x51   : > { %2003 = vmatmul.mubr.f32.gmra.mrb[18].mxu0 %v211_v62  ;;  %2099 = vmatmul.mubr.f32.gmra.mrb[18].mxu1 %v275_v63  ;;  %v243_v62 = vld [vmem:[%s2472_s21 + $0x198] sm:$0xff] }
  0x52   : > { %2005 = vmatprep.mubr.f32.mxu0 %v212_v0  ;;  %2101 = vmatprep.mubr.f32.mxu1 %v276_v1  ;;  %v307_v63 = vld [vmem:[%s2472_s21 + $0x398] sm:$0xff]  ;;  %v244_v0 = vld [vmem:[%s2472_s21 + $0x1a0] sm:$0xff] }
  0x53   : > { %v308_v1 = vld [vmem:[%s2472_s21 + $0x3a0] sm:$0xff] }
  0x55   : > { %2006 = vmatmul.mubr.f32.gmra.mrb[20].mxu0 %v213_v2  ;;  %2102 = vmatmul.mubr.f32.gmra.mrb[20].mxu1 %v277_v3  ;;  %v245_v2 = vld [vmem:[%s2472_s21 + $0x1a8] sm:$0xff] }
  0x56   : > { %2008 = vmatprep.mubr.f32.mxu0 %v214_v4  ;;  %2104 = vmatprep.mubr.f32.mxu1 %v278_v5  ;;  %v309_v3 = vld [vmem:[%s2472_s21 + $0x3a8] sm:$0xff]  ;;  %v246_v4 = vld [vmem:[%s2472_s21 + $0x1b0] sm:$0xff] }
  0x57   : > { %v310_v5 = vld [vmem:[%s2472_s21 + $0x3b0] sm:$0xff] }
  0x59   : > { %2009 = vmatmul.mubr.f32.gmra.mrb[22].mxu0 %v215_v6  ;;  %2105 = vmatmul.mubr.f32.gmra.mrb[22].mxu1 %v279_v7  ;;  %v247_v6 = vld [vmem:[%s2472_s21 + $0x1b8] sm:$0xff] }
  0x5a   : > { %2011 = vmatprep.mubr.f32.mxu0 %v216_v8  ;;  %2107 = vmatprep.mubr.f32.mxu1 %v280_v9  ;;  %v311_v7 = vld [vmem:[%s2472_s21 + $0x3b8] sm:$0xff]  ;;  %v248_v8 = vld [vmem:[%s2472_s21 + $0x1c0] sm:$0xff] }
  0x5b   : > { %v312_v9 = vld [vmem:[%s2472_s21 + $0x3c0] sm:$0xff] }
  0x5d   : > { %2012 = vmatmul.mubr.f32.gmra.mrb[24].mxu0 %v217_v10  ;;  %2108 = vmatmul.mubr.f32.gmra.mrb[24].mxu1 %v281_v11  ;;  %v249_v10 = vld [vmem:[%s2472_s21 + $0x1c8] sm:$0xff] }
  0x5e   : > { %2014 = vmatprep.mubr.f32.mxu0 %v218_v12  ;;  %2110 = vmatprep.mubr.f32.mxu1 %v282_v13  ;;  %v313_v11 = vld [vmem:[%s2472_s21 + $0x3c8] sm:$0xff]  ;;  %v250_v12 = vld [vmem:[%s2472_s21 + $0x1d0] sm:$0xff] }
  0x5f   : > { %v314_v13 = vld [vmem:[%s2472_s21 + $0x3d0] sm:$0xff] }
  0x61   : > { %2015 = vmatmul.mubr.f32.gmra.mrb[26].mxu0 %v219_v14  ;;  %2111 = vmatmul.mubr.f32.gmra.mrb[26].mxu1 %v283_v15  ;;  %v251_v14 = vld [vmem:[%s2472_s21 + $0x1d8] sm:$0xff] }
  0x62   : > { %2017 = vmatprep.mubr.f32.mxu0 %v220_v16  ;;  %2113 = vmatprep.mubr.f32.mxu1 %v284_v17  ;;  %v315_v15 = vld [vmem:[%s2472_s21 + $0x3d8] sm:$0xff]  ;;  %v252_v16 = vld [vmem:[%s2472_s21 + $0x1e0] sm:$0xff] }
  0x63   : > { %v316_v17 = vld [vmem:[%s2472_s21 + $0x3e0] sm:$0xff] }
  0x65   : > { %2018 = vmatmul.mubr.f32.gmra.mrb[28].mxu0 %v221_v18  ;;  %2114 = vmatmul.mubr.f32.gmra.mrb[28].mxu1 %v285_v19  ;;  %v253_v18 = vld [vmem:[%s2472_s21 + $0x1e8] sm:$0xff] }
  0x66   : > { %2020 = vmatprep.mubr.f32.mxu0 %v222_v20  ;;  %2116 = vmatprep.mubr.f32.mxu1 %v286_v21  ;;  %v317_v19 = vld [vmem:[%s2472_s21 + $0x3e8] sm:$0xff]  ;;  %v254_v20 = vld [vmem:[%s2472_s21 + $0x1f0] sm:$0xff] }
  0x67   : > { %v318_v21 = vld [vmem:[%s2472_s21 + $0x3f0] sm:$0xff] }
  0x69   : > { %2021 = vmatmul.mubr.f32.gmra.mrb[30].mxu0 %v223_v22  ;;  %2117 = vmatmul.mubr.f32.gmra.mrb[30].mxu1 %v287_v23  ;;  %v255_v22 = vld [vmem:[%s2472_s21 + $0x1f8] sm:$0xff] }
  0x6a   : > { %2023 = vmatprep.mubr.f32.mxu0 %v224_v24  ;;  %2119 = vmatprep.mubr.f32.mxu1 %v288_v25  ;;  %v319_v23 = vld [vmem:[%s2472_s21 + $0x3f8] sm:$0xff]  ;;  %v2630_v24 = vld [vmem:[%s3098_s2] ss:$0 sm:$0xff]  ;;  %s1312_s21 = ssub.s32 (%p2436_p4), 241, %s2450_s27 }
  0x6b   : > { %p1313_p8 = scmp.lt.s32.totalorder (%p2436_p4), %s1312_s21, 128 }
  0x6d   : > { %2024 = vmatmul.mubr.f32.gmra.mrb[32].mxu0 %v225_v26  ;;  %2120 = vmatmul.mubr.f32.gmra.mrb[32].mxu1 %v289_v27 }
  0x6e   : > { %2026 = vmatprep.mubr.f32.mxu0 %v226_v28  ;;  %2122 = vmatprep.mubr.f32.mxu1 %v290_v29 }
  0x71   : > { %2027 = vmatmul.mubr.f32.gmra.mrb[34].mxu0 %v227_v30  ;;  %2123 = vmatmul.mubr.f32.gmra.mrb[34].mxu1 %v291_v31 }
  0x72   : > { %2029 = vmatprep.mubr.f32.mxu0 %v228_v32  ;;  %2125 = vmatprep.mubr.f32.mxu1 %v292_v33 }
  0x75   : > { %2030 = vmatmul.mubr.f32.gmra.mrb[36].mxu0 %v229_v34  ;;  %2126 = vmatmul.mubr.f32.gmra.mrb[36].mxu1 %v293_v35 }
  0x76   : > { %2032 = vmatprep.mubr.f32.mxu0 %v230_v36  ;;  %2128 = vmatprep.mubr.f32.mxu1 %v294_v37 }
  0x79   : > { %2033 = vmatmul.mubr.f32.gmra.mrb[38].mxu0 %v231_v38  ;;  %2129 = vmatmul.mubr.f32.gmra.mrb[38].mxu1 %v295_v39 }
  0x7a   : > { %2035 = vmatprep.mubr.f32.mxu0 %v232_v40  ;;  %2131 = vmatprep.mubr.f32.mxu1 %v296_v41 }
  0x7d   : > { %2036 = vmatmul.mubr.f32.gmra.mrb[40].mxu0 %v233_v42  ;;  %2132 = vmatmul.mubr.f32.gmra.mrb[40].mxu1 %v297_v43 }
  0x7e   : > { %2038 = vmatprep.mubr.f32.mxu0 %v234_v44  ;;  %2134 = vmatprep.mubr.f32.mxu1 %v298_v45 }
  0x81   : > { %2039 = vmatmul.mubr.f32.gmra.mrb[42].mxu0 %v235_v46  ;;  %2135 = vmatmul.mubr.f32.gmra.mrb[42].mxu1 %v299_v47 }
  0x82   : > { %2041 = vmatprep.mubr.f32.mxu0 %v236_v48  ;;  %2137 = vmatprep.mubr.f32.mxu1 %v300_v49 }
  0x85   : > { %2042 = vmatmul.mubr.f32.gmra.mrb[44].mxu0 %v237_v50  ;;  %2138 = vmatmul.mubr.f32.gmra.mrb[44].mxu1 %v301_v51 }
  0x86   : > { %2044 = vmatprep.mubr.f32.mxu0 %v238_v52  ;;  %2140 = vmatprep.mubr.f32.mxu1 %v302_v53 }
  0x89   : > { %2045 = vmatmul.mubr.f32.gmra.mrb[46].mxu0 %v239_v54  ;;  %2141 = vmatmul.mubr.f32.gmra.mrb[46].mxu1 %v303_v55 }
  0x8a   : > { %2047 = vmatprep.mubr.f32.mxu0 %v240_v56  ;;  %2143 = vmatprep.mubr.f32.mxu1 %v304_v57 }
  0x8d   : > { %2048 = vmatmul.mubr.f32.gmra.mrb[48].mxu0 %v241_v58  ;;  %2144 = vmatmul.mubr.f32.gmra.mrb[48].mxu1 %v305_v59 }
  0x8e   : > { %2050 = vmatprep.mubr.f32.mxu0 %v242_v60  ;;  %2146 = vmatprep.mubr.f32.mxu1 %v306_v61 }
  0x91   : > { %2051 = vmatmul.mubr.f32.gmra.mrb[50].mxu0 %v243_v62  ;;  %2147 = vmatmul.mubr.f32.gmra.mrb[50].mxu1 %v307_v63 }
  0x92   : > { %2053 = vmatprep.mubr.f32.mxu0 %v244_v0  ;;  %2149 = vmatprep.mubr.f32.mxu1 %v308_v1 }
  0x95   : > { %2054 = vmatmul.mubr.f32.gmra.mrb[52].mxu0 %v245_v2  ;;  %2150 = vmatmul.mubr.f32.gmra.mrb[52].mxu1 %v309_v3 }
  0x96   : > { %2056 = vmatprep.mubr.f32.mxu0 %v246_v4  ;;  %2152 = vmatprep.mubr.f32.mxu1 %v310_v5 }
  0x99   : > { %2057 = vmatmul.mubr.f32.gmra.mrb[54].mxu0 %v247_v6  ;;  %2153 = vmatmul.mubr.f32.gmra.mrb[54].mxu1 %v311_v7 }
  0x9a   : > { %2059 = vmatprep.mubr.f32.mxu0 %v248_v8  ;;  %2155 = vmatprep.mubr.f32.mxu1 %v312_v9 }
  0x9d   : > { %2060 = vmatmul.mubr.f32.gmra.mrb[56].mxu0 %v249_v10  ;;  %2156 = vmatmul.mubr.f32.gmra.mrb[56].mxu1 %v313_v11 }
  0x9e   : > { %2062 = vmatprep.mubr.f32.mxu0 %v250_v12  ;;  %2158 = vmatprep.mubr.f32.mxu1 %v314_v13 }
  0xa1   : > { %2063 = vmatmul.mubr.f32.gmra.mrb[58].mxu0 %v251_v14  ;;  %2159 = vmatmul.mubr.f32.gmra.mrb[58].mxu1 %v315_v15 }
  0xa2   : > { %2065 = vmatprep.mubr.f32.mxu0 %v252_v16  ;;  %2161 = vmatprep.mubr.f32.mxu1 %v316_v17 }
  0xa5   : > { %2066 = vmatmul.mubr.f32.gmra.mrb[60].mxu0 %v253_v18  ;;  %2162 = vmatmul.mubr.f32.gmra.mrb[60].mxu1 %v317_v19 }
  0xa6   : > { %2068 = vmatprep.mubr.f32.mxu0 %v254_v20  ;;  %2164 = vmatprep.mubr.f32.mxu1 %v318_v21 }
  0xa9   : > { %2069 = vmatmul.mubr.f32.gmra.mrb[62].mxu0 %v255_v22  ;;  %2165 = vmatmul.mubr.f32.gmra.mrb[62].mxu1 %v319_v23 }
 0x100   : > { %v1977_v25 = vpop.f32.mrb[0].mxu0  ;;  %v2073_v26 = vpop.f32.mrb[0].mxu1 }
 0x101   : > { %v415_v27 = vadd.f32 %v1977_v25, %v2630_v24  ;;  %v735_v28 = vadd.f32 %v2073_v26, %v2630_v24  ;;  %v409_v29 = vpop.f32.mrb[1].mxu0  ;;  %v729_v30 = vpop.f32.mrb[1].mxu1 }
 0x102   : > { %v410_v31 = vadd.f32 %v2630_v24, %v409_v29  ;;  %v730_v32 = vadd.f32 %v2630_v24, %v729_v30 }
 0x103   : > { %v1049_v33 = vmax.f32 %v415_v27, 0.0  ;;  %v1113_v34 = vmax.f32 %v735_v28, 0.0 }
 0x104   : > { %v1048_v35 = vmax.f32 %v410_v31, 0.0  ;;  %v1112_v36 = vmax.f32 %v730_v32, 0.0  ;;  %v1980_v37 = vpop.f32.mrb[2].mxu0  ;;  %v2076_v38 = vpop.f32.mrb[2].mxu1 }
 0x105   : > { %1177 = vst [vmem:[%s2636_s12 + $0x8] sm:$0xff] %v1049_v33  ;;  %1241 = vst [vmem:[%s2636_s12 + $0x208] sm:$0xff] %v1113_v34  ;;  %v425_v39 = vadd.f32 %v1980_v37, %v2630_v24  ;;  %v745_v40 = vadd.f32 %v2076_v38, %v2630_v24  ;;  %v419_v41 = vpop.f32.mrb[3].mxu0  ;;  %v739_v42 = vpop.f32.mrb[3].mxu1 }
 0x106   : > { %1176 = vst [vmem:[%s2636_s12] sm:$0xff] %v1048_v35  ;;  %1240 = vst [vmem:[%s2636_s12 + $0x200] sm:$0xff] %v1112_v36  ;;  %v420_v43 = vadd.f32 %v2630_v24, %v419_v41  ;;  %v740_v44 = vadd.f32 %v2630_v24, %v739_v42 }
 0x107   : > { %v1051_v45 = vmax.f32 %v425_v39, 0.0  ;;  %v1115_v46 = vmax.f32 %v745_v40, 0.0 }
 0x108   : > { %v1050_v47 = vmax.f32 %v420_v43, 0.0  ;;  %v1114_v48 = vmax.f32 %v740_v44, 0.0  ;;  %v1983_v49 = vpop.f32.mrb[4].mxu0  ;;  %v2079_v50 = vpop.f32.mrb[4].mxu1 }
 0x109   : > { %1179 = vst [vmem:[%s2636_s12 + $0x18] sm:$0xff] %v1051_v45  ;;  %1243 = vst [vmem:[%s2636_s12 + $0x218] sm:$0xff] %v1115_v46  ;;  %v435_v51 = vadd.f32 %v1983_v49, %v2630_v24  ;;  %v755_v52 = vadd.f32 %v2079_v50, %v2630_v24  ;;  %v429_v53 = vpop.f32.mrb[5].mxu0  ;;  %v749_v54 = vpop.f32.mrb[5].mxu1 }
 0x10a   : > { %1178 = vst [vmem:[%s2636_s12 + $0x10] sm:$0xff] %v1050_v47  ;;  %1242 = vst [vmem:[%s2636_s12 + $0x210] sm:$0xff] %v1114_v48  ;;  %v430_v55 = vadd.f32 %v2630_v24, %v429_v53  ;;  %v750_v56 = vadd.f32 %v2630_v24, %v749_v54 }
 0x10b   : > { %v1053_v57 = vmax.f32 %v435_v51, 0.0  ;;  %v1117_v58 = vmax.f32 %v755_v52, 0.0 }
 0x10c   : > { %v1052_v59 = vmax.f32 %v430_v55, 0.0  ;;  %v1116_v60 = vmax.f32 %v750_v56, 0.0  ;;  %v1986_v61 = vpop.f32.mrb[6].mxu0  ;;  %v2082_v62 = vpop.f32.mrb[6].mxu1 }
 0x10d   : > { %1181 = vst [vmem:[%s2636_s12 + $0x28] sm:$0xff] %v1053_v57  ;;  %1245 = vst [vmem:[%s2636_s12 + $0x228] sm:$0xff] %v1117_v58  ;;  %v445_v63 = vadd.f32 %v1986_v61, %v2630_v24  ;;  %v765_v0 = vadd.f32 %v2082_v62, %v2630_v24  ;;  %v439_v1 = vpop.f32.mrb[7].mxu0  ;;  %v759_v2 = vpop.f32.mrb[7].mxu1 }
 0x10e   : > { %1180 = vst [vmem:[%s2636_s12 + $0x20] sm:$0xff] %v1052_v59  ;;  %1244 = vst [vmem:[%s2636_s12 + $0x220] sm:$0xff] %v1116_v60  ;;  %v440_v3 = vadd.f32 %v2630_v24, %v439_v1  ;;  %v760_v4 = vadd.f32 %v2630_v24, %v759_v2 }
 0x10f   : > { %v1055_v5 = vmax.f32 %v445_v63, 0.0  ;;  %v1119_v6 = vmax.f32 %v765_v0, 0.0 }
 0x110   : > { %v1054_v7 = vmax.f32 %v440_v3, 0.0  ;;  %v1118_v8 = vmax.f32 %v760_v4, 0.0  ;;  %v1989_v9 = vpop.f32.mrb[8].mxu0  ;;  %v2085_v10 = vpop.f32.mrb[8].mxu1 }
 0x111   : > { %1183 = vst [vmem:[%s2636_s12 + $0x38] sm:$0xff] %v1055_v5  ;;  %1247 = vst [vmem:[%s2636_s12 + $0x238] sm:$0xff] %v1119_v6  ;;  %v455_v11 = vadd.f32 %v1989_v9, %v2630_v24  ;;  %v775_v12 = vadd.f32 %v2085_v10, %v2630_v24  ;;  %v449_v13 = vpop.f32.mrb[9].mxu0  ;;  %v769_v14 = vpop.f32.mrb[9].mxu1 }
 0x112   : > { %1182 = vst [vmem:[%s2636_s12 + $0x30] sm:$0xff] %v1054_v7  ;;  %1246 = vst [vmem:[%s2636_s12 + $0x230] sm:$0xff] %v1118_v8  ;;  %v450_v15 = vadd.f32 %v2630_v24, %v449_v13  ;;  %v770_v16 = vadd.f32 %v2630_v24, %v769_v14 }
 0x113   : > { %v1057_v17 = vmax.f32 %v455_v11, 0.0  ;;  %v1121_v18 = vmax.f32 %v775_v12, 0.0 }
 0x114   : > { %v1056_v19 = vmax.f32 %v450_v15, 0.0  ;;  %v1120_v20 = vmax.f32 %v770_v16, 0.0  ;;  %v1992_v21 = vpop.f32.mrb[10].mxu0  ;;  %v2088_v22 = vpop.f32.mrb[10].mxu1 }
 0x115   : > { %1185 = vst [vmem:[%s2636_s12 + $0x48] sm:$0xff] %v1057_v17  ;;  %1249 = vst [vmem:[%s2636_s12 + $0x248] sm:$0xff] %v1121_v18  ;;  %v465_v23 = vadd.f32 %v1992_v21, %v2630_v24  ;;  %v785_v25 = vadd.f32 %v2088_v22, %v2630_v24  ;;  %v459_v26 = vpop.f32.mrb[11].mxu0  ;;  %v779_v27 = vpop.f32.mrb[11].mxu1 }
 0x116   : > { %1184 = vst [vmem:[%s2636_s12 + $0x40] sm:$0xff] %v1056_v19  ;;  %1248 = vst [vmem:[%s2636_s12 + $0x240] sm:$0xff] %v1120_v20  ;;  %v460_v28 = vadd.f32 %v2630_v24, %v459_v26  ;;  %v780_v29 = vadd.f32 %v2630_v24, %v779_v27 }
 0x117   : > { %v1059_v30 = vmax.f32 %v465_v23, 0.0  ;;  %v1123_v31 = vmax.f32 %v785_v25, 0.0 }
 0x118   : > { %v1058_v32 = vmax.f32 %v460_v28, 0.0  ;;  %v1122_v33 = vmax.f32 %v780_v29, 0.0  ;;  %v1995_v34 = vpop.f32.mrb[12].mxu0  ;;  %v2091_v35 = vpop.f32.mrb[12].mxu1 }
 0x119   : > { %1187 = vst [vmem:[%s2636_s12 + $0x58] sm:$0xff] %v1059_v30  ;;  %1251 = vst [vmem:[%s2636_s12 + $0x258] sm:$0xff] %v1123_v31  ;;  %v475_v36 = vadd.f32 %v1995_v34, %v2630_v24  ;;  %v795_v37 = vadd.f32 %v2091_v35, %v2630_v24  ;;  %v469_v38 = vpop.f32.mrb[13].mxu0  ;;  %v789_v39 = vpop.f32.mrb[13].mxu1 }
 0x11a   : > { %1186 = vst [vmem:[%s2636_s12 + $0x50] sm:$0xff] %v1058_v32  ;;  %1250 = vst [vmem:[%s2636_s12 + $0x250] sm:$0xff] %v1122_v33  ;;  %v470_v40 = vadd.f32 %v2630_v24, %v469_v38  ;;  %v790_v41 = vadd.f32 %v2630_v24, %v789_v39 }
 0x11b   : > { %v1061_v42 = vmax.f32 %v475_v36, 0.0  ;;  %v1125_v43 = vmax.f32 %v795_v37, 0.0 }
 0x11c   : > { %v1060_v44 = vmax.f32 %v470_v40, 0.0  ;;  %v1124_v45 = vmax.f32 %v790_v41, 0.0  ;;  %v1998_v46 = vpop.f32.mrb[14].mxu0  ;;  %v2094_v47 = vpop.f32.mrb[14].mxu1 }
 0x11d   : > { %1189 = vst [vmem:[%s2636_s12 + $0x68] sm:$0xff] %v1061_v42  ;;  %1253 = vst [vmem:[%s2636_s12 + $0x268] sm:$0xff] %v1125_v43  ;;  %v485_v48 = vadd.f32 %v1998_v46, %v2630_v24  ;;  %v805_v49 = vadd.f32 %v2094_v47, %v2630_v24  ;;  %v479_v50 = vpop.f32.mrb[15].mxu0  ;;  %v799_v51 = vpop.f32.mrb[15].mxu1 }
 0x11e   : > { %1188 = vst [vmem:[%s2636_s12 + $0x60] sm:$0xff] %v1060_v44  ;;  %1252 = vst [vmem:[%s2636_s12 + $0x260] sm:$0xff] %v1124_v45  ;;  %v480_v52 = vadd.f32 %v2630_v24, %v479_v50  ;;  %v800_v53 = vadd.f32 %v2630_v24, %v799_v51 }
 0x11f   : > { %v1063_v54 = vmax.f32 %v485_v48, 0.0  ;;  %v1127_v55 = vmax.f32 %v805_v49, 0.0 }
 0x120   : > { %v1062_v56 = vmax.f32 %v480_v52, 0.0  ;;  %v1126_v57 = vmax.f32 %v800_v53, 0.0  ;;  %v2001_v58 = vpop.f32.mrb[16].mxu0  ;;  %v2097_v59 = vpop.f32.mrb[16].mxu1 }
 0x121   : > { %1191 = vst [vmem:[%s2636_s12 + $0x78] sm:$0xff] %v1063_v54  ;;  %1255 = vst [vmem:[%s2636_s12 + $0x278] sm:$0xff] %v1127_v55  ;;  %v495_v60 = vadd.f32 %v2001_v58, %v2630_v24  ;;  %v815_v61 = vadd.f32 %v2097_v59, %v2630_v24  ;;  %v489_v62 = vpop.f32.mrb[17].mxu0  ;;  %v809_v63 = vpop.f32.mrb[17].mxu1 }
 0x122   : > { %1190 = vst [vmem:[%s2636_s12 + $0x70] sm:$0xff] %v1062_v56  ;;  %1254 = vst [vmem:[%s2636_s12 + $0x270] sm:$0xff] %v1126_v57  ;;  %v490_v0 = vadd.f32 %v2630_v24, %v489_v62  ;;  %v810_v1 = vadd.f32 %v2630_v24, %v809_v63 }
 0x123   : > { %v1065_v2 = vmax.f32 %v495_v60, 0.0  ;;  %v1129_v3 = vmax.f32 %v815_v61, 0.0 }
 0x124   : > { %v1064_v4 = vmax.f32 %v490_v0, 0.0  ;;  %v1128_v5 = vmax.f32 %v810_v1, 0.0  ;;  %v2004_v6 = vpop.f32.mrb[18].mxu0  ;;  %v2100_v7 = vpop.f32.mrb[18].mxu1 }
 0x125   : > { %1193 = vst [vmem:[%s2636_s12 + $0x88] sm:$0xff] %v1065_v2  ;;  %1257 = vst [vmem:[%s2636_s12 + $0x288] sm:$0xff] %v1129_v3  ;;  %v505_v8 = vadd.f32 %v2004_v6, %v2630_v24  ;;  %v825_v9 = vadd.f32 %v2100_v7, %v2630_v24  ;;  %v499_v10 = vpop.f32.mrb[19].mxu0  ;;  %v819_v11 = vpop.f32.mrb[19].mxu1 }
 0x126   : > { %1192 = vst [vmem:[%s2636_s12 + $0x80] sm:$0xff] %v1064_v4  ;;  %1256 = vst [vmem:[%s2636_s12 + $0x280] sm:$0xff] %v1128_v5  ;;  %v500_v12 = vadd.f32 %v2630_v24, %v499_v10  ;;  %v820_v13 = vadd.f32 %v2630_v24, %v819_v11 }
 0x127   : > { %v1067_v14 = vmax.f32 %v505_v8, 0.0  ;;  %v1131_v15 = vmax.f32 %v825_v9, 0.0 }
 0x128   : > { %v1066_v16 = vmax.f32 %v500_v12, 0.0  ;;  %v1130_v17 = vmax.f32 %v820_v13, 0.0  ;;  %v2007_v18 = vpop.f32.mrb[20].mxu0  ;;  %v2103_v19 = vpop.f32.mrb[20].mxu1 }
 0x129   : > { %1195 = vst [vmem:[%s2636_s12 + $0x98] sm:$0xff] %v1067_v14  ;;  %1259 = vst [vmem:[%s2636_s12 + $0x298] sm:$0xff] %v1131_v15  ;;  %v515_v20 = vadd.f32 %v2007_v18, %v2630_v24  ;;  %v835_v21 = vadd.f32 %v2103_v19, %v2630_v24  ;;  %v509_v22 = vpop.f32.mrb[21].mxu0  ;;  %v829_v23 = vpop.f32.mrb[21].mxu1 }
 0x12a   : > { %1194 = vst [vmem:[%s2636_s12 + $0x90] sm:$0xff] %v1066_v16  ;;  %1258 = vst [vmem:[%s2636_s12 + $0x290] sm:$0xff] %v1130_v17  ;;  %v510_v25 = vadd.f32 %v2630_v24, %v509_v22  ;;  %v830_v26 = vadd.f32 %v2630_v24, %v829_v23 }
 0x12b   : > { %v1069_v27 = vmax.f32 %v515_v20, 0.0  ;;  %v1133_v28 = vmax.f32 %v835_v21, 0.0 }
 0x12c   : > { %v1068_v29 = vmax.f32 %v510_v25, 0.0  ;;  %v1132_v30 = vmax.f32 %v830_v26, 0.0  ;;  %v2010_v31 = vpop.f32.mrb[22].mxu0  ;;  %v2106_v32 = vpop.f32.mrb[22].mxu1 }
 0x12d   : > { %1197 = vst [vmem:[%s2636_s12 + $0xa8] sm:$0xff] %v1069_v27  ;;  %1261 = vst [vmem:[%s2636_s12 + $0x2a8] sm:$0xff] %v1133_v28  ;;  %v525_v33 = vadd.f32 %v2010_v31, %v2630_v24  ;;  %v845_v34 = vadd.f32 %v2106_v32, %v2630_v24  ;;  %v519_v35 = vpop.f32.mrb[23].mxu0  ;;  %v839_v36 = vpop.f32.mrb[23].mxu1 }
 0x12e   : > { %1196 = vst [vmem:[%s2636_s12 + $0xa0] sm:$0xff] %v1068_v29  ;;  %1260 = vst [vmem:[%s2636_s12 + $0x2a0] sm:$0xff] %v1132_v30  ;;  %v520_v37 = vadd.f32 %v2630_v24, %v519_v35  ;;  %v840_v38 = vadd.f32 %v2630_v24, %v839_v36 }
 0x12f   : > { %v1071_v39 = vmax.f32 %v525_v33, 0.0  ;;  %v1135_v40 = vmax.f32 %v845_v34, 0.0 }
 0x130   : > { %v1070_v41 = vmax.f32 %v520_v37, 0.0  ;;  %v1134_v42 = vmax.f32 %v840_v38, 0.0  ;;  %v2013_v43 = vpop.f32.mrb[24].mxu0  ;;  %v2109_v44 = vpop.f32.mrb[24].mxu1 }
 0x131   : > { %1199 = vst [vmem:[%s2636_s12 + $0xb8] sm:$0xff] %v1071_v39  ;;  %1263 = vst [vmem:[%s2636_s12 + $0x2b8] sm:$0xff] %v1135_v40  ;;  %v535_v45 = vadd.f32 %v2013_v43, %v2630_v24  ;;  %v855_v46 = vadd.f32 %v2109_v44, %v2630_v24  ;;  %v529_v47 = vpop.f32.mrb[25].mxu0  ;;  %v849_v48 = vpop.f32.mrb[25].mxu1 }
 0x132   : > { %1198 = vst [vmem:[%s2636_s12 + $0xb0] sm:$0xff] %v1070_v41  ;;  %1262 = vst [vmem:[%s2636_s12 + $0x2b0] sm:$0xff] %v1134_v42  ;;  %v530_v49 = vadd.f32 %v2630_v24, %v529_v47  ;;  %v850_v50 = vadd.f32 %v2630_v24, %v849_v48 }
 0x133   : > { %v1073_v51 = vmax.f32 %v535_v45, 0.0  ;;  %v1137_v52 = vmax.f32 %v855_v46, 0.0 }
 0x134   : > { %v1072_v53 = vmax.f32 %v530_v49, 0.0  ;;  %v1136_v54 = vmax.f32 %v850_v50, 0.0  ;;  %v2016_v55 = vpop.f32.mrb[26].mxu0  ;;  %v2112_v56 = vpop.f32.mrb[26].mxu1 }
 0x135   : > { %1201 = vst [vmem:[%s2636_s12 + $0xc8] sm:$0xff] %v1073_v51  ;;  %1265 = vst [vmem:[%s2636_s12 + $0x2c8] sm:$0xff] %v1137_v52  ;;  %v545_v57 = vadd.f32 %v2016_v55, %v2630_v24  ;;  %v865_v58 = vadd.f32 %v2112_v56, %v2630_v24  ;;  %v539_v59 = vpop.f32.mrb[27].mxu0  ;;  %v859_v60 = vpop.f32.mrb[27].mxu1 }
 0x136   : > { %1200 = vst [vmem:[%s2636_s12 + $0xc0] sm:$0xff] %v1072_v53  ;;  %1264 = vst [vmem:[%s2636_s12 + $0x2c0] sm:$0xff] %v1136_v54  ;;  %v540_v61 = vadd.f32 %v2630_v24, %v539_v59  ;;  %v860_v62 = vadd.f32 %v2630_v24, %v859_v60 }
 0x137   : > { %v1075_v63 = vmax.f32 %v545_v57, 0.0  ;;  %v1139_v0 = vmax.f32 %v865_v58, 0.0 }
 0x138   : > { %v1074_v1 = vmax.f32 %v540_v61, 0.0  ;;  %v1138_v2 = vmax.f32 %v860_v62, 0.0  ;;  %v2019_v3 = vpop.f32.mrb[28].mxu0  ;;  %v2115_v4 = vpop.f32.mrb[28].mxu1 }
 0x139   : > { %1203 = vst [vmem:[%s2636_s12 + $0xd8] sm:$0xff] %v1075_v63  ;;  %1267 = vst [vmem:[%s2636_s12 + $0x2d8] sm:$0xff] %v1139_v0  ;;  %v555_v5 = vadd.f32 %v2019_v3, %v2630_v24  ;;  %v875_v6 = vadd.f32 %v2115_v4, %v2630_v24  ;;  %v549_v7 = vpop.f32.mrb[29].mxu0  ;;  %v869_v8 = vpop.f32.mrb[29].mxu1 }
 0x13a   : > { %1202 = vst [vmem:[%s2636_s12 + $0xd0] sm:$0xff] %v1074_v1  ;;  %1266 = vst [vmem:[%s2636_s12 + $0x2d0] sm:$0xff] %v1138_v2  ;;  %v550_v9 = vadd.f32 %v2630_v24, %v549_v7  ;;  %v870_v10 = vadd.f32 %v2630_v24, %v869_v8 }
 0x13b   : > { %v1077_v11 = vmax.f32 %v555_v5, 0.0  ;;  %v1141_v12 = vmax.f32 %v875_v6, 0.0 }
 0x13c   : > { %v1076_v13 = vmax.f32 %v550_v9, 0.0  ;;  %v1140_v14 = vmax.f32 %v870_v10, 0.0  ;;  %v2022_v15 = vpop.f32.mrb[30].mxu0  ;;  %v2118_v16 = vpop.f32.mrb[30].mxu1 }
 0x13d   : > { %1205 = vst [vmem:[%s2636_s12 + $0xe8] sm:$0xff] %v1077_v11  ;;  %1269 = vst [vmem:[%s2636_s12 + $0x2e8] sm:$0xff] %v1141_v12  ;;  %v565_v17 = vadd.f32 %v2022_v15, %v2630_v24  ;;  %v885_v18 = vadd.f32 %v2118_v16, %v2630_v24  ;;  %v559_v19 = vpop.f32.mrb[31].mxu0  ;;  %v879_v20 = vpop.f32.mrb[31].mxu1 }
 0x13e   : > { %1204 = vst [vmem:[%s2636_s12 + $0xe0] sm:$0xff] %v1076_v13  ;;  %1268 = vst [vmem:[%s2636_s12 + $0x2e0] sm:$0xff] %v1140_v14  ;;  %v560_v21 = vadd.f32 %v2630_v24, %v559_v19  ;;  %v880_v22 = vadd.f32 %v2630_v24, %v879_v20 }
 0x13f   : > { %v1079_v23 = vmax.f32 %v565_v17, 0.0  ;;  %v1143_v25 = vmax.f32 %v885_v18, 0.0 }
 0x140   : > { %v1078_v26 = vmax.f32 %v560_v21, 0.0  ;;  %v1142_v27 = vmax.f32 %v880_v22, 0.0  ;;  %v2025_v28 = vpop.f32.mrb[32].mxu0  ;;  %v2121_v29 = vpop.f32.mrb[32].mxu1 }
 0x141   : > { %1207 = vst [vmem:[%s2636_s12 + $0xf8] sm:$0xff] %v1079_v23  ;;  %1271 = vst [vmem:[%s2636_s12 + $0x2f8] sm:$0xff] %v1143_v25  ;;  %v575_v30 = vadd.f32 %v2025_v28, %v2630_v24  ;;  %v895_v31 = vadd.f32 %v2121_v29, %v2630_v24  ;;  %v569_v32 = vpop.f32.mrb[33].mxu0  ;;  %v889_v33 = vpop.f32.mrb[33].mxu1 }
 0x142   : > { %1206 = vst [vmem:[%s2636_s12 + $0xf0] sm:$0xff] %v1078_v26  ;;  %1270 = vst [vmem:[%s2636_s12 + $0x2f0] sm:$0xff] %v1142_v27  ;;  %v570_v34 = vadd.f32 %v2630_v24, %v569_v32  ;;  %v890_v35 = vadd.f32 %v2630_v24, %v889_v33 }
 0x143   : > { %v1081_v36 = vmax.f32 %v575_v30, 0.0  ;;  %v1145_v37 = vmax.f32 %v895_v31, 0.0 }
 0x144   : > { %v1080_v38 = vmax.f32 %v570_v34, 0.0  ;;  %v1144_v39 = vmax.f32 %v890_v35, 0.0  ;;  %v2028_v40 = vpop.f32.mrb[34].mxu0  ;;  %v2124_v41 = vpop.f32.mrb[34].mxu1 }
 0x145   : > { %1209 = vst [vmem:[%s2636_s12 + $0x108] sm:$0xff] %v1081_v36  ;;  %1273 = vst [vmem:[%s2636_s12 + $0x308] sm:$0xff] %v1145_v37  ;;  %v585_v42 = vadd.f32 %v2028_v40, %v2630_v24  ;;  %v905_v43 = vadd.f32 %v2124_v41, %v2630_v24  ;;  %v579_v44 = vpop.f32.mrb[35].mxu0  ;;  %v899_v45 = vpop.f32.mrb[35].mxu1 }
 0x146   : > { %1208 = vst [vmem:[%s2636_s12 + $0x100] sm:$0xff] %v1080_v38  ;;  %1272 = vst [vmem:[%s2636_s12 + $0x300] sm:$0xff] %v1144_v39  ;;  %v580_v46 = vadd.f32 %v2630_v24, %v579_v44  ;;  %v900_v47 = vadd.f32 %v2630_v24, %v899_v45 }
 0x147   : > { %v1083_v48 = vmax.f32 %v585_v42, 0.0  ;;  %v1147_v49 = vmax.f32 %v905_v43, 0.0 }
 0x148   : > { %v1082_v50 = vmax.f32 %v580_v46, 0.0  ;;  %v1146_v51 = vmax.f32 %v900_v47, 0.0  ;;  %v2031_v52 = vpop.f32.mrb[36].mxu0  ;;  %v2127_v53 = vpop.f32.mrb[36].mxu1 }
 0x149   : > { %1211 = vst [vmem:[%s2636_s12 + $0x118] sm:$0xff] %v1083_v48  ;;  %1275 = vst [vmem:[%s2636_s12 + $0x318] sm:$0xff] %v1147_v49  ;;  %v595_v54 = vadd.f32 %v2031_v52, %v2630_v24  ;;  %v915_v55 = vadd.f32 %v2127_v53, %v2630_v24  ;;  %v589_v56 = vpop.f32.mrb[37].mxu0  ;;  %v909_v57 = vpop.f32.mrb[37].mxu1 }
 0x14a   : > { %1210 = vst [vmem:[%s2636_s12 + $0x110] sm:$0xff] %v1082_v50  ;;  %1274 = vst [vmem:[%s2636_s12 + $0x310] sm:$0xff] %v1146_v51  ;;  %v590_v58 = vadd.f32 %v2630_v24, %v589_v56  ;;  %v910_v59 = vadd.f32 %v2630_v24, %v909_v57 }
 0x14b   : > { %v1085_v60 = vmax.f32 %v595_v54, 0.0  ;;  %v1149_v61 = vmax.f32 %v915_v55, 0.0 }
 0x14c   : > { %v1084_v62 = vmax.f32 %v590_v58, 0.0  ;;  %v1148_v63 = vmax.f32 %v910_v59, 0.0  ;;  %v2034_v0 = vpop.f32.mrb[38].mxu0  ;;  %v2130_v1 = vpop.f32.mrb[38].mxu1 }
 0x14d   : > { %1213 = vst [vmem:[%s2636_s12 + $0x128] sm:$0xff] %v1085_v60  ;;  %1277 = vst [vmem:[%s2636_s12 + $0x328] sm:$0xff] %v1149_v61  ;;  %v605_v2 = vadd.f32 %v2034_v0, %v2630_v24  ;;  %v925_v3 = vadd.f32 %v2130_v1, %v2630_v24  ;;  %v599_v4 = vpop.f32.mrb[39].mxu0  ;;  %v919_v5 = vpop.f32.mrb[39].mxu1 }
 0x14e   : > { %1212 = vst [vmem:[%s2636_s12 + $0x120] sm:$0xff] %v1084_v62  ;;  %1276 = vst [vmem:[%s2636_s12 + $0x320] sm:$0xff] %v1148_v63  ;;  %v600_v6 = vadd.f32 %v2630_v24, %v599_v4  ;;  %v920_v7 = vadd.f32 %v2630_v24, %v919_v5 }
 0x14f   : > { %v1087_v8 = vmax.f32 %v605_v2, 0.0  ;;  %v1151_v9 = vmax.f32 %v925_v3, 0.0 }
 0x150   : > { %v1086_v10 = vmax.f32 %v600_v6, 0.0  ;;  %v1150_v11 = vmax.f32 %v920_v7, 0.0  ;;  %v2037_v12 = vpop.f32.mrb[40].mxu0  ;;  %v2133_v13 = vpop.f32.mrb[40].mxu1 }
 0x151   : > { %1215 = vst [vmem:[%s2636_s12 + $0x138] sm:$0xff] %v1087_v8  ;;  %1279 = vst [vmem:[%s2636_s12 + $0x338] sm:$0xff] %v1151_v9  ;;  %v615_v14 = vadd.f32 %v2037_v12, %v2630_v24  ;;  %v935_v15 = vadd.f32 %v2133_v13, %v2630_v24  ;;  %v609_v16 = vpop.f32.mrb[41].mxu0  ;;  %v929_v17 = vpop.f32.mrb[41].mxu1 }
 0x152   : > { %1214 = vst [vmem:[%s2636_s12 + $0x130] sm:$0xff] %v1086_v10  ;;  %1278 = vst [vmem:[%s2636_s12 + $0x330] sm:$0xff] %v1150_v11  ;;  %v610_v18 = vadd.f32 %v2630_v24, %v609_v16  ;;  %v930_v19 = vadd.f32 %v2630_v24, %v929_v17 }
 0x153   : > { %v1089_v20 = vmax.f32 %v615_v14, 0.0  ;;  %v1153_v21 = vmax.f32 %v935_v15, 0.0 }
 0x154   : > { %v1088_v22 = vmax.f32 %v610_v18, 0.0  ;;  %v1152_v23 = vmax.f32 %v930_v19, 0.0  ;;  %v2040_v25 = vpop.f32.mrb[42].mxu0  ;;  %v2136_v26 = vpop.f32.mrb[42].mxu1 }
 0x155   : > { %1217 = vst [vmem:[%s2636_s12 + $0x148] sm:$0xff] %v1089_v20  ;;  %1281 = vst [vmem:[%s2636_s12 + $0x348] sm:$0xff] %v1153_v21  ;;  %v625_v27 = vadd.f32 %v2040_v25, %v2630_v24  ;;  %v945_v28 = vadd.f32 %v2136_v26, %v2630_v24  ;;  %v619_v29 = vpop.f32.mrb[43].mxu0  ;;  %v939_v30 = vpop.f32.mrb[43].mxu1 }
 0x156   : > { %1216 = vst [vmem:[%s2636_s12 + $0x140] sm:$0xff] %v1088_v22  ;;  %1280 = vst [vmem:[%s2636_s12 + $0x340] sm:$0xff] %v1152_v23  ;;  %v620_v31 = vadd.f32 %v2630_v24, %v619_v29  ;;  %v940_v32 = vadd.f32 %v2630_v24, %v939_v30 }
 0x157   : > { %v1091_v33 = vmax.f32 %v625_v27, 0.0  ;;  %v1155_v34 = vmax.f32 %v945_v28, 0.0 }
 0x158   : > { %v1090_v35 = vmax.f32 %v620_v31, 0.0  ;;  %v1154_v36 = vmax.f32 %v940_v32, 0.0  ;;  %v2043_v37 = vpop.f32.mrb[44].mxu0  ;;  %v2139_v38 = vpop.f32.mrb[44].mxu1 }
 0x159   : > { %1219 = vst [vmem:[%s2636_s12 + $0x158] sm:$0xff] %v1091_v33  ;;  %1283 = vst [vmem:[%s2636_s12 + $0x358] sm:$0xff] %v1155_v34  ;;  %v635_v39 = vadd.f32 %v2043_v37, %v2630_v24  ;;  %v955_v40 = vadd.f32 %v2139_v38, %v2630_v24  ;;  %v629_v41 = vpop.f32.mrb[45].mxu0  ;;  %v949_v42 = vpop.f32.mrb[45].mxu1 }
 0x15a   : > { %1218 = vst [vmem:[%s2636_s12 + $0x150] sm:$0xff] %v1090_v35  ;;  %1282 = vst [vmem:[%s2636_s12 + $0x350] sm:$0xff] %v1154_v36  ;;  %v630_v43 = vadd.f32 %v2630_v24, %v629_v41  ;;  %v950_v44 = vadd.f32 %v2630_v24, %v949_v42 }
 0x15b   : > { %v1093_v45 = vmax.f32 %v635_v39, 0.0  ;;  %v1157_v46 = vmax.f32 %v955_v40, 0.0 }
 0x15c   : > { %v1092_v47 = vmax.f32 %v630_v43, 0.0  ;;  %v1156_v48 = vmax.f32 %v950_v44, 0.0  ;;  %v2046_v49 = vpop.f32.mrb[46].mxu0  ;;  %v2142_v50 = vpop.f32.mrb[46].mxu1 }
 0x15d   : > { %1221 = vst [vmem:[%s2636_s12 + $0x168] sm:$0xff] %v1093_v45  ;;  %1285 = vst [vmem:[%s2636_s12 + $0x368] sm:$0xff] %v1157_v46  ;;  %v645_v51 = vadd.f32 %v2046_v49, %v2630_v24  ;;  %v965_v52 = vadd.f32 %v2142_v50, %v2630_v24  ;;  %v639_v53 = vpop.f32.mrb[47].mxu0  ;;  %v959_v54 = vpop.f32.mrb[47].mxu1 }
 0x15e   : > { %1220 = vst [vmem:[%s2636_s12 + $0x160] sm:$0xff] %v1092_v47  ;;  %1284 = vst [vmem:[%s2636_s12 + $0x360] sm:$0xff] %v1156_v48  ;;  %v640_v55 = vadd.f32 %v2630_v24, %v639_v53  ;;  %v960_v56 = vadd.f32 %v2630_v24, %v959_v54 }
 0x15f   : > { %v1095_v57 = vmax.f32 %v645_v51, 0.0  ;;  %v1159_v58 = vmax.f32 %v965_v52, 0.0 }
 0x160   : > { %v1094_v59 = vmax.f32 %v640_v55, 0.0  ;;  %v1158_v60 = vmax.f32 %v960_v56, 0.0  ;;  %v2049_v61 = vpop.f32.mrb[48].mxu0  ;;  %v2145_v62 = vpop.f32.mrb[48].mxu1 }
 0x161   : > { %1223 = vst [vmem:[%s2636_s12 + $0x178] sm:$0xff] %v1095_v57  ;;  %1287 = vst [vmem:[%s2636_s12 + $0x378] sm:$0xff] %v1159_v58  ;;  %v655_v63 = vadd.f32 %v2049_v61, %v2630_v24  ;;  %v975_v0 = vadd.f32 %v2145_v62, %v2630_v24  ;;  %v649_v1 = vpop.f32.mrb[49].mxu0  ;;  %v969_v2 = vpop.f32.mrb[49].mxu1 }
 0x162   : > { %1222 = vst [vmem:[%s2636_s12 + $0x170] sm:$0xff] %v1094_v59  ;;  %1286 = vst [vmem:[%s2636_s12 + $0x370] sm:$0xff] %v1158_v60  ;;  %v650_v3 = vadd.f32 %v2630_v24, %v649_v1  ;;  %v970_v4 = vadd.f32 %v2630_v24, %v969_v2 }
 0x163   : > { %v1097_v5 = vmax.f32 %v655_v63, 0.0  ;;  %v1161_v6 = vmax.f32 %v975_v0, 0.0 }
 0x164   : > { %v1096_v7 = vmax.f32 %v650_v3, 0.0  ;;  %v1160_v8 = vmax.f32 %v970_v4, 0.0  ;;  %v2052_v9 = vpop.f32.mrb[50].mxu0  ;;  %v2148_v10 = vpop.f32.mrb[50].mxu1 }
 0x165   : > { %1225 = vst [vmem:[%s2636_s12 + $0x188] sm:$0xff] %v1097_v5  ;;  %1289 = vst [vmem:[%s2636_s12 + $0x388] sm:$0xff] %v1161_v6  ;;  %v665_v11 = vadd.f32 %v2052_v9, %v2630_v24  ;;  %v985_v12 = vadd.f32 %v2148_v10, %v2630_v24  ;;  %v659_v13 = vpop.f32.mrb[51].mxu0  ;;  %v979_v14 = vpop.f32.mrb[51].mxu1 }
 0x166   : > { %1224 = vst [vmem:[%s2636_s12 + $0x180] sm:$0xff] %v1096_v7  ;;  %1288 = vst [vmem:[%s2636_s12 + $0x380] sm:$0xff] %v1160_v8  ;;  %v660_v15 = vadd.f32 %v2630_v24, %v659_v13  ;;  %v980_v16 = vadd.f32 %v2630_v24, %v979_v14 }
 0x167   : > { %v1099_v17 = vmax.f32 %v665_v11, 0.0  ;;  %v1163_v18 = vmax.f32 %v985_v12, 0.0 }
 0x168   : > { %v1098_v19 = vmax.f32 %v660_v15, 0.0  ;;  %v1162_v20 = vmax.f32 %v980_v16, 0.0  ;;  %v2055_v21 = vpop.f32.mrb[52].mxu0  ;;  %v2151_v22 = vpop.f32.mrb[52].mxu1 }
 0x169   : > { %1227 = vst [vmem:[%s2636_s12 + $0x198] sm:$0xff] %v1099_v17  ;;  %1291 = vst [vmem:[%s2636_s12 + $0x398] sm:$0xff] %v1163_v18  ;;  %v675_v23 = vadd.f32 %v2055_v21, %v2630_v24  ;;  %v995_v25 = vadd.f32 %v2151_v22, %v2630_v24  ;;  %v669_v26 = vpop.f32.mrb[53].mxu0  ;;  %v989_v27 = vpop.f32.mrb[53].mxu1 }
 0x16a   : > { %1226 = vst [vmem:[%s2636_s12 + $0x190] sm:$0xff] %v1098_v19  ;;  %1290 = vst [vmem:[%s2636_s12 + $0x390] sm:$0xff] %v1162_v20  ;;  %v670_v28 = vadd.f32 %v2630_v24, %v669_v26  ;;  %v990_v29 = vadd.f32 %v2630_v24, %v989_v27 }
 0x16b   : > { %v1101_v30 = vmax.f32 %v675_v23, 0.0  ;;  %v1165_v31 = vmax.f32 %v995_v25, 0.0 }
 0x16c   : > { %v1100_v32 = vmax.f32 %v670_v28, 0.0  ;;  %v1164_v33 = vmax.f32 %v990_v29, 0.0  ;;  %v2058_v34 = vpop.f32.mrb[54].mxu0  ;;  %v2154_v35 = vpop.f32.mrb[54].mxu1 }
 0x16d   : > { %1229 = vst [vmem:[%s2636_s12 + $0x1a8] sm:$0xff] %v1101_v30  ;;  %1293 = vst [vmem:[%s2636_s12 + $0x3a8] sm:$0xff] %v1165_v31  ;;  %v685_v36 = vadd.f32 %v2058_v34, %v2630_v24  ;;  %v1005_v37 = vadd.f32 %v2154_v35, %v2630_v24  ;;  %v679_v38 = vpop.f32.mrb[55].mxu0  ;;  %v999_v39 = vpop.f32.mrb[55].mxu1 }
 0x16e   : > { %1228 = vst [vmem:[%s2636_s12 + $0x1a0] sm:$0xff] %v1100_v32  ;;  %1292 = vst [vmem:[%s2636_s12 + $0x3a0] sm:$0xff] %v1164_v33  ;;  %v680_v40 = vadd.f32 %v2630_v24, %v679_v38  ;;  %v1000_v41 = vadd.f32 %v2630_v24, %v999_v39 }
 0x16f   : > { %v1103_v42 = vmax.f32 %v685_v36, 0.0  ;;  %v1167_v43 = vmax.f32 %v1005_v37, 0.0 }
 0x170   : > { %v1102_v44 = vmax.f32 %v680_v40, 0.0  ;;  %v1166_v45 = vmax.f32 %v1000_v41, 0.0  ;;  %v2061_v46 = vpop.f32.mrb[56].mxu0  ;;  %v2157_v47 = vpop.f32.mrb[56].mxu1 }
 0x171   : > { %1231 = vst [vmem:[%s2636_s12 + $0x1b8] sm:$0xff] %v1103_v42  ;;  %1295 = vst [vmem:[%s2636_s12 + $0x3b8] sm:$0xff] %v1167_v43  ;;  %v695_v48 = vadd.f32 %v2061_v46, %v2630_v24  ;;  %v1015_v49 = vadd.f32 %v2157_v47, %v2630_v24  ;;  %v689_v50 = vpop.f32.mrb[57].mxu0  ;;  %v1009_v51 = vpop.f32.mrb[57].mxu1 }
 0x172   : > { %1230 = vst [vmem:[%s2636_s12 + $0x1b0] sm:$0xff] %v1102_v44  ;;  %1294 = vst [vmem:[%s2636_s12 + $0x3b0] sm:$0xff] %v1166_v45  ;;  %v690_v52 = vadd.f32 %v2630_v24, %v689_v50  ;;  %v1010_v53 = vadd.f32 %v2630_v24, %v1009_v51 }
 0x173   : > { %v1105_v54 = vmax.f32 %v695_v48, 0.0  ;;  %v1169_v55 = vmax.f32 %v1015_v49, 0.0 }
 0x174   : > { %v1104_v56 = vmax.f32 %v690_v52, 0.0  ;;  %v1168_v57 = vmax.f32 %v1010_v53, 0.0  ;;  %v2064_v58 = vpop.f32.mrb[58].mxu0  ;;  %v2160_v59 = vpop.f32.mrb[58].mxu1 }
 0x175   : > { %1233 = vst [vmem:[%s2636_s12 + $0x1c8] sm:$0xff] %v1105_v54  ;;  %1297 = vst [vmem:[%s2636_s12 + $0x3c8] sm:$0xff] %v1169_v55  ;;  %v705_v60 = vadd.f32 %v2064_v58, %v2630_v24  ;;  %v1025_v61 = vadd.f32 %v2160_v59, %v2630_v24  ;;  %v699_v62 = vpop.f32.mrb[59].mxu0  ;;  %v1019_v63 = vpop.f32.mrb[59].mxu1 }
 0x176   : > { %1232 = vst [vmem:[%s2636_s12 + $0x1c0] sm:$0xff] %v1104_v56  ;;  %1296 = vst [vmem:[%s2636_s12 + $0x3c0] sm:$0xff] %v1168_v57  ;;  %v700_v0 = vadd.f32 %v2630_v24, %v699_v62  ;;  %v1020_v1 = vadd.f32 %v2630_v24, %v1019_v63 }
 0x177   : > { %v1107_v2 = vmax.f32 %v705_v60, 0.0  ;;  %v1171_v3 = vmax.f32 %v1025_v61, 0.0 }
 0x178   : > { %v1106_v4 = vmax.f32 %v700_v0, 0.0  ;;  %v1170_v5 = vmax.f32 %v1020_v1, 0.0  ;;  %v2067_v6 = vpop.f32.mrb[60].mxu0  ;;  %v2163_v7 = vpop.f32.mrb[60].mxu1 }
 0x179   : > { %1235 = vst [vmem:[%s2636_s12 + $0x1d8] sm:$0xff] %v1107_v2  ;;  %1299 = vst [vmem:[%s2636_s12 + $0x3d8] sm:$0xff] %v1171_v3  ;;  %v715_v8 = vadd.f32 %v2067_v6, %v2630_v24  ;;  %v1035_v9 = vadd.f32 %v2163_v7, %v2630_v24  ;;  %v709_v10 = vpop.f32.mrb[61].mxu0  ;;  %v1029_v11 = vpop.f32.mrb[61].mxu1 }
 0x17a   : > { %1234 = vst [vmem:[%s2636_s12 + $0x1d0] sm:$0xff] %v1106_v4  ;;  %1298 = vst [vmem:[%s2636_s12 + $0x3d0] sm:$0xff] %v1170_v5  ;;  %v710_v12 = vadd.f32 %v2630_v24, %v709_v10  ;;  %v1030_v13 = vadd.f32 %v2630_v24, %v1029_v11 }
 0x17b   : > { %v1109_v14 = vmax.f32 %v715_v8, 0.0  ;;  %v1173_v15 = vmax.f32 %v1035_v9, 0.0 }
 0x17c   : > { %v1108_v16 = vmax.f32 %v710_v12, 0.0  ;;  %v1172_v17 = vmax.f32 %v1030_v13, 0.0  ;;  %v2070_v18 = vpop.f32.mrb[62].mxu0  ;;  %v2166_v19 = vpop.f32.mrb[62].mxu1  ;;  %1310 = sbr.rel (!%p2436_p4) target bundleno = 459 (0x1cb), region = 36 }
 0x17d   : > { %1237 = vst [vmem:[%s2636_s12 + $0x1e8] sm:$0xff] %v1109_v14  ;;  %1301 = vst [vmem:[%s2636_s12 + $0x3e8] sm:$0xff] %v1173_v15  ;;  %v725_v20 = vadd.f32 %v2070_v18, %v2630_v24  ;;  %v1045_v21 = vadd.f32 %v2166_v19, %v2630_v24  ;;  %v719_v22 = vpop.f32.mrb[63].mxu0  ;;  %v1039_v23 = vpop.f32.mrb[63].mxu1 }
 0x17e   : > { %1236 = vst [vmem:[%s2636_s12 + $0x1e0] sm:$0xff] %v1108_v16  ;;  %1300 = vst [vmem:[%s2636_s12 + $0x3e0] sm:$0xff] %v1172_v17  ;;  %v720_v25 = vadd.f32 %v2630_v24, %v719_v22  ;;  %v1040_v26 = vadd.f32 %v2630_v24, %v1039_v23 }
 0x17f   : > { %v1111_v27 = vmax.f32 %v725_v20, 0.0  ;;  %v1175_v28 = vmax.f32 %v1045_v21, 0.0 }
 0x180   : > { %v1110_v29 = vmax.f32 %v720_v25, 0.0  ;;  %v1174_v30 = vmax.f32 %v1040_v26, 0.0 }
 0x181   : > { %1239 = vst [vmem:[%s2636_s12 + $0x1f8] sm:$0xff] %v1111_v27  ;;  %1303 = vst [vmem:[%s2636_s12 + $0x3f8] sm:$0xff] %v1175_v28 }
 0x182   : > { %1238 = vst [vmem:[%s2636_s12 + $0x1f0] sm:$0xff] %v1110_v29  ;;  %1302 = vst [vmem:[%s2636_s12 + $0x3f0] sm:$0xff] %v1174_v30 }
 0x183   : > { %s3110_s21 = smov (!%p1313_p8, %s1312_s21), 128 }
 0x184   : > { %s1781_s28 = sshll.u32 %s3110_s21, 7 }
 0x185   : > { %p1784_p9 = scmp.eq.s32.totalorder %s1781_s28, 0 }
 0x186   : > { %s2903_s29 = sshrl.u32 (!%p1784_p9), %s3110_s21, 6 }
 0x187   : > { %1321 = sbr.rel (%p1784_p9) target bundleno = 459 (0x1cb), region = 40  ;;  %p1785_p10 = scmp.le.s32.totalorder (!%p1784_p9), %s2903_s29, 0 }
 0x18e   : > { %1727 = sbr.rel (%p1785_p10) target bundleno = 438 (0x1b6), region = 116  ;;  %s3101_s15 = smov (!%p1785_p10), %s2897_s26 }
 0x18f   : > { %s3102_s20 = smov (!%p1785_p10), %s2636_s12  ;;  %s2912_s27 = smov (!%p1785_p10), 0  }
 0x190   : > { %s2914_s30 = smov (!%p1785_p10), 0  }
 0x195 LB: >> { %v1509_v24 = vld [vmem:[%s2365_s20] sm:$0xff]  ;;  %v1511_v31 = vld [vmem:[%s2365_s20 + $0x8] sm:$0xff]  ;;  %v1513_v32 = vld [vmem:[%s2365_s20 + $0x10] sm:$0xff]  ;;  %s1637_s4 = sadd.s32 1, %s2369_s27  ;;  %s1503_s30 = sadd.s32 1, %s2373_s30   ;;  %s2373_s30 = sphi %s2914_s30, %s1503_s30   ;;  %s2369_s27 = sphi %s2912_s27, %s3105_s27   ;;  %s2365_s20 = sphi %s3102_s20, %s3104_s20   ;;  %s2361_s15 = sphi %s3101_s15, %s3103_s15  }
 0x196   : >> { %1510 = vst [vmem:[%s2361_s15] sm:$0xff] %v1509_v24  ;;  %1512 = vst [vmem:[%s2361_s15 + $0x8] sm:$0xff] %v1511_v31  ;;  %v1515_v33 = vld [vmem:[%s2365_s20 + $0x18] sm:$0xff]  ;;  %v1517_v34 = vld [vmem:[%s2365_s20 + $0x20] sm:$0xff]  ;;  %p1638_p11 = scmp.ge.s32.totalorder %s1637_s4, %s2903_s29  ;;  %p1502_p12 = scmp.ge.s32.totalorder %s1503_s30, %s2903_s29 }
 0x197   : >> { %1514 = vst [vmem:[%s2361_s15 + $0x10] sm:$0xff] %v1513_v32  ;;  %v1519_v35 = vld [vmem:[%s2365_s20 + $0x28] sm:$0xff]  ;;  %1516 = vst [vmem:[%s2361_s15 + $0x18] sm:$0xff] %v1515_v33  ;;  %v1521_v36 = vld [vmem:[%s2365_s20 + $0x30] sm:$0xff] }
 0x198   : >> { %1518 = vst [vmem:[%s2361_s15 + $0x20] sm:$0xff] %v1517_v34  ;;  %1520 = vst [vmem:[%s2361_s15 + $0x28] sm:$0xff] %v1519_v35  ;;  %v1523_v37 = vld [vmem:[%s2365_s20 + $0x38] sm:$0xff]  ;;  %v1525_v38 = vld [vmem:[%s2365_s20 + $0x40] sm:$0xff]  ;;  %s3112_s4 = smov (%p1638_p11, %s1637_s4), 0 }
 0x199   : >> { %1522 = vst [vmem:[%s2361_s15 + $0x30] sm:$0xff] %v1521_v36  ;;  %1524 = vst [vmem:[%s2361_s15 + $0x38] sm:$0xff] %v1523_v37  ;;  %v1527_v39 = vld [vmem:[%s2365_s20 + $0x48] sm:$0xff]  ;;  %v1529_v40 = vld [vmem:[%s2365_s20 + $0x50] sm:$0xff]  ;;  %s1786_s5 = sshll.u32 %s3112_s4, 9  ;;  %s3105_s27 = smov %s3112_s4 }
 0x19a   : >> { %1526 = vst [vmem:[%s2361_s15 + $0x40] sm:$0xff] %v1525_v38  ;;  %v1531_v41 = vld [vmem:[%s2365_s20 + $0x58] sm:$0xff]  ;;  %1528 = vst [vmem:[%s2361_s15 + $0x48] sm:$0xff] %v1527_v39  ;;  %v1533_v42 = vld [vmem:[%s2365_s20 + $0x60] sm:$0xff]  ;;  %s2970_s6 = scalar_lea.vmem %s2636_s12, %s1786_s5 [#allocation2]   ;;  %s2973_s7 = scalar_lea.vmem %s2897_s26, %s1786_s5  }
 0x19b   : >> { %1530 = vst [vmem:[%s2361_s15 + $0x50] sm:$0xff] %v1529_v40  ;;  %1532 = vst [vmem:[%s2361_s15 + $0x58] sm:$0xff] %v1531_v41  ;;  %v1535_v43 = vld [vmem:[%s2365_s20 + $0x68] sm:$0xff]  ;;  %v1537_v44 = vld [vmem:[%s2365_s20 + $0x70] sm:$0xff] }
 0x19c   : >> { %1534 = vst [vmem:[%s2361_s15 + $0x60] sm:$0xff] %v1533_v42  ;;  %1536 = vst [vmem:[%s2361_s15 + $0x68] sm:$0xff] %v1535_v43  ;;  %v1539_v45 = vld [vmem:[%s2365_s20 + $0x78] sm:$0xff]  ;;  %v1541_v46 = vld [vmem:[%s2365_s20 + $0x80] sm:$0xff] }
 0x19d   : >> { %1538 = vst [vmem:[%s2361_s15 + $0x70] sm:$0xff] %v1537_v44  ;;  %v1543_v47 = vld [vmem:[%s2365_s20 + $0x88] sm:$0xff]  ;;  %1540 = vst [vmem:[%s2361_s15 + $0x78] sm:$0xff] %v1539_v45  ;;  %v1545_v48 = vld [vmem:[%s2365_s20 + $0x90] sm:$0xff] }
 0x19e   : >> { %1542 = vst [vmem:[%s2361_s15 + $0x80] sm:$0xff] %v1541_v46  ;;  %1544 = vst [vmem:[%s2361_s15 + $0x88] sm:$0xff] %v1543_v47  ;;  %v1547_v49 = vld [vmem:[%s2365_s20 + $0x98] sm:$0xff]  ;;  %v1549_v50 = vld [vmem:[%s2365_s20 + $0xa0] sm:$0xff] }
 0x19f   : >> { %1546 = vst [vmem:[%s2361_s15 + $0x90] sm:$0xff] %v1545_v48  ;;  %1548 = vst [vmem:[%s2361_s15 + $0x98] sm:$0xff] %v1547_v49  ;;  %v1551_v51 = vld [vmem:[%s2365_s20 + $0xa8] sm:$0xff]  ;;  %v1553_v52 = vld [vmem:[%s2365_s20 + $0xb0] sm:$0xff] }
 0x1a0   : >> { %1550 = vst [vmem:[%s2361_s15 + $0xa0] sm:$0xff] %v1549_v50  ;;  %v1555_v53 = vld [vmem:[%s2365_s20 + $0xb8] sm:$0xff]  ;;  %1552 = vst [vmem:[%s2361_s15 + $0xa8] sm:$0xff] %v1551_v51  ;;  %v1557_v54 = vld [vmem:[%s2365_s20 + $0xc0] sm:$0xff] }
 0x1a1   : >> { %1554 = vst [vmem:[%s2361_s15 + $0xb0] sm:$0xff] %v1553_v52  ;;  %1556 = vst [vmem:[%s2361_s15 + $0xb8] sm:$0xff] %v1555_v53  ;;  %v1559_v55 = vld [vmem:[%s2365_s20 + $0xc8] sm:$0xff]  ;;  %v1561_v56 = vld [vmem:[%s2365_s20 + $0xd0] sm:$0xff] }
 0x1a2   : >> { %1558 = vst [vmem:[%s2361_s15 + $0xc0] sm:$0xff] %v1557_v54  ;;  %1560 = vst [vmem:[%s2361_s15 + $0xc8] sm:$0xff] %v1559_v55  ;;  %v1563_v57 = vld [vmem:[%s2365_s20 + $0xd8] sm:$0xff]  ;;  %v1565_v58 = vld [vmem:[%s2365_s20 + $0xe0] sm:$0xff] }
 0x1a3   : >> { %1562 = vst [vmem:[%s2361_s15 + $0xd0] sm:$0xff] %v1561_v56  ;;  %v1567_v59 = vld [vmem:[%s2365_s20 + $0xe8] sm:$0xff]  ;;  %1564 = vst [vmem:[%s2361_s15 + $0xd8] sm:$0xff] %v1563_v57  ;;  %v1569_v60 = vld [vmem:[%s2365_s20 + $0xf0] sm:$0xff] }
 0x1a4   : >> { %1566 = vst [vmem:[%s2361_s15 + $0xe0] sm:$0xff] %v1565_v58  ;;  %1568 = vst [vmem:[%s2361_s15 + $0xe8] sm:$0xff] %v1567_v59  ;;  %v1571_v61 = vld [vmem:[%s2365_s20 + $0xf8] sm:$0xff]  ;;  %v1573_v62 = vld [vmem:[%s2365_s20 + $0x100] sm:$0xff] }
 0x1a5   : >> { %1570 = vst [vmem:[%s2361_s15 + $0xf0] sm:$0xff] %v1569_v60  ;;  %1572 = vst [vmem:[%s2361_s15 + $0xf8] sm:$0xff] %v1571_v61  ;;  %v1575_v63 = vld [vmem:[%s2365_s20 + $0x108] sm:$0xff]  ;;  %v1577_v0 = vld [vmem:[%s2365_s20 + $0x110] sm:$0xff] }
 0x1a6   : >> { %1574 = vst [vmem:[%s2361_s15 + $0x100] sm:$0xff] %v1573_v62  ;;  %v1579_v1 = vld [vmem:[%s2365_s20 + $0x118] sm:$0xff]  ;;  %1576 = vst [vmem:[%s2361_s15 + $0x108] sm:$0xff] %v1575_v63  ;;  %v1581_v2 = vld [vmem:[%s2365_s20 + $0x120] sm:$0xff] }
 0x1a7   : >> { %1578 = vst [vmem:[%s2361_s15 + $0x110] sm:$0xff] %v1577_v0  ;;  %1580 = vst [vmem:[%s2361_s15 + $0x118] sm:$0xff] %v1579_v1  ;;  %v1583_v3 = vld [vmem:[%s2365_s20 + $0x128] sm:$0xff]  ;;  %v1585_v4 = vld [vmem:[%s2365_s20 + $0x130] sm:$0xff] }
 0x1a8   : >> { %1582 = vst [vmem:[%s2361_s15 + $0x120] sm:$0xff] %v1581_v2  ;;  %1584 = vst [vmem:[%s2361_s15 + $0x128] sm:$0xff] %v1583_v3  ;;  %v1587_v5 = vld [vmem:[%s2365_s20 + $0x138] sm:$0xff]  ;;  %v1589_v6 = vld [vmem:[%s2365_s20 + $0x140] sm:$0xff] }
 0x1a9   : >> { %1586 = vst [vmem:[%s2361_s15 + $0x130] sm:$0xff] %v1585_v4  ;;  %v1591_v7 = vld [vmem:[%s2365_s20 + $0x148] sm:$0xff]  ;;  %1588 = vst [vmem:[%s2361_s15 + $0x138] sm:$0xff] %v1587_v5  ;;  %v1593_v8 = vld [vmem:[%s2365_s20 + $0x150] sm:$0xff] }
 0x1aa   : >> { %1590 = vst [vmem:[%s2361_s15 + $0x140] sm:$0xff] %v1589_v6  ;;  %1592 = vst [vmem:[%s2361_s15 + $0x148] sm:$0xff] %v1591_v7  ;;  %v1595_v9 = vld [vmem:[%s2365_s20 + $0x158] sm:$0xff]  ;;  %v1597_v10 = vld [vmem:[%s2365_s20 + $0x160] sm:$0xff] }
 0x1ab   : >> { %1594 = vst [vmem:[%s2361_s15 + $0x150] sm:$0xff] %v1593_v8  ;;  %1596 = vst [vmem:[%s2361_s15 + $0x158] sm:$0xff] %v1595_v9  ;;  %v1599_v11 = vld [vmem:[%s2365_s20 + $0x168] sm:$0xff]  ;;  %v1601_v12 = vld [vmem:[%s2365_s20 + $0x170] sm:$0xff] }
 0x1ac   : >> { %1598 = vst [vmem:[%s2361_s15 + $0x160] sm:$0xff] %v1597_v10  ;;  %v1603_v13 = vld [vmem:[%s2365_s20 + $0x178] sm:$0xff]  ;;  %1600 = vst [vmem:[%s2361_s15 + $0x168] sm:$0xff] %v1599_v11  ;;  %v1605_v14 = vld [vmem:[%s2365_s20 + $0x180] sm:$0xff] }
 0x1ad   : >> { %1602 = vst [vmem:[%s2361_s15 + $0x170] sm:$0xff] %v1601_v12  ;;  %1604 = vst [vmem:[%s2361_s15 + $0x178] sm:$0xff] %v1603_v13  ;;  %v1607_v15 = vld [vmem:[%s2365_s20 + $0x188] sm:$0xff]  ;;  %v1609_v16 = vld [vmem:[%s2365_s20 + $0x190] sm:$0xff] }
 0x1ae   : >> { %1606 = vst [vmem:[%s2361_s15 + $0x180] sm:$0xff] %v1605_v14  ;;  %1608 = vst [vmem:[%s2361_s15 + $0x188] sm:$0xff] %v1607_v15  ;;  %v1611_v17 = vld [vmem:[%s2365_s20 + $0x198] sm:$0xff]  ;;  %v1613_v18 = vld [vmem:[%s2365_s20 + $0x1a0] sm:$0xff] }
 0x1af   : >> { %1610 = vst [vmem:[%s2361_s15 + $0x190] sm:$0xff] %v1609_v16  ;;  %v1615_v19 = vld [vmem:[%s2365_s20 + $0x1a8] sm:$0xff]  ;;  %1612 = vst [vmem:[%s2361_s15 + $0x198] sm:$0xff] %v1611_v17  ;;  %v1617_v20 = vld [vmem:[%s2365_s20 + $0x1b0] sm:$0xff]  ;;  %1505 = sbr.rel (!%p1502_p12) target bundleno = 405 (0x195), region = 122 }
 0x1b0   : >> { %1614 = vst [vmem:[%s2361_s15 + $0x1a0] sm:$0xff] %v1613_v18  ;;  %1616 = vst [vmem:[%s2361_s15 + $0x1a8] sm:$0xff] %v1615_v19  ;;  %v1619_v21 = vld [vmem:[%s2365_s20 + $0x1b8] sm:$0xff]  ;;  %v1621_v22 = vld [vmem:[%s2365_s20 + $0x1c0] sm:$0xff] }
 0x1b1   : >> { %1618 = vst [vmem:[%s2361_s15 + $0x1b0] sm:$0xff] %v1617_v20  ;;  %1620 = vst [vmem:[%s2361_s15 + $0x1b8] sm:$0xff] %v1619_v21  ;;  %v1623_v23 = vld [vmem:[%s2365_s20 + $0x1c8] sm:$0xff]  ;;  %v1625_v25 = vld [vmem:[%s2365_s20 + $0x1d0] sm:$0xff] }
 0x1b2   : >> { %1622 = vst [vmem:[%s2361_s15 + $0x1c0] sm:$0xff] %v1621_v22  ;;  %v1627_v26 = vld [vmem:[%s2365_s20 + $0x1d8] sm:$0xff]  ;;  %1624 = vst [vmem:[%s2361_s15 + $0x1c8] sm:$0xff] %v1623_v23  ;;  %v1629_v27 = vld [vmem:[%s2365_s20 + $0x1e0] sm:$0xff] }
 0x1b3   : >> { %1626 = vst [vmem:[%s2361_s15 + $0x1d0] sm:$0xff] %v1625_v25  ;;  %1628 = vst [vmem:[%s2361_s15 + $0x1d8] sm:$0xff] %v1627_v26  ;;  %v1631_v28 = vld [vmem:[%s2365_s20 + $0x1e8] sm:$0xff]  ;;  %v1633_v29 = vld [vmem:[%s2365_s20 + $0x1f0] sm:$0xff] }
 0x1b4   : >> { %1630 = vst [vmem:[%s2361_s15 + $0x1e0] sm:$0xff] %v1629_v27  ;;  %1632 = vst [vmem:[%s2361_s15 + $0x1e8] sm:$0xff] %v1631_v28  ;;  %v1635_v30 = vld [vmem:[%s2365_s20 + $0x1f8] sm:$0xff]  ;;  %s3104_s20 = smov %s2970_s6 }
 0x1b5   : >> { %1634 = vst [vmem:[%s2361_s15 + $0x1f0] sm:$0xff] %v1633_v29  ;;  %1636 = vst [vmem:[%s2361_s15 + $0x1f8] sm:$0xff] %v1635_v30  ;;  %s3103_s15 = smov %s2973_s7 }
 0x1b6 PF: > { %s3078_s8 = sand.u32 63, %s3110_s21   ;;  %s1797_s9 = sshll.u32 %s2903_s29, 9 }
 0x1b7   : > { %s1648_s10 = scalar_lea.vmem %s2636_s12, %s1797_s9 [#allocation2]   ;;  %s1650_s11 = scalar_lea.vmem %s2897_s26, %s1797_s9  }
 0x1b8   : > { %p1791_p13 = scmp.le.s32.totalorder %s3078_s8, 0 }
 0x1b9   : > { %s2375_s14 = smov (!%p1791_p13), %s1650_s11   ;;  %s2379_s17 = smov (!%p1791_p13), %s1648_s10  }
 0x1ba   : > { %1741 = sbr.rel (%p1791_p13) target bundleno = 459 (0x1cb), region = 127  ;;  %s2383_s18 = smov (!%p1791_p13), 0  }
 0x1bb   : > { %s2387_s22 = smov (!%p1791_p13), 0  }
 0x1c1 LB: >> { %v1660_v24 = vld [vmem:[%s2381_s17] sm:$0xff]  ;;  %s1662_s21 = sadd.s32 1, %s2385_s18  ;;  %s1654_s22 = sadd.s32 1, %s2389_s22   ;;  %s2389_s22 = sphi %s2387_s22, %s1654_s22   ;;  %s2385_s18 = sphi %s2383_s18, %s2384_s18   ;;  %s2381_s17 = sphi %s2379_s17, %s1667_s17   ;;  %s2377_s14 = sphi %s2375_s14, %s1668_s14  }
 0x1c2   : >> { %1661 = vst [vmem:[%s2377_s14] sm:$0xff] %v1660_v24  ;;  %p1663_p0 = scmp.ge.s32.totalorder %s1662_s21, %s3078_s8  ;;  %p1653_p1 = scmp.ge.s32.totalorder %s1654_s22, %s3078_s8 }
 0x1c4   : >> { %s3114_s21 = smov (%p1663_p0, %s1662_s21), 0  ;;  %1656 = sbr.rel (!%p1653_p1) target bundleno = 449 (0x1c1), region = 133 }
 0x1c5   : >> { %s1792_s12 = sshll.u32 %s3114_s21, 3  ;;  %s2384_s18 = smov %s3114_s21  }
 0x1c6   : >> { %s1667_s17 = scalar_lea.vmem %s1648_s10, %s1792_s12 [#allocation2]   ;;  %s1668_s14 = scalar_lea.vmem %s1650_s11, %s1792_s12  }
 0x1cb PF: > { %p10_p2 = scmp.ge.s32.totalorder %s2426_s16, 4   ;;  %s3106_s12 = smov %s2353_s13 }
 0x1cc   : > { %s3107_s13 = smov %s2434_s19  ;;  %s3108_s14 = smov %s2426_s16 }
 0x1cd   :  { %12 = sbr.rel (!%p10_p2) target bundleno = 2 (0x2), region = 144 }

// kernel: forward.5
= control target key start
LH: loop header
LB: loop body
LE: loop exit
PB: predicated region body
PF: predicated region fallthrough
CT: control target
= control target key end

     0   :  { %v4715_v0 = vmov 0.0|0.0   ;;  %s8185_s1 = inlined_call_operand.vmem [shape: f32[2048,128], index: 1, kind: input, shape index: {}]   ;;  %s8186_s0 = inlined_call_operand.vmem [shape: f32[392,2048], index: 0, kind: input, shape index: {}]   ;;  %s8187_s2 = inlined_call_operand.vmem [shape: f32[1,128], index: 2, kind: input, shape index: {}]   ;;  %s8188_s3 = inlined_call_operand.vmem [shape: f32[392,128], index: 3, kind: output, shape index: {}]  }
   0x1   :  { %3644 = vmatprep.subr.bf16.mxu1 %v4715_v0  ;;  %3836 = vmatprep.subr.bf16.mxu0 %v4715_v0  ;;  %v798_v1 = vld [vmem:[%s8185_s1] sm:$0xff]  ;;  %v799_v2 = vld [vmem:[%s8185_s1 + $0x8] sm:$0xff]  ;;  %v800_v6 = vld [vmem:[%s8185_s1 + $0x10] sm:$0xff] }
   0x2   :  { %v926_v3 = vld [vmem:[%s8185_s1 + $0x400] sm:$0xff]  ;;  %v3645_v4 = vpack.c.bf16 %v799_v2, %v798_v1  ;;  %v927_v5 = vld [vmem:[%s8185_s1 + $0x408] sm:$0xff]  ;;  %v801_v7 = vld [vmem:[%s8185_s1 + $0x18] sm:$0xff] }
   0x3   :  { %v3837_v8 = vpack.c.bf16 %v927_v5, %v926_v3  ;;  %v928_v9 = vld [vmem:[%s8185_s1 + $0x410] sm:$0xff]  ;;  %v929_v10 = vld [vmem:[%s8185_s1 + $0x418] sm:$0xff]  ;;  %v3648_v11 = vpack.c.bf16 %v801_v7, %v800_v6  ;;  %v802_v13 = vld [vmem:[%s8185_s1 + $0x20] sm:$0xff] }
   0x4   :  { %3646 = vmatpush1.bf16.msra.mxu1 %v3645_v4  ;;  %v3840_v12 = vpack.c.bf16 %v929_v10, %v928_v9  ;;  %v803_v14 = vld [vmem:[%s8185_s1 + $0x28] sm:$0xff]  ;;  %v930_v15 = vld [vmem:[%s8185_s1 + $0x420] sm:$0xff]  ;;  %v804_v19 = vld [vmem:[%s8185_s1 + $0x30] sm:$0xff] }
   0x5   :  { %3838 = vmatpush1.bf16.msra.mxu0 %v3837_v8  ;;  %3647 = vmatprep.subr.bf16.mxu1 %v4715_v0  ;;  %v931_v16 = vld [vmem:[%s8185_s1 + $0x428] sm:$0xff]  ;;  %v3651_v17 = vpack.c.bf16 %v803_v14, %v802_v13  ;;  %v805_v20 = vld [vmem:[%s8185_s1 + $0x38] sm:$0xff]  ;;  %v932_v21 = vld [vmem:[%s8185_s1 + $0x430] sm:$0xff] }
   0x6   :  { %3839 = vmatprep.subr.bf16.mxu0 %v4715_v0  ;;  %v3843_v18 = vpack.c.bf16 %v931_v16, %v930_v15  ;;  %v933_v22 = vld [vmem:[%s8185_s1 + $0x438] sm:$0xff]  ;;  %v3654_v23 = vpack.c.bf16 %v805_v20, %v804_v19  ;;  %v806_v25 = vld [vmem:[%s8185_s1 + $0x40] sm:$0xff]  ;;  %v807_v26 = vld [vmem:[%s8185_s1 + $0x48] sm:$0xff] }
   0x7   :  { %v3846_v24 = vpack.c.bf16 %v933_v22, %v932_v21  ;;  %v934_v27 = vld [vmem:[%s8185_s1 + $0x440] sm:$0xff]  ;;  %v935_v28 = vld [vmem:[%s8185_s1 + $0x448] sm:$0xff]  ;;  %v3657_v29 = vpack.c.bf16 %v807_v26, %v806_v25  ;;  %v808_v31 = vld [vmem:[%s8185_s1 + $0x50] sm:$0xff] }
   0x8   :  { %3649 = vmatpush1.bf16.msra.mxu1 %v3648_v11  ;;  %v3849_v30 = vpack.c.bf16 %v935_v28, %v934_v27  ;;  %v809_v32 = vld [vmem:[%s8185_s1 + $0x58] sm:$0xff]  ;;  %v936_v33 = vld [vmem:[%s8185_s1 + $0x450] sm:$0xff]  ;;  %v810_v37 = vld [vmem:[%s8185_s1 + $0x60] sm:$0xff] }
   0x9   :  { %3841 = vmatpush1.bf16.msra.mxu0 %v3840_v12  ;;  %3650 = vmatprep.subr.bf16.mxu1 %v4715_v0  ;;  %v937_v34 = vld [vmem:[%s8185_s1 + $0x458] sm:$0xff]  ;;  %v3660_v35 = vpack.c.bf16 %v809_v32, %v808_v31  ;;  %v811_v38 = vld [vmem:[%s8185_s1 + $0x68] sm:$0xff]  ;;  %v938_v39 = vld [vmem:[%s8185_s1 + $0x460] sm:$0xff] }
   0xa   :  { %3842 = vmatprep.subr.bf16.mxu0 %v4715_v0  ;;  %v3852_v36 = vpack.c.bf16 %v937_v34, %v936_v33  ;;  %v939_v40 = vld [vmem:[%s8185_s1 + $0x468] sm:$0xff]  ;;  %v3663_v43 = vpack.c.bf16 %v811_v38, %v810_v37  ;;  %v812_v45 = vld [vmem:[%s8185_s1 + $0x70] sm:$0xff]  ;;  %v813_v46 = vld [vmem:[%s8185_s1 + $0x78] sm:$0xff] }
   0xb   :  { %v15_v41 = vld [vmem:[%s8186_s0 + $0x8] sm:$0xff]  ;;  %v3855_v44 = vpack.c.bf16 %v939_v40, %v938_v39  ;;  %v940_v47 = vld [vmem:[%s8185_s1 + $0x470] sm:$0xff]  ;;  %v941_v48 = vld [vmem:[%s8185_s1 + $0x478] sm:$0xff]  ;;  %v3666_v49 = vpack.c.bf16 %v813_v46, %v812_v45 }
   0xc   :  { %3652 = vmatpush1.bf16.msra.mxu1 %v3651_v17  ;;  %v23_v42 = vld [vmem:[%s8186_s0 + $0x48] sm:$0xff]  ;;  %1125 = vmatprep.mubr.f32.mxu1 %v15_v41  ;;  %v3858_v50 = vpack.c.bf16 %v941_v48, %v940_v47  ;;  %v814_v51 = vld [vmem:[%s8185_s1 + $0x80] sm:$0xff]  ;;  %v816_v57 = vld [vmem:[%s8185_s1 + $0x90] sm:$0xff] }
   0xd   :  { %3844 = vmatpush1.bf16.msra.mxu0 %v3843_v18  ;;  %3653 = vmatprep.subr.bf16.mxu1 %v4715_v0  ;;  %v815_v52 = vld [vmem:[%s8185_s1 + $0x88] sm:$0xff]  ;;  %v942_v53 = vld [vmem:[%s8185_s1 + $0x480] sm:$0xff]  ;;  %v817_v58 = vld [vmem:[%s8185_s1 + $0x98] sm:$0xff] }
   0xe   :  { %3845 = vmatprep.subr.bf16.mxu0 %v4715_v0  ;;  %2365 = vmatprep.mubr.f32.mxu0 %v23_v42  ;;  %v943_v54 = vld [vmem:[%s8185_s1 + $0x488] sm:$0xff]  ;;  %v3669_v55 = vpack.c.bf16 %v815_v52, %v814_v51  ;;  %v944_v59 = vld [vmem:[%s8185_s1 + $0x490] sm:$0xff]  ;;  %v945_v60 = vld [vmem:[%s8185_s1 + $0x498] sm:$0xff]  ;;  %v3672_v61 = vpack.c.bf16 %v817_v58, %v816_v57 }
   0xf   :  { %v3861_v56 = vpack.c.bf16 %v943_v54, %v942_v53  ;;  %v3864_v62 = vpack.c.bf16 %v945_v60, %v944_v59  ;;  %v818_v63 = vld [vmem:[%s8185_s1 + $0xa0] sm:$0xff]  ;;  %v819_v1 = vld [vmem:[%s8185_s1 + $0xa8] sm:$0xff]  ;;  %v820_v6 = vld [vmem:[%s8185_s1 + $0xb0] sm:$0xff] }
  0x10   :  { %3655 = vmatpush1.bf16.msra.mxu1 %v3654_v23  ;;  %v946_v2 = vld [vmem:[%s8185_s1 + $0x4a0] sm:$0xff]  ;;  %v947_v3 = vld [vmem:[%s8185_s1 + $0x4a8] sm:$0xff]  ;;  %v3675_v4 = vpack.c.bf16 %v819_v1, %v818_v63  ;;  %v821_v7 = vld [vmem:[%s8185_s1 + $0xb8] sm:$0xff] }
  0x11   :  { %3847 = vmatpush1.bf16.msra.mxu0 %v3846_v24  ;;  %3656 = vmatprep.subr.bf16.mxu1 %v4715_v0  ;;  %v3867_v5 = vpack.c.bf16 %v947_v3, %v946_v2  ;;  %v948_v8 = vld [vmem:[%s8185_s1 + $0x4b0] sm:$0xff]  ;;  %v949_v9 = vld [vmem:[%s8185_s1 + $0x4b8] sm:$0xff]  ;;  %v3678_v10 = vpack.c.bf16 %v821_v7, %v820_v6  ;;  %v822_v12 = vld [vmem:[%s8185_s1 + $0xc0] sm:$0xff] }
  0x12   :  { %3848 = vmatprep.subr.bf16.mxu0 %v4715_v0  ;;  %v3870_v11 = vpack.c.bf16 %v949_v9, %v948_v8  ;;  %v823_v13 = vld [vmem:[%s8185_s1 + $0xc8] sm:$0xff]  ;;  %v950_v14 = vld [vmem:[%s8185_s1 + $0x4c0] sm:$0xff]  ;;  %v824_v18 = vld [vmem:[%s8185_s1 + $0xd0] sm:$0xff] }
  0x13   :  { %v951_v15 = vld [vmem:[%s8185_s1 + $0x4c8] sm:$0xff]  ;;  %v3681_v16 = vpack.c.bf16 %v823_v13, %v822_v12  ;;  %v825_v19 = vld [vmem:[%s8185_s1 + $0xd8] sm:$0xff]  ;;  %v952_v20 = vld [vmem:[%s8185_s1 + $0x4d0] sm:$0xff] }
  0x14   :  { %3658 = vmatpush1.bf16.msra.mxu1 %v3657_v29  ;;  %v3873_v17 = vpack.c.bf16 %v951_v15, %v950_v14  ;;  %v953_v21 = vld [vmem:[%s8185_s1 + $0x4d8] sm:$0xff]  ;;  %v3684_v22 = vpack.c.bf16 %v825_v19, %v824_v18  ;;  %v826_v24 = vld [vmem:[%s8185_s1 + $0xe0] sm:$0xff]  ;;  %v827_v25 = vld [vmem:[%s8185_s1 + $0xe8] sm:$0xff] }
  0x15   :  { %3850 = vmatpush1.bf16.msra.mxu0 %v3849_v30  ;;  %3659 = vmatprep.subr.bf16.mxu1 %v4715_v0  ;;  %v3876_v23 = vpack.c.bf16 %v953_v21, %v952_v20  ;;  %v954_v26 = vld [vmem:[%s8185_s1 + $0x4e0] sm:$0xff]  ;;  %v955_v27 = vld [vmem:[%s8185_s1 + $0x4e8] sm:$0xff]  ;;  %v3687_v28 = vpack.c.bf16 %v827_v25, %v826_v24  ;;  %v828_v30 = vld [vmem:[%s8185_s1 + $0xf0] sm:$0xff] }
  0x16   :  { %3851 = vmatprep.subr.bf16.mxu0 %v4715_v0  ;;  %v3879_v29 = vpack.c.bf16 %v955_v27, %v954_v26  ;;  %v829_v31 = vld [vmem:[%s8185_s1 + $0xf8] sm:$0xff]  ;;  %v956_v32 = vld [vmem:[%s8185_s1 + $0x4f0] sm:$0xff]  ;;  %v831_v37 = vld [vmem:[%s8185_s1 + $0x108] sm:$0xff] }
  0x17   :  { %v957_v33 = vld [vmem:[%s8185_s1 + $0x4f8] sm:$0xff]  ;;  %v3690_v34 = vpack.c.bf16 %v829_v31, %v828_v30  ;;  %v958_v38 = vld [vmem:[%s8185_s1 + $0x500] sm:$0xff]  ;;  %v959_v39 = vld [vmem:[%s8185_s1 + $0x508] sm:$0xff] }
  0x18   :  { %3661 = vmatpush1.bf16.msra.mxu1 %v3660_v35  ;;  %v3882_v35 = vpack.c.bf16 %v957_v33, %v956_v32  ;;  %v14_v40 = vld [vmem:[%s8186_s0] sm:$0xff]  ;;  %v3885_v45 = vpack.c.bf16 %v959_v39, %v958_v38  ;;  %v832_v46 = vld [vmem:[%s8185_s1 + $0x110] sm:$0xff]  ;;  %v833_v47 = vld [vmem:[%s8185_s1 + $0x118] sm:$0xff] }
  0x19   :  { %3853 = vmatpush1.bf16.msra.mxu0 %v3852_v36  ;;  %3662 = vmatprep.subr.bf16.mxu1 %v4715_v0  ;;  %v830_v36 = vld [vmem:[%s8185_s1 + $0x100] sm:$0xff]  ;;  %v960_v48 = vld [vmem:[%s8185_s1 + $0x510] sm:$0xff]  ;;  %v47_v52 = vld [vmem:[%s8186_s0 + $0x108] sm:$0xff]  ;;  %v3696_v53 = vpack.c.bf16 %v833_v47, %v832_v46 }
  0x1a   :  { %3854 = vmatprep.subr.bf16.mxu0 %v4715_v0  ;;  %v3693_v41 = vpack.c.bf16 %v831_v37, %v830_v36  ;;  %v22_v42 = vld [vmem:[%s8186_s0 + $0x40] sm:$0xff]  ;;  %v55_v54 = vld [vmem:[%s8186_s0 + $0x148] sm:$0xff]  ;;  %v836_v3 = vld [vmem:[%s8185_s1 + $0x130] sm:$0xff] }
  0x1b   :  { %v38_v51 = vld [vmem:[%s8186_s0 + $0xc0] sm:$0xff]  ;;  %v835_v57 = vld [vmem:[%s8185_s1 + $0x128] sm:$0xff]  ;;  %v965_v6 = vld [vmem:[%s8185_s1 + $0x538] sm:$0xff] }
  0x1c   :  { %3664 = vmatpush1.bf16.msra.mxu1 %v3663_v43  ;;  %v31_v43 = vld [vmem:[%s8186_s0 + $0x88] sm:$0xff]  ;;  %v962_v58 = vld [vmem:[%s8185_s1 + $0x520] sm:$0xff]  ;;  %v841_v24 = vld [vmem:[%s8185_s1 + $0x158] sm:$0xff] }
  0x1d   :  { %3856 = vmatpush1.bf16.msra.mxu0 %v3855_v44  ;;  %3665 = vmatprep.subr.bf16.mxu1 %v4715_v0  ;;  %v39_v44 = vld [vmem:[%s8186_s0 + $0xc8] sm:$0xff]  ;;  %v46_v60 = vld [vmem:[%s8186_s0 + $0x100] sm:$0xff]  ;;  %v968_v25 = vld [vmem:[%s8185_s1 + $0x550] sm:$0xff] }
  0x1e   :  { %3857 = vmatprep.subr.bf16.mxu0 %v4715_v0  ;;  %v963_v59 = vld [vmem:[%s8185_s1 + $0x528] sm:$0xff]  ;;  %v62_v7 = vld [vmem:[%s8186_s0 + $0x180] sm:$0xff]  ;;  %v969_v26 = vld [vmem:[%s8185_s1 + $0x558] sm:$0xff] }
  0x1f   :  { %v71_v1 = vld [vmem:[%s8186_s0 + $0x1c8] sm:$0xff]  ;;  %v3891_v2 = vpack.c.bf16 %v963_v59, %v962_v58  ;;  %v70_v8 = vld [vmem:[%s8186_s0 + $0x1c0] sm:$0xff]  ;;  %v3900_v32 = vpack.c.bf16 %v969_v26, %v968_v25  ;;  %v973_v46 = vld [vmem:[%s8185_s1 + $0x578] sm:$0xff] }
  0x20   :  { %3667 = vmatpush1.bf16.msra.mxu1 %v3666_v49  ;;  %v961_v49 = vld [vmem:[%s8185_s1 + $0x518] sm:$0xff]  ;;  %v79_v9 = vld [vmem:[%s8186_s0 + $0x208] sm:$0xff]  ;;  %v838_v13 = vld [vmem:[%s8185_s1 + $0x140] sm:$0xff] }
  0x21   :  { %3859 = vmatpush1.bf16.msra.mxu0 %v3858_v50  ;;  %3668 = vmatprep.subr.bf16.mxu1 %v4715_v0  ;;  %v30_v50 = vld [vmem:[%s8186_s0 + $0x80] sm:$0xff]  ;;  %v839_v14 = vld [vmem:[%s8185_s1 + $0x148] sm:$0xff] }
  0x22   :  { %3860 = vmatprep.subr.bf16.mxu0 %v4715_v0  ;;  %v966_v15 = vld [vmem:[%s8185_s1 + $0x540] sm:$0xff]  ;;  %v95_v19 = vld [vmem:[%s8186_s0 + $0x288] sm:$0xff]  ;;  %v3705_v20 = vpack.c.bf16 %v839_v14, %v838_v13 }
  0x23   :  { %v86_v18 = vld [vmem:[%s8186_s0 + $0x240] sm:$0xff]  ;;  %v103_v21 = vld [vmem:[%s8186_s0 + $0x2c8] sm:$0xff] }
  0x24   :  { %3670 = vmatpush1.bf16.msra.mxu1 %v3669_v55  ;;  %v3888_v55 = vpack.c.bf16 %v961_v49, %v960_v48  ;;  %v94_v27 = vld [vmem:[%s8186_s0 + $0x280] sm:$0xff]  ;;  %v119_v31 = vld [vmem:[%s8186_s0 + $0x348] sm:$0xff] }
  0x25   :  { %3862 = vmatpush1.bf16.msra.mxu0 %v3861_v56  ;;  %3671 = vmatprep.subr.bf16.mxu1 %v4715_v0  ;;  %v834_v56 = vld [vmem:[%s8185_s1 + $0x120] sm:$0xff]  ;;  %v971_v36 = vld [vmem:[%s8185_s1 + $0x568] sm:$0xff] }
  0x26   :  { %3863 = vmatprep.subr.bf16.mxu0 %v4715_v0  ;;  %v3699_v63 = vpack.c.bf16 %v835_v57, %v834_v56  ;;  %v842_v33 = vld [vmem:[%s8185_s1 + $0x160] sm:$0xff]  ;;  %v127_v39 = vld [vmem:[%s8186_s0 + $0x388] sm:$0xff] }
  0x27   :  { %v110_v37 = vld [vmem:[%s8186_s0 + $0x300] sm:$0xff]  ;;  %v143_v49 = vld [vmem:[%s8186_s0 + $0x408] sm:$0xff] }
  0x28   :  { %3673 = vmatpush1.bf16.msra.mxu1 %v3672_v61  ;;  %v54_v61 = vld [vmem:[%s8186_s0 + $0x140] sm:$0xff]  ;;  %v975_v56 = vld [vmem:[%s8185_s1 + $0x588] sm:$0xff] }
  0x29   :  { %3865 = vmatpush1.bf16.msra.mxu0 %v3864_v62  ;;  %3674 = vmatprep.subr.bf16.mxu1 %v4715_v0  ;;  %v63_v62 = vld [vmem:[%s8186_s0 + $0x188] sm:$0xff]  ;;  %v118_v38 = vld [vmem:[%s8186_s0 + $0x340] sm:$0xff] }
  0x2a   :  { %3866 = vmatprep.subr.bf16.mxu0 %v4715_v0  ;;  %v126_v47 = vld [vmem:[%s8186_s0 + $0x380] sm:$0xff]  ;;  %v159_v59 = vld [vmem:[%s8186_s0 + $0x488] sm:$0xff] }
  0x2b   :  { %v134_v48 = vld [vmem:[%s8186_s0 + $0x3c0] sm:$0xff]  ;;  %v979_v13 = vld [vmem:[%s8185_s1 + $0x5a8] sm:$0xff] }
  0x2c   :  { %3676 = vmatpush1.bf16.msra.mxu1 %v3675_v4  ;;  %v837_v4 = vld [vmem:[%s8185_s1 + $0x138] sm:$0xff]  ;;  %v142_v57 = vld [vmem:[%s8186_s0 + $0x400] sm:$0xff]  ;;  %v207_v26 = vld [vmem:[%s8186_s0 + $0x608] sm:$0xff] }
  0x2d   :  { %3868 = vmatpush1.bf16.msra.mxu0 %v3867_v5  ;;  %3677 = vmatprep.subr.bf16.mxu1 %v4715_v0  ;;  %v964_v5 = vld [vmem:[%s8185_s1 + $0x530] sm:$0xff]  ;;  %v150_v58 = vld [vmem:[%s8186_s0 + $0x440] sm:$0xff] }
  0x2e   :  { %3869 = vmatprep.subr.bf16.mxu0 %v4715_v0  ;;  %v3894_v12 = vpack.c.bf16 %v965_v6, %v964_v5  ;;  %v166_v5 = vld [vmem:[%s8186_s0 + $0x4c0] sm:$0xff]  ;;  %v175_v6 = vld [vmem:[%s8186_s0 + $0x508] sm:$0xff] }
  0x2f   :  { %v174_v14 = vld [vmem:[%s8186_s0 + $0x500] sm:$0xff] }
  0x30   :  { %3679 = vmatpush1.bf16.msra.mxu1 %v3678_v10  ;;  %v3702_v10 = vpack.c.bf16 %v837_v4, %v836_v3  ;;  %v977_v3 = vld [vmem:[%s8185_s1 + $0x598] sm:$0xff]  ;;  %v158_v4 = vld [vmem:[%s8186_s0 + $0x480] sm:$0xff] }
  0x31   :  { %3871 = vmatpush1.bf16.msra.mxu0 %v3870_v11  ;;  %3680 = vmatprep.subr.bf16.mxu1 %v4715_v0  ;;  %v87_v11 = vld [vmem:[%s8186_s0 + $0x248] sm:$0xff]  ;;  %v198_v25 = vld [vmem:[%s8186_s0 + $0x5c0] sm:$0xff] }
  0x32   :  { %3872 = vmatprep.subr.bf16.mxu0 %v4715_v0 }
  0x34   :  { %3682 = vmatpush1.bf16.msra.mxu1 %v3681_v16  ;;  %v967_v16 = vld [vmem:[%s8185_s1 + $0x548] sm:$0xff] }
  0x35   :  { %3874 = vmatpush1.bf16.msra.mxu0 %v3873_v17  ;;  %3683 = vmatprep.subr.bf16.mxu1 %v4715_v0  ;;  %v78_v17 = vld [vmem:[%s8186_s0 + $0x200] sm:$0xff] }
  0x36   :  { %3875 = vmatprep.subr.bf16.mxu0 %v4715_v0 }
  0x38   :  { %3685 = vmatpush1.bf16.msra.mxu1 %v3684_v22  ;;  %v3897_v22 = vpack.c.bf16 %v967_v16, %v966_v15  ;;  %v182_v15 = vld [vmem:[%s8186_s0 + $0x540] sm:$0xff]  ;;  %v191_v16 = vld [vmem:[%s8186_s0 + $0x588] sm:$0xff] }
  0x39   :  { %3877 = vmatpush1.bf16.msra.mxu0 %v3876_v23  ;;  %3686 = vmatprep.subr.bf16.mxu1 %v4715_v0  ;;  %v840_v23 = vld [vmem:[%s8185_s1 + $0x150] sm:$0xff] }
  0x3a   :  { %3878 = vmatprep.subr.bf16.mxu0 %v4715_v0  ;;  %v3708_v30 = vpack.c.bf16 %v841_v24, %v840_v23  ;;  %v981_v23 = vld [vmem:[%s8185_s1 + $0x5b8] sm:$0xff]  ;;  %v190_v24 = vld [vmem:[%s8186_s0 + $0x580] sm:$0xff] }
  0x3c   :  { %3688 = vmatpush1.bf16.msra.mxu1 %v3687_v28  ;;  %v102_v28 = vld [vmem:[%s8186_s0 + $0x2c0] sm:$0xff] }
  0x3d   :  { %3880 = vmatpush1.bf16.msra.mxu0 %v3879_v29  ;;  %3689 = vmatprep.subr.bf16.mxu1 %v4715_v0  ;;  %v111_v29 = vld [vmem:[%s8186_s0 + $0x308] sm:$0xff] }
  0x3e   :  { %3881 = vmatprep.subr.bf16.mxu0 %v4715_v0 }
  0x40   :  { %3691 = vmatpush1.bf16.msra.mxu1 %v3690_v34  ;;  %v843_v34 = vld [vmem:[%s8185_s1 + $0x168] sm:$0xff] }
  0x41   :  { %3883 = vmatpush1.bf16.msra.mxu0 %v3882_v35  ;;  %3692 = vmatprep.subr.bf16.mxu1 %v4715_v0  ;;  %v970_v35 = vld [vmem:[%s8185_s1 + $0x560] sm:$0xff] }
  0x42   :  { %3884 = vmatprep.subr.bf16.mxu0 %v4715_v0 }
  0x43   :  { %1126 = vmatmul.mubr.f32.vlgmr.msra.gmra.mrb[0].mxu1 %v14_v40  ;;  %v3711_v40 = vpack.c.bf16 %v843_v34, %v842_v33  ;;  %v983_v33 = vld [vmem:[%s8185_s1 + $0x5c8] sm:$0xff]  ;;  %v206_v34 = vld [vmem:[%s8186_s0 + $0x600] sm:$0xff] }
  0x44   :  { %2366 = vmatmul.mubr.f32.vlgmr.msra.gmra.mrb[0].mxu0 %v22_v42  ;;  %3694 = vmatpush1.bf16.msra.mxu1 %v3693_v41  ;;  %v135_v41 = vld [vmem:[%s8186_s0 + $0x3c8] sm:$0xff]  ;;  %v3903_v42 = vpack.c.bf16 %v971_v36, %v970_v35  ;;  %v214_v35 = vld [vmem:[%s8186_s0 + $0x640] sm:$0xff] }
  0x45   :  { %1130 = vmatprep.mubr.f32.mxu1 %v31_v43  ;;  %2370 = vmatprep.mubr.f32.mxu0 %v39_v44  ;;  %v844_v43 = vld [vmem:[%s8185_s1 + $0x170] sm:$0xff]  ;;  %v845_v44 = vld [vmem:[%s8185_s1 + $0x178] sm:$0xff]  ;;  %v223_v36 = vld [vmem:[%s8186_s0 + $0x688] sm:$0xff] }
  0x46   :  { %3886 = vmatpush1.bf16.msra.mxu0 %v3885_v45  ;;  %3695 = vmatprep.subr.bf16.mxu1 %v4715_v0  ;;  %v972_v45 = vld [vmem:[%s8185_s1 + $0x570] sm:$0xff] }
  0x47   :  { %1131 = vmatmul.mubr.f32.gmra.mrb[2].mxu1 %v30_v50  ;;  %3887 = vmatprep.subr.bf16.mxu0 %v4715_v0  ;;  %v3714_v50 = vpack.c.bf16 %v845_v44, %v844_v43  ;;  %v985_v43 = vld [vmem:[%s8185_s1 + $0x5d8] sm:$0xff]  ;;  %v222_v44 = vld [vmem:[%s8186_s0 + $0x680] sm:$0xff] }
  0x48   :  { %2371 = vmatmul.mubr.f32.gmra.mrb[2].mxu0 %v38_v51  ;;  %1135 = vmatprep.mubr.f32.mxu1 %v47_v52  ;;  %v151_v51 = vld [vmem:[%s8186_s0 + $0x448] sm:$0xff]  ;;  %v3906_v52 = vpack.c.bf16 %v973_v46, %v972_v45  ;;  %v230_v45 = vld [vmem:[%s8186_s0 + $0x6c0] sm:$0xff] }
  0x49   :  { %2375 = vmatprep.mubr.f32.mxu0 %v55_v54  ;;  %3697 = vmatpush1.bf16.msra.mxu1 %v3696_v53  ;;  %v846_v53 = vld [vmem:[%s8185_s1 + $0x180] sm:$0xff]  ;;  %v847_v54 = vld [vmem:[%s8185_s1 + $0x188] sm:$0xff] }
  0x4a   :  { %3889 = vmatpush1.bf16.msra.mxu0 %v3888_v55  ;;  %3698 = vmatprep.subr.bf16.mxu1 %v4715_v0  ;;  %v974_v55 = vld [vmem:[%s8185_s1 + $0x580] sm:$0xff]  ;;  %v239_v46 = vld [vmem:[%s8186_s0 + $0x708] sm:$0xff] }
  0x4b   :  { %1136 = vmatmul.mubr.f32.gmra.mrb[4].mxu1 %v46_v60  ;;  %3890 = vmatprep.subr.bf16.mxu0 %v4715_v0  ;;  %v3717_v60 = vpack.c.bf16 %v847_v54, %v846_v53  ;;  %v987_v53 = vld [vmem:[%s8185_s1 + $0x5e8] sm:$0xff]  ;;  %v238_v54 = vld [vmem:[%s8186_s0 + $0x700] sm:$0xff] }
  0x4c   :  { %2376 = vmatmul.mubr.f32.gmra.mrb[4].mxu0 %v54_v61  ;;  %1140 = vmatprep.mubr.f32.mxu1 %v63_v62  ;;  %v167_v61 = vld [vmem:[%s8186_s0 + $0x4c8] sm:$0xff]  ;;  %v3909_v62 = vpack.c.bf16 %v975_v56, %v974_v55  ;;  %v246_v55 = vld [vmem:[%s8186_s0 + $0x740] sm:$0xff] }
  0x4d   :  { %2380 = vmatprep.mubr.f32.mxu0 %v71_v1  ;;  %3700 = vmatpush1.bf16.msra.mxu1 %v3699_v63  ;;  %v848_v63 = vld [vmem:[%s8185_s1 + $0x190] sm:$0xff]  ;;  %v849_v1 = vld [vmem:[%s8185_s1 + $0x198] sm:$0xff]  ;;  %v255_v56 = vld [vmem:[%s8186_s0 + $0x788] sm:$0xff] }
  0x4e   :  { %3892 = vmatpush1.bf16.msra.mxu0 %v3891_v2  ;;  %3701 = vmatprep.subr.bf16.mxu1 %v4715_v0  ;;  %v976_v2 = vld [vmem:[%s8185_s1 + $0x590] sm:$0xff] }
  0x4f   :  { %1141 = vmatmul.mubr.f32.gmra.mrb[6].mxu1 %v62_v7  ;;  %3893 = vmatprep.subr.bf16.mxu0 %v4715_v0  ;;  %v3720_v7 = vpack.c.bf16 %v849_v1, %v848_v63  ;;  %v861_v63 = vld [vmem:[%s8185_s1 + $0x1f8] sm:$0xff]  ;;  %v271_v1 = vld [vmem:[%s8186_s0 + $0x808] sm:$0xff] }
  0x50   :  { %2381 = vmatmul.mubr.f32.gmra.mrb[6].mxu0 %v70_v8  ;;  %1145 = vmatprep.mubr.f32.mxu1 %v79_v9  ;;  %v183_v8 = vld [vmem:[%s8186_s0 + $0x548] sm:$0xff]  ;;  %v3912_v9 = vpack.c.bf16 %v977_v3, %v976_v2  ;;  %v988_v3 = vld [vmem:[%s8185_s1 + $0x5f0] sm:$0xff] }
  0x51   :  { %2385 = vmatprep.mubr.f32.mxu0 %v87_v11  ;;  %3703 = vmatpush1.bf16.msra.mxu1 %v3702_v10  ;;  %v850_v10 = vld [vmem:[%s8185_s1 + $0x1a0] sm:$0xff]  ;;  %v851_v11 = vld [vmem:[%s8185_s1 + $0x1a8] sm:$0xff] }
  0x52   :  { %3895 = vmatpush1.bf16.msra.mxu0 %v3894_v12  ;;  %3704 = vmatprep.subr.bf16.mxu1 %v4715_v0  ;;  %v978_v12 = vld [vmem:[%s8185_s1 + $0x5a0] sm:$0xff] }
  0x53   :  { %1146 = vmatmul.mubr.f32.gmra.mrb[8].mxu1 %v78_v17  ;;  %3896 = vmatprep.subr.bf16.mxu0 %v4715_v0  ;;  %v3723_v17 = vpack.c.bf16 %v851_v11, %v850_v10  ;;  %v295_v10 = vld [vmem:[%s8186_s0 + $0x8c8] sm:$0xff]  ;;  %v286_v11 = vld [vmem:[%s8186_s0 + $0x880] sm:$0xff] }
  0x54   :  { %2386 = vmatmul.mubr.f32.gmra.mrb[8].mxu0 %v86_v18  ;;  %1150 = vmatprep.mubr.f32.mxu1 %v95_v19  ;;  %v199_v18 = vld [vmem:[%s8186_s0 + $0x5c8] sm:$0xff]  ;;  %v3915_v19 = vpack.c.bf16 %v979_v13, %v978_v12  ;;  %v294_v12 = vld [vmem:[%s8186_s0 + $0x8c0] sm:$0xff] }
  0x55   :  { %2390 = vmatprep.mubr.f32.mxu0 %v103_v21  ;;  %3706 = vmatpush1.bf16.msra.mxu1 %v3705_v20  ;;  %v852_v20 = vld [vmem:[%s8185_s1 + $0x1b0] sm:$0xff]  ;;  %v853_v21 = vld [vmem:[%s8185_s1 + $0x1b8] sm:$0xff]  ;;  %v303_v13 = vld [vmem:[%s8186_s0 + $0x908] sm:$0xff] }
  0x56   :  { %3898 = vmatpush1.bf16.msra.mxu0 %v3897_v22  ;;  %3707 = vmatprep.subr.bf16.mxu1 %v4715_v0  ;;  %v980_v22 = vld [vmem:[%s8185_s1 + $0x5b0] sm:$0xff] }
  0x57   :  { %1151 = vmatmul.mubr.f32.gmra.mrb[10].mxu1 %v94_v27  ;;  %3899 = vmatprep.subr.bf16.mxu0 %v4715_v0  ;;  %v3726_v27 = vpack.c.bf16 %v853_v21, %v852_v20  ;;  %v326_v20 = vld [vmem:[%s8186_s0 + $0x9c0] sm:$0xff]  ;;  %v335_v21 = vld [vmem:[%s8186_s0 + $0xa08] sm:$0xff] }
  0x58   :  { %2391 = vmatmul.mubr.f32.gmra.mrb[10].mxu0 %v102_v28  ;;  %1155 = vmatprep.mubr.f32.mxu1 %v111_v29  ;;  %v215_v28 = vld [vmem:[%s8186_s0 + $0x648] sm:$0xff]  ;;  %v3918_v29 = vpack.c.bf16 %v981_v23, %v980_v22  ;;  %v334_v23 = vld [vmem:[%s8186_s0 + $0xa00] sm:$0xff] }
  0x59   :  { %2395 = vmatprep.mubr.f32.mxu0 %v119_v31  ;;  %3709 = vmatpush1.bf16.msra.mxu1 %v3708_v30  ;;  %v854_v30 = vld [vmem:[%s8185_s1 + $0x1c0] sm:$0xff]  ;;  %v855_v31 = vld [vmem:[%s8185_s1 + $0x1c8] sm:$0xff] }
  0x5a   :  { %3901 = vmatpush1.bf16.msra.mxu0 %v3900_v32  ;;  %3710 = vmatprep.subr.bf16.mxu1 %v4715_v0  ;;  %v982_v32 = vld [vmem:[%s8185_s1 + $0x5c0] sm:$0xff]  ;;  %v343_v22 = vld [vmem:[%s8186_s0 + $0xa48] sm:$0xff] }
  0x5b   :  { %1156 = vmatmul.mubr.f32.gmra.mrb[12].mxu1 %v110_v37  ;;  %3902 = vmatprep.subr.bf16.mxu0 %v4715_v0  ;;  %v3729_v37 = vpack.c.bf16 %v855_v31, %v854_v30  ;;  %v375_v30 = vld [vmem:[%s8186_s0 + $0xb48] sm:$0xff]  ;;  %v366_v31 = vld [vmem:[%s8186_s0 + $0xb00] sm:$0xff] }
  0x5c   :  { %2396 = vmatmul.mubr.f32.gmra.mrb[12].mxu0 %v118_v38  ;;  %1160 = vmatprep.mubr.f32.mxu1 %v127_v39  ;;  %v231_v38 = vld [vmem:[%s8186_s0 + $0x6c8] sm:$0xff]  ;;  %v3921_v39 = vpack.c.bf16 %v983_v33, %v982_v32  ;;  %v374_v32 = vld [vmem:[%s8186_s0 + $0xb40] sm:$0xff] }
  0x5d   :  { %2400 = vmatprep.mubr.f32.mxu0 %v135_v41  ;;  %3712 = vmatpush1.bf16.msra.mxu1 %v3711_v40  ;;  %v856_v40 = vld [vmem:[%s8185_s1 + $0x1d0] sm:$0xff]  ;;  %v857_v41 = vld [vmem:[%s8185_s1 + $0x1d8] sm:$0xff]  ;;  %v383_v33 = vld [vmem:[%s8186_s0 + $0xb88] sm:$0xff] }
  0x5e   :  { %3904 = vmatpush1.bf16.msra.mxu0 %v3903_v42  ;;  %3713 = vmatprep.subr.bf16.mxu1 %v4715_v0  ;;  %v984_v42 = vld [vmem:[%s8185_s1 + $0x5d0] sm:$0xff] }
  0x5f   :  { %1161 = vmatmul.mubr.f32.gmra.mrb[14].mxu1 %v126_v47  ;;  %3905 = vmatprep.subr.bf16.mxu0 %v4715_v0  ;;  %v3732_v47 = vpack.c.bf16 %v857_v41, %v856_v40  ;;  %v406_v40 = vld [vmem:[%s8186_s0 + $0xc40] sm:$0xff]  ;;  %v415_v41 = vld [vmem:[%s8186_s0 + $0xc88] sm:$0xff] }
  0x60   :  { %2401 = vmatmul.mubr.f32.gmra.mrb[14].mxu0 %v134_v48  ;;  %1165 = vmatprep.mubr.f32.mxu1 %v143_v49  ;;  %v247_v48 = vld [vmem:[%s8186_s0 + $0x748] sm:$0xff]  ;;  %v3924_v49 = vpack.c.bf16 %v985_v43, %v984_v42  ;;  %v414_v43 = vld [vmem:[%s8186_s0 + $0xc80] sm:$0xff] }
  0x61   :  { %2405 = vmatprep.mubr.f32.mxu0 %v151_v51  ;;  %3715 = vmatpush1.bf16.msra.mxu1 %v3714_v50  ;;  %v858_v50 = vld [vmem:[%s8185_s1 + $0x1e0] sm:$0xff]  ;;  %v859_v51 = vld [vmem:[%s8185_s1 + $0x1e8] sm:$0xff] }
  0x62   :  { %3907 = vmatpush1.bf16.msra.mxu0 %v3906_v52  ;;  %3716 = vmatprep.subr.bf16.mxu1 %v4715_v0  ;;  %v986_v52 = vld [vmem:[%s8185_s1 + $0x5e0] sm:$0xff]  ;;  %v423_v42 = vld [vmem:[%s8186_s0 + $0xcc8] sm:$0xff] }
  0x63   :  { %1166 = vmatmul.mubr.f32.gmra.mrb[16].mxu1 %v142_v57  ;;  %3908 = vmatprep.subr.bf16.mxu0 %v4715_v0  ;;  %v3735_v57 = vpack.c.bf16 %v859_v51, %v858_v50  ;;  %v455_v50 = vld [vmem:[%s8186_s0 + $0xdc8] sm:$0xff]  ;;  %v446_v51 = vld [vmem:[%s8186_s0 + $0xd80] sm:$0xff] }
  0x64   :  { %2406 = vmatmul.mubr.f32.gmra.mrb[16].mxu0 %v150_v58  ;;  %1170 = vmatprep.mubr.f32.mxu1 %v159_v59  ;;  %v263_v58 = vld [vmem:[%s8186_s0 + $0x7c8] sm:$0xff]  ;;  %v3927_v59 = vpack.c.bf16 %v987_v53, %v986_v52  ;;  %v454_v52 = vld [vmem:[%s8186_s0 + $0xdc0] sm:$0xff] }
  0x65   :  { %2410 = vmatprep.mubr.f32.mxu0 %v167_v61  ;;  %3718 = vmatpush1.bf16.msra.mxu1 %v3717_v60  ;;  %v254_v60 = vld [vmem:[%s8186_s0 + $0x780] sm:$0xff]  ;;  %v463_v53 = vld [vmem:[%s8186_s0 + $0xe08] sm:$0xff] }
  0x66   :  { %3910 = vmatpush1.bf16.msra.mxu0 %v3909_v62  ;;  %3719 = vmatprep.subr.bf16.mxu1 %v4715_v0  ;;  %v262_v61 = vld [vmem:[%s8186_s0 + $0x7c0] sm:$0xff]  ;;  %v860_v62 = vld [vmem:[%s8185_s1 + $0x1f0] sm:$0xff] }
  0x67   :  { %1171 = vmatmul.mubr.f32.gmra.mrb[18].mxu1 %v158_v4  ;;  %3911 = vmatprep.subr.bf16.mxu0 %v4715_v0  ;;  %v3738_v2 = vpack.c.bf16 %v861_v63, %v860_v62  ;;  %v989_v4 = vld [vmem:[%s8185_s1 + $0x5f8] sm:$0xff]  ;;  %v503_v62 = vld [vmem:[%s8186_s0 + $0xf48] sm:$0xff]  ;;  %v494_v63 = vld [vmem:[%s8186_s0 + $0xf00] sm:$0xff] }
  0x68   :  { %2411 = vmatmul.mubr.f32.gmra.mrb[18].mxu0 %v166_v5  ;;  %1175 = vmatprep.mubr.f32.mxu1 %v175_v6  ;;  %v279_v5 = vld [vmem:[%s8186_s0 + $0x848] sm:$0xff]  ;;  %v3930_v6 = vpack.c.bf16 %v989_v4, %v988_v3  ;;  %v510_v4 = vld [vmem:[%s8186_s0 + $0xf80] sm:$0xff] }
  0x69   :  { %2415 = vmatprep.mubr.f32.mxu0 %v183_v8  ;;  %3721 = vmatpush1.bf16.msra.mxu1 %v3720_v7  ;;  %v270_v7 = vld [vmem:[%s8186_s0 + $0x800] sm:$0xff]  ;;  %v519_v3 = vld [vmem:[%s8186_s0 + $0xfc8] sm:$0xff] }
  0x6a   :  { %3913 = vmatpush1.bf16.msra.mxu0 %v3912_v9  ;;  %3722 = vmatprep.subr.bf16.mxu1 %v4715_v0  ;;  %v278_v8 = vld [vmem:[%s8186_s0 + $0x840] sm:$0xff]  ;;  %v287_v9 = vld [vmem:[%s8186_s0 + $0x888] sm:$0xff] }
  0x6b   :  { %1176 = vmatmul.mubr.f32.gmra.mrb[20].mxu1 %v174_v14  ;;  %3914 = vmatprep.subr.bf16.mxu0 %v4715_v0  ;;  %v311_v14 = vld [vmem:[%s8186_s0 + $0x948] sm:$0xff] }
  0x6c   :  { %2416 = vmatmul.mubr.f32.gmra.mrb[20].mxu0 %v182_v15  ;;  %1180 = vmatprep.mubr.f32.mxu1 %v191_v16  ;;  %v302_v15 = vld [vmem:[%s8186_s0 + $0x900] sm:$0xff] }
  0x6d   :  { %2420 = vmatprep.mubr.f32.mxu0 %v199_v18  ;;  %3724 = vmatpush1.bf16.msra.mxu1 %v3723_v17  ;;  %v310_v16 = vld [vmem:[%s8186_s0 + $0x940] sm:$0xff]  ;;  %v319_v17 = vld [vmem:[%s8186_s0 + $0x988] sm:$0xff] }
  0x6e   :  { %3916 = vmatpush1.bf16.msra.mxu0 %v3915_v19  ;;  %3725 = vmatprep.subr.bf16.mxu1 %v4715_v0  ;;  %v327_v18 = vld [vmem:[%s8186_s0 + $0x9c8] sm:$0xff]  ;;  %v318_v19 = vld [vmem:[%s8186_s0 + $0x980] sm:$0xff] }
  0x6f   :  { %1181 = vmatmul.mubr.f32.gmra.mrb[22].mxu1 %v190_v24  ;;  %3917 = vmatprep.subr.bf16.mxu0 %v4715_v0  ;;  %v342_v24 = vld [vmem:[%s8186_s0 + $0xa40] sm:$0xff] }
  0x70   :  { %2421 = vmatmul.mubr.f32.gmra.mrb[22].mxu0 %v198_v25  ;;  %1185 = vmatprep.mubr.f32.mxu1 %v207_v26  ;;  %v351_v25 = vld [vmem:[%s8186_s0 + $0xa88] sm:$0xff] }
  0x71   :  { %2425 = vmatprep.mubr.f32.mxu0 %v215_v28  ;;  %3727 = vmatpush1.bf16.msra.mxu1 %v3726_v27  ;;  %v359_v26 = vld [vmem:[%s8186_s0 + $0xac8] sm:$0xff]  ;;  %v350_v27 = vld [vmem:[%s8186_s0 + $0xa80] sm:$0xff] }
  0x72   :  { %3919 = vmatpush1.bf16.msra.mxu0 %v3918_v29  ;;  %3728 = vmatprep.subr.bf16.mxu1 %v4715_v0  ;;  %v358_v28 = vld [vmem:[%s8186_s0 + $0xac0] sm:$0xff]  ;;  %v367_v29 = vld [vmem:[%s8186_s0 + $0xb08] sm:$0xff] }
  0x73   :  { %1186 = vmatmul.mubr.f32.gmra.mrb[24].mxu1 %v206_v34  ;;  %3920 = vmatprep.subr.bf16.mxu0 %v4715_v0  ;;  %v391_v34 = vld [vmem:[%s8186_s0 + $0xbc8] sm:$0xff] }
  0x74   :  { %2426 = vmatmul.mubr.f32.gmra.mrb[24].mxu0 %v214_v35  ;;  %1190 = vmatprep.mubr.f32.mxu1 %v223_v36  ;;  %v382_v35 = vld [vmem:[%s8186_s0 + $0xb80] sm:$0xff] }
  0x75   :  { %2430 = vmatprep.mubr.f32.mxu0 %v231_v38  ;;  %3730 = vmatpush1.bf16.msra.mxu1 %v3729_v37  ;;  %v390_v36 = vld [vmem:[%s8186_s0 + $0xbc0] sm:$0xff]  ;;  %v399_v37 = vld [vmem:[%s8186_s0 + $0xc08] sm:$0xff] }
  0x76   :  { %3922 = vmatpush1.bf16.msra.mxu0 %v3921_v39  ;;  %3731 = vmatprep.subr.bf16.mxu1 %v4715_v0  ;;  %v407_v38 = vld [vmem:[%s8186_s0 + $0xc48] sm:$0xff]  ;;  %v398_v39 = vld [vmem:[%s8186_s0 + $0xc00] sm:$0xff] }
  0x77   :  { %1191 = vmatmul.mubr.f32.gmra.mrb[26].mxu1 %v222_v44  ;;  %3923 = vmatprep.subr.bf16.mxu0 %v4715_v0  ;;  %v422_v44 = vld [vmem:[%s8186_s0 + $0xcc0] sm:$0xff] }
  0x78   :  { %2431 = vmatmul.mubr.f32.gmra.mrb[26].mxu0 %v230_v45  ;;  %1195 = vmatprep.mubr.f32.mxu1 %v239_v46  ;;  %v431_v45 = vld [vmem:[%s8186_s0 + $0xd08] sm:$0xff] }
  0x79   :  { %2435 = vmatprep.mubr.f32.mxu0 %v247_v48  ;;  %3733 = vmatpush1.bf16.msra.mxu1 %v3732_v47  ;;  %v439_v46 = vld [vmem:[%s8186_s0 + $0xd48] sm:$0xff]  ;;  %v430_v47 = vld [vmem:[%s8186_s0 + $0xd00] sm:$0xff] }
  0x7a   :  { %3925 = vmatpush1.bf16.msra.mxu0 %v3924_v49  ;;  %3734 = vmatprep.subr.bf16.mxu1 %v4715_v0  ;;  %v438_v48 = vld [vmem:[%s8186_s0 + $0xd40] sm:$0xff]  ;;  %v447_v49 = vld [vmem:[%s8186_s0 + $0xd88] sm:$0xff] }
  0x7b   :  { %1196 = vmatmul.mubr.f32.gmra.mrb[28].mxu1 %v238_v54  ;;  %3926 = vmatprep.subr.bf16.mxu0 %v4715_v0  ;;  %v471_v54 = vld [vmem:[%s8186_s0 + $0xe48] sm:$0xff] }
  0x7c   :  { %2436 = vmatmul.mubr.f32.gmra.mrb[28].mxu0 %v246_v55  ;;  %1200 = vmatprep.mubr.f32.mxu1 %v255_v56  ;;  %v462_v55 = vld [vmem:[%s8186_s0 + $0xe00] sm:$0xff] }
  0x7d   :  { %2440 = vmatprep.mubr.f32.mxu0 %v263_v58  ;;  %3736 = vmatpush1.bf16.msra.mxu1 %v3735_v57  ;;  %v470_v56 = vld [vmem:[%s8186_s0 + $0xe40] sm:$0xff]  ;;  %v479_v57 = vld [vmem:[%s8186_s0 + $0xe88] sm:$0xff] }
  0x7e   :  { %3928 = vmatpush1.bf16.msra.mxu0 %v3927_v59  ;;  %3737 = vmatprep.subr.bf16.mxu1 %v4715_v0  ;;  %v487_v58 = vld [vmem:[%s8186_s0 + $0xec8] sm:$0xff]  ;;  %v478_v59 = vld [vmem:[%s8186_s0 + $0xe80] sm:$0xff] }
  0x7f   :  { %1201 = vmatmul.mubr.f32.gmra.mrb[30].mxu1 %v254_v60  ;;  %3929 = vmatprep.subr.bf16.mxu0 %v4715_v0  ;;  %v486_v60 = vld [vmem:[%s8186_s0 + $0xec0] sm:$0xff] }
  0x80   :  { %2441 = vmatmul.mubr.f32.gmra.mrb[30].mxu0 %v262_v61  ;;  %1205 = vmatprep.mubr.f32.mxu1 %v271_v1  ;;  %v495_v61 = vld [vmem:[%s8186_s0 + $0xf08] sm:$0xff]  ;;  %v502_v1 = vld [vmem:[%s8186_s0 + $0xf40] sm:$0xff] }
  0x81   :  { %2445 = vmatprep.mubr.f32.mxu0 %v279_v5  ;;  %3739 = vmatpush1.bf16.msra.mxu1 %v3738_v2  ;;  %v511_v2 = vld [vmem:[%s8186_s0 + $0xf88] sm:$0xff]  ;;  %v518_v5 = vld [vmem:[%s8186_s0 + $0xfc0] sm:$0xff] }
  0x82   :  { %3931 = vmatpush1.bf16.msra.mxu0 %v3930_v6  ;;  %3740 = vmatprep.subr.bf16.mxu1 %v4715_v0  ;;  %v527_v6 = vld [vmem:[%s8186_s0 + $0x1008] sm:$0xff] }
  0x83   :  { %1206 = vmatmul.mubr.f32.gmra.mrb[32].mxu1 %v270_v7  ;;  %3932 = vmatprep.subr.bf16.mxu0 %v4715_v0  ;;  %v535_v7 = vld [vmem:[%s8186_s0 + $0x1048] sm:$0xff] }
  0x84   :  { %2446 = vmatmul.mubr.f32.gmra.mrb[32].mxu0 %v278_v8  ;;  %1210 = vmatprep.mubr.f32.mxu1 %v287_v9  ;;  %v526_v8 = vld [vmem:[%s8186_s0 + $0x1000] sm:$0xff] }
  0x85   :  { %2450 = vmatprep.mubr.f32.mxu0 %v295_v10  ;;  %v534_v9 = vld [vmem:[%s8186_s0 + $0x1040] sm:$0xff]  ;;  %v543_v10 = vld [vmem:[%s8186_s0 + $0x1088] sm:$0xff] }
  0x87   :  { %1211 = vmatmul.mubr.f32.gmra.mrb[34].mxu1 %v286_v11  ;;  %v551_v11 = vld [vmem:[%s8186_s0 + $0x10c8] sm:$0xff] }
  0x88   :  { %2451 = vmatmul.mubr.f32.gmra.mrb[34].mxu0 %v294_v12  ;;  %1215 = vmatprep.mubr.f32.mxu1 %v303_v13  ;;  %v542_v12 = vld [vmem:[%s8186_s0 + $0x1080] sm:$0xff] }
  0x89   :  { %2455 = vmatprep.mubr.f32.mxu0 %v311_v14  ;;  %v550_v13 = vld [vmem:[%s8186_s0 + $0x10c0] sm:$0xff]  ;;  %v559_v14 = vld [vmem:[%s8186_s0 + $0x1108] sm:$0xff] }
  0x8b   :  { %1216 = vmatmul.mubr.f32.gmra.mrb[36].mxu1 %v302_v15  ;;  %v567_v15 = vld [vmem:[%s8186_s0 + $0x1148] sm:$0xff] }
  0x8c   :  { %2456 = vmatmul.mubr.f32.gmra.mrb[36].mxu0 %v310_v16  ;;  %1220 = vmatprep.mubr.f32.mxu1 %v319_v17  ;;  %v558_v16 = vld [vmem:[%s8186_s0 + $0x1100] sm:$0xff] }
  0x8d   :  { %2460 = vmatprep.mubr.f32.mxu0 %v327_v18  ;;  %v566_v17 = vld [vmem:[%s8186_s0 + $0x1140] sm:$0xff]  ;;  %v575_v18 = vld [vmem:[%s8186_s0 + $0x1188] sm:$0xff] }
  0x8f   :  { %1221 = vmatmul.mubr.f32.gmra.mrb[38].mxu1 %v318_v19  ;;  %v583_v19 = vld [vmem:[%s8186_s0 + $0x11c8] sm:$0xff] }
  0x90   :  { %2461 = vmatmul.mubr.f32.gmra.mrb[38].mxu0 %v326_v20  ;;  %1225 = vmatprep.mubr.f32.mxu1 %v335_v21  ;;  %v574_v20 = vld [vmem:[%s8186_s0 + $0x1180] sm:$0xff] }
  0x91   :  { %2465 = vmatprep.mubr.f32.mxu0 %v343_v22  ;;  %v582_v21 = vld [vmem:[%s8186_s0 + $0x11c0] sm:$0xff]  ;;  %v591_v22 = vld [vmem:[%s8186_s0 + $0x1208] sm:$0xff] }
  0x93   :  { %1226 = vmatmul.mubr.f32.gmra.mrb[40].mxu1 %v334_v23  ;;  %v599_v23 = vld [vmem:[%s8186_s0 + $0x1248] sm:$0xff] }
  0x94   :  { %2466 = vmatmul.mubr.f32.gmra.mrb[40].mxu0 %v342_v24  ;;  %1230 = vmatprep.mubr.f32.mxu1 %v351_v25  ;;  %v590_v24 = vld [vmem:[%s8186_s0 + $0x1200] sm:$0xff] }
  0x95   :  { %2470 = vmatprep.mubr.f32.mxu0 %v359_v26  ;;  %v598_v25 = vld [vmem:[%s8186_s0 + $0x1240] sm:$0xff]  ;;  %v607_v26 = vld [vmem:[%s8186_s0 + $0x1288] sm:$0xff] }
  0x97   :  { %1231 = vmatmul.mubr.f32.gmra.mrb[42].mxu1 %v350_v27  ;;  %v615_v27 = vld [vmem:[%s8186_s0 + $0x12c8] sm:$0xff] }
  0x98   :  { %2471 = vmatmul.mubr.f32.gmra.mrb[42].mxu0 %v358_v28  ;;  %1235 = vmatprep.mubr.f32.mxu1 %v367_v29  ;;  %v606_v28 = vld [vmem:[%s8186_s0 + $0x1280] sm:$0xff] }
  0x99   :  { %2475 = vmatprep.mubr.f32.mxu0 %v375_v30  ;;  %v614_v29 = vld [vmem:[%s8186_s0 + $0x12c0] sm:$0xff]  ;;  %v623_v30 = vld [vmem:[%s8186_s0 + $0x1308] sm:$0xff] }
  0x9b   :  { %1236 = vmatmul.mubr.f32.gmra.mrb[44].mxu1 %v366_v31  ;;  %v631_v31 = vld [vmem:[%s8186_s0 + $0x1348] sm:$0xff] }
  0x9c   :  { %2476 = vmatmul.mubr.f32.gmra.mrb[44].mxu0 %v374_v32  ;;  %1240 = vmatprep.mubr.f32.mxu1 %v383_v33  ;;  %v622_v32 = vld [vmem:[%s8186_s0 + $0x1300] sm:$0xff] }
  0x9d   :  { %2480 = vmatprep.mubr.f32.mxu0 %v391_v34  ;;  %v630_v33 = vld [vmem:[%s8186_s0 + $0x1340] sm:$0xff]  ;;  %v639_v34 = vld [vmem:[%s8186_s0 + $0x1388] sm:$0xff] }
  0x9f   :  { %1241 = vmatmul.mubr.f32.gmra.mrb[46].mxu1 %v382_v35  ;;  %v647_v35 = vld [vmem:[%s8186_s0 + $0x13c8] sm:$0xff] }
  0xa0   :  { %2481 = vmatmul.mubr.f32.gmra.mrb[46].mxu0 %v390_v36  ;;  %1245 = vmatprep.mubr.f32.mxu1 %v399_v37  ;;  %v638_v36 = vld [vmem:[%s8186_s0 + $0x1380] sm:$0xff] }
  0xa1   :  { %2485 = vmatprep.mubr.f32.mxu0 %v407_v38  ;;  %v646_v37 = vld [vmem:[%s8186_s0 + $0x13c0] sm:$0xff]  ;;  %v655_v38 = vld [vmem:[%s8186_s0 + $0x1408] sm:$0xff] }
  0xa3   :  { %1246 = vmatmul.mubr.f32.gmra.mrb[48].mxu1 %v398_v39  ;;  %v663_v39 = vld [vmem:[%s8186_s0 + $0x1448] sm:$0xff] }
  0xa4   :  { %2486 = vmatmul.mubr.f32.gmra.mrb[48].mxu0 %v406_v40  ;;  %1250 = vmatprep.mubr.f32.mxu1 %v415_v41  ;;  %v654_v40 = vld [vmem:[%s8186_s0 + $0x1400] sm:$0xff] }
  0xa5   :  { %2490 = vmatprep.mubr.f32.mxu0 %v423_v42  ;;  %v662_v41 = vld [vmem:[%s8186_s0 + $0x1440] sm:$0xff]  ;;  %v671_v42 = vld [vmem:[%s8186_s0 + $0x1488] sm:$0xff] }
  0xa7   :  { %1251 = vmatmul.mubr.f32.gmra.mrb[50].mxu1 %v414_v43  ;;  %v679_v43 = vld [vmem:[%s8186_s0 + $0x14c8] sm:$0xff] }
  0xa8   :  { %2491 = vmatmul.mubr.f32.gmra.mrb[50].mxu0 %v422_v44  ;;  %1255 = vmatprep.mubr.f32.mxu1 %v431_v45  ;;  %v670_v44 = vld [vmem:[%s8186_s0 + $0x1480] sm:$0xff] }
  0xa9   :  { %2495 = vmatprep.mubr.f32.mxu0 %v439_v46  ;;  %v678_v45 = vld [vmem:[%s8186_s0 + $0x14c0] sm:$0xff]  ;;  %v687_v46 = vld [vmem:[%s8186_s0 + $0x1508] sm:$0xff] }
  0xab   :  { %1256 = vmatmul.mubr.f32.gmra.mrb[52].mxu1 %v430_v47  ;;  %v695_v47 = vld [vmem:[%s8186_s0 + $0x1548] sm:$0xff] }
  0xac   :  { %2496 = vmatmul.mubr.f32.gmra.mrb[52].mxu0 %v438_v48  ;;  %1260 = vmatprep.mubr.f32.mxu1 %v447_v49  ;;  %v686_v48 = vld [vmem:[%s8186_s0 + $0x1500] sm:$0xff] }
  0xad   :  { %2500 = vmatprep.mubr.f32.mxu0 %v455_v50  ;;  %v694_v49 = vld [vmem:[%s8186_s0 + $0x1540] sm:$0xff]  ;;  %v703_v50 = vld [vmem:[%s8186_s0 + $0x1588] sm:$0xff] }
  0xaf   :  { %1261 = vmatmul.mubr.f32.gmra.mrb[54].mxu1 %v446_v51  ;;  %v711_v51 = vld [vmem:[%s8186_s0 + $0x15c8] sm:$0xff] }
  0xb0   :  { %2501 = vmatmul.mubr.f32.gmra.mrb[54].mxu0 %v454_v52  ;;  %1265 = vmatprep.mubr.f32.mxu1 %v463_v53  ;;  %v702_v52 = vld [vmem:[%s8186_s0 + $0x1580] sm:$0xff] }
  0xb1   :  { %2505 = vmatprep.mubr.f32.mxu0 %v471_v54  ;;  %v710_v53 = vld [vmem:[%s8186_s0 + $0x15c0] sm:$0xff]  ;;  %v719_v54 = vld [vmem:[%s8186_s0 + $0x1608] sm:$0xff] }
  0xb3   :  { %1266 = vmatmul.mubr.f32.gmra.mrb[56].mxu1 %v462_v55  ;;  %v727_v55 = vld [vmem:[%s8186_s0 + $0x1648] sm:$0xff] }
  0xb4   :  { %2506 = vmatmul.mubr.f32.gmra.mrb[56].mxu0 %v470_v56  ;;  %1270 = vmatprep.mubr.f32.mxu1 %v479_v57  ;;  %v718_v56 = vld [vmem:[%s8186_s0 + $0x1600] sm:$0xff] }
  0xb5   :  { %2510 = vmatprep.mubr.f32.mxu0 %v487_v58  ;;  %v726_v57 = vld [vmem:[%s8186_s0 + $0x1640] sm:$0xff]  ;;  %v735_v58 = vld [vmem:[%s8186_s0 + $0x1688] sm:$0xff] }
  0xb7   :  { %1271 = vmatmul.mubr.f32.gmra.mrb[58].mxu1 %v478_v59  ;;  %v743_v59 = vld [vmem:[%s8186_s0 + $0x16c8] sm:$0xff] }
  0xb8   :  { %2511 = vmatmul.mubr.f32.gmra.mrb[58].mxu0 %v486_v60  ;;  %1275 = vmatprep.mubr.f32.mxu1 %v495_v61  ;;  %v734_v60 = vld [vmem:[%s8186_s0 + $0x1680] sm:$0xff] }
  0xb9   :  { %2515 = vmatprep.mubr.f32.mxu0 %v503_v62  ;;  %v742_v61 = vld [vmem:[%s8186_s0 + $0x16c0] sm:$0xff]  ;;  %v751_v62 = vld [vmem:[%s8186_s0 + $0x1708] sm:$0xff] }
  0xbb   :  { %1276 = vmatmul.mubr.f32.gmra.mrb[60].mxu1 %v494_v63  ;;  %v759_v63 = vld [vmem:[%s8186_s0 + $0x1748] sm:$0xff] }
  0xbc   :  { %2516 = vmatmul.mubr.f32.gmra.mrb[60].mxu0 %v502_v1  ;;  %1280 = vmatprep.mubr.f32.mxu1 %v511_v2  ;;  %v750_v1 = vld [vmem:[%s8186_s0 + $0x1700] sm:$0xff] }
  0xbd   :  { %2520 = vmatprep.mubr.f32.mxu0 %v519_v3  ;;  %v758_v2 = vld [vmem:[%s8186_s0 + $0x1740] sm:$0xff]  ;;  %v767_v3 = vld [vmem:[%s8186_s0 + $0x1788] sm:$0xff] }
  0xbf   :  { %1281 = vmatmul.mubr.f32.gmra.mrb[62].mxu1 %v510_v4  ;;  %v775_v4 = vld [vmem:[%s8186_s0 + $0x17c8] sm:$0xff] }
  0xc0   :  { %2521 = vmatmul.mubr.f32.gmra.mrb[62].mxu0 %v518_v5  ;;  %1285 = vmatprep.mubr.f32.mxu1 %v527_v6  ;;  %v766_v5 = vld [vmem:[%s8186_s0 + $0x1780] sm:$0xff] }
  0xc1   :  { %2525 = vmatprep.mubr.f32.mxu0 %v535_v7  ;;  %v774_v6 = vld [vmem:[%s8186_s0 + $0x17c0] sm:$0xff]  ;;  %v783_v7 = vld [vmem:[%s8186_s0 + $0x1808] sm:$0xff] }
  0xc3   :  { %1286 = vmatmul.mubr.f32.gmra.mrb[64].mxu1 %v526_v8  ;;  %v791_v8 = vld [vmem:[%s8186_s0 + $0x1848] sm:$0xff] }
  0xc4   :  { %2526 = vmatmul.mubr.f32.gmra.mrb[64].mxu0 %v534_v9  ;;  %1290 = vmatprep.mubr.f32.mxu1 %v543_v10  ;;  %v782_v9 = vld [vmem:[%s8186_s0 + $0x1800] sm:$0xff] }
  0xc5   :  { %2530 = vmatprep.mubr.f32.mxu0 %v551_v11  ;;  %v790_v10 = vld [vmem:[%s8186_s0 + $0x1840] sm:$0xff]  ;;  %v17_v11 = vld [vmem:[%s8186_s0 + $0x18] sm:$0xff] }
  0xc7   :  { %1291 = vmatmul.mubr.f32.gmra.mrb[66].mxu1 %v542_v12  ;;  %v862_v12 = vld [vmem:[%s8185_s1 + $0x200] sm:$0xff] }
  0xc8   :  { %2531 = vmatmul.mubr.f32.gmra.mrb[66].mxu0 %v550_v13  ;;  %1295 = vmatprep.mubr.f32.mxu1 %v559_v14  ;;  %v863_v13 = vld [vmem:[%s8185_s1 + $0x208] sm:$0xff]  ;;  %v25_v14 = vld [vmem:[%s8186_s0 + $0x58] sm:$0xff] }
  0xc9   :  { %2535 = vmatprep.mubr.f32.mxu0 %v567_v15  ;;  %v990_v15 = vld [vmem:[%s8185_s1 + $0x600] sm:$0xff] }
  0xcb   :  { %1296 = vmatmul.mubr.f32.gmra.mrb[68].mxu1 %v558_v16  ;;  %v991_v16 = vld [vmem:[%s8185_s1 + $0x608] sm:$0xff] }
  0xcc   :  { %2536 = vmatmul.mubr.f32.gmra.mrb[68].mxu0 %v566_v17  ;;  %1300 = vmatprep.mubr.f32.mxu1 %v575_v18  ;;  %v16_v17 = vld [vmem:[%s8186_s0 + $0x10] sm:$0xff]  ;;  %v3741_v18 = vpack.c.bf16 %v863_v13, %v862_v12  ;;  %v1002_v12 = vld [vmem:[%s8185_s1 + $0x660] sm:$0xff]  ;;  %v1003_v13 = vld [vmem:[%s8185_s1 + $0x668] sm:$0xff] }
  0xcd   :  { %2540 = vmatprep.mubr.f32.mxu0 %v583_v19  ;;  %v24_v19 = vld [vmem:[%s8186_s0 + $0x50] sm:$0xff] }
  0xcf   :  { %1301 = vmatmul.mubr.f32.gmra.mrb[70].mxu1 %v574_v20  ;;  %v33_v20 = vld [vmem:[%s8186_s0 + $0x98] sm:$0xff] }
  0xd0   :  { %2541 = vmatmul.mubr.f32.gmra.mrb[70].mxu0 %v582_v21  ;;  %1305 = vmatprep.mubr.f32.mxu1 %v591_v22  ;;  %v41_v21 = vld [vmem:[%s8186_s0 + $0xd8] sm:$0xff]  ;;  %v3933_v22 = vpack.c.bf16 %v991_v16, %v990_v15  ;;  %v120_v15 = vld [vmem:[%s8186_s0 + $0x350] sm:$0xff] }
  0xd1   :  { %2545 = vmatprep.mubr.f32.mxu0 %v599_v23  ;;  %v864_v23 = vld [vmem:[%s8185_s1 + $0x210] sm:$0xff]  ;;  %v129_v16 = vld [vmem:[%s8186_s0 + $0x398] sm:$0xff] }
  0xd3   :  { %1306 = vmatmul.mubr.f32.gmra.mrb[72].mxu1 %v590_v24  ;;  %v865_v24 = vld [vmem:[%s8185_s1 + $0x218] sm:$0xff] }
  0xd4   :  { %2546 = vmatmul.mubr.f32.gmra.mrb[72].mxu0 %v598_v25  ;;  %1310 = vmatprep.mubr.f32.mxu1 %v607_v26  ;;  %v992_v25 = vld [vmem:[%s8185_s1 + $0x610] sm:$0xff]  ;;  %v993_v26 = vld [vmem:[%s8185_s1 + $0x618] sm:$0xff] }
  0xd5   :  { %2550 = vmatprep.mubr.f32.mxu0 %v615_v27  ;;  %v32_v27 = vld [vmem:[%s8186_s0 + $0x90] sm:$0xff] }
  0xd7   :  { %1311 = vmatmul.mubr.f32.gmra.mrb[74].mxu1 %v606_v28  ;;  %v40_v28 = vld [vmem:[%s8186_s0 + $0xd0] sm:$0xff] }
  0xd8   :  { %2551 = vmatmul.mubr.f32.gmra.mrb[74].mxu0 %v614_v29  ;;  %1315 = vmatprep.mubr.f32.mxu1 %v623_v30  ;;  %v49_v29 = vld [vmem:[%s8186_s0 + $0x118] sm:$0xff]  ;;  %v3744_v30 = vpack.c.bf16 %v865_v24, %v864_v23  ;;  %v128_v24 = vld [vmem:[%s8186_s0 + $0x390] sm:$0xff] }
  0xd9   :  { %2555 = vmatprep.mubr.f32.mxu0 %v631_v31  ;;  %v57_v31 = vld [vmem:[%s8186_s0 + $0x158] sm:$0xff] }
  0xda   :  { %v1005_v23 = vld [vmem:[%s8185_s1 + $0x678] sm:$0xff] }
  0xdb   :  { %1316 = vmatmul.mubr.f32.gmra.mrb[76].mxu1 %v622_v32  ;;  %v3936_v32 = vpack.c.bf16 %v993_v26, %v992_v25  ;;  %v136_v25 = vld [vmem:[%s8186_s0 + $0x3d0] sm:$0xff]  ;;  %v145_v26 = vld [vmem:[%s8186_s0 + $0x418] sm:$0xff] }
  0xdc   :  { %2556 = vmatmul.mubr.f32.gmra.mrb[76].mxu0 %v630_v33  ;;  %1320 = vmatprep.mubr.f32.mxu1 %v639_v34  ;;  %v866_v33 = vld [vmem:[%s8185_s1 + $0x220] sm:$0xff]  ;;  %v867_v34 = vld [vmem:[%s8185_s1 + $0x228] sm:$0xff] }
  0xdd   :  { %2560 = vmatprep.mubr.f32.mxu0 %v647_v35  ;;  %v994_v35 = vld [vmem:[%s8185_s1 + $0x620] sm:$0xff] }
  0xdf   :  { %1321 = vmatmul.mubr.f32.gmra.mrb[78].mxu1 %v638_v36  ;;  %v995_v36 = vld [vmem:[%s8185_s1 + $0x628] sm:$0xff] }
  0xe0   :  { %2561 = vmatmul.mubr.f32.gmra.mrb[78].mxu0 %v646_v37  ;;  %1325 = vmatprep.mubr.f32.mxu1 %v655_v38  ;;  %v48_v37 = vld [vmem:[%s8186_s0 + $0x110] sm:$0xff] }
  0xe1   :  { %2565 = vmatprep.mubr.f32.mxu0 %v663_v39  ;;  %v56_v38 = vld [vmem:[%s8186_s0 + $0x150] sm:$0xff]  ;;  %v65_v39 = vld [vmem:[%s8186_s0 + $0x198] sm:$0xff] }
  0xe3   :  { %1326 = vmatmul.mubr.f32.gmra.mrb[80].mxu1 %v654_v40  ;;  %v3747_v40 = vpack.c.bf16 %v867_v34, %v866_v33  ;;  %v1007_v33 = vld [vmem:[%s8185_s1 + $0x688] sm:$0xff]  ;;  %v144_v34 = vld [vmem:[%s8186_s0 + $0x410] sm:$0xff] }
  0xe4   :  { %2566 = vmatmul.mubr.f32.gmra.mrb[80].mxu0 %v662_v41  ;;  %1330 = vmatprep.mubr.f32.mxu1 %v671_v42  ;;  %v73_v41 = vld [vmem:[%s8186_s0 + $0x1d8] sm:$0xff]  ;;  %v3939_v42 = vpack.c.bf16 %v995_v36, %v994_v35  ;;  %v152_v35 = vld [vmem:[%s8186_s0 + $0x450] sm:$0xff] }
  0xe5   :  { %2570 = vmatprep.mubr.f32.mxu0 %v679_v43  ;;  %v868_v43 = vld [vmem:[%s8185_s1 + $0x230] sm:$0xff]  ;;  %v161_v36 = vld [vmem:[%s8186_s0 + $0x498] sm:$0xff] }
  0xe7   :  { %1331 = vmatmul.mubr.f32.gmra.mrb[82].mxu1 %v670_v44  ;;  %v869_v44 = vld [vmem:[%s8185_s1 + $0x238] sm:$0xff] }
  0xe8   :  { %2571 = vmatmul.mubr.f32.gmra.mrb[82].mxu0 %v678_v45  ;;  %1335 = vmatprep.mubr.f32.mxu1 %v687_v46  ;;  %v996_v45 = vld [vmem:[%s8185_s1 + $0x630] sm:$0xff]  ;;  %v997_v46 = vld [vmem:[%s8185_s1 + $0x638] sm:$0xff] }
  0xe9   :  { %2575 = vmatprep.mubr.f32.mxu0 %v695_v47  ;;  %v64_v47 = vld [vmem:[%s8186_s0 + $0x190] sm:$0xff] }
  0xeb   :  { %1336 = vmatmul.mubr.f32.gmra.mrb[84].mxu1 %v686_v48  ;;  %v72_v48 = vld [vmem:[%s8186_s0 + $0x1d0] sm:$0xff] }
  0xec   :  { %2576 = vmatmul.mubr.f32.gmra.mrb[84].mxu0 %v694_v49  ;;  %1340 = vmatprep.mubr.f32.mxu1 %v703_v50  ;;  %v81_v49 = vld [vmem:[%s8186_s0 + $0x218] sm:$0xff]  ;;  %v3750_v50 = vpack.c.bf16 %v869_v44, %v868_v43  ;;  %v160_v44 = vld [vmem:[%s8186_s0 + $0x490] sm:$0xff] }
  0xed   :  { %2580 = vmatprep.mubr.f32.mxu0 %v711_v51  ;;  %v89_v51 = vld [vmem:[%s8186_s0 + $0x258] sm:$0xff] }
  0xee   :  { %v1009_v43 = vld [vmem:[%s8185_s1 + $0x698] sm:$0xff] }
  0xef   :  { %1341 = vmatmul.mubr.f32.gmra.mrb[86].mxu1 %v702_v52  ;;  %v3942_v52 = vpack.c.bf16 %v997_v46, %v996_v45  ;;  %v168_v45 = vld [vmem:[%s8186_s0 + $0x4d0] sm:$0xff]  ;;  %v177_v46 = vld [vmem:[%s8186_s0 + $0x518] sm:$0xff] }
  0xf0   :  { %2581 = vmatmul.mubr.f32.gmra.mrb[86].mxu0 %v710_v53  ;;  %1345 = vmatprep.mubr.f32.mxu1 %v719_v54  ;;  %v870_v53 = vld [vmem:[%s8185_s1 + $0x240] sm:$0xff]  ;;  %v871_v54 = vld [vmem:[%s8185_s1 + $0x248] sm:$0xff] }
  0xf1   :  { %2585 = vmatprep.mubr.f32.mxu0 %v727_v55  ;;  %v998_v55 = vld [vmem:[%s8185_s1 + $0x640] sm:$0xff] }
  0xf3   :  { %1346 = vmatmul.mubr.f32.gmra.mrb[88].mxu1 %v718_v56  ;;  %v999_v56 = vld [vmem:[%s8185_s1 + $0x648] sm:$0xff] }
  0xf4   :  { %2586 = vmatmul.mubr.f32.gmra.mrb[88].mxu0 %v726_v57  ;;  %1350 = vmatprep.mubr.f32.mxu1 %v735_v58  ;;  %v80_v57 = vld [vmem:[%s8186_s0 + $0x210] sm:$0xff] }
  0xf5   :  { %2590 = vmatprep.mubr.f32.mxu0 %v743_v59  ;;  %v88_v58 = vld [vmem:[%s8186_s0 + $0x250] sm:$0xff]  ;;  %v97_v59 = vld [vmem:[%s8186_s0 + $0x298] sm:$0xff] }
  0xf7   :  { %1351 = vmatmul.mubr.f32.gmra.mrb[90].mxu1 %v734_v60  ;;  %v3753_v60 = vpack.c.bf16 %v871_v54, %v870_v53  ;;  %v1011_v53 = vld [vmem:[%s8185_s1 + $0x6a8] sm:$0xff]  ;;  %v176_v54 = vld [vmem:[%s8186_s0 + $0x510] sm:$0xff] }
  0xf8   :  { %2591 = vmatmul.mubr.f32.gmra.mrb[90].mxu0 %v742_v61  ;;  %1355 = vmatprep.mubr.f32.mxu1 %v751_v62  ;;  %v105_v61 = vld [vmem:[%s8186_s0 + $0x2d8] sm:$0xff]  ;;  %v3945_v62 = vpack.c.bf16 %v999_v56, %v998_v55  ;;  %v184_v55 = vld [vmem:[%s8186_s0 + $0x550] sm:$0xff] }
  0xf9   :  { %2595 = vmatprep.mubr.f32.mxu0 %v759_v63  ;;  %v872_v63 = vld [vmem:[%s8185_s1 + $0x250] sm:$0xff]  ;;  %v193_v56 = vld [vmem:[%s8186_s0 + $0x598] sm:$0xff] }
  0xfb   :  { %1356 = vmatmul.mubr.f32.gmra.mrb[92].mxu1 %v750_v1  ;;  %v873_v1 = vld [vmem:[%s8185_s1 + $0x258] sm:$0xff] }
  0xfc   :  { %2596 = vmatmul.mubr.f32.gmra.mrb[92].mxu0 %v758_v2  ;;  %1360 = vmatprep.mubr.f32.mxu1 %v767_v3  ;;  %v1000_v2 = vld [vmem:[%s8185_s1 + $0x650] sm:$0xff]  ;;  %v1001_v3 = vld [vmem:[%s8185_s1 + $0x658] sm:$0xff] }
  0xfd   :  { %2600 = vmatprep.mubr.f32.mxu0 %v775_v4  ;;  %v96_v4 = vld [vmem:[%s8186_s0 + $0x290] sm:$0xff] }
  0xff   :  { %1361 = vmatmul.mubr.f32.gmra.mrb[94].mxu1 %v766_v5  ;;  %v104_v5 = vld [vmem:[%s8186_s0 + $0x2d0] sm:$0xff] }
 0x100   :  { %2601 = vmatmul.mubr.f32.gmra.mrb[94].mxu0 %v774_v6  ;;  %1365 = vmatprep.mubr.f32.mxu1 %v783_v7  ;;  %v113_v6 = vld [vmem:[%s8186_s0 + $0x318] sm:$0xff]  ;;  %v3756_v7 = vpack.c.bf16 %v873_v1, %v872_v63  ;;  %v192_v1 = vld [vmem:[%s8186_s0 + $0x590] sm:$0xff] }
 0x101   :  { %2605 = vmatprep.mubr.f32.mxu0 %v791_v8  ;;  %v121_v8 = vld [vmem:[%s8186_s0 + $0x358] sm:$0xff] }
 0x102   :  { %v1013_v63 = vld [vmem:[%s8185_s1 + $0x6b8] sm:$0xff] }
 0x103   :  { %1366 = vmatmul.mubr.f32.gmra.mrb[96].mxu1 %v782_v9  ;;  %v3948_v9 = vpack.c.bf16 %v1001_v3, %v1000_v2  ;;  %v200_v2 = vld [vmem:[%s8186_s0 + $0x5d0] sm:$0xff]  ;;  %v209_v3 = vld [vmem:[%s8186_s0 + $0x618] sm:$0xff] }
 0x104   :  { %2606 = vmatmul.mubr.f32.gmra.mrb[96].mxu0 %v790_v10  ;;  %1435 = vmatprep.mubr.f32.mxu1 %v17_v11  ;;  %v874_v10 = vld [vmem:[%s8185_s1 + $0x260] sm:$0xff]  ;;  %v875_v11 = vld [vmem:[%s8185_s1 + $0x268] sm:$0xff] }
 0x105   :  { %2675 = vmatprep.mubr.f32.mxu0 %v25_v14  ;;  %v112_v14 = vld [vmem:[%s8186_s0 + $0x310] sm:$0xff] }
 0x107   :  { %1436 = vmatmul.mubr.f32.vlgmr.msra.gmra.mrb[0].mxu1 %v16_v17  ;;  %v3759_v17 = vpack.c.bf16 %v875_v11, %v874_v10  ;;  %v1015_v10 = vld [vmem:[%s8185_s1 + $0x6c8] sm:$0xff]  ;;  %v208_v11 = vld [vmem:[%s8186_s0 + $0x610] sm:$0xff] }
 0x108   :  { %2676 = vmatmul.mubr.f32.vlgmr.msra.gmra.mrb[0].mxu0 %v24_v19  ;;  %3742 = vmatpush1.bf16.msra.mxu1 %v3741_v18  ;;  %v137_v18 = vld [vmem:[%s8186_s0 + $0x3d8] sm:$0xff]  ;;  %v3951_v19 = vpack.c.bf16 %v1003_v13, %v1002_v12  ;;  %v216_v12 = vld [vmem:[%s8186_s0 + $0x650] sm:$0xff] }
 0x109   :  { %1440 = vmatprep.mubr.f32.mxu1 %v33_v20  ;;  %2680 = vmatprep.mubr.f32.mxu0 %v41_v21  ;;  %v876_v20 = vld [vmem:[%s8185_s1 + $0x270] sm:$0xff]  ;;  %v877_v21 = vld [vmem:[%s8185_s1 + $0x278] sm:$0xff] }
 0x10a   :  { %3934 = vmatpush1.bf16.msra.mxu0 %v3933_v22  ;;  %3743 = vmatprep.subr.bf16.mxu1 %v4715_v0  ;;  %v1004_v22 = vld [vmem:[%s8185_s1 + $0x670] sm:$0xff]  ;;  %v225_v13 = vld [vmem:[%s8186_s0 + $0x698] sm:$0xff] }
 0x10b   :  { %1441 = vmatmul.mubr.f32.gmra.mrb[2].mxu1 %v32_v27  ;;  %3935 = vmatprep.subr.bf16.mxu0 %v4715_v0  ;;  %v3762_v27 = vpack.c.bf16 %v877_v21, %v876_v20  ;;  %v1017_v20 = vld [vmem:[%s8185_s1 + $0x6d8] sm:$0xff]  ;;  %v224_v21 = vld [vmem:[%s8186_s0 + $0x690] sm:$0xff] }
 0x10c   :  { %2681 = vmatmul.mubr.f32.gmra.mrb[2].mxu0 %v40_v28  ;;  %1445 = vmatprep.mubr.f32.mxu1 %v49_v29  ;;  %v153_v28 = vld [vmem:[%s8186_s0 + $0x458] sm:$0xff]  ;;  %v3954_v29 = vpack.c.bf16 %v1005_v23, %v1004_v22  ;;  %v232_v22 = vld [vmem:[%s8186_s0 + $0x6d0] sm:$0xff] }
 0x10d   :  { %2685 = vmatprep.mubr.f32.mxu0 %v57_v31  ;;  %3745 = vmatpush1.bf16.msra.mxu1 %v3744_v30  ;;  %v878_v30 = vld [vmem:[%s8185_s1 + $0x280] sm:$0xff]  ;;  %v879_v31 = vld [vmem:[%s8185_s1 + $0x288] sm:$0xff]  ;;  %v241_v23 = vld [vmem:[%s8186_s0 + $0x718] sm:$0xff] }
 0x10e   :  { %3937 = vmatpush1.bf16.msra.mxu0 %v3936_v32  ;;  %3746 = vmatprep.subr.bf16.mxu1 %v4715_v0  ;;  %v1006_v32 = vld [vmem:[%s8185_s1 + $0x680] sm:$0xff] }
 0x10f   :  { %1446 = vmatmul.mubr.f32.gmra.mrb[4].mxu1 %v48_v37  ;;  %3938 = vmatprep.subr.bf16.mxu0 %v4715_v0  ;;  %v3765_v37 = vpack.c.bf16 %v879_v31, %v878_v30  ;;  %v1019_v30 = vld [vmem:[%s8185_s1 + $0x6e8] sm:$0xff]  ;;  %v240_v31 = vld [vmem:[%s8186_s0 + $0x710] sm:$0xff] }
 0x110   :  { %2686 = vmatmul.mubr.f32.gmra.mrb[4].mxu0 %v56_v38  ;;  %1450 = vmatprep.mubr.f32.mxu1 %v65_v39  ;;  %v169_v38 = vld [vmem:[%s8186_s0 + $0x4d8] sm:$0xff]  ;;  %v3957_v39 = vpack.c.bf16 %v1007_v33, %v1006_v32  ;;  %v248_v32 = vld [vmem:[%s8186_s0 + $0x750] sm:$0xff] }
 0x111   :  { %2690 = vmatprep.mubr.f32.mxu0 %v73_v41  ;;  %3748 = vmatpush1.bf16.msra.mxu1 %v3747_v40  ;;  %v880_v40 = vld [vmem:[%s8185_s1 + $0x290] sm:$0xff]  ;;  %v881_v41 = vld [vmem:[%s8185_s1 + $0x298] sm:$0xff] }
 0x112   :  { %3940 = vmatpush1.bf16.msra.mxu0 %v3939_v42  ;;  %3749 = vmatprep.subr.bf16.mxu1 %v4715_v0  ;;  %v1008_v42 = vld [vmem:[%s8185_s1 + $0x690] sm:$0xff]  ;;  %v257_v33 = vld [vmem:[%s8186_s0 + $0x798] sm:$0xff] }
 0x113   :  { %1451 = vmatmul.mubr.f32.gmra.mrb[6].mxu1 %v64_v47  ;;  %3941 = vmatprep.subr.bf16.mxu0 %v4715_v0  ;;  %v3768_v47 = vpack.c.bf16 %v881_v41, %v880_v40  ;;  %v893_v40 = vld [vmem:[%s8185_s1 + $0x2f8] sm:$0xff] }
 0x114   :  { %2691 = vmatmul.mubr.f32.gmra.mrb[6].mxu0 %v72_v48  ;;  %1455 = vmatprep.mubr.f32.mxu1 %v81_v49  ;;  %v185_v48 = vld [vmem:[%s8186_s0 + $0x558] sm:$0xff]  ;;  %v3960_v49 = vpack.c.bf16 %v1009_v43, %v1008_v42  ;;  %v1020_v43 = vld [vmem:[%s8185_s1 + $0x6f0] sm:$0xff] }
 0x115   :  { %2695 = vmatprep.mubr.f32.mxu0 %v89_v51  ;;  %3751 = vmatpush1.bf16.msra.mxu1 %v3750_v50  ;;  %v882_v50 = vld [vmem:[%s8185_s1 + $0x2a0] sm:$0xff]  ;;  %v883_v51 = vld [vmem:[%s8185_s1 + $0x2a8] sm:$0xff]  ;;  %v273_v41 = vld [vmem:[%s8186_s0 + $0x818] sm:$0xff] }
 0x116   :  { %3943 = vmatpush1.bf16.msra.mxu0 %v3942_v52  ;;  %3752 = vmatprep.subr.bf16.mxu1 %v4715_v0  ;;  %v1010_v52 = vld [vmem:[%s8185_s1 + $0x6a0] sm:$0xff] }
 0x117   :  { %1456 = vmatmul.mubr.f32.gmra.mrb[8].mxu1 %v80_v57  ;;  %3944 = vmatprep.subr.bf16.mxu0 %v4715_v0  ;;  %v3771_v57 = vpack.c.bf16 %v883_v51, %v882_v50  ;;  %v297_v50 = vld [vmem:[%s8186_s0 + $0x8d8] sm:$0xff]  ;;  %v288_v51 = vld [vmem:[%s8186_s0 + $0x890] sm:$0xff] }
 0x118   :  { %2696 = vmatmul.mubr.f32.gmra.mrb[8].mxu0 %v88_v58  ;;  %1460 = vmatprep.mubr.f32.mxu1 %v97_v59  ;;  %v201_v58 = vld [vmem:[%s8186_s0 + $0x5d8] sm:$0xff]  ;;  %v3963_v59 = vpack.c.bf16 %v1011_v53, %v1010_v52  ;;  %v296_v52 = vld [vmem:[%s8186_s0 + $0x8d0] sm:$0xff] }
 0x119   :  { %2700 = vmatprep.mubr.f32.mxu0 %v105_v61  ;;  %3754 = vmatpush1.bf16.msra.mxu1 %v3753_v60  ;;  %v884_v60 = vld [vmem:[%s8185_s1 + $0x2b0] sm:$0xff]  ;;  %v885_v61 = vld [vmem:[%s8185_s1 + $0x2b8] sm:$0xff] }
 0x11a   :  { %3946 = vmatpush1.bf16.msra.mxu0 %v3945_v62  ;;  %3755 = vmatprep.subr.bf16.mxu1 %v4715_v0  ;;  %v1012_v62 = vld [vmem:[%s8185_s1 + $0x6b0] sm:$0xff]  ;;  %v305_v53 = vld [vmem:[%s8186_s0 + $0x918] sm:$0xff] }
 0x11b   :  { %1461 = vmatmul.mubr.f32.gmra.mrb[10].mxu1 %v96_v4  ;;  %3947 = vmatprep.subr.bf16.mxu0 %v4715_v0  ;;  %v3774_v4 = vpack.c.bf16 %v885_v61, %v884_v60  ;;  %v328_v60 = vld [vmem:[%s8186_s0 + $0x9d0] sm:$0xff]  ;;  %v337_v61 = vld [vmem:[%s8186_s0 + $0xa18] sm:$0xff] }
 0x11c   :  { %2701 = vmatmul.mubr.f32.gmra.mrb[10].mxu0 %v104_v5  ;;  %1465 = vmatprep.mubr.f32.mxu1 %v113_v6  ;;  %v217_v5 = vld [vmem:[%s8186_s0 + $0x658] sm:$0xff]  ;;  %v3966_v6 = vpack.c.bf16 %v1013_v63, %v1012_v62  ;;  %v336_v63 = vld [vmem:[%s8186_s0 + $0xa10] sm:$0xff] }
 0x11d   :  { %2705 = vmatprep.mubr.f32.mxu0 %v121_v8  ;;  %3757 = vmatpush1.bf16.msra.mxu1 %v3756_v7  ;;  %v886_v7 = vld [vmem:[%s8185_s1 + $0x2c0] sm:$0xff]  ;;  %v887_v8 = vld [vmem:[%s8185_s1 + $0x2c8] sm:$0xff]  ;;  %v345_v62 = vld [vmem:[%s8186_s0 + $0xa58] sm:$0xff] }
 0x11e   :  { %3949 = vmatpush1.bf16.msra.mxu0 %v3948_v9  ;;  %3758 = vmatprep.subr.bf16.mxu1 %v4715_v0  ;;  %v1014_v9 = vld [vmem:[%s8185_s1 + $0x6c0] sm:$0xff] }
 0x11f   :  { %1466 = vmatmul.mubr.f32.gmra.mrb[12].mxu1 %v112_v14  ;;  %3950 = vmatprep.subr.bf16.mxu0 %v4715_v0  ;;  %v3777_v14 = vpack.c.bf16 %v887_v8, %v886_v7  ;;  %v377_v7 = vld [vmem:[%s8186_s0 + $0xb58] sm:$0xff]  ;;  %v368_v8 = vld [vmem:[%s8186_s0 + $0xb10] sm:$0xff] }
 0x120   :  { %2706 = vmatmul.mubr.f32.gmra.mrb[12].mxu0 %v120_v15  ;;  %1470 = vmatprep.mubr.f32.mxu1 %v129_v16  ;;  %v233_v15 = vld [vmem:[%s8186_s0 + $0x6d8] sm:$0xff]  ;;  %v3969_v16 = vpack.c.bf16 %v1015_v10, %v1014_v9  ;;  %v376_v9 = vld [vmem:[%s8186_s0 + $0xb50] sm:$0xff] }
 0x121   :  { %2710 = vmatprep.mubr.f32.mxu0 %v137_v18  ;;  %3760 = vmatpush1.bf16.msra.mxu1 %v3759_v17  ;;  %v888_v17 = vld [vmem:[%s8185_s1 + $0x2d0] sm:$0xff]  ;;  %v889_v18 = vld [vmem:[%s8185_s1 + $0x2d8] sm:$0xff] }
 0x122   :  { %3952 = vmatpush1.bf16.msra.mxu0 %v3951_v19  ;;  %3761 = vmatprep.subr.bf16.mxu1 %v4715_v0  ;;  %v1016_v19 = vld [vmem:[%s8185_s1 + $0x6d0] sm:$0xff]  ;;  %v385_v10 = vld [vmem:[%s8186_s0 + $0xb98] sm:$0xff] }
 0x123   :  { %1471 = vmatmul.mubr.f32.gmra.mrb[14].mxu1 %v128_v24  ;;  %3953 = vmatprep.subr.bf16.mxu0 %v4715_v0  ;;  %v3780_v24 = vpack.c.bf16 %v889_v18, %v888_v17  ;;  %v408_v17 = vld [vmem:[%s8186_s0 + $0xc50] sm:$0xff]  ;;  %v417_v18 = vld [vmem:[%s8186_s0 + $0xc98] sm:$0xff] }
 0x124   :  { %2711 = vmatmul.mubr.f32.gmra.mrb[14].mxu0 %v136_v25  ;;  %1475 = vmatprep.mubr.f32.mxu1 %v145_v26  ;;  %v249_v25 = vld [vmem:[%s8186_s0 + $0x758] sm:$0xff]  ;;  %v3972_v26 = vpack.c.bf16 %v1017_v20, %v1016_v19  ;;  %v416_v20 = vld [vmem:[%s8186_s0 + $0xc90] sm:$0xff] }
 0x125   :  { %2715 = vmatprep.mubr.f32.mxu0 %v153_v28  ;;  %3763 = vmatpush1.bf16.msra.mxu1 %v3762_v27  ;;  %v890_v27 = vld [vmem:[%s8185_s1 + $0x2e0] sm:$0xff]  ;;  %v891_v28 = vld [vmem:[%s8185_s1 + $0x2e8] sm:$0xff]  ;;  %v425_v19 = vld [vmem:[%s8186_s0 + $0xcd8] sm:$0xff] }
 0x126   :  { %3955 = vmatpush1.bf16.msra.mxu0 %v3954_v29  ;;  %3764 = vmatprep.subr.bf16.mxu1 %v4715_v0  ;;  %v1018_v29 = vld [vmem:[%s8185_s1 + $0x6e0] sm:$0xff] }
 0x127   :  { %1476 = vmatmul.mubr.f32.gmra.mrb[16].mxu1 %v144_v34  ;;  %3956 = vmatprep.subr.bf16.mxu0 %v4715_v0  ;;  %v3783_v34 = vpack.c.bf16 %v891_v28, %v890_v27  ;;  %v457_v27 = vld [vmem:[%s8186_s0 + $0xdd8] sm:$0xff]  ;;  %v448_v28 = vld [vmem:[%s8186_s0 + $0xd90] sm:$0xff] }
 0x128   :  { %2716 = vmatmul.mubr.f32.gmra.mrb[16].mxu0 %v152_v35  ;;  %1480 = vmatprep.mubr.f32.mxu1 %v161_v36  ;;  %v265_v35 = vld [vmem:[%s8186_s0 + $0x7d8] sm:$0xff]  ;;  %v3975_v36 = vpack.c.bf16 %v1019_v30, %v1018_v29  ;;  %v456_v29 = vld [vmem:[%s8186_s0 + $0xdd0] sm:$0xff] }
 0x129   :  { %2720 = vmatprep.mubr.f32.mxu0 %v169_v38  ;;  %3766 = vmatpush1.bf16.msra.mxu1 %v3765_v37  ;;  %v256_v37 = vld [vmem:[%s8186_s0 + $0x790] sm:$0xff]  ;;  %v465_v30 = vld [vmem:[%s8186_s0 + $0xe18] sm:$0xff] }
 0x12a   :  { %3958 = vmatpush1.bf16.msra.mxu0 %v3957_v39  ;;  %3767 = vmatprep.subr.bf16.mxu1 %v4715_v0  ;;  %v264_v38 = vld [vmem:[%s8186_s0 + $0x7d0] sm:$0xff] }
 0x12b   :  { %1481 = vmatmul.mubr.f32.gmra.mrb[18].mxu1 %v160_v44  ;;  %3959 = vmatprep.subr.bf16.mxu0 %v4715_v0  ;;  %v892_v39 = vld [vmem:[%s8185_s1 + $0x2f0] sm:$0xff]  ;;  %v1021_v44 = vld [vmem:[%s8185_s1 + $0x6f8] sm:$0xff] }
 0x12c   :  { %2721 = vmatmul.mubr.f32.gmra.mrb[18].mxu0 %v168_v45  ;;  %1485 = vmatprep.mubr.f32.mxu1 %v177_v46  ;;  %v3786_v42 = vpack.c.bf16 %v893_v40, %v892_v39  ;;  %v281_v45 = vld [vmem:[%s8186_s0 + $0x858] sm:$0xff]  ;;  %v3978_v46 = vpack.c.bf16 %v1021_v44, %v1020_v43  ;;  %v496_v40 = vld [vmem:[%s8186_s0 + $0xf10] sm:$0xff] }
 0x12d   :  { %2725 = vmatprep.mubr.f32.mxu0 %v185_v48  ;;  %3769 = vmatpush1.bf16.msra.mxu1 %v3768_v47  ;;  %v272_v47 = vld [vmem:[%s8186_s0 + $0x810] sm:$0xff]  ;;  %v505_v39 = vld [vmem:[%s8186_s0 + $0xf58] sm:$0xff] }
 0x12e   :  { %3961 = vmatpush1.bf16.msra.mxu0 %v3960_v49  ;;  %3770 = vmatprep.subr.bf16.mxu1 %v4715_v0  ;;  %v280_v48 = vld [vmem:[%s8186_s0 + $0x850] sm:$0xff]  ;;  %v289_v49 = vld [vmem:[%s8186_s0 + $0x898] sm:$0xff] }
 0x12f   :  { %1486 = vmatmul.mubr.f32.gmra.mrb[20].mxu1 %v176_v54  ;;  %3962 = vmatprep.subr.bf16.mxu0 %v4715_v0  ;;  %v313_v54 = vld [vmem:[%s8186_s0 + $0x958] sm:$0xff]  ;;  %v512_v44 = vld [vmem:[%s8186_s0 + $0xf90] sm:$0xff] }
 0x130   :  { %2726 = vmatmul.mubr.f32.gmra.mrb[20].mxu0 %v184_v55  ;;  %1490 = vmatprep.mubr.f32.mxu1 %v193_v56  ;;  %v304_v55 = vld [vmem:[%s8186_s0 + $0x910] sm:$0xff]  ;;  %v521_v43 = vld [vmem:[%s8186_s0 + $0xfd8] sm:$0xff] }
 0x131   :  { %2730 = vmatprep.mubr.f32.mxu0 %v201_v58  ;;  %3772 = vmatpush1.bf16.msra.mxu1 %v3771_v57  ;;  %v312_v56 = vld [vmem:[%s8186_s0 + $0x950] sm:$0xff]  ;;  %v321_v57 = vld [vmem:[%s8186_s0 + $0x998] sm:$0xff] }
 0x132   :  { %3964 = vmatpush1.bf16.msra.mxu0 %v3963_v59  ;;  %3773 = vmatprep.subr.bf16.mxu1 %v4715_v0  ;;  %v329_v58 = vld [vmem:[%s8186_s0 + $0x9d8] sm:$0xff]  ;;  %v320_v59 = vld [vmem:[%s8186_s0 + $0x990] sm:$0xff] }
 0x133   :  { %1491 = vmatmul.mubr.f32.gmra.mrb[22].mxu1 %v192_v1  ;;  %3965 = vmatprep.subr.bf16.mxu0 %v4715_v0  ;;  %v344_v1 = vld [vmem:[%s8186_s0 + $0xa50] sm:$0xff] }
 0x134   :  { %2731 = vmatmul.mubr.f32.gmra.mrb[22].mxu0 %v200_v2  ;;  %1495 = vmatprep.mubr.f32.mxu1 %v209_v3  ;;  %v353_v2 = vld [vmem:[%s8186_s0 + $0xa98] sm:$0xff] }
 0x135   :  { %2735 = vmatprep.mubr.f32.mxu0 %v217_v5  ;;  %3775 = vmatpush1.bf16.msra.mxu1 %v3774_v4  ;;  %v361_v3 = vld [vmem:[%s8186_s0 + $0xad8] sm:$0xff]  ;;  %v352_v4 = vld [vmem:[%s8186_s0 + $0xa90] sm:$0xff] }
 0x136   :  { %3967 = vmatpush1.bf16.msra.mxu0 %v3966_v6  ;;  %3776 = vmatprep.subr.bf16.mxu1 %v4715_v0  ;;  %v360_v5 = vld [vmem:[%s8186_s0 + $0xad0] sm:$0xff]  ;;  %v369_v6 = vld [vmem:[%s8186_s0 + $0xb18] sm:$0xff] }
 0x137   :  { %1496 = vmatmul.mubr.f32.gmra.mrb[24].mxu1 %v208_v11  ;;  %3968 = vmatprep.subr.bf16.mxu0 %v4715_v0  ;;  %v393_v11 = vld [vmem:[%s8186_s0 + $0xbd8] sm:$0xff] }
 0x138   :  { %2736 = vmatmul.mubr.f32.gmra.mrb[24].mxu0 %v216_v12  ;;  %1500 = vmatprep.mubr.f32.mxu1 %v225_v13  ;;  %v384_v12 = vld [vmem:[%s8186_s0 + $0xb90] sm:$0xff] }
 0x139   :  { %2740 = vmatprep.mubr.f32.mxu0 %v233_v15  ;;  %3778 = vmatpush1.bf16.msra.mxu1 %v3777_v14  ;;  %v392_v13 = vld [vmem:[%s8186_s0 + $0xbd0] sm:$0xff]  ;;  %v401_v14 = vld [vmem:[%s8186_s0 + $0xc18] sm:$0xff] }
 0x13a   :  { %3970 = vmatpush1.bf16.msra.mxu0 %v3969_v16  ;;  %3779 = vmatprep.subr.bf16.mxu1 %v4715_v0  ;;  %v409_v15 = vld [vmem:[%s8186_s0 + $0xc58] sm:$0xff]  ;;  %v400_v16 = vld [vmem:[%s8186_s0 + $0xc10] sm:$0xff] }
 0x13b   :  { %1501 = vmatmul.mubr.f32.gmra.mrb[26].mxu1 %v224_v21  ;;  %3971 = vmatprep.subr.bf16.mxu0 %v4715_v0  ;;  %v424_v21 = vld [vmem:[%s8186_s0 + $0xcd0] sm:$0xff] }
 0x13c   :  { %2741 = vmatmul.mubr.f32.gmra.mrb[26].mxu0 %v232_v22  ;;  %1505 = vmatprep.mubr.f32.mxu1 %v241_v23  ;;  %v433_v22 = vld [vmem:[%s8186_s0 + $0xd18] sm:$0xff] }
 0x13d   :  { %2745 = vmatprep.mubr.f32.mxu0 %v249_v25  ;;  %3781 = vmatpush1.bf16.msra.mxu1 %v3780_v24  ;;  %v441_v23 = vld [vmem:[%s8186_s0 + $0xd58] sm:$0xff]  ;;  %v432_v24 = vld [vmem:[%s8186_s0 + $0xd10] sm:$0xff] }
 0x13e   :  { %3973 = vmatpush1.bf16.msra.mxu0 %v3972_v26  ;;  %3782 = vmatprep.subr.bf16.mxu1 %v4715_v0  ;;  %v440_v25 = vld [vmem:[%s8186_s0 + $0xd50] sm:$0xff]  ;;  %v449_v26 = vld [vmem:[%s8186_s0 + $0xd98] sm:$0xff] }
 0x13f   :  { %1506 = vmatmul.mubr.f32.gmra.mrb[28].mxu1 %v240_v31  ;;  %3974 = vmatprep.subr.bf16.mxu0 %v4715_v0  ;;  %v473_v31 = vld [vmem:[%s8186_s0 + $0xe58] sm:$0xff] }
 0x140   :  { %2746 = vmatmul.mubr.f32.gmra.mrb[28].mxu0 %v248_v32  ;;  %1510 = vmatprep.mubr.f32.mxu1 %v257_v33  ;;  %v464_v32 = vld [vmem:[%s8186_s0 + $0xe10] sm:$0xff] }
 0x141   :  { %2750 = vmatprep.mubr.f32.mxu0 %v265_v35  ;;  %3784 = vmatpush1.bf16.msra.mxu1 %v3783_v34  ;;  %v472_v33 = vld [vmem:[%s8186_s0 + $0xe50] sm:$0xff]  ;;  %v481_v34 = vld [vmem:[%s8186_s0 + $0xe98] sm:$0xff] }
 0x142   :  { %3976 = vmatpush1.bf16.msra.mxu0 %v3975_v36  ;;  %3785 = vmatprep.subr.bf16.mxu1 %v4715_v0  ;;  %v489_v35 = vld [vmem:[%s8186_s0 + $0xed8] sm:$0xff]  ;;  %v480_v36 = vld [vmem:[%s8186_s0 + $0xe90] sm:$0xff] }
 0x143   :  { %1511 = vmatmul.mubr.f32.gmra.mrb[30].mxu1 %v256_v37  ;;  %3977 = vmatprep.subr.bf16.mxu0 %v4715_v0  ;;  %v488_v37 = vld [vmem:[%s8186_s0 + $0xed0] sm:$0xff] }
 0x144   :  { %2751 = vmatmul.mubr.f32.gmra.mrb[30].mxu0 %v264_v38  ;;  %1515 = vmatprep.mubr.f32.mxu1 %v273_v41  ;;  %v497_v38 = vld [vmem:[%s8186_s0 + $0xf18] sm:$0xff]  ;;  %v504_v41 = vld [vmem:[%s8186_s0 + $0xf50] sm:$0xff] }
 0x145   :  { %2755 = vmatprep.mubr.f32.mxu0 %v281_v45  ;;  %3787 = vmatpush1.bf16.msra.mxu1 %v3786_v42  ;;  %v513_v42 = vld [vmem:[%s8186_s0 + $0xf98] sm:$0xff]  ;;  %v520_v45 = vld [vmem:[%s8186_s0 + $0xfd0] sm:$0xff] }
 0x146   :  { %3979 = vmatpush1.bf16.msra.mxu0 %v3978_v46  ;;  %3788 = vmatprep.subr.bf16.mxu1 %v4715_v0  ;;  %v529_v46 = vld [vmem:[%s8186_s0 + $0x1018] sm:$0xff] }
 0x147   :  { %1516 = vmatmul.mubr.f32.gmra.mrb[32].mxu1 %v272_v47  ;;  %3980 = vmatprep.subr.bf16.mxu0 %v4715_v0  ;;  %v537_v47 = vld [vmem:[%s8186_s0 + $0x1058] sm:$0xff] }
 0x148   :  { %2756 = vmatmul.mubr.f32.gmra.mrb[32].mxu0 %v280_v48  ;;  %1520 = vmatprep.mubr.f32.mxu1 %v289_v49  ;;  %v528_v48 = vld [vmem:[%s8186_s0 + $0x1010] sm:$0xff] }
 0x149   :  { %2760 = vmatprep.mubr.f32.mxu0 %v297_v50  ;;  %v536_v49 = vld [vmem:[%s8186_s0 + $0x1050] sm:$0xff]  ;;  %v545_v50 = vld [vmem:[%s8186_s0 + $0x1098] sm:$0xff] }
 0x14b   :  { %1521 = vmatmul.mubr.f32.gmra.mrb[34].mxu1 %v288_v51  ;;  %v553_v51 = vld [vmem:[%s8186_s0 + $0x10d8] sm:$0xff] }
 0x14c   :  { %2761 = vmatmul.mubr.f32.gmra.mrb[34].mxu0 %v296_v52  ;;  %1525 = vmatprep.mubr.f32.mxu1 %v305_v53  ;;  %v544_v52 = vld [vmem:[%s8186_s0 + $0x1090] sm:$0xff] }
 0x14d   :  { %2765 = vmatprep.mubr.f32.mxu0 %v313_v54  ;;  %v552_v53 = vld [vmem:[%s8186_s0 + $0x10d0] sm:$0xff]  ;;  %v561_v54 = vld [vmem:[%s8186_s0 + $0x1118] sm:$0xff] }
 0x14f   :  { %1526 = vmatmul.mubr.f32.gmra.mrb[36].mxu1 %v304_v55  ;;  %v569_v55 = vld [vmem:[%s8186_s0 + $0x1158] sm:$0xff] }
 0x150   :  { %2766 = vmatmul.mubr.f32.gmra.mrb[36].mxu0 %v312_v56  ;;  %1530 = vmatprep.mubr.f32.mxu1 %v321_v57  ;;  %v560_v56 = vld [vmem:[%s8186_s0 + $0x1110] sm:$0xff] }
 0x151   :  { %2770 = vmatprep.mubr.f32.mxu0 %v329_v58  ;;  %v568_v57 = vld [vmem:[%s8186_s0 + $0x1150] sm:$0xff]  ;;  %v577_v58 = vld [vmem:[%s8186_s0 + $0x1198] sm:$0xff] }
 0x153   :  { %1531 = vmatmul.mubr.f32.gmra.mrb[38].mxu1 %v320_v59  ;;  %v585_v59 = vld [vmem:[%s8186_s0 + $0x11d8] sm:$0xff] }
 0x154   :  { %2771 = vmatmul.mubr.f32.gmra.mrb[38].mxu0 %v328_v60  ;;  %1535 = vmatprep.mubr.f32.mxu1 %v337_v61  ;;  %v576_v60 = vld [vmem:[%s8186_s0 + $0x1190] sm:$0xff] }
 0x155   :  { %2775 = vmatprep.mubr.f32.mxu0 %v345_v62  ;;  %v584_v61 = vld [vmem:[%s8186_s0 + $0x11d0] sm:$0xff]  ;;  %v593_v62 = vld [vmem:[%s8186_s0 + $0x1218] sm:$0xff] }
 0x157   :  { %1536 = vmatmul.mubr.f32.gmra.mrb[40].mxu1 %v336_v63  ;;  %v601_v63 = vld [vmem:[%s8186_s0 + $0x1258] sm:$0xff] }
 0x158   :  { %2776 = vmatmul.mubr.f32.gmra.mrb[40].mxu0 %v344_v1  ;;  %1540 = vmatprep.mubr.f32.mxu1 %v353_v2  ;;  %v592_v1 = vld [vmem:[%s8186_s0 + $0x1210] sm:$0xff] }
 0x159   :  { %2780 = vmatprep.mubr.f32.mxu0 %v361_v3  ;;  %v600_v2 = vld [vmem:[%s8186_s0 + $0x1250] sm:$0xff]  ;;  %v609_v3 = vld [vmem:[%s8186_s0 + $0x1298] sm:$0xff] }
 0x15b   :  { %1541 = vmatmul.mubr.f32.gmra.mrb[42].mxu1 %v352_v4  ;;  %v617_v4 = vld [vmem:[%s8186_s0 + $0x12d8] sm:$0xff] }
 0x15c   :  { %2781 = vmatmul.mubr.f32.gmra.mrb[42].mxu0 %v360_v5  ;;  %1545 = vmatprep.mubr.f32.mxu1 %v369_v6  ;;  %v608_v5 = vld [vmem:[%s8186_s0 + $0x1290] sm:$0xff] }
 0x15d   :  { %2785 = vmatprep.mubr.f32.mxu0 %v377_v7  ;;  %v616_v6 = vld [vmem:[%s8186_s0 + $0x12d0] sm:$0xff]  ;;  %v625_v7 = vld [vmem:[%s8186_s0 + $0x1318] sm:$0xff] }
 0x15f   :  { %1546 = vmatmul.mubr.f32.gmra.mrb[44].mxu1 %v368_v8  ;;  %v633_v8 = vld [vmem:[%s8186_s0 + $0x1358] sm:$0xff] }
 0x160   :  { %2786 = vmatmul.mubr.f32.gmra.mrb[44].mxu0 %v376_v9  ;;  %1550 = vmatprep.mubr.f32.mxu1 %v385_v10  ;;  %v624_v9 = vld [vmem:[%s8186_s0 + $0x1310] sm:$0xff] }
 0x161   :  { %2790 = vmatprep.mubr.f32.mxu0 %v393_v11  ;;  %v632_v10 = vld [vmem:[%s8186_s0 + $0x1350] sm:$0xff]  ;;  %v641_v11 = vld [vmem:[%s8186_s0 + $0x1398] sm:$0xff] }
 0x163   :  { %1551 = vmatmul.mubr.f32.gmra.mrb[46].mxu1 %v384_v12  ;;  %v649_v12 = vld [vmem:[%s8186_s0 + $0x13d8] sm:$0xff] }
 0x164   :  { %2791 = vmatmul.mubr.f32.gmra.mrb[46].mxu0 %v392_v13  ;;  %1555 = vmatprep.mubr.f32.mxu1 %v401_v14  ;;  %v640_v13 = vld [vmem:[%s8186_s0 + $0x1390] sm:$0xff] }
 0x165   :  { %2795 = vmatprep.mubr.f32.mxu0 %v409_v15  ;;  %v648_v14 = vld [vmem:[%s8186_s0 + $0x13d0] sm:$0xff]  ;;  %v657_v15 = vld [vmem:[%s8186_s0 + $0x1418] sm:$0xff] }
 0x167   :  { %1556 = vmatmul.mubr.f32.gmra.mrb[48].mxu1 %v400_v16  ;;  %v665_v16 = vld [vmem:[%s8186_s0 + $0x1458] sm:$0xff] }
 0x168   :  { %2796 = vmatmul.mubr.f32.gmra.mrb[48].mxu0 %v408_v17  ;;  %1560 = vmatprep.mubr.f32.mxu1 %v417_v18  ;;  %v656_v17 = vld [vmem:[%s8186_s0 + $0x1410] sm:$0xff] }
 0x169   :  { %2800 = vmatprep.mubr.f32.mxu0 %v425_v19  ;;  %v664_v18 = vld [vmem:[%s8186_s0 + $0x1450] sm:$0xff]  ;;  %v673_v19 = vld [vmem:[%s8186_s0 + $0x1498] sm:$0xff] }
 0x16b   :  { %1561 = vmatmul.mubr.f32.gmra.mrb[50].mxu1 %v416_v20  ;;  %v681_v20 = vld [vmem:[%s8186_s0 + $0x14d8] sm:$0xff] }
 0x16c   :  { %2801 = vmatmul.mubr.f32.gmra.mrb[50].mxu0 %v424_v21  ;;  %1565 = vmatprep.mubr.f32.mxu1 %v433_v22  ;;  %v672_v21 = vld [vmem:[%s8186_s0 + $0x1490] sm:$0xff] }
 0x16d   :  { %2805 = vmatprep.mubr.f32.mxu0 %v441_v23  ;;  %v680_v22 = vld [vmem:[%s8186_s0 + $0x14d0] sm:$0xff]  ;;  %v689_v23 = vld [vmem:[%s8186_s0 + $0x1518] sm:$0xff] }
 0x16f   :  { %1566 = vmatmul.mubr.f32.gmra.mrb[52].mxu1 %v432_v24  ;;  %v697_v24 = vld [vmem:[%s8186_s0 + $0x1558] sm:$0xff] }
 0x170   :  { %2806 = vmatmul.mubr.f32.gmra.mrb[52].mxu0 %v440_v25  ;;  %1570 = vmatprep.mubr.f32.mxu1 %v449_v26  ;;  %v688_v25 = vld [vmem:[%s8186_s0 + $0x1510] sm:$0xff] }
 0x171   :  { %2810 = vmatprep.mubr.f32.mxu0 %v457_v27  ;;  %v696_v26 = vld [vmem:[%s8186_s0 + $0x1550] sm:$0xff]  ;;  %v705_v27 = vld [vmem:[%s8186_s0 + $0x1598] sm:$0xff] }
 0x173   :  { %1571 = vmatmul.mubr.f32.gmra.mrb[54].mxu1 %v448_v28  ;;  %v713_v28 = vld [vmem:[%s8186_s0 + $0x15d8] sm:$0xff] }
 0x174   :  { %2811 = vmatmul.mubr.f32.gmra.mrb[54].mxu0 %v456_v29  ;;  %1575 = vmatprep.mubr.f32.mxu1 %v465_v30  ;;  %v704_v29 = vld [vmem:[%s8186_s0 + $0x1590] sm:$0xff] }
 0x175   :  { %2815 = vmatprep.mubr.f32.mxu0 %v473_v31  ;;  %v712_v30 = vld [vmem:[%s8186_s0 + $0x15d0] sm:$0xff]  ;;  %v721_v31 = vld [vmem:[%s8186_s0 + $0x1618] sm:$0xff] }
 0x177   :  { %1576 = vmatmul.mubr.f32.gmra.mrb[56].mxu1 %v464_v32  ;;  %v729_v32 = vld [vmem:[%s8186_s0 + $0x1658] sm:$0xff] }
 0x178   :  { %2816 = vmatmul.mubr.f32.gmra.mrb[56].mxu0 %v472_v33  ;;  %1580 = vmatprep.mubr.f32.mxu1 %v481_v34  ;;  %v720_v33 = vld [vmem:[%s8186_s0 + $0x1610] sm:$0xff] }
 0x179   :  { %2820 = vmatprep.mubr.f32.mxu0 %v489_v35  ;;  %v728_v34 = vld [vmem:[%s8186_s0 + $0x1650] sm:$0xff]  ;;  %v737_v35 = vld [vmem:[%s8186_s0 + $0x1698] sm:$0xff] }
 0x17b   :  { %1581 = vmatmul.mubr.f32.gmra.mrb[58].mxu1 %v480_v36  ;;  %v745_v36 = vld [vmem:[%s8186_s0 + $0x16d8] sm:$0xff] }
 0x17c   :  { %2821 = vmatmul.mubr.f32.gmra.mrb[58].mxu0 %v488_v37  ;;  %1585 = vmatprep.mubr.f32.mxu1 %v497_v38  ;;  %v736_v37 = vld [vmem:[%s8186_s0 + $0x1690] sm:$0xff] }
 0x17d   :  { %2825 = vmatprep.mubr.f32.mxu0 %v505_v39  ;;  %v744_v38 = vld [vmem:[%s8186_s0 + $0x16d0] sm:$0xff]  ;;  %v753_v39 = vld [vmem:[%s8186_s0 + $0x1718] sm:$0xff] }
 0x17f   :  { %1586 = vmatmul.mubr.f32.gmra.mrb[60].mxu1 %v496_v40  ;;  %v761_v40 = vld [vmem:[%s8186_s0 + $0x1758] sm:$0xff] }
 0x180   :  { %2826 = vmatmul.mubr.f32.gmra.mrb[60].mxu0 %v504_v41  ;;  %1590 = vmatprep.mubr.f32.mxu1 %v513_v42  ;;  %v752_v41 = vld [vmem:[%s8186_s0 + $0x1710] sm:$0xff] }
 0x181   :  { %2830 = vmatprep.mubr.f32.mxu0 %v521_v43  ;;  %v760_v42 = vld [vmem:[%s8186_s0 + $0x1750] sm:$0xff]  ;;  %v769_v43 = vld [vmem:[%s8186_s0 + $0x1798] sm:$0xff] }
 0x183   :  { %1591 = vmatmul.mubr.f32.gmra.mrb[62].mxu1 %v512_v44  ;;  %v777_v44 = vld [vmem:[%s8186_s0 + $0x17d8] sm:$0xff] }
 0x184   :  { %2831 = vmatmul.mubr.f32.gmra.mrb[62].mxu0 %v520_v45  ;;  %1595 = vmatprep.mubr.f32.mxu1 %v529_v46  ;;  %v768_v45 = vld [vmem:[%s8186_s0 + $0x1790] sm:$0xff] }
 0x185   :  { %2835 = vmatprep.mubr.f32.mxu0 %v537_v47  ;;  %v776_v46 = vld [vmem:[%s8186_s0 + $0x17d0] sm:$0xff]  ;;  %v785_v47 = vld [vmem:[%s8186_s0 + $0x1818] sm:$0xff] }
 0x187   :  { %1596 = vmatmul.mubr.f32.gmra.mrb[64].mxu1 %v528_v48  ;;  %v793_v48 = vld [vmem:[%s8186_s0 + $0x1858] sm:$0xff] }
 0x188   :  { %2836 = vmatmul.mubr.f32.gmra.mrb[64].mxu0 %v536_v49  ;;  %1600 = vmatprep.mubr.f32.mxu1 %v545_v50  ;;  %v784_v49 = vld [vmem:[%s8186_s0 + $0x1810] sm:$0xff] }
 0x189   :  { %2840 = vmatprep.mubr.f32.mxu0 %v553_v51  ;;  %v792_v50 = vld [vmem:[%s8186_s0 + $0x1850] sm:$0xff]  ;;  %v19_v51 = vld [vmem:[%s8186_s0 + $0x28] sm:$0xff] }
 0x18b   :  { %1601 = vmatmul.mubr.f32.gmra.mrb[66].mxu1 %v544_v52  ;;  %v894_v52 = vld [vmem:[%s8185_s1 + $0x300] sm:$0xff] }
 0x18c   :  { %2841 = vmatmul.mubr.f32.gmra.mrb[66].mxu0 %v552_v53  ;;  %1605 = vmatprep.mubr.f32.mxu1 %v561_v54  ;;  %v895_v53 = vld [vmem:[%s8185_s1 + $0x308] sm:$0xff] }
 0x18d   :  { %2845 = vmatprep.mubr.f32.mxu0 %v569_v55  ;;  %v27_v54 = vld [vmem:[%s8186_s0 + $0x68] sm:$0xff]  ;;  %v1022_v55 = vld [vmem:[%s8185_s1 + $0x700] sm:$0xff] }
 0x18f   :  { %1606 = vmatmul.mubr.f32.gmra.mrb[68].mxu1 %v560_v56  ;;  %v1023_v56 = vld [vmem:[%s8185_s1 + $0x708] sm:$0xff] }
 0x190   :  { %2846 = vmatmul.mubr.f32.gmra.mrb[68].mxu0 %v568_v57  ;;  %1610 = vmatprep.mubr.f32.mxu1 %v577_v58  ;;  %v18_v57 = vld [vmem:[%s8186_s0 + $0x20] sm:$0xff]  ;;  %v3789_v58 = vpack.c.bf16 %v895_v53, %v894_v52  ;;  %v1035_v53 = vld [vmem:[%s8185_s1 + $0x768] sm:$0xff] }
 0x191   :  { %2850 = vmatprep.mubr.f32.mxu0 %v585_v59  ;;  %v26_v59 = vld [vmem:[%s8186_s0 + $0x60] sm:$0xff] }
 0x192   :  { %v1034_v52 = vld [vmem:[%s8185_s1 + $0x760] sm:$0xff] }
 0x193   :  { %1611 = vmatmul.mubr.f32.gmra.mrb[70].mxu1 %v576_v60  ;;  %v35_v60 = vld [vmem:[%s8186_s0 + $0xa8] sm:$0xff] }
 0x194   :  { %2851 = vmatmul.mubr.f32.gmra.mrb[70].mxu0 %v584_v61  ;;  %1615 = vmatprep.mubr.f32.mxu1 %v593_v62  ;;  %v43_v61 = vld [vmem:[%s8186_s0 + $0xe8] sm:$0xff]  ;;  %v3981_v62 = vpack.c.bf16 %v1023_v56, %v1022_v55  ;;  %v122_v55 = vld [vmem:[%s8186_s0 + $0x360] sm:$0xff] }
 0x195   :  { %2855 = vmatprep.mubr.f32.mxu0 %v601_v63  ;;  %v896_v63 = vld [vmem:[%s8185_s1 + $0x310] sm:$0xff]  ;;  %v131_v56 = vld [vmem:[%s8186_s0 + $0x3a8] sm:$0xff] }
 0x197   :  { %1616 = vmatmul.mubr.f32.gmra.mrb[72].mxu1 %v592_v1  ;;  %v897_v1 = vld [vmem:[%s8185_s1 + $0x318] sm:$0xff] }
 0x198   :  { %2856 = vmatmul.mubr.f32.gmra.mrb[72].mxu0 %v600_v2  ;;  %1620 = vmatprep.mubr.f32.mxu1 %v609_v3  ;;  %v1024_v2 = vld [vmem:[%s8185_s1 + $0x710] sm:$0xff]  ;;  %v1025_v3 = vld [vmem:[%s8185_s1 + $0x718] sm:$0xff] }
 0x199   :  { %2860 = vmatprep.mubr.f32.mxu0 %v617_v4  ;;  %v34_v4 = vld [vmem:[%s8186_s0 + $0xa0] sm:$0xff] }
 0x19b   :  { %1621 = vmatmul.mubr.f32.gmra.mrb[74].mxu1 %v608_v5  ;;  %v42_v5 = vld [vmem:[%s8186_s0 + $0xe0] sm:$0xff] }
 0x19c   :  { %2861 = vmatmul.mubr.f32.gmra.mrb[74].mxu0 %v616_v6  ;;  %1625 = vmatprep.mubr.f32.mxu1 %v625_v7  ;;  %v51_v6 = vld [vmem:[%s8186_s0 + $0x128] sm:$0xff]  ;;  %v3792_v7 = vpack.c.bf16 %v897_v1, %v896_v63  ;;  %v1037_v63 = vld [vmem:[%s8185_s1 + $0x778] sm:$0xff]  ;;  %v130_v1 = vld [vmem:[%s8186_s0 + $0x3a0] sm:$0xff] }
 0x19d   :  { %2865 = vmatprep.mubr.f32.mxu0 %v633_v8  ;;  %v59_v8 = vld [vmem:[%s8186_s0 + $0x168] sm:$0xff] }
 0x19f   :  { %1626 = vmatmul.mubr.f32.gmra.mrb[76].mxu1 %v624_v9  ;;  %v3984_v9 = vpack.c.bf16 %v1025_v3, %v1024_v2  ;;  %v138_v2 = vld [vmem:[%s8186_s0 + $0x3e0] sm:$0xff]  ;;  %v147_v3 = vld [vmem:[%s8186_s0 + $0x428] sm:$0xff] }
 0x1a0   :  { %2866 = vmatmul.mubr.f32.gmra.mrb[76].mxu0 %v632_v10  ;;  %1630 = vmatprep.mubr.f32.mxu1 %v641_v11  ;;  %v898_v10 = vld [vmem:[%s8185_s1 + $0x320] sm:$0xff]  ;;  %v899_v11 = vld [vmem:[%s8185_s1 + $0x328] sm:$0xff] }
 0x1a1   :  { %2870 = vmatprep.mubr.f32.mxu0 %v649_v12  ;;  %v1026_v12 = vld [vmem:[%s8185_s1 + $0x720] sm:$0xff] }
 0x1a3   :  { %1631 = vmatmul.mubr.f32.gmra.mrb[78].mxu1 %v640_v13  ;;  %v1027_v13 = vld [vmem:[%s8185_s1 + $0x728] sm:$0xff] }
 0x1a4   :  { %2871 = vmatmul.mubr.f32.gmra.mrb[78].mxu0 %v648_v14  ;;  %1635 = vmatprep.mubr.f32.mxu1 %v657_v15  ;;  %v50_v14 = vld [vmem:[%s8186_s0 + $0x120] sm:$0xff] }
 0x1a5   :  { %2875 = vmatprep.mubr.f32.mxu0 %v665_v16  ;;  %v58_v15 = vld [vmem:[%s8186_s0 + $0x160] sm:$0xff]  ;;  %v67_v16 = vld [vmem:[%s8186_s0 + $0x1a8] sm:$0xff] }
 0x1a7   :  { %1636 = vmatmul.mubr.f32.gmra.mrb[80].mxu1 %v656_v17  ;;  %v3795_v17 = vpack.c.bf16 %v899_v11, %v898_v10  ;;  %v1039_v10 = vld [vmem:[%s8185_s1 + $0x788] sm:$0xff]  ;;  %v146_v11 = vld [vmem:[%s8186_s0 + $0x420] sm:$0xff] }
 0x1a8   :  { %2876 = vmatmul.mubr.f32.gmra.mrb[80].mxu0 %v664_v18  ;;  %1640 = vmatprep.mubr.f32.mxu1 %v673_v19  ;;  %v75_v18 = vld [vmem:[%s8186_s0 + $0x1e8] sm:$0xff]  ;;  %v3987_v19 = vpack.c.bf16 %v1027_v13, %v1026_v12  ;;  %v154_v12 = vld [vmem:[%s8186_s0 + $0x460] sm:$0xff] }
 0x1a9   :  { %2880 = vmatprep.mubr.f32.mxu0 %v681_v20  ;;  %v900_v20 = vld [vmem:[%s8185_s1 + $0x330] sm:$0xff]  ;;  %v163_v13 = vld [vmem:[%s8186_s0 + $0x4a8] sm:$0xff] }
 0x1ab   :  { %1641 = vmatmul.mubr.f32.gmra.mrb[82].mxu1 %v672_v21  ;;  %v901_v21 = vld [vmem:[%s8185_s1 + $0x338] sm:$0xff] }
 0x1ac   :  { %2881 = vmatmul.mubr.f32.gmra.mrb[82].mxu0 %v680_v22  ;;  %1645 = vmatprep.mubr.f32.mxu1 %v689_v23  ;;  %v1028_v22 = vld [vmem:[%s8185_s1 + $0x730] sm:$0xff]  ;;  %v1029_v23 = vld [vmem:[%s8185_s1 + $0x738] sm:$0xff] }
 0x1ad   :  { %2885 = vmatprep.mubr.f32.mxu0 %v697_v24  ;;  %v66_v24 = vld [vmem:[%s8186_s0 + $0x1a0] sm:$0xff] }
 0x1af   :  { %1646 = vmatmul.mubr.f32.gmra.mrb[84].mxu1 %v688_v25  ;;  %v74_v25 = vld [vmem:[%s8186_s0 + $0x1e0] sm:$0xff] }
 0x1b0   :  { %2886 = vmatmul.mubr.f32.gmra.mrb[84].mxu0 %v696_v26  ;;  %1650 = vmatprep.mubr.f32.mxu1 %v705_v27  ;;  %v83_v26 = vld [vmem:[%s8186_s0 + $0x228] sm:$0xff]  ;;  %v3798_v27 = vpack.c.bf16 %v901_v21, %v900_v20  ;;  %v1041_v20 = vld [vmem:[%s8185_s1 + $0x798] sm:$0xff]  ;;  %v162_v21 = vld [vmem:[%s8186_s0 + $0x4a0] sm:$0xff] }
 0x1b1   :  { %2890 = vmatprep.mubr.f32.mxu0 %v713_v28  ;;  %v91_v28 = vld [vmem:[%s8186_s0 + $0x268] sm:$0xff] }
 0x1b3   :  { %1651 = vmatmul.mubr.f32.gmra.mrb[86].mxu1 %v704_v29  ;;  %v3990_v29 = vpack.c.bf16 %v1029_v23, %v1028_v22  ;;  %v170_v22 = vld [vmem:[%s8186_s0 + $0x4e0] sm:$0xff]  ;;  %v179_v23 = vld [vmem:[%s8186_s0 + $0x528] sm:$0xff] }
 0x1b4   :  { %2891 = vmatmul.mubr.f32.gmra.mrb[86].mxu0 %v712_v30  ;;  %1655 = vmatprep.mubr.f32.mxu1 %v721_v31  ;;  %v902_v30 = vld [vmem:[%s8185_s1 + $0x340] sm:$0xff]  ;;  %v903_v31 = vld [vmem:[%s8185_s1 + $0x348] sm:$0xff] }
 0x1b5   :  { %2895 = vmatprep.mubr.f32.mxu0 %v729_v32  ;;  %v1030_v32 = vld [vmem:[%s8185_s1 + $0x740] sm:$0xff] }
 0x1b7   :  { %1656 = vmatmul.mubr.f32.gmra.mrb[88].mxu1 %v720_v33  ;;  %v1031_v33 = vld [vmem:[%s8185_s1 + $0x748] sm:$0xff] }
 0x1b8   :  { %2896 = vmatmul.mubr.f32.gmra.mrb[88].mxu0 %v728_v34  ;;  %1660 = vmatprep.mubr.f32.mxu1 %v737_v35  ;;  %v82_v34 = vld [vmem:[%s8186_s0 + $0x220] sm:$0xff] }
 0x1b9   :  { %2900 = vmatprep.mubr.f32.mxu0 %v745_v36  ;;  %v90_v35 = vld [vmem:[%s8186_s0 + $0x260] sm:$0xff]  ;;  %v99_v36 = vld [vmem:[%s8186_s0 + $0x2a8] sm:$0xff] }
 0x1bb   :  { %1661 = vmatmul.mubr.f32.gmra.mrb[90].mxu1 %v736_v37  ;;  %v3801_v37 = vpack.c.bf16 %v903_v31, %v902_v30  ;;  %v1043_v30 = vld [vmem:[%s8185_s1 + $0x7a8] sm:$0xff]  ;;  %v178_v31 = vld [vmem:[%s8186_s0 + $0x520] sm:$0xff] }
 0x1bc   :  { %2901 = vmatmul.mubr.f32.gmra.mrb[90].mxu0 %v744_v38  ;;  %1665 = vmatprep.mubr.f32.mxu1 %v753_v39  ;;  %v107_v38 = vld [vmem:[%s8186_s0 + $0x2e8] sm:$0xff]  ;;  %v3993_v39 = vpack.c.bf16 %v1031_v33, %v1030_v32  ;;  %v186_v32 = vld [vmem:[%s8186_s0 + $0x560] sm:$0xff] }
 0x1bd   :  { %2905 = vmatprep.mubr.f32.mxu0 %v761_v40  ;;  %v904_v40 = vld [vmem:[%s8185_s1 + $0x350] sm:$0xff]  ;;  %v195_v33 = vld [vmem:[%s8186_s0 + $0x5a8] sm:$0xff] }
 0x1bf   :  { %1666 = vmatmul.mubr.f32.gmra.mrb[92].mxu1 %v752_v41  ;;  %v905_v41 = vld [vmem:[%s8185_s1 + $0x358] sm:$0xff] }
 0x1c0   :  { %2906 = vmatmul.mubr.f32.gmra.mrb[92].mxu0 %v760_v42  ;;  %1670 = vmatprep.mubr.f32.mxu1 %v769_v43  ;;  %v1032_v42 = vld [vmem:[%s8185_s1 + $0x750] sm:$0xff]  ;;  %v1033_v43 = vld [vmem:[%s8185_s1 + $0x758] sm:$0xff] }
 0x1c1   :  { %2910 = vmatprep.mubr.f32.mxu0 %v777_v44  ;;  %v98_v44 = vld [vmem:[%s8186_s0 + $0x2a0] sm:$0xff] }
 0x1c3   :  { %1671 = vmatmul.mubr.f32.gmra.mrb[94].mxu1 %v768_v45  ;;  %v106_v45 = vld [vmem:[%s8186_s0 + $0x2e0] sm:$0xff] }
 0x1c4   :  { %2911 = vmatmul.mubr.f32.gmra.mrb[94].mxu0 %v776_v46  ;;  %1675 = vmatprep.mubr.f32.mxu1 %v785_v47  ;;  %v115_v46 = vld [vmem:[%s8186_s0 + $0x328] sm:$0xff]  ;;  %v3804_v47 = vpack.c.bf16 %v905_v41, %v904_v40  ;;  %v1045_v40 = vld [vmem:[%s8185_s1 + $0x7b8] sm:$0xff]  ;;  %v194_v41 = vld [vmem:[%s8186_s0 + $0x5a0] sm:$0xff] }
 0x1c5   :  { %2915 = vmatprep.mubr.f32.mxu0 %v793_v48  ;;  %v123_v48 = vld [vmem:[%s8186_s0 + $0x368] sm:$0xff] }
 0x1c7   :  { %1676 = vmatmul.mubr.f32.gmra.mrb[96].mxu1 %v784_v49  ;;  %v3996_v49 = vpack.c.bf16 %v1033_v43, %v1032_v42  ;;  %v202_v42 = vld [vmem:[%s8186_s0 + $0x5e0] sm:$0xff]  ;;  %v211_v43 = vld [vmem:[%s8186_s0 + $0x628] sm:$0xff] }
 0x1c8   :  { %2916 = vmatmul.mubr.f32.gmra.mrb[96].mxu0 %v792_v50  ;;  %1745 = vmatprep.mubr.f32.mxu1 %v19_v51  ;;  %v906_v50 = vld [vmem:[%s8185_s1 + $0x360] sm:$0xff]  ;;  %v907_v51 = vld [vmem:[%s8185_s1 + $0x368] sm:$0xff] }
 0x1c9   :  { %2985 = vmatprep.mubr.f32.mxu0 %v27_v54  ;;  %v114_v54 = vld [vmem:[%s8186_s0 + $0x320] sm:$0xff] }
 0x1cb   :  { %1746 = vmatmul.mubr.f32.vlgmr.msra.gmra.mrb[0].mxu1 %v18_v57  ;;  %v3807_v57 = vpack.c.bf16 %v907_v51, %v906_v50  ;;  %v1047_v50 = vld [vmem:[%s8185_s1 + $0x7c8] sm:$0xff]  ;;  %v210_v51 = vld [vmem:[%s8186_s0 + $0x620] sm:$0xff] }
 0x1cc   :  { %2986 = vmatmul.mubr.f32.vlgmr.msra.gmra.mrb[0].mxu0 %v26_v59  ;;  %3790 = vmatpush1.bf16.msra.mxu1 %v3789_v58  ;;  %v139_v58 = vld [vmem:[%s8186_s0 + $0x3e8] sm:$0xff]  ;;  %v3999_v59 = vpack.c.bf16 %v1035_v53, %v1034_v52  ;;  %v218_v52 = vld [vmem:[%s8186_s0 + $0x660] sm:$0xff] }
 0x1cd   :  { %1750 = vmatprep.mubr.f32.mxu1 %v35_v60  ;;  %2990 = vmatprep.mubr.f32.mxu0 %v43_v61  ;;  %v908_v60 = vld [vmem:[%s8185_s1 + $0x370] sm:$0xff]  ;;  %v909_v61 = vld [vmem:[%s8185_s1 + $0x378] sm:$0xff]  ;;  %v227_v53 = vld [vmem:[%s8186_s0 + $0x6a8] sm:$0xff] }
 0x1ce   :  { %3982 = vmatpush1.bf16.msra.mxu0 %v3981_v62  ;;  %3791 = vmatprep.subr.bf16.mxu1 %v4715_v0  ;;  %v1036_v62 = vld [vmem:[%s8185_s1 + $0x770] sm:$0xff] }
 0x1cf   :  { %1751 = vmatmul.mubr.f32.gmra.mrb[2].mxu1 %v34_v4  ;;  %3983 = vmatprep.subr.bf16.mxu0 %v4715_v0  ;;  %v3810_v4 = vpack.c.bf16 %v909_v61, %v908_v60  ;;  %v1049_v60 = vld [vmem:[%s8185_s1 + $0x7d8] sm:$0xff]  ;;  %v226_v61 = vld [vmem:[%s8186_s0 + $0x6a0] sm:$0xff] }
 0x1d0   :  { %2991 = vmatmul.mubr.f32.gmra.mrb[2].mxu0 %v42_v5  ;;  %1755 = vmatprep.mubr.f32.mxu1 %v51_v6  ;;  %v155_v5 = vld [vmem:[%s8186_s0 + $0x468] sm:$0xff]  ;;  %v4002_v6 = vpack.c.bf16 %v1037_v63, %v1036_v62  ;;  %v234_v62 = vld [vmem:[%s8186_s0 + $0x6e0] sm:$0xff] }
 0x1d1   :  { %2995 = vmatprep.mubr.f32.mxu0 %v59_v8  ;;  %3793 = vmatpush1.bf16.msra.mxu1 %v3792_v7  ;;  %v910_v7 = vld [vmem:[%s8185_s1 + $0x380] sm:$0xff]  ;;  %v911_v8 = vld [vmem:[%s8185_s1 + $0x388] sm:$0xff] }
 0x1d2   :  { %3985 = vmatpush1.bf16.msra.mxu0 %v3984_v9  ;;  %3794 = vmatprep.subr.bf16.mxu1 %v4715_v0  ;;  %v1038_v9 = vld [vmem:[%s8185_s1 + $0x780] sm:$0xff]  ;;  %v243_v63 = vld [vmem:[%s8186_s0 + $0x728] sm:$0xff] }
 0x1d3   :  { %1756 = vmatmul.mubr.f32.gmra.mrb[4].mxu1 %v50_v14  ;;  %3986 = vmatprep.subr.bf16.mxu0 %v4715_v0  ;;  %v3813_v14 = vpack.c.bf16 %v911_v8, %v910_v7  ;;  %v1051_v7 = vld [vmem:[%s8185_s1 + $0x7e8] sm:$0xff]  ;;  %v242_v8 = vld [vmem:[%s8186_s0 + $0x720] sm:$0xff] }
 0x1d4   :  { %2996 = vmatmul.mubr.f32.gmra.mrb[4].mxu0 %v58_v15  ;;  %1760 = vmatprep.mubr.f32.mxu1 %v67_v16  ;;  %v171_v15 = vld [vmem:[%s8186_s0 + $0x4e8] sm:$0xff]  ;;  %v4005_v16 = vpack.c.bf16 %v1039_v10, %v1038_v9  ;;  %v250_v9 = vld [vmem:[%s8186_s0 + $0x760] sm:$0xff] }
 0x1d5   :  { %3000 = vmatprep.mubr.f32.mxu0 %v75_v18  ;;  %3796 = vmatpush1.bf16.msra.mxu1 %v3795_v17  ;;  %v912_v17 = vld [vmem:[%s8185_s1 + $0x390] sm:$0xff]  ;;  %v913_v18 = vld [vmem:[%s8185_s1 + $0x398] sm:$0xff]  ;;  %v259_v10 = vld [vmem:[%s8186_s0 + $0x7a8] sm:$0xff] }
 0x1d6   :  { %3988 = vmatpush1.bf16.msra.mxu0 %v3987_v19  ;;  %3797 = vmatprep.subr.bf16.mxu1 %v4715_v0  ;;  %v1040_v19 = vld [vmem:[%s8185_s1 + $0x790] sm:$0xff] }
 0x1d7   :  { %1761 = vmatmul.mubr.f32.gmra.mrb[6].mxu1 %v66_v24  ;;  %3989 = vmatprep.subr.bf16.mxu0 %v4715_v0  ;;  %v3816_v24 = vpack.c.bf16 %v913_v18, %v912_v17  ;;  %v925_v17 = vld [vmem:[%s8185_s1 + $0x3f8] sm:$0xff]  ;;  %v275_v18 = vld [vmem:[%s8186_s0 + $0x828] sm:$0xff] }
 0x1d8   :  { %3001 = vmatmul.mubr.f32.gmra.mrb[6].mxu0 %v74_v25  ;;  %1765 = vmatprep.mubr.f32.mxu1 %v83_v26  ;;  %v187_v25 = vld [vmem:[%s8186_s0 + $0x568] sm:$0xff]  ;;  %v4008_v26 = vpack.c.bf16 %v1041_v20, %v1040_v19  ;;  %v1052_v20 = vld [vmem:[%s8185_s1 + $0x7f0] sm:$0xff] }
 0x1d9   :  { %3005 = vmatprep.mubr.f32.mxu0 %v91_v28  ;;  %3799 = vmatpush1.bf16.msra.mxu1 %v3798_v27  ;;  %v914_v27 = vld [vmem:[%s8185_s1 + $0x3a0] sm:$0xff]  ;;  %v915_v28 = vld [vmem:[%s8185_s1 + $0x3a8] sm:$0xff] }
 0x1da   :  { %3991 = vmatpush1.bf16.msra.mxu0 %v3990_v29  ;;  %3800 = vmatprep.subr.bf16.mxu1 %v4715_v0  ;;  %v1042_v29 = vld [vmem:[%s8185_s1 + $0x7a0] sm:$0xff] }
 0x1db   :  { %1766 = vmatmul.mubr.f32.gmra.mrb[8].mxu1 %v82_v34  ;;  %3992 = vmatprep.subr.bf16.mxu0 %v4715_v0  ;;  %v3819_v34 = vpack.c.bf16 %v915_v28, %v914_v27  ;;  %v290_v27 = vld [vmem:[%s8186_s0 + $0x8a0] sm:$0xff] }
 0x1dc   :  { %3006 = vmatmul.mubr.f32.gmra.mrb[8].mxu0 %v90_v35  ;;  %1770 = vmatprep.mubr.f32.mxu1 %v99_v36  ;;  %v203_v35 = vld [vmem:[%s8186_s0 + $0x5e8] sm:$0xff]  ;;  %v4011_v36 = vpack.c.bf16 %v1043_v30, %v1042_v29  ;;  %v298_v28 = vld [vmem:[%s8186_s0 + $0x8e0] sm:$0xff] }
 0x1dd   :  { %3010 = vmatprep.mubr.f32.mxu0 %v107_v38  ;;  %3802 = vmatpush1.bf16.msra.mxu1 %v3801_v37  ;;  %v916_v37 = vld [vmem:[%s8185_s1 + $0x3b0] sm:$0xff]  ;;  %v917_v38 = vld [vmem:[%s8185_s1 + $0x3b8] sm:$0xff]  ;;  %v307_v29 = vld [vmem:[%s8186_s0 + $0x928] sm:$0xff] }
 0x1de   :  { %3994 = vmatpush1.bf16.msra.mxu0 %v3993_v39  ;;  %3803 = vmatprep.subr.bf16.mxu1 %v4715_v0  ;;  %v1044_v39 = vld [vmem:[%s8185_s1 + $0x7b0] sm:$0xff]  ;;  %v315_v30 = vld [vmem:[%s8186_s0 + $0x968] sm:$0xff] }
 0x1df   :  { %1771 = vmatmul.mubr.f32.gmra.mrb[10].mxu1 %v98_v44  ;;  %3995 = vmatprep.subr.bf16.mxu0 %v4715_v0  ;;  %v3822_v44 = vpack.c.bf16 %v917_v38, %v916_v37  ;;  %v339_v37 = vld [vmem:[%s8186_s0 + $0xa28] sm:$0xff] }
 0x1e0   :  { %3011 = vmatmul.mubr.f32.gmra.mrb[10].mxu0 %v106_v45  ;;  %1775 = vmatprep.mubr.f32.mxu1 %v115_v46  ;;  %v219_v45 = vld [vmem:[%s8186_s0 + $0x668] sm:$0xff]  ;;  %v4014_v46 = vpack.c.bf16 %v1045_v40, %v1044_v39  ;;  %v338_v39 = vld [vmem:[%s8186_s0 + $0xa20] sm:$0xff] }
 0x1e1   :  { %3015 = vmatprep.mubr.f32.mxu0 %v123_v48  ;;  %3805 = vmatpush1.bf16.msra.mxu1 %v3804_v47  ;;  %v918_v47 = vld [vmem:[%s8185_s1 + $0x3c0] sm:$0xff]  ;;  %v919_v48 = vld [vmem:[%s8185_s1 + $0x3c8] sm:$0xff] }
 0x1e2   :  { %3997 = vmatpush1.bf16.msra.mxu0 %v3996_v49  ;;  %3806 = vmatprep.subr.bf16.mxu1 %v4715_v0  ;;  %v1046_v49 = vld [vmem:[%s8185_s1 + $0x7c0] sm:$0xff]  ;;  %v347_v38 = vld [vmem:[%s8186_s0 + $0xa68] sm:$0xff] }
 0x1e3   :  { %1776 = vmatmul.mubr.f32.gmra.mrb[12].mxu1 %v114_v54  ;;  %3998 = vmatprep.subr.bf16.mxu0 %v4715_v0  ;;  %v3825_v54 = vpack.c.bf16 %v919_v48, %v918_v47  ;;  %v346_v40 = vld [vmem:[%s8186_s0 + $0xa60] sm:$0xff] }
 0x1e4   :  { %3016 = vmatmul.mubr.f32.gmra.mrb[12].mxu0 %v122_v55  ;;  %1780 = vmatprep.mubr.f32.mxu1 %v131_v56  ;;  %v235_v55 = vld [vmem:[%s8186_s0 + $0x6e8] sm:$0xff]  ;;  %v4017_v56 = vpack.c.bf16 %v1047_v50, %v1046_v49  ;;  %v370_v47 = vld [vmem:[%s8186_s0 + $0xb20] sm:$0xff] }
 0x1e5   :  { %3020 = vmatprep.mubr.f32.mxu0 %v139_v58  ;;  %3808 = vmatpush1.bf16.msra.mxu1 %v3807_v57  ;;  %v920_v57 = vld [vmem:[%s8185_s1 + $0x3d0] sm:$0xff]  ;;  %v921_v58 = vld [vmem:[%s8185_s1 + $0x3d8] sm:$0xff]  ;;  %v378_v48 = vld [vmem:[%s8186_s0 + $0xb60] sm:$0xff] }
 0x1e6   :  { %4000 = vmatpush1.bf16.msra.mxu0 %v3999_v59  ;;  %3809 = vmatprep.subr.bf16.mxu1 %v4715_v0  ;;  %v1048_v59 = vld [vmem:[%s8185_s1 + $0x7d0] sm:$0xff]  ;;  %v387_v49 = vld [vmem:[%s8186_s0 + $0xba8] sm:$0xff] }
 0x1e7   :  { %1781 = vmatmul.mubr.f32.gmra.mrb[14].mxu1 %v130_v1  ;;  %4001 = vmatprep.subr.bf16.mxu0 %v4715_v0  ;;  %v3828_v1 = vpack.c.bf16 %v921_v58, %v920_v57  ;;  %v395_v50 = vld [vmem:[%s8186_s0 + $0xbe8] sm:$0xff] }
 0x1e8   :  { %3021 = vmatmul.mubr.f32.gmra.mrb[14].mxu0 %v138_v2  ;;  %1785 = vmatprep.mubr.f32.mxu1 %v147_v3  ;;  %v251_v2 = vld [vmem:[%s8186_s0 + $0x768] sm:$0xff]  ;;  %v4020_v3 = vpack.c.bf16 %v1049_v60, %v1048_v59  ;;  %v418_v59 = vld [vmem:[%s8186_s0 + $0xca0] sm:$0xff] }
 0x1e9   :  { %3025 = vmatprep.mubr.f32.mxu0 %v155_v5  ;;  %3811 = vmatpush1.bf16.msra.mxu1 %v3810_v4  ;;  %v922_v4 = vld [vmem:[%s8185_s1 + $0x3e0] sm:$0xff]  ;;  %v923_v5 = vld [vmem:[%s8185_s1 + $0x3e8] sm:$0xff] }
 0x1ea   :  { %4003 = vmatpush1.bf16.msra.mxu0 %v4002_v6  ;;  %3812 = vmatprep.subr.bf16.mxu1 %v4715_v0  ;;  %v1050_v6 = vld [vmem:[%s8185_s1 + $0x7e0] sm:$0xff]  ;;  %v419_v57 = vld [vmem:[%s8186_s0 + $0xca8] sm:$0xff] }
 0x1eb   :  { %1786 = vmatmul.mubr.f32.gmra.mrb[16].mxu1 %v146_v11  ;;  %4004 = vmatprep.subr.bf16.mxu0 %v4715_v0  ;;  %v3831_v11 = vpack.c.bf16 %v923_v5, %v922_v4  ;;  %v427_v58 = vld [vmem:[%s8186_s0 + $0xce8] sm:$0xff]  ;;  %v426_v60 = vld [vmem:[%s8186_s0 + $0xce0] sm:$0xff] }
 0x1ec   :  { %3026 = vmatmul.mubr.f32.gmra.mrb[16].mxu0 %v154_v12  ;;  %1790 = vmatprep.mubr.f32.mxu1 %v163_v13  ;;  %v267_v12 = vld [vmem:[%s8186_s0 + $0x7e8] sm:$0xff]  ;;  %v4023_v13 = vpack.c.bf16 %v1051_v7, %v1050_v6  ;;  %v450_v4 = vld [vmem:[%s8186_s0 + $0xda0] sm:$0xff] }
 0x1ed   :  { %3030 = vmatprep.mubr.f32.mxu0 %v171_v15  ;;  %3814 = vmatpush1.bf16.msra.mxu1 %v3813_v14  ;;  %v258_v14 = vld [vmem:[%s8186_s0 + $0x7a0] sm:$0xff]  ;;  %v467_v6 = vld [vmem:[%s8186_s0 + $0xe28] sm:$0xff] }
 0x1ee   :  { %4006 = vmatpush1.bf16.msra.mxu0 %v4005_v16  ;;  %3815 = vmatprep.subr.bf16.mxu1 %v4715_v0  ;;  %v266_v15 = vld [vmem:[%s8186_s0 + $0x7e0] sm:$0xff]  ;;  %v924_v16 = vld [vmem:[%s8185_s1 + $0x3f0] sm:$0xff]  ;;  %v475_v7 = vld [vmem:[%s8186_s0 + $0xe68] sm:$0xff] }
 0x1ef   :  { %1791 = vmatmul.mubr.f32.gmra.mrb[18].mxu1 %v162_v21  ;;  %4007 = vmatprep.subr.bf16.mxu0 %v4715_v0  ;;  %v3834_v19 = vpack.c.bf16 %v925_v17, %v924_v16  ;;  %v1053_v21 = vld [vmem:[%s8185_s1 + $0x7f8] sm:$0xff]  ;;  %v458_v5 = vld [vmem:[%s8186_s0 + $0xde0] sm:$0xff] }
 0x1f0   :  { %3031 = vmatmul.mubr.f32.gmra.mrb[18].mxu0 %v170_v22  ;;  %1795 = vmatprep.mubr.f32.mxu1 %v179_v23  ;;  %v283_v22 = vld [vmem:[%s8186_s0 + $0x868] sm:$0xff]  ;;  %v4026_v23 = vpack.c.bf16 %v1053_v21, %v1052_v20  ;;  %v498_v16 = vld [vmem:[%s8186_s0 + $0xf20] sm:$0xff] }
 0x1f1   :  { %3035 = vmatprep.mubr.f32.mxu0 %v187_v25  ;;  %3817 = vmatpush1.bf16.msra.mxu1 %v3816_v24  ;;  %v274_v24 = vld [vmem:[%s8186_s0 + $0x820] sm:$0xff] }
 0x1f2   :  { %4009 = vmatpush1.bf16.msra.mxu0 %v4008_v26  ;;  %3818 = vmatprep.subr.bf16.mxu1 %v4715_v0  ;;  %v282_v25 = vld [vmem:[%s8186_s0 + $0x860] sm:$0xff]  ;;  %v291_v26 = vld [vmem:[%s8186_s0 + $0x8a8] sm:$0xff] }
 0x1f3   :  { %1796 = vmatmul.mubr.f32.gmra.mrb[20].mxu1 %v178_v31  ;;  %4010 = vmatprep.subr.bf16.mxu0 %v4715_v0  ;;  %v306_v31 = vld [vmem:[%s8186_s0 + $0x920] sm:$0xff] }
 0x1f4   :  { %3036 = vmatmul.mubr.f32.gmra.mrb[20].mxu0 %v186_v32  ;;  %1800 = vmatprep.mubr.f32.mxu1 %v195_v33  ;;  %v314_v32 = vld [vmem:[%s8186_s0 + $0x960] sm:$0xff]  ;;  %v323_v33 = vld [vmem:[%s8186_s0 + $0x9a8] sm:$0xff] }
 0x1f5   :  { %3040 = vmatprep.mubr.f32.mxu0 %v203_v35  ;;  %3820 = vmatpush1.bf16.msra.mxu1 %v3819_v34  ;;  %v331_v34 = vld [vmem:[%s8186_s0 + $0x9e8] sm:$0xff]  ;;  %v322_v35 = vld [vmem:[%s8186_s0 + $0x9a0] sm:$0xff] }
 0x1f6   :  { %4012 = vmatpush1.bf16.msra.mxu0 %v4011_v36  ;;  %3821 = vmatprep.subr.bf16.mxu1 %v4715_v0  ;;  %v330_v36 = vld [vmem:[%s8186_s0 + $0x9e0] sm:$0xff] }
 0x1f7   :  { %1801 = vmatmul.mubr.f32.gmra.mrb[22].mxu1 %v194_v41  ;;  %4013 = vmatprep.subr.bf16.mxu0 %v4715_v0  ;;  %v355_v41 = vld [vmem:[%s8186_s0 + $0xaa8] sm:$0xff]  ;;  %v506_v17 = vld [vmem:[%s8186_s0 + $0xf60] sm:$0xff] }
 0x1f8   :  { %3041 = vmatmul.mubr.f32.gmra.mrb[22].mxu0 %v202_v42  ;;  %1805 = vmatprep.mubr.f32.mxu1 %v211_v43  ;;  %v363_v42 = vld [vmem:[%s8186_s0 + $0xae8] sm:$0xff]  ;;  %v354_v43 = vld [vmem:[%s8186_s0 + $0xaa0] sm:$0xff] }
 0x1f9   :  { %3045 = vmatprep.mubr.f32.mxu0 %v219_v45  ;;  %3823 = vmatpush1.bf16.msra.mxu1 %v3822_v44  ;;  %v362_v44 = vld [vmem:[%s8186_s0 + $0xae0] sm:$0xff]  ;;  %v371_v45 = vld [vmem:[%s8186_s0 + $0xb28] sm:$0xff] }
 0x1fa   :  { %4015 = vmatpush1.bf16.msra.mxu0 %v4014_v46  ;;  %3824 = vmatprep.subr.bf16.mxu1 %v4715_v0  ;;  %v379_v46 = vld [vmem:[%s8186_s0 + $0xb68] sm:$0xff]  ;;  %v514_v20 = vld [vmem:[%s8186_s0 + $0xfa0] sm:$0xff] }
 0x1fb   :  { %1806 = vmatmul.mubr.f32.gmra.mrb[24].mxu1 %v210_v51  ;;  %4016 = vmatprep.subr.bf16.mxu0 %v4715_v0  ;;  %v386_v51 = vld [vmem:[%s8186_s0 + $0xba0] sm:$0xff] }
 0x1fc   :  { %3046 = vmatmul.mubr.f32.gmra.mrb[24].mxu0 %v218_v52  ;;  %1810 = vmatprep.mubr.f32.mxu1 %v227_v53  ;;  %v394_v52 = vld [vmem:[%s8186_s0 + $0xbe0] sm:$0xff]  ;;  %v403_v53 = vld [vmem:[%s8186_s0 + $0xc28] sm:$0xff] }
 0x1fd   :  { %3050 = vmatprep.mubr.f32.mxu0 %v235_v55  ;;  %3826 = vmatpush1.bf16.msra.mxu1 %v3825_v54  ;;  %v411_v54 = vld [vmem:[%s8186_s0 + $0xc68] sm:$0xff]  ;;  %v402_v55 = vld [vmem:[%s8186_s0 + $0xc20] sm:$0xff] }
 0x1fe   :  { %4018 = vmatpush1.bf16.msra.mxu0 %v4017_v56  ;;  %3827 = vmatprep.subr.bf16.mxu1 %v4715_v0  ;;  %v410_v56 = vld [vmem:[%s8186_s0 + $0xc60] sm:$0xff] }
 0x1ff   :  { %1811 = vmatmul.mubr.f32.gmra.mrb[26].mxu1 %v226_v61  ;;  %4019 = vmatprep.subr.bf16.mxu0 %v4715_v0  ;;  %v435_v61 = vld [vmem:[%s8186_s0 + $0xd28] sm:$0xff]  ;;  %v522_v21 = vld [vmem:[%s8186_s0 + $0xfe0] sm:$0xff] }
 0x200   :  { %3051 = vmatmul.mubr.f32.gmra.mrb[26].mxu0 %v234_v62  ;;  %1815 = vmatprep.mubr.f32.mxu1 %v243_v63  ;;  %v443_v62 = vld [vmem:[%s8186_s0 + $0xd68] sm:$0xff]  ;;  %v434_v63 = vld [vmem:[%s8186_s0 + $0xd20] sm:$0xff] }
 0x201   :  { %3055 = vmatprep.mubr.f32.mxu0 %v251_v2  ;;  %3829 = vmatpush1.bf16.msra.mxu1 %v3828_v1  ;;  %v442_v1 = vld [vmem:[%s8186_s0 + $0xd60] sm:$0xff]  ;;  %v451_v2 = vld [vmem:[%s8186_s0 + $0xda8] sm:$0xff] }
 0x202   :  { %4021 = vmatpush1.bf16.msra.mxu0 %v4020_v3  ;;  %3830 = vmatprep.subr.bf16.mxu1 %v4715_v0  ;;  %v459_v3 = vld [vmem:[%s8186_s0 + $0xde8] sm:$0xff] }
 0x203   :  { %1816 = vmatmul.mubr.f32.gmra.mrb[28].mxu1 %v242_v8  ;;  %4022 = vmatprep.subr.bf16.mxu0 %v4715_v0  ;;  %v466_v8 = vld [vmem:[%s8186_s0 + $0xe20] sm:$0xff] }
 0x204   :  { %3056 = vmatmul.mubr.f32.gmra.mrb[28].mxu0 %v250_v9  ;;  %1820 = vmatprep.mubr.f32.mxu1 %v259_v10  ;;  %v474_v9 = vld [vmem:[%s8186_s0 + $0xe60] sm:$0xff]  ;;  %v483_v10 = vld [vmem:[%s8186_s0 + $0xea8] sm:$0xff] }
 0x205   :  { %3060 = vmatprep.mubr.f32.mxu0 %v267_v12  ;;  %3832 = vmatpush1.bf16.msra.mxu1 %v3831_v11  ;;  %v491_v11 = vld [vmem:[%s8186_s0 + $0xee8] sm:$0xff]  ;;  %v482_v12 = vld [vmem:[%s8186_s0 + $0xea0] sm:$0xff] }
 0x206   :  { %4024 = vmatpush1.bf16.msra.mxu0 %v4023_v13  ;;  %3833 = vmatprep.subr.bf16.mxu1 %v4715_v0  ;;  %v490_v13 = vld [vmem:[%s8186_s0 + $0xee0] sm:$0xff] }
 0x207   :  { %1821 = vmatmul.mubr.f32.gmra.mrb[30].mxu1 %v258_v14  ;;  %4025 = vmatprep.subr.bf16.mxu0 %v4715_v0  ;;  %v299_v0 = vld [vmem:[%s8186_s0 + $0x8e8] sm:$0xff] }
 0x208   :  { %3061 = vmatmul.mubr.f32.gmra.mrb[30].mxu0 %v266_v15  ;;  %1825 = vmatprep.mubr.f32.mxu1 %v275_v18  ;;  %v499_v14 = vld [vmem:[%s8186_s0 + $0xf28] sm:$0xff] }
 0x209   :  { %3065 = vmatprep.mubr.f32.mxu0 %v283_v22  ;;  %3835 = vmatpush1.bf16.msra.mxu1 %v3834_v19  ;;  %v507_v15 = vld [vmem:[%s8186_s0 + $0xf68] sm:$0xff] }
 0x20a   :  { %4027 = vmatpush1.bf16.msra.mxu0 %v4026_v23  ;;  %v515_v18 = vld [vmem:[%s8186_s0 + $0xfa8] sm:$0xff] }
 0x20b   :  { %1826 = vmatmul.mubr.f32.gmra.mrb[32].mxu1 %v274_v24  ;;  %v523_v19 = vld [vmem:[%s8186_s0 + $0xfe8] sm:$0xff]  ;;  %v530_v24 = vld [vmem:[%s8186_s0 + $0x1020] sm:$0xff] }
 0x20c   :  { %3066 = vmatmul.mubr.f32.gmra.mrb[32].mxu0 %v282_v25  ;;  %1830 = vmatprep.mubr.f32.mxu1 %v291_v26  ;;  %v531_v22 = vld [vmem:[%s8186_s0 + $0x1028] sm:$0xff]  ;;  %v538_v25 = vld [vmem:[%s8186_s0 + $0x1060] sm:$0xff] }
 0x20d   :  { %3070 = vmatprep.mubr.f32.mxu0 %v299_v0  ;;  %v539_v23 = vld [vmem:[%s8186_s0 + $0x1068] sm:$0xff] }
 0x20e   :  { %v547_v26 = vld [vmem:[%s8186_s0 + $0x10a8] sm:$0xff] }
 0x20f   :  { %1831 = vmatmul.mubr.f32.gmra.mrb[34].mxu1 %v290_v27  ;;  %v555_v0 = vld [vmem:[%s8186_s0 + $0x10e8] sm:$0xff]  ;;  %v546_v27 = vld [vmem:[%s8186_s0 + $0x10a0] sm:$0xff] }
 0x210   :  { %3071 = vmatmul.mubr.f32.gmra.mrb[34].mxu0 %v298_v28  ;;  %1835 = vmatprep.mubr.f32.mxu1 %v307_v29  ;;  %v554_v28 = vld [vmem:[%s8186_s0 + $0x10e0] sm:$0xff]  ;;  %v563_v29 = vld [vmem:[%s8186_s0 + $0x1128] sm:$0xff] }
 0x211   :  { %3075 = vmatprep.mubr.f32.mxu0 %v315_v30  ;;  %v571_v30 = vld [vmem:[%s8186_s0 + $0x1168] sm:$0xff] }
 0x213   :  { %1836 = vmatmul.mubr.f32.gmra.mrb[36].mxu1 %v306_v31  ;;  %v562_v31 = vld [vmem:[%s8186_s0 + $0x1120] sm:$0xff] }
 0x214   :  { %3076 = vmatmul.mubr.f32.gmra.mrb[36].mxu0 %v314_v32  ;;  %1840 = vmatprep.mubr.f32.mxu1 %v323_v33  ;;  %v570_v32 = vld [vmem:[%s8186_s0 + $0x1160] sm:$0xff]  ;;  %v579_v33 = vld [vmem:[%s8186_s0 + $0x11a8] sm:$0xff] }
 0x215   :  { %3080 = vmatprep.mubr.f32.mxu0 %v331_v34  ;;  %v587_v34 = vld [vmem:[%s8186_s0 + $0x11e8] sm:$0xff] }
 0x217   :  { %1841 = vmatmul.mubr.f32.gmra.mrb[38].mxu1 %v322_v35  ;;  %v578_v35 = vld [vmem:[%s8186_s0 + $0x11a0] sm:$0xff] }
 0x218   :  { %3081 = vmatmul.mubr.f32.gmra.mrb[38].mxu0 %v330_v36  ;;  %1845 = vmatprep.mubr.f32.mxu1 %v339_v37  ;;  %v586_v36 = vld [vmem:[%s8186_s0 + $0x11e0] sm:$0xff]  ;;  %v595_v37 = vld [vmem:[%s8186_s0 + $0x1228] sm:$0xff] }
 0x219   :  { %3085 = vmatprep.mubr.f32.mxu0 %v347_v38  ;;  %v603_v38 = vld [vmem:[%s8186_s0 + $0x1268] sm:$0xff] }
 0x21b   :  { %1846 = vmatmul.mubr.f32.gmra.mrb[40].mxu1 %v338_v39  ;;  %v594_v39 = vld [vmem:[%s8186_s0 + $0x1220] sm:$0xff] }
 0x21c   :  { %3086 = vmatmul.mubr.f32.gmra.mrb[40].mxu0 %v346_v40  ;;  %1850 = vmatprep.mubr.f32.mxu1 %v355_v41  ;;  %v602_v40 = vld [vmem:[%s8186_s0 + $0x1260] sm:$0xff]  ;;  %v611_v41 = vld [vmem:[%s8186_s0 + $0x12a8] sm:$0xff] }
 0x21d   :  { %3090 = vmatprep.mubr.f32.mxu0 %v363_v42  ;;  %v619_v42 = vld [vmem:[%s8186_s0 + $0x12e8] sm:$0xff] }
 0x21f   :  { %1851 = vmatmul.mubr.f32.gmra.mrb[42].mxu1 %v354_v43  ;;  %v610_v43 = vld [vmem:[%s8186_s0 + $0x12a0] sm:$0xff] }
 0x220   :  { %3091 = vmatmul.mubr.f32.gmra.mrb[42].mxu0 %v362_v44  ;;  %1855 = vmatprep.mubr.f32.mxu1 %v371_v45  ;;  %v618_v44 = vld [vmem:[%s8186_s0 + $0x12e0] sm:$0xff]  ;;  %v627_v45 = vld [vmem:[%s8186_s0 + $0x1328] sm:$0xff] }
 0x221   :  { %3095 = vmatprep.mubr.f32.mxu0 %v379_v46  ;;  %v635_v46 = vld [vmem:[%s8186_s0 + $0x1368] sm:$0xff] }
 0x223   :  { %1856 = vmatmul.mubr.f32.gmra.mrb[44].mxu1 %v370_v47  ;;  %v626_v47 = vld [vmem:[%s8186_s0 + $0x1320] sm:$0xff] }
 0x224   :  { %3096 = vmatmul.mubr.f32.gmra.mrb[44].mxu0 %v378_v48  ;;  %1860 = vmatprep.mubr.f32.mxu1 %v387_v49  ;;  %v634_v48 = vld [vmem:[%s8186_s0 + $0x1360] sm:$0xff]  ;;  %v643_v49 = vld [vmem:[%s8186_s0 + $0x13a8] sm:$0xff] }
 0x225   :  { %3100 = vmatprep.mubr.f32.mxu0 %v395_v50  ;;  %v651_v50 = vld [vmem:[%s8186_s0 + $0x13e8] sm:$0xff] }
 0x227   :  { %1861 = vmatmul.mubr.f32.gmra.mrb[46].mxu1 %v386_v51  ;;  %v642_v51 = vld [vmem:[%s8186_s0 + $0x13a0] sm:$0xff] }
 0x228   :  { %3101 = vmatmul.mubr.f32.gmra.mrb[46].mxu0 %v394_v52  ;;  %1865 = vmatprep.mubr.f32.mxu1 %v403_v53  ;;  %v650_v52 = vld [vmem:[%s8186_s0 + $0x13e0] sm:$0xff]  ;;  %v659_v53 = vld [vmem:[%s8186_s0 + $0x1428] sm:$0xff] }
 0x229   :  { %3105 = vmatprep.mubr.f32.mxu0 %v411_v54  ;;  %v667_v54 = vld [vmem:[%s8186_s0 + $0x1468] sm:$0xff] }
 0x22b   :  { %1866 = vmatmul.mubr.f32.gmra.mrb[48].mxu1 %v402_v55  ;;  %v658_v55 = vld [vmem:[%s8186_s0 + $0x1420] sm:$0xff] }
 0x22c   :  { %3106 = vmatmul.mubr.f32.gmra.mrb[48].mxu0 %v410_v56  ;;  %1870 = vmatprep.mubr.f32.mxu1 %v419_v57  ;;  %v666_v56 = vld [vmem:[%s8186_s0 + $0x1460] sm:$0xff]  ;;  %v675_v57 = vld [vmem:[%s8186_s0 + $0x14a8] sm:$0xff] }
 0x22d   :  { %3110 = vmatprep.mubr.f32.mxu0 %v427_v58  ;;  %v683_v58 = vld [vmem:[%s8186_s0 + $0x14e8] sm:$0xff] }
 0x22f   :  { %1871 = vmatmul.mubr.f32.gmra.mrb[50].mxu1 %v418_v59  ;;  %v674_v59 = vld [vmem:[%s8186_s0 + $0x14a0] sm:$0xff] }
 0x230   :  { %3111 = vmatmul.mubr.f32.gmra.mrb[50].mxu0 %v426_v60  ;;  %1875 = vmatprep.mubr.f32.mxu1 %v435_v61  ;;  %v682_v60 = vld [vmem:[%s8186_s0 + $0x14e0] sm:$0xff]  ;;  %v691_v61 = vld [vmem:[%s8186_s0 + $0x1528] sm:$0xff] }
 0x231   :  { %3115 = vmatprep.mubr.f32.mxu0 %v443_v62  ;;  %v699_v62 = vld [vmem:[%s8186_s0 + $0x1568] sm:$0xff] }
 0x233   :  { %1876 = vmatmul.mubr.f32.gmra.mrb[52].mxu1 %v434_v63  ;;  %v690_v63 = vld [vmem:[%s8186_s0 + $0x1520] sm:$0xff] }
 0x234   :  { %3116 = vmatmul.mubr.f32.gmra.mrb[52].mxu0 %v442_v1  ;;  %1880 = vmatprep.mubr.f32.mxu1 %v451_v2  ;;  %v698_v1 = vld [vmem:[%s8186_s0 + $0x1560] sm:$0xff]  ;;  %v707_v2 = vld [vmem:[%s8186_s0 + $0x15a8] sm:$0xff] }
 0x235   :  { %3120 = vmatprep.mubr.f32.mxu0 %v459_v3  ;;  %v715_v3 = vld [vmem:[%s8186_s0 + $0x15e8] sm:$0xff] }
 0x237   :  { %1881 = vmatmul.mubr.f32.gmra.mrb[54].mxu1 %v450_v4  ;;  %v706_v4 = vld [vmem:[%s8186_s0 + $0x15a0] sm:$0xff] }
 0x238   :  { %3121 = vmatmul.mubr.f32.gmra.mrb[54].mxu0 %v458_v5  ;;  %1885 = vmatprep.mubr.f32.mxu1 %v467_v6  ;;  %v714_v5 = vld [vmem:[%s8186_s0 + $0x15e0] sm:$0xff]  ;;  %v723_v6 = vld [vmem:[%s8186_s0 + $0x1628] sm:$0xff] }
 0x239   :  { %3125 = vmatprep.mubr.f32.mxu0 %v475_v7  ;;  %v731_v7 = vld [vmem:[%s8186_s0 + $0x1668] sm:$0xff] }
 0x23b   :  { %1886 = vmatmul.mubr.f32.gmra.mrb[56].mxu1 %v466_v8  ;;  %v722_v8 = vld [vmem:[%s8186_s0 + $0x1620] sm:$0xff] }
 0x23c   :  { %3126 = vmatmul.mubr.f32.gmra.mrb[56].mxu0 %v474_v9  ;;  %1890 = vmatprep.mubr.f32.mxu1 %v483_v10  ;;  %v730_v9 = vld [vmem:[%s8186_s0 + $0x1660] sm:$0xff]  ;;  %v739_v10 = vld [vmem:[%s8186_s0 + $0x16a8] sm:$0xff] }
 0x23d   :  { %3130 = vmatprep.mubr.f32.mxu0 %v491_v11  ;;  %v747_v11 = vld [vmem:[%s8186_s0 + $0x16e8] sm:$0xff] }
 0x23f   :  { %1891 = vmatmul.mubr.f32.gmra.mrb[58].mxu1 %v482_v12  ;;  %v738_v12 = vld [vmem:[%s8186_s0 + $0x16a0] sm:$0xff] }
 0x240   :  { %3131 = vmatmul.mubr.f32.gmra.mrb[58].mxu0 %v490_v13  ;;  %1895 = vmatprep.mubr.f32.mxu1 %v499_v14  ;;  %v746_v13 = vld [vmem:[%s8186_s0 + $0x16e0] sm:$0xff]  ;;  %v755_v14 = vld [vmem:[%s8186_s0 + $0x1728] sm:$0xff] }
 0x241   :  { %3135 = vmatprep.mubr.f32.mxu0 %v507_v15  ;;  %v763_v15 = vld [vmem:[%s8186_s0 + $0x1768] sm:$0xff] }
 0x243   :  { %1896 = vmatmul.mubr.f32.gmra.mrb[60].mxu1 %v498_v16  ;;  %v754_v16 = vld [vmem:[%s8186_s0 + $0x1720] sm:$0xff] }
 0x244   :  { %3136 = vmatmul.mubr.f32.gmra.mrb[60].mxu0 %v506_v17  ;;  %1900 = vmatprep.mubr.f32.mxu1 %v515_v18  ;;  %v762_v17 = vld [vmem:[%s8186_s0 + $0x1760] sm:$0xff]  ;;  %v771_v18 = vld [vmem:[%s8186_s0 + $0x17a8] sm:$0xff] }
 0x245   :  { %3140 = vmatprep.mubr.f32.mxu0 %v523_v19  ;;  %v779_v19 = vld [vmem:[%s8186_s0 + $0x17e8] sm:$0xff] }
 0x247   :  { %1901 = vmatmul.mubr.f32.gmra.mrb[62].mxu1 %v514_v20  ;;  %v770_v20 = vld [vmem:[%s8186_s0 + $0x17a0] sm:$0xff] }
 0x248   :  { %3141 = vmatmul.mubr.f32.gmra.mrb[62].mxu0 %v522_v21  ;;  %1905 = vmatprep.mubr.f32.mxu1 %v531_v22  ;;  %v778_v21 = vld [vmem:[%s8186_s0 + $0x17e0] sm:$0xff]  ;;  %v787_v22 = vld [vmem:[%s8186_s0 + $0x1828] sm:$0xff] }
 0x249   :  { %3145 = vmatprep.mubr.f32.mxu0 %v539_v23  ;;  %v795_v23 = vld [vmem:[%s8186_s0 + $0x1868] sm:$0xff] }
 0x24b   :  { %1906 = vmatmul.mubr.f32.gmra.mrb[64].mxu1 %v530_v24  ;;  %v786_v24 = vld [vmem:[%s8186_s0 + $0x1820] sm:$0xff] }
 0x24c   :  { %3146 = vmatmul.mubr.f32.gmra.mrb[64].mxu0 %v538_v25  ;;  %1910 = vmatprep.mubr.f32.mxu1 %v547_v26  ;;  %v794_v25 = vld [vmem:[%s8186_s0 + $0x1860] sm:$0xff]  ;;  %v21_v26 = vld [vmem:[%s8186_s0 + $0x38] sm:$0xff] }
 0x24d   :  { %3150 = vmatprep.mubr.f32.mxu0 %v555_v0  ;;  %v29_v0 = vld [vmem:[%s8186_s0 + $0x78] sm:$0xff] }
 0x24f   :  { %1911 = vmatmul.mubr.f32.gmra.mrb[66].mxu1 %v546_v27  ;;  %v20_v27 = vld [vmem:[%s8186_s0 + $0x30] sm:$0xff] }
 0x250   :  { %3151 = vmatmul.mubr.f32.gmra.mrb[66].mxu0 %v554_v28  ;;  %1915 = vmatprep.mubr.f32.mxu1 %v563_v29  ;;  %v28_v28 = vld [vmem:[%s8186_s0 + $0x70] sm:$0xff]  ;;  %v37_v29 = vld [vmem:[%s8186_s0 + $0xb8] sm:$0xff] }
 0x251   :  { %3155 = vmatprep.mubr.f32.mxu0 %v571_v30  ;;  %v45_v30 = vld [vmem:[%s8186_s0 + $0xf8] sm:$0xff] }
 0x253   :  { %1916 = vmatmul.mubr.f32.gmra.mrb[68].mxu1 %v562_v31  ;;  %v36_v31 = vld [vmem:[%s8186_s0 + $0xb0] sm:$0xff] }
 0x254   :  { %3156 = vmatmul.mubr.f32.gmra.mrb[68].mxu0 %v570_v32  ;;  %1920 = vmatprep.mubr.f32.mxu1 %v579_v33  ;;  %v44_v32 = vld [vmem:[%s8186_s0 + $0xf0] sm:$0xff]  ;;  %v53_v33 = vld [vmem:[%s8186_s0 + $0x138] sm:$0xff] }
 0x255   :  { %3160 = vmatprep.mubr.f32.mxu0 %v587_v34  ;;  %v61_v34 = vld [vmem:[%s8186_s0 + $0x178] sm:$0xff] }
 0x257   :  { %1921 = vmatmul.mubr.f32.gmra.mrb[70].mxu1 %v578_v35  ;;  %v52_v35 = vld [vmem:[%s8186_s0 + $0x130] sm:$0xff] }
 0x258   :  { %3161 = vmatmul.mubr.f32.gmra.mrb[70].mxu0 %v586_v36  ;;  %1925 = vmatprep.mubr.f32.mxu1 %v595_v37  ;;  %v60_v36 = vld [vmem:[%s8186_s0 + $0x170] sm:$0xff]  ;;  %v69_v37 = vld [vmem:[%s8186_s0 + $0x1b8] sm:$0xff] }
 0x259   :  { %3165 = vmatprep.mubr.f32.mxu0 %v603_v38  ;;  %v77_v38 = vld [vmem:[%s8186_s0 + $0x1f8] sm:$0xff] }
 0x25b   :  { %1926 = vmatmul.mubr.f32.gmra.mrb[72].mxu1 %v594_v39  ;;  %v68_v39 = vld [vmem:[%s8186_s0 + $0x1b0] sm:$0xff] }
 0x25c   :  { %3166 = vmatmul.mubr.f32.gmra.mrb[72].mxu0 %v602_v40  ;;  %1930 = vmatprep.mubr.f32.mxu1 %v611_v41  ;;  %v76_v40 = vld [vmem:[%s8186_s0 + $0x1f0] sm:$0xff]  ;;  %v85_v41 = vld [vmem:[%s8186_s0 + $0x238] sm:$0xff] }
 0x25d   :  { %3170 = vmatprep.mubr.f32.mxu0 %v619_v42  ;;  %v93_v42 = vld [vmem:[%s8186_s0 + $0x278] sm:$0xff] }
 0x25f   :  { %1931 = vmatmul.mubr.f32.gmra.mrb[74].mxu1 %v610_v43  ;;  %v84_v43 = vld [vmem:[%s8186_s0 + $0x230] sm:$0xff] }
 0x260   :  { %3171 = vmatmul.mubr.f32.gmra.mrb[74].mxu0 %v618_v44  ;;  %1935 = vmatprep.mubr.f32.mxu1 %v627_v45  ;;  %v92_v44 = vld [vmem:[%s8186_s0 + $0x270] sm:$0xff]  ;;  %v101_v45 = vld [vmem:[%s8186_s0 + $0x2b8] sm:$0xff] }
 0x261   :  { %3175 = vmatprep.mubr.f32.mxu0 %v635_v46  ;;  %v109_v46 = vld [vmem:[%s8186_s0 + $0x2f8] sm:$0xff] }
 0x263   :  { %1936 = vmatmul.mubr.f32.gmra.mrb[76].mxu1 %v626_v47  ;;  %v100_v47 = vld [vmem:[%s8186_s0 + $0x2b0] sm:$0xff] }
 0x264   :  { %3176 = vmatmul.mubr.f32.gmra.mrb[76].mxu0 %v634_v48  ;;  %1940 = vmatprep.mubr.f32.mxu1 %v643_v49  ;;  %v108_v48 = vld [vmem:[%s8186_s0 + $0x2f0] sm:$0xff]  ;;  %v117_v49 = vld [vmem:[%s8186_s0 + $0x338] sm:$0xff] }
 0x265   :  { %3180 = vmatprep.mubr.f32.mxu0 %v651_v50  ;;  %v125_v50 = vld [vmem:[%s8186_s0 + $0x378] sm:$0xff] }
 0x267   :  { %1941 = vmatmul.mubr.f32.gmra.mrb[78].mxu1 %v642_v51  ;;  %v116_v51 = vld [vmem:[%s8186_s0 + $0x330] sm:$0xff] }
 0x268   :  { %3181 = vmatmul.mubr.f32.gmra.mrb[78].mxu0 %v650_v52  ;;  %1945 = vmatprep.mubr.f32.mxu1 %v659_v53  ;;  %v124_v52 = vld [vmem:[%s8186_s0 + $0x370] sm:$0xff]  ;;  %v133_v53 = vld [vmem:[%s8186_s0 + $0x3b8] sm:$0xff] }
 0x269   :  { %3185 = vmatprep.mubr.f32.mxu0 %v667_v54  ;;  %v141_v54 = vld [vmem:[%s8186_s0 + $0x3f8] sm:$0xff] }
 0x26b   :  { %1946 = vmatmul.mubr.f32.gmra.mrb[80].mxu1 %v658_v55  ;;  %v132_v55 = vld [vmem:[%s8186_s0 + $0x3b0] sm:$0xff] }
 0x26c   :  { %3186 = vmatmul.mubr.f32.gmra.mrb[80].mxu0 %v666_v56  ;;  %1950 = vmatprep.mubr.f32.mxu1 %v675_v57  ;;  %v140_v56 = vld [vmem:[%s8186_s0 + $0x3f0] sm:$0xff]  ;;  %v149_v57 = vld [vmem:[%s8186_s0 + $0x438] sm:$0xff] }
 0x26d   :  { %3190 = vmatprep.mubr.f32.mxu0 %v683_v58  ;;  %v157_v58 = vld [vmem:[%s8186_s0 + $0x478] sm:$0xff] }
 0x26f   :  { %1951 = vmatmul.mubr.f32.gmra.mrb[82].mxu1 %v674_v59  ;;  %v148_v59 = vld [vmem:[%s8186_s0 + $0x430] sm:$0xff] }
 0x270   :  { %3191 = vmatmul.mubr.f32.gmra.mrb[82].mxu0 %v682_v60  ;;  %1955 = vmatprep.mubr.f32.mxu1 %v691_v61  ;;  %v156_v60 = vld [vmem:[%s8186_s0 + $0x470] sm:$0xff]  ;;  %v165_v61 = vld [vmem:[%s8186_s0 + $0x4b8] sm:$0xff] }
 0x271   :  { %3195 = vmatprep.mubr.f32.mxu0 %v699_v62  ;;  %v173_v62 = vld [vmem:[%s8186_s0 + $0x4f8] sm:$0xff] }
 0x273   :  { %1956 = vmatmul.mubr.f32.gmra.mrb[84].mxu1 %v690_v63  ;;  %v164_v63 = vld [vmem:[%s8186_s0 + $0x4b0] sm:$0xff] }
 0x274   :  { %3196 = vmatmul.mubr.f32.gmra.mrb[84].mxu0 %v698_v1  ;;  %1960 = vmatprep.mubr.f32.mxu1 %v707_v2  ;;  %v172_v1 = vld [vmem:[%s8186_s0 + $0x4f0] sm:$0xff]  ;;  %v181_v2 = vld [vmem:[%s8186_s0 + $0x538] sm:$0xff] }
 0x275   :  { %3200 = vmatprep.mubr.f32.mxu0 %v715_v3  ;;  %v189_v3 = vld [vmem:[%s8186_s0 + $0x578] sm:$0xff] }
 0x277   :  { %1961 = vmatmul.mubr.f32.gmra.mrb[86].mxu1 %v706_v4  ;;  %v180_v4 = vld [vmem:[%s8186_s0 + $0x530] sm:$0xff] }
 0x278   :  { %3201 = vmatmul.mubr.f32.gmra.mrb[86].mxu0 %v714_v5  ;;  %1965 = vmatprep.mubr.f32.mxu1 %v723_v6  ;;  %v188_v5 = vld [vmem:[%s8186_s0 + $0x570] sm:$0xff]  ;;  %v197_v6 = vld [vmem:[%s8186_s0 + $0x5b8] sm:$0xff] }
 0x279   :  { %3205 = vmatprep.mubr.f32.mxu0 %v731_v7  ;;  %v205_v7 = vld [vmem:[%s8186_s0 + $0x5f8] sm:$0xff] }
 0x27b   :  { %1966 = vmatmul.mubr.f32.gmra.mrb[88].mxu1 %v722_v8  ;;  %v196_v8 = vld [vmem:[%s8186_s0 + $0x5b0] sm:$0xff] }
 0x27c   :  { %3206 = vmatmul.mubr.f32.gmra.mrb[88].mxu0 %v730_v9  ;;  %1970 = vmatprep.mubr.f32.mxu1 %v739_v10  ;;  %v204_v9 = vld [vmem:[%s8186_s0 + $0x5f0] sm:$0xff]  ;;  %v213_v10 = vld [vmem:[%s8186_s0 + $0x638] sm:$0xff] }
 0x27d   :  { %3210 = vmatprep.mubr.f32.mxu0 %v747_v11  ;;  %v221_v11 = vld [vmem:[%s8186_s0 + $0x678] sm:$0xff] }
 0x27f   :  { %1971 = vmatmul.mubr.f32.gmra.mrb[90].mxu1 %v738_v12  ;;  %v212_v12 = vld [vmem:[%s8186_s0 + $0x630] sm:$0xff] }
 0x280   :  { %3211 = vmatmul.mubr.f32.gmra.mrb[90].mxu0 %v746_v13  ;;  %1975 = vmatprep.mubr.f32.mxu1 %v755_v14  ;;  %v220_v13 = vld [vmem:[%s8186_s0 + $0x670] sm:$0xff]  ;;  %v229_v14 = vld [vmem:[%s8186_s0 + $0x6b8] sm:$0xff] }
 0x281   :  { %3215 = vmatprep.mubr.f32.mxu0 %v763_v15  ;;  %v237_v15 = vld [vmem:[%s8186_s0 + $0x6f8] sm:$0xff] }
 0x283   :  { %1976 = vmatmul.mubr.f32.gmra.mrb[92].mxu1 %v754_v16  ;;  %v228_v16 = vld [vmem:[%s8186_s0 + $0x6b0] sm:$0xff] }
 0x284   :  { %3216 = vmatmul.mubr.f32.gmra.mrb[92].mxu0 %v762_v17  ;;  %1980 = vmatprep.mubr.f32.mxu1 %v771_v18  ;;  %v236_v17 = vld [vmem:[%s8186_s0 + $0x6f0] sm:$0xff]  ;;  %v245_v18 = vld [vmem:[%s8186_s0 + $0x738] sm:$0xff] }
 0x285   :  { %3220 = vmatprep.mubr.f32.mxu0 %v779_v19  ;;  %v253_v19 = vld [vmem:[%s8186_s0 + $0x778] sm:$0xff] }
 0x287   :  { %1981 = vmatmul.mubr.f32.gmra.mrb[94].mxu1 %v770_v20  ;;  %v244_v20 = vld [vmem:[%s8186_s0 + $0x730] sm:$0xff] }
 0x288   :  { %3221 = vmatmul.mubr.f32.gmra.mrb[94].mxu0 %v778_v21  ;;  %1985 = vmatprep.mubr.f32.mxu1 %v787_v22  ;;  %v252_v21 = vld [vmem:[%s8186_s0 + $0x770] sm:$0xff]  ;;  %v261_v22 = vld [vmem:[%s8186_s0 + $0x7b8] sm:$0xff] }
 0x289   :  { %3225 = vmatprep.mubr.f32.mxu0 %v795_v23  ;;  %v269_v23 = vld [vmem:[%s8186_s0 + $0x7f8] sm:$0xff] }
 0x28b   :  { %1986 = vmatmul.mubr.f32.gmra.mrb[96].mxu1 %v786_v24  ;;  %v260_v24 = vld [vmem:[%s8186_s0 + $0x7b0] sm:$0xff] }
 0x28c   :  { %3226 = vmatmul.mubr.f32.gmra.mrb[96].mxu0 %v794_v25  ;;  %2055 = vmatprep.mubr.f32.mxu1 %v21_v26  ;;  %v268_v25 = vld [vmem:[%s8186_s0 + $0x7f0] sm:$0xff]  ;;  %v277_v26 = vld [vmem:[%s8186_s0 + $0x838] sm:$0xff] }
 0x28d   :  { %3295 = vmatprep.mubr.f32.mxu0 %v29_v0  ;;  %v285_v0 = vld [vmem:[%s8186_s0 + $0x878] sm:$0xff] }
 0x28f   :  { %2056 = vmatmul.mubr.f32.vlgmr.msra.gmra.mrb[0].mxu1 %v20_v27  ;;  %v276_v27 = vld [vmem:[%s8186_s0 + $0x830] sm:$0xff] }
 0x290   :  { %3296 = vmatmul.mubr.f32.vlgmr.msra.gmra.mrb[0].mxu0 %v28_v28  ;;  %2060 = vmatprep.mubr.f32.mxu1 %v37_v29  ;;  %v284_v28 = vld [vmem:[%s8186_s0 + $0x870] sm:$0xff]  ;;  %v293_v29 = vld [vmem:[%s8186_s0 + $0x8b8] sm:$0xff] }
 0x291   :  { %3300 = vmatprep.mubr.f32.mxu0 %v45_v30  ;;  %v301_v30 = vld [vmem:[%s8186_s0 + $0x8f8] sm:$0xff] }
 0x293   :  { %2061 = vmatmul.mubr.f32.gmra.mrb[2].mxu1 %v36_v31  ;;  %v292_v31 = vld [vmem:[%s8186_s0 + $0x8b0] sm:$0xff] }
 0x294   :  { %3301 = vmatmul.mubr.f32.gmra.mrb[2].mxu0 %v44_v32  ;;  %2065 = vmatprep.mubr.f32.mxu1 %v53_v33  ;;  %v300_v32 = vld [vmem:[%s8186_s0 + $0x8f0] sm:$0xff]  ;;  %v309_v33 = vld [vmem:[%s8186_s0 + $0x938] sm:$0xff] }
 0x295   :  { %3305 = vmatprep.mubr.f32.mxu0 %v61_v34  ;;  %v317_v34 = vld [vmem:[%s8186_s0 + $0x978] sm:$0xff] }
 0x297   :  { %2066 = vmatmul.mubr.f32.gmra.mrb[4].mxu1 %v52_v35  ;;  %v308_v35 = vld [vmem:[%s8186_s0 + $0x930] sm:$0xff] }
 0x298   :  { %3306 = vmatmul.mubr.f32.gmra.mrb[4].mxu0 %v60_v36  ;;  %2070 = vmatprep.mubr.f32.mxu1 %v69_v37  ;;  %v316_v36 = vld [vmem:[%s8186_s0 + $0x970] sm:$0xff]  ;;  %v325_v37 = vld [vmem:[%s8186_s0 + $0x9b8] sm:$0xff] }
 0x299   :  { %3310 = vmatprep.mubr.f32.mxu0 %v77_v38  ;;  %v333_v38 = vld [vmem:[%s8186_s0 + $0x9f8] sm:$0xff] }
 0x29b   :  { %2071 = vmatmul.mubr.f32.gmra.mrb[6].mxu1 %v68_v39  ;;  %v324_v39 = vld [vmem:[%s8186_s0 + $0x9b0] sm:$0xff] }
 0x29c   :  { %3311 = vmatmul.mubr.f32.gmra.mrb[6].mxu0 %v76_v40  ;;  %2075 = vmatprep.mubr.f32.mxu1 %v85_v41  ;;  %v332_v40 = vld [vmem:[%s8186_s0 + $0x9f0] sm:$0xff]  ;;  %v341_v41 = vld [vmem:[%s8186_s0 + $0xa38] sm:$0xff] }
 0x29d   :  { %3315 = vmatprep.mubr.f32.mxu0 %v93_v42  ;;  %v349_v42 = vld [vmem:[%s8186_s0 + $0xa78] sm:$0xff] }
 0x29f   :  { %2076 = vmatmul.mubr.f32.gmra.mrb[8].mxu1 %v84_v43  ;;  %v340_v43 = vld [vmem:[%s8186_s0 + $0xa30] sm:$0xff] }
 0x2a0   :  { %3316 = vmatmul.mubr.f32.gmra.mrb[8].mxu0 %v92_v44  ;;  %2080 = vmatprep.mubr.f32.mxu1 %v101_v45  ;;  %v348_v44 = vld [vmem:[%s8186_s0 + $0xa70] sm:$0xff]  ;;  %v357_v45 = vld [vmem:[%s8186_s0 + $0xab8] sm:$0xff] }
 0x2a1   :  { %3320 = vmatprep.mubr.f32.mxu0 %v109_v46  ;;  %v365_v46 = vld [vmem:[%s8186_s0 + $0xaf8] sm:$0xff] }
 0x2a3   :  { %2081 = vmatmul.mubr.f32.gmra.mrb[10].mxu1 %v100_v47  ;;  %v356_v47 = vld [vmem:[%s8186_s0 + $0xab0] sm:$0xff] }
 0x2a4   :  { %3321 = vmatmul.mubr.f32.gmra.mrb[10].mxu0 %v108_v48  ;;  %2085 = vmatprep.mubr.f32.mxu1 %v117_v49  ;;  %v364_v48 = vld [vmem:[%s8186_s0 + $0xaf0] sm:$0xff]  ;;  %v373_v49 = vld [vmem:[%s8186_s0 + $0xb38] sm:$0xff] }
 0x2a5   :  { %3325 = vmatprep.mubr.f32.mxu0 %v125_v50  ;;  %v381_v50 = vld [vmem:[%s8186_s0 + $0xb78] sm:$0xff] }
 0x2a7   :  { %2086 = vmatmul.mubr.f32.gmra.mrb[12].mxu1 %v116_v51  ;;  %v372_v51 = vld [vmem:[%s8186_s0 + $0xb30] sm:$0xff] }
 0x2a8   :  { %3326 = vmatmul.mubr.f32.gmra.mrb[12].mxu0 %v124_v52  ;;  %2090 = vmatprep.mubr.f32.mxu1 %v133_v53  ;;  %v380_v52 = vld [vmem:[%s8186_s0 + $0xb70] sm:$0xff]  ;;  %v389_v53 = vld [vmem:[%s8186_s0 + $0xbb8] sm:$0xff] }
 0x2a9   :  { %3330 = vmatprep.mubr.f32.mxu0 %v141_v54  ;;  %v397_v54 = vld [vmem:[%s8186_s0 + $0xbf8] sm:$0xff] }
 0x2ab   :  { %2091 = vmatmul.mubr.f32.gmra.mrb[14].mxu1 %v132_v55  ;;  %v388_v55 = vld [vmem:[%s8186_s0 + $0xbb0] sm:$0xff] }
 0x2ac   :  { %3331 = vmatmul.mubr.f32.gmra.mrb[14].mxu0 %v140_v56  ;;  %2095 = vmatprep.mubr.f32.mxu1 %v149_v57  ;;  %v396_v56 = vld [vmem:[%s8186_s0 + $0xbf0] sm:$0xff]  ;;  %v405_v57 = vld [vmem:[%s8186_s0 + $0xc38] sm:$0xff] }
 0x2ad   :  { %3335 = vmatprep.mubr.f32.mxu0 %v157_v58  ;;  %v413_v58 = vld [vmem:[%s8186_s0 + $0xc78] sm:$0xff] }
 0x2af   :  { %2096 = vmatmul.mubr.f32.gmra.mrb[16].mxu1 %v148_v59  ;;  %v404_v59 = vld [vmem:[%s8186_s0 + $0xc30] sm:$0xff] }
 0x2b0   :  { %3336 = vmatmul.mubr.f32.gmra.mrb[16].mxu0 %v156_v60  ;;  %2100 = vmatprep.mubr.f32.mxu1 %v165_v61  ;;  %v412_v60 = vld [vmem:[%s8186_s0 + $0xc70] sm:$0xff]  ;;  %v421_v61 = vld [vmem:[%s8186_s0 + $0xcb8] sm:$0xff] }
 0x2b1   :  { %3340 = vmatprep.mubr.f32.mxu0 %v173_v62  ;;  %v429_v62 = vld [vmem:[%s8186_s0 + $0xcf8] sm:$0xff] }
 0x2b3   :  { %2101 = vmatmul.mubr.f32.gmra.mrb[18].mxu1 %v164_v63  ;;  %v420_v63 = vld [vmem:[%s8186_s0 + $0xcb0] sm:$0xff] }
 0x2b4   :  { %3341 = vmatmul.mubr.f32.gmra.mrb[18].mxu0 %v172_v1  ;;  %2105 = vmatprep.mubr.f32.mxu1 %v181_v2  ;;  %v428_v1 = vld [vmem:[%s8186_s0 + $0xcf0] sm:$0xff]  ;;  %v437_v2 = vld [vmem:[%s8186_s0 + $0xd38] sm:$0xff] }
 0x2b5   :  { %3345 = vmatprep.mubr.f32.mxu0 %v189_v3  ;;  %v445_v3 = vld [vmem:[%s8186_s0 + $0xd78] sm:$0xff] }
 0x2b7   :  { %2106 = vmatmul.mubr.f32.gmra.mrb[20].mxu1 %v180_v4  ;;  %v436_v4 = vld [vmem:[%s8186_s0 + $0xd30] sm:$0xff] }
 0x2b8   :  { %3346 = vmatmul.mubr.f32.gmra.mrb[20].mxu0 %v188_v5  ;;  %2110 = vmatprep.mubr.f32.mxu1 %v197_v6  ;;  %v444_v5 = vld [vmem:[%s8186_s0 + $0xd70] sm:$0xff]  ;;  %v453_v6 = vld [vmem:[%s8186_s0 + $0xdb8] sm:$0xff] }
 0x2b9   :  { %3350 = vmatprep.mubr.f32.mxu0 %v205_v7  ;;  %v461_v7 = vld [vmem:[%s8186_s0 + $0xdf8] sm:$0xff] }
 0x2bb   :  { %2111 = vmatmul.mubr.f32.gmra.mrb[22].mxu1 %v196_v8  ;;  %v452_v8 = vld [vmem:[%s8186_s0 + $0xdb0] sm:$0xff] }
 0x2bc   :  { %3351 = vmatmul.mubr.f32.gmra.mrb[22].mxu0 %v204_v9  ;;  %2115 = vmatprep.mubr.f32.mxu1 %v213_v10  ;;  %v460_v9 = vld [vmem:[%s8186_s0 + $0xdf0] sm:$0xff]  ;;  %v469_v10 = vld [vmem:[%s8186_s0 + $0xe38] sm:$0xff] }
 0x2bd   :  { %3355 = vmatprep.mubr.f32.mxu0 %v221_v11  ;;  %v477_v11 = vld [vmem:[%s8186_s0 + $0xe78] sm:$0xff] }
 0x2bf   :  { %2116 = vmatmul.mubr.f32.gmra.mrb[24].mxu1 %v212_v12  ;;  %v468_v12 = vld [vmem:[%s8186_s0 + $0xe30] sm:$0xff] }
 0x2c0   :  { %3356 = vmatmul.mubr.f32.gmra.mrb[24].mxu0 %v220_v13  ;;  %2120 = vmatprep.mubr.f32.mxu1 %v229_v14  ;;  %v476_v13 = vld [vmem:[%s8186_s0 + $0xe70] sm:$0xff]  ;;  %v485_v14 = vld [vmem:[%s8186_s0 + $0xeb8] sm:$0xff] }
 0x2c1   :  { %3360 = vmatprep.mubr.f32.mxu0 %v237_v15  ;;  %v493_v15 = vld [vmem:[%s8186_s0 + $0xef8] sm:$0xff] }
 0x2c3   :  { %2121 = vmatmul.mubr.f32.gmra.mrb[26].mxu1 %v228_v16  ;;  %v484_v16 = vld [vmem:[%s8186_s0 + $0xeb0] sm:$0xff] }
 0x2c4   :  { %3361 = vmatmul.mubr.f32.gmra.mrb[26].mxu0 %v236_v17  ;;  %2125 = vmatprep.mubr.f32.mxu1 %v245_v18  ;;  %v492_v17 = vld [vmem:[%s8186_s0 + $0xef0] sm:$0xff]  ;;  %v501_v18 = vld [vmem:[%s8186_s0 + $0xf38] sm:$0xff] }
 0x2c5   :  { %3365 = vmatprep.mubr.f32.mxu0 %v253_v19  ;;  %v509_v19 = vld [vmem:[%s8186_s0 + $0xf78] sm:$0xff] }
 0x2c7   :  { %2126 = vmatmul.mubr.f32.gmra.mrb[28].mxu1 %v244_v20  ;;  %v500_v20 = vld [vmem:[%s8186_s0 + $0xf30] sm:$0xff] }
 0x2c8   :  { %3366 = vmatmul.mubr.f32.gmra.mrb[28].mxu0 %v252_v21  ;;  %2130 = vmatprep.mubr.f32.mxu1 %v261_v22  ;;  %v508_v21 = vld [vmem:[%s8186_s0 + $0xf70] sm:$0xff]  ;;  %v517_v22 = vld [vmem:[%s8186_s0 + $0xfb8] sm:$0xff] }
 0x2c9   :  { %3370 = vmatprep.mubr.f32.mxu0 %v269_v23  ;;  %v525_v23 = vld [vmem:[%s8186_s0 + $0xff8] sm:$0xff] }
 0x2cb   :  { %2131 = vmatmul.mubr.f32.gmra.mrb[30].mxu1 %v260_v24  ;;  %v516_v24 = vld [vmem:[%s8186_s0 + $0xfb0] sm:$0xff] }
 0x2cc   :  { %3371 = vmatmul.mubr.f32.gmra.mrb[30].mxu0 %v268_v25  ;;  %2135 = vmatprep.mubr.f32.mxu1 %v277_v26  ;;  %v524_v25 = vld [vmem:[%s8186_s0 + $0xff0] sm:$0xff]  ;;  %v533_v26 = vld [vmem:[%s8186_s0 + $0x1038] sm:$0xff] }
 0x2cd   :  { %3375 = vmatprep.mubr.f32.mxu0 %v285_v0  ;;  %v541_v0 = vld [vmem:[%s8186_s0 + $0x1078] sm:$0xff] }
 0x2cf   :  { %2136 = vmatmul.mubr.f32.gmra.mrb[32].mxu1 %v276_v27  ;;  %v532_v27 = vld [vmem:[%s8186_s0 + $0x1030] sm:$0xff] }
 0x2d0   :  { %3376 = vmatmul.mubr.f32.gmra.mrb[32].mxu0 %v284_v28  ;;  %2140 = vmatprep.mubr.f32.mxu1 %v293_v29  ;;  %v540_v28 = vld [vmem:[%s8186_s0 + $0x1070] sm:$0xff]  ;;  %v549_v29 = vld [vmem:[%s8186_s0 + $0x10b8] sm:$0xff] }
 0x2d1   :  { %3380 = vmatprep.mubr.f32.mxu0 %v301_v30  ;;  %v557_v30 = vld [vmem:[%s8186_s0 + $0x10f8] sm:$0xff] }
 0x2d3   :  { %2141 = vmatmul.mubr.f32.gmra.mrb[34].mxu1 %v292_v31  ;;  %v548_v31 = vld [vmem:[%s8186_s0 + $0x10b0] sm:$0xff] }
 0x2d4   :  { %3381 = vmatmul.mubr.f32.gmra.mrb[34].mxu0 %v300_v32  ;;  %2145 = vmatprep.mubr.f32.mxu1 %v309_v33  ;;  %v556_v32 = vld [vmem:[%s8186_s0 + $0x10f0] sm:$0xff]  ;;  %v565_v33 = vld [vmem:[%s8186_s0 + $0x1138] sm:$0xff] }
 0x2d5   :  { %3385 = vmatprep.mubr.f32.mxu0 %v317_v34  ;;  %v573_v34 = vld [vmem:[%s8186_s0 + $0x1178] sm:$0xff] }
 0x2d7   :  { %2146 = vmatmul.mubr.f32.gmra.mrb[36].mxu1 %v308_v35  ;;  %v564_v35 = vld [vmem:[%s8186_s0 + $0x1130] sm:$0xff] }
 0x2d8   :  { %3386 = vmatmul.mubr.f32.gmra.mrb[36].mxu0 %v316_v36  ;;  %2150 = vmatprep.mubr.f32.mxu1 %v325_v37  ;;  %v572_v36 = vld [vmem:[%s8186_s0 + $0x1170] sm:$0xff]  ;;  %v581_v37 = vld [vmem:[%s8186_s0 + $0x11b8] sm:$0xff] }
 0x2d9   :  { %3390 = vmatprep.mubr.f32.mxu0 %v333_v38  ;;  %v589_v38 = vld [vmem:[%s8186_s0 + $0x11f8] sm:$0xff] }
 0x2db   :  { %2151 = vmatmul.mubr.f32.gmra.mrb[38].mxu1 %v324_v39  ;;  %v580_v39 = vld [vmem:[%s8186_s0 + $0x11b0] sm:$0xff] }
 0x2dc   :  { %3391 = vmatmul.mubr.f32.gmra.mrb[38].mxu0 %v332_v40  ;;  %2155 = vmatprep.mubr.f32.mxu1 %v341_v41  ;;  %v588_v40 = vld [vmem:[%s8186_s0 + $0x11f0] sm:$0xff]  ;;  %v597_v41 = vld [vmem:[%s8186_s0 + $0x1238] sm:$0xff] }
 0x2dd   :  { %3395 = vmatprep.mubr.f32.mxu0 %v349_v42  ;;  %v605_v42 = vld [vmem:[%s8186_s0 + $0x1278] sm:$0xff] }
 0x2df   :  { %2156 = vmatmul.mubr.f32.gmra.mrb[40].mxu1 %v340_v43  ;;  %v596_v43 = vld [vmem:[%s8186_s0 + $0x1230] sm:$0xff] }
 0x2e0   :  { %3396 = vmatmul.mubr.f32.gmra.mrb[40].mxu0 %v348_v44  ;;  %2160 = vmatprep.mubr.f32.mxu1 %v357_v45  ;;  %v604_v44 = vld [vmem:[%s8186_s0 + $0x1270] sm:$0xff]  ;;  %v613_v45 = vld [vmem:[%s8186_s0 + $0x12b8] sm:$0xff] }
 0x2e1   :  { %3400 = vmatprep.mubr.f32.mxu0 %v365_v46  ;;  %v621_v46 = vld [vmem:[%s8186_s0 + $0x12f8] sm:$0xff] }
 0x2e3   :  { %2161 = vmatmul.mubr.f32.gmra.mrb[42].mxu1 %v356_v47  ;;  %v612_v47 = vld [vmem:[%s8186_s0 + $0x12b0] sm:$0xff] }
 0x2e4   :  { %3401 = vmatmul.mubr.f32.gmra.mrb[42].mxu0 %v364_v48  ;;  %2165 = vmatprep.mubr.f32.mxu1 %v373_v49  ;;  %v620_v48 = vld [vmem:[%s8186_s0 + $0x12f0] sm:$0xff]  ;;  %v629_v49 = vld [vmem:[%s8186_s0 + $0x1338] sm:$0xff] }
 0x2e5   :  { %3405 = vmatprep.mubr.f32.mxu0 %v381_v50  ;;  %v637_v50 = vld [vmem:[%s8186_s0 + $0x1378] sm:$0xff] }
 0x2e7   :  { %2166 = vmatmul.mubr.f32.gmra.mrb[44].mxu1 %v372_v51  ;;  %v628_v51 = vld [vmem:[%s8186_s0 + $0x1330] sm:$0xff] }
 0x2e8   :  { %3406 = vmatmul.mubr.f32.gmra.mrb[44].mxu0 %v380_v52  ;;  %2170 = vmatprep.mubr.f32.mxu1 %v389_v53  ;;  %v636_v52 = vld [vmem:[%s8186_s0 + $0x1370] sm:$0xff]  ;;  %v645_v53 = vld [vmem:[%s8186_s0 + $0x13b8] sm:$0xff] }
 0x2e9   :  { %3410 = vmatprep.mubr.f32.mxu0 %v397_v54  ;;  %v653_v54 = vld [vmem:[%s8186_s0 + $0x13f8] sm:$0xff] }
 0x2eb   :  { %2171 = vmatmul.mubr.f32.gmra.mrb[46].mxu1 %v388_v55  ;;  %v644_v55 = vld [vmem:[%s8186_s0 + $0x13b0] sm:$0xff] }
 0x2ec   :  { %3411 = vmatmul.mubr.f32.gmra.mrb[46].mxu0 %v396_v56  ;;  %2175 = vmatprep.mubr.f32.mxu1 %v405_v57  ;;  %v652_v56 = vld [vmem:[%s8186_s0 + $0x13f0] sm:$0xff]  ;;  %v661_v57 = vld [vmem:[%s8186_s0 + $0x1438] sm:$0xff] }
 0x2ed   :  { %3415 = vmatprep.mubr.f32.mxu0 %v413_v58  ;;  %v669_v58 = vld [vmem:[%s8186_s0 + $0x1478] sm:$0xff] }
 0x2ef   :  { %2176 = vmatmul.mubr.f32.gmra.mrb[48].mxu1 %v404_v59  ;;  %v660_v59 = vld [vmem:[%s8186_s0 + $0x1430] sm:$0xff] }
 0x2f0   :  { %3416 = vmatmul.mubr.f32.gmra.mrb[48].mxu0 %v412_v60  ;;  %2180 = vmatprep.mubr.f32.mxu1 %v421_v61  ;;  %v668_v60 = vld [vmem:[%s8186_s0 + $0x1470] sm:$0xff]  ;;  %v677_v61 = vld [vmem:[%s8186_s0 + $0x14b8] sm:$0xff] }
 0x2f1   :  { %3420 = vmatprep.mubr.f32.mxu0 %v429_v62  ;;  %v685_v62 = vld [vmem:[%s8186_s0 + $0x14f8] sm:$0xff] }
 0x2f3   :  { %2181 = vmatmul.mubr.f32.gmra.mrb[50].mxu1 %v420_v63  ;;  %v676_v63 = vld [vmem:[%s8186_s0 + $0x14b0] sm:$0xff] }
 0x2f4   :  { %3421 = vmatmul.mubr.f32.gmra.mrb[50].mxu0 %v428_v1  ;;  %2185 = vmatprep.mubr.f32.mxu1 %v437_v2  ;;  %v684_v1 = vld [vmem:[%s8186_s0 + $0x14f0] sm:$0xff]  ;;  %v693_v2 = vld [vmem:[%s8186_s0 + $0x1538] sm:$0xff] }
 0x2f5   :  { %3425 = vmatprep.mubr.f32.mxu0 %v445_v3  ;;  %v701_v3 = vld [vmem:[%s8186_s0 + $0x1578] sm:$0xff] }
 0x2f7   :  { %2186 = vmatmul.mubr.f32.gmra.mrb[52].mxu1 %v436_v4  ;;  %v692_v4 = vld [vmem:[%s8186_s0 + $0x1530] sm:$0xff] }
 0x2f8   :  { %3426 = vmatmul.mubr.f32.gmra.mrb[52].mxu0 %v444_v5  ;;  %2190 = vmatprep.mubr.f32.mxu1 %v453_v6  ;;  %v700_v5 = vld [vmem:[%s8186_s0 + $0x1570] sm:$0xff]  ;;  %v709_v6 = vld [vmem:[%s8186_s0 + $0x15b8] sm:$0xff] }
 0x2f9   :  { %3430 = vmatprep.mubr.f32.mxu0 %v461_v7  ;;  %v717_v7 = vld [vmem:[%s8186_s0 + $0x15f8] sm:$0xff] }
 0x2fb   :  { %2191 = vmatmul.mubr.f32.gmra.mrb[54].mxu1 %v452_v8  ;;  %v708_v8 = vld [vmem:[%s8186_s0 + $0x15b0] sm:$0xff] }
 0x2fc   :  { %3431 = vmatmul.mubr.f32.gmra.mrb[54].mxu0 %v460_v9  ;;  %2195 = vmatprep.mubr.f32.mxu1 %v469_v10  ;;  %v716_v9 = vld [vmem:[%s8186_s0 + $0x15f0] sm:$0xff]  ;;  %v725_v10 = vld [vmem:[%s8186_s0 + $0x1638] sm:$0xff] }
 0x2fd   :  { %3435 = vmatprep.mubr.f32.mxu0 %v477_v11  ;;  %v733_v11 = vld [vmem:[%s8186_s0 + $0x1678] sm:$0xff] }
 0x2ff   :  { %2196 = vmatmul.mubr.f32.gmra.mrb[56].mxu1 %v468_v12  ;;  %v724_v12 = vld [vmem:[%s8186_s0 + $0x1630] sm:$0xff] }
 0x300   :  { %3436 = vmatmul.mubr.f32.gmra.mrb[56].mxu0 %v476_v13  ;;  %2200 = vmatprep.mubr.f32.mxu1 %v485_v14  ;;  %v732_v13 = vld [vmem:[%s8186_s0 + $0x1670] sm:$0xff]  ;;  %v741_v14 = vld [vmem:[%s8186_s0 + $0x16b8] sm:$0xff] }
 0x301   :  { %3440 = vmatprep.mubr.f32.mxu0 %v493_v15  ;;  %v749_v15 = vld [vmem:[%s8186_s0 + $0x16f8] sm:$0xff] }
 0x303   :  { %2201 = vmatmul.mubr.f32.gmra.mrb[58].mxu1 %v484_v16  ;;  %v740_v16 = vld [vmem:[%s8186_s0 + $0x16b0] sm:$0xff] }
 0x304   :  { %3441 = vmatmul.mubr.f32.gmra.mrb[58].mxu0 %v492_v17  ;;  %2205 = vmatprep.mubr.f32.mxu1 %v501_v18  ;;  %v748_v17 = vld [vmem:[%s8186_s0 + $0x16f0] sm:$0xff]  ;;  %v757_v18 = vld [vmem:[%s8186_s0 + $0x1738] sm:$0xff] }
 0x305   :  { %3445 = vmatprep.mubr.f32.mxu0 %v509_v19  ;;  %v765_v19 = vld [vmem:[%s8186_s0 + $0x1778] sm:$0xff] }
 0x307   :  { %2206 = vmatmul.mubr.f32.gmra.mrb[60].mxu1 %v500_v20  ;;  %v756_v20 = vld [vmem:[%s8186_s0 + $0x1730] sm:$0xff] }
 0x308   :  { %3446 = vmatmul.mubr.f32.gmra.mrb[60].mxu0 %v508_v21  ;;  %2210 = vmatprep.mubr.f32.mxu1 %v517_v22  ;;  %v764_v21 = vld [vmem:[%s8186_s0 + $0x1770] sm:$0xff]  ;;  %v773_v22 = vld [vmem:[%s8186_s0 + $0x17b8] sm:$0xff] }
 0x309   :  { %3450 = vmatprep.mubr.f32.mxu0 %v525_v23  ;;  %v781_v23 = vld [vmem:[%s8186_s0 + $0x17f8] sm:$0xff] }
 0x30b   :  { %2211 = vmatmul.mubr.f32.gmra.mrb[62].mxu1 %v516_v24  ;;  %v772_v24 = vld [vmem:[%s8186_s0 + $0x17b0] sm:$0xff] }
 0x30c   :  { %3451 = vmatmul.mubr.f32.gmra.mrb[62].mxu0 %v524_v25  ;;  %2215 = vmatprep.mubr.f32.mxu1 %v533_v26  ;;  %v780_v25 = vld [vmem:[%s8186_s0 + $0x17f0] sm:$0xff]  ;;  %v789_v26 = vld [vmem:[%s8186_s0 + $0x1838] sm:$0xff] }
 0x30d   :  { %3455 = vmatprep.mubr.f32.mxu0 %v541_v0  ;;  %v797_v0 = vld [vmem:[%s8186_s0 + $0x1878] sm:$0xff] }
 0x30f   :  { %2216 = vmatmul.mubr.f32.gmra.mrb[64].mxu1 %v532_v27  ;;  %v788_v27 = vld [vmem:[%s8186_s0 + $0x1830] sm:$0xff] }
 0x310   :  { %3456 = vmatmul.mubr.f32.gmra.mrb[64].mxu0 %v540_v28  ;;  %2220 = vmatprep.mubr.f32.mxu1 %v549_v29  ;;  %v796_v28 = vld [vmem:[%s8186_s0 + $0x1870] sm:$0xff]  ;;  %v7987_v29 = vld [vmem:[%s8187_s2] ss:$0 sm:$0xff] }
 0x311   :  { %3460 = vmatprep.mubr.f32.mxu0 %v557_v30 }
 0x313   :  { %2221 = vmatmul.mubr.f32.gmra.mrb[66].mxu1 %v548_v31 }
 0x314   :  { %3461 = vmatmul.mubr.f32.gmra.mrb[66].mxu0 %v556_v32  ;;  %2225 = vmatprep.mubr.f32.mxu1 %v565_v33 }
 0x315   :  { %3465 = vmatprep.mubr.f32.mxu0 %v573_v34 }
 0x317   :  { %2226 = vmatmul.mubr.f32.gmra.mrb[68].mxu1 %v564_v35 }
 0x318   :  { %3466 = vmatmul.mubr.f32.gmra.mrb[68].mxu0 %v572_v36  ;;  %2230 = vmatprep.mubr.f32.mxu1 %v581_v37 }
 0x319   :  { %3470 = vmatprep.mubr.f32.mxu0 %v589_v38 }
 0x31b   :  { %2231 = vmatmul.mubr.f32.gmra.mrb[70].mxu1 %v580_v39 }
 0x31c   :  { %3471 = vmatmul.mubr.f32.gmra.mrb[70].mxu0 %v588_v40  ;;  %2235 = vmatprep.mubr.f32.mxu1 %v597_v41 }
 0x31d   :  { %3475 = vmatprep.mubr.f32.mxu0 %v605_v42 }
 0x31f   :  { %2236 = vmatmul.mubr.f32.gmra.mrb[72].mxu1 %v596_v43 }
 0x320   :  { %3476 = vmatmul.mubr.f32.gmra.mrb[72].mxu0 %v604_v44  ;;  %2240 = vmatprep.mubr.f32.mxu1 %v613_v45 }
 0x321   :  { %3480 = vmatprep.mubr.f32.mxu0 %v621_v46 }
 0x323   :  { %2241 = vmatmul.mubr.f32.gmra.mrb[74].mxu1 %v612_v47 }
 0x324   :  { %3481 = vmatmul.mubr.f32.gmra.mrb[74].mxu0 %v620_v48  ;;  %2245 = vmatprep.mubr.f32.mxu1 %v629_v49 }
 0x325   :  { %3485 = vmatprep.mubr.f32.mxu0 %v637_v50 }
 0x327   :  { %2246 = vmatmul.mubr.f32.gmra.mrb[76].mxu1 %v628_v51 }
 0x328   :  { %3486 = vmatmul.mubr.f32.gmra.mrb[76].mxu0 %v636_v52  ;;  %2250 = vmatprep.mubr.f32.mxu1 %v645_v53 }
 0x329   :  { %3490 = vmatprep.mubr.f32.mxu0 %v653_v54 }
 0x32b   :  { %2251 = vmatmul.mubr.f32.gmra.mrb[78].mxu1 %v644_v55 }
 0x32c   :  { %3491 = vmatmul.mubr.f32.gmra.mrb[78].mxu0 %v652_v56  ;;  %2255 = vmatprep.mubr.f32.mxu1 %v661_v57 }
 0x32d   :  { %3495 = vmatprep.mubr.f32.mxu0 %v669_v58 }
 0x32f   :  { %2256 = vmatmul.mubr.f32.gmra.mrb[80].mxu1 %v660_v59 }
 0x330   :  { %3496 = vmatmul.mubr.f32.gmra.mrb[80].mxu0 %v668_v60  ;;  %2260 = vmatprep.mubr.f32.mxu1 %v677_v61 }
 0x331   :  { %3500 = vmatprep.mubr.f32.mxu0 %v685_v62 }
 0x333   :  { %2261 = vmatmul.mubr.f32.gmra.mrb[82].mxu1 %v676_v63 }
 0x334   :  { %3501 = vmatmul.mubr.f32.gmra.mrb[82].mxu0 %v684_v1  ;;  %2265 = vmatprep.mubr.f32.mxu1 %v693_v2 }
 0x335   :  { %3505 = vmatprep.mubr.f32.mxu0 %v701_v3 }
 0x337   :  { %2266 = vmatmul.mubr.f32.gmra.mrb[84].mxu1 %v692_v4 }
 0x338   :  { %3506 = vmatmul.mubr.f32.gmra.mrb[84].mxu0 %v700_v5  ;;  %2270 = vmatprep.mubr.f32.mxu1 %v709_v6 }
 0x339   :  { %3510 = vmatprep.mubr.f32.mxu0 %v717_v7 }
 0x33b   :  { %2271 = vmatmul.mubr.f32.gmra.mrb[86].mxu1 %v708_v8 }
 0x33c   :  { %3511 = vmatmul.mubr.f32.gmra.mrb[86].mxu0 %v716_v9  ;;  %2275 = vmatprep.mubr.f32.mxu1 %v725_v10 }
 0x33d   :  { %3515 = vmatprep.mubr.f32.mxu0 %v733_v11 }
 0x33f   :  { %2276 = vmatmul.mubr.f32.gmra.mrb[88].mxu1 %v724_v12 }
 0x340   :  { %3516 = vmatmul.mubr.f32.gmra.mrb[88].mxu0 %v732_v13  ;;  %2280 = vmatprep.mubr.f32.mxu1 %v741_v14 }
 0x341   :  { %3520 = vmatprep.mubr.f32.mxu0 %v749_v15 }
 0x343   :  { %2281 = vmatmul.mubr.f32.gmra.mrb[90].mxu1 %v740_v16 }
 0x344   :  { %3521 = vmatmul.mubr.f32.gmra.mrb[90].mxu0 %v748_v17  ;;  %2285 = vmatprep.mubr.f32.mxu1 %v757_v18 }
 0x345   :  { %3525 = vmatprep.mubr.f32.mxu0 %v765_v19 }
 0x347   :  { %2286 = vmatmul.mubr.f32.gmra.mrb[92].mxu1 %v756_v20 }
 0x348   :  { %3526 = vmatmul.mubr.f32.gmra.mrb[92].mxu0 %v764_v21  ;;  %2290 = vmatprep.mubr.f32.mxu1 %v773_v22 }
 0x349   :  { %3530 = vmatprep.mubr.f32.mxu0 %v781_v23 }
 0x34b   :  { %2291 = vmatmul.mubr.f32.gmra.mrb[94].mxu1 %v772_v24 }
 0x34c   :  { %3531 = vmatmul.mubr.f32.gmra.mrb[94].mxu0 %v780_v25  ;;  %2295 = vmatprep.mubr.f32.mxu1 %v789_v26 }
 0x34d   :  { %3535 = vmatprep.mubr.f32.mxu0 %v797_v0 }
 0x34f   :  { %2296 = vmatmul.mubr.f32.gmra.mrb[96].mxu1 %v788_v27 }
 0x350   :  { %3536 = vmatmul.mubr.f32.gmra.mrb[96].mxu0 %v796_v28 }
 0x362   :  { %v2057_v30 = vpop.f32.mrb[0].mxu1 }
 0x363   :  { %v4028_v31 = vadd.f32 %v7987_v29, %v2057_v30  ;;  %v3297_v32 = vpop.f32.mrb[0].mxu0  ;;  %v2059_v33 = vpop.f32.mrb[1].mxu1 }
 0x364   :  { %v3299_v34 = vpop.f32.mrb[1].mxu0 }
 0x365   :  { %v4029_v35 = vadd.f32 %v4028_v31, %v3297_v32 }
 0x366   :  { %v2062_v36 = vpop.f32.mrb[2].mxu1 }
 0x367   :  { %v3541_v37 = vmax.f32 %v4029_v35, 0.0  ;;  %v4030_v38 = vadd.f32 %v7987_v29, %v2062_v36  ;;  %v3302_v39 = vpop.f32.mrb[2].mxu0  ;;  %v2064_v40 = vpop.f32.mrb[3].mxu1 }
 0x368   :  { %v3304_v41 = vpop.f32.mrb[3].mxu0 }
 0x369   :  { %3590 = vst [vmem:[%s8188_s3] sm:$0xff] %v3541_v37  ;;  %v4031_v42 = vadd.f32 %v4030_v38, %v3302_v39 }
 0x36a   :  { %v2067_v43 = vpop.f32.mrb[4].mxu1 }
 0x36b   :  { %v3542_v44 = vmax.f32 %v4031_v42, 0.0  ;;  %v4032_v45 = vadd.f32 %v7987_v29, %v2067_v43  ;;  %v3307_v46 = vpop.f32.mrb[4].mxu0  ;;  %v2069_v47 = vpop.f32.mrb[5].mxu1 }
 0x36c   :  { %v3309_v48 = vpop.f32.mrb[5].mxu0 }
 0x36d   :  { %3591 = vst [vmem:[%s8188_s3 + $0x8] sm:$0xff] %v3542_v44  ;;  %v4033_v49 = vadd.f32 %v4032_v45, %v3307_v46 }
 0x36e   :  { %v2072_v50 = vpop.f32.mrb[6].mxu1 }
 0x36f   :  { %v3543_v51 = vmax.f32 %v4033_v49, 0.0  ;;  %v4034_v52 = vadd.f32 %v7987_v29, %v2072_v50  ;;  %v3312_v53 = vpop.f32.mrb[6].mxu0  ;;  %v2074_v54 = vpop.f32.mrb[7].mxu1 }
 0x370   :  { %v3314_v55 = vpop.f32.mrb[7].mxu0 }
 0x371   :  { %3592 = vst [vmem:[%s8188_s3 + $0x10] sm:$0xff] %v3543_v51  ;;  %v4035_v56 = vadd.f32 %v4034_v52, %v3312_v53 }
 0x372   :  { %v2077_v57 = vpop.f32.mrb[8].mxu1 }
 0x373   :  { %v3544_v58 = vmax.f32 %v4035_v56, 0.0  ;;  %v4036_v59 = vadd.f32 %v7987_v29, %v2077_v57  ;;  %v3317_v60 = vpop.f32.mrb[8].mxu0  ;;  %v2079_v61 = vpop.f32.mrb[9].mxu1 }
 0x374   :  { %v3319_v62 = vpop.f32.mrb[9].mxu0 }
 0x375   :  { %3593 = vst [vmem:[%s8188_s3 + $0x18] sm:$0xff] %v3544_v58  ;;  %v4037_v63 = vadd.f32 %v4036_v59, %v3317_v60 }
 0x376   :  { %v2082_v1 = vpop.f32.mrb[10].mxu1 }
 0x377   :  { %v3545_v2 = vmax.f32 %v4037_v63, 0.0  ;;  %v4038_v3 = vadd.f32 %v7987_v29, %v2082_v1  ;;  %v3322_v4 = vpop.f32.mrb[10].mxu0  ;;  %v2084_v5 = vpop.f32.mrb[11].mxu1 }
 0x378   :  { %v3324_v6 = vpop.f32.mrb[11].mxu0 }
 0x379   :  { %3594 = vst [vmem:[%s8188_s3 + $0x20] sm:$0xff] %v3545_v2  ;;  %v4039_v7 = vadd.f32 %v4038_v3, %v3322_v4 }
 0x37a   :  { %v2087_v8 = vpop.f32.mrb[12].mxu1 }
 0x37b   :  { %v3546_v9 = vmax.f32 %v4039_v7, 0.0  ;;  %v4040_v10 = vadd.f32 %v7987_v29, %v2087_v8  ;;  %v3327_v11 = vpop.f32.mrb[12].mxu0  ;;  %v2089_v12 = vpop.f32.mrb[13].mxu1 }
 0x37c   :  { %v3329_v13 = vpop.f32.mrb[13].mxu0 }
 0x37d   :  { %3595 = vst [vmem:[%s8188_s3 + $0x28] sm:$0xff] %v3546_v9  ;;  %v4041_v14 = vadd.f32 %v4040_v10, %v3327_v11 }
 0x37e   :  { %v2092_v15 = vpop.f32.mrb[14].mxu1 }
 0x37f   :  { %v3547_v16 = vmax.f32 %v4041_v14, 0.0  ;;  %v4042_v17 = vadd.f32 %v7987_v29, %v2092_v15  ;;  %v3332_v18 = vpop.f32.mrb[14].mxu0  ;;  %v2094_v19 = vpop.f32.mrb[15].mxu1 }
 0x380   :  { %v3334_v20 = vpop.f32.mrb[15].mxu0 }
 0x381   :  { %3596 = vst [vmem:[%s8188_s3 + $0x30] sm:$0xff] %v3547_v16  ;;  %v4043_v21 = vadd.f32 %v4042_v17, %v3332_v18 }
 0x382   :  { %v2097_v22 = vpop.f32.mrb[16].mxu1 }
 0x383   :  { %v3548_v23 = vmax.f32 %v4043_v21, 0.0  ;;  %v4044_v24 = vadd.f32 %v7987_v29, %v2097_v22  ;;  %v3337_v25 = vpop.f32.mrb[16].mxu0  ;;  %v2099_v26 = vpop.f32.mrb[17].mxu1 }
 0x384   :  { %v3339_v0 = vpop.f32.mrb[17].mxu0 }
 0x385   :  { %3597 = vst [vmem:[%s8188_s3 + $0x38] sm:$0xff] %v3548_v23  ;;  %v4045_v27 = vadd.f32 %v4044_v24, %v3337_v25 }
 0x386   :  { %v2102_v28 = vpop.f32.mrb[18].mxu1 }
 0x387   :  { %v3549_v30 = vmax.f32 %v4045_v27, 0.0  ;;  %v4046_v31 = vadd.f32 %v7987_v29, %v2102_v28  ;;  %v3342_v32 = vpop.f32.mrb[18].mxu0  ;;  %v2104_v33 = vpop.f32.mrb[19].mxu1 }
 0x388   :  { %v3344_v34 = vpop.f32.mrb[19].mxu0 }
 0x389   :  { %3598 = vst [vmem:[%s8188_s3 + $0x40] sm:$0xff] %v3549_v30  ;;  %v4047_v35 = vadd.f32 %v4046_v31, %v3342_v32 }
 0x38a   :  { %v2107_v36 = vpop.f32.mrb[20].mxu1 }
 0x38b   :  { %v3550_v37 = vmax.f32 %v4047_v35, 0.0  ;;  %v4048_v38 = vadd.f32 %v7987_v29, %v2107_v36  ;;  %v3347_v39 = vpop.f32.mrb[20].mxu0  ;;  %v2109_v40 = vpop.f32.mrb[21].mxu1 }
 0x38c   :  { %v3349_v41 = vpop.f32.mrb[21].mxu0 }
 0x38d   :  { %3599 = vst [vmem:[%s8188_s3 + $0x48] sm:$0xff] %v3550_v37  ;;  %v4049_v42 = vadd.f32 %v4048_v38, %v3347_v39 }
 0x38e   :  { %v2112_v43 = vpop.f32.mrb[22].mxu1 }
 0x38f   :  { %v3551_v44 = vmax.f32 %v4049_v42, 0.0  ;;  %v4050_v45 = vadd.f32 %v7987_v29, %v2112_v43  ;;  %v3352_v46 = vpop.f32.mrb[22].mxu0  ;;  %v2114_v47 = vpop.f32.mrb[23].mxu1 }
 0x390   :  { %v3354_v48 = vpop.f32.mrb[23].mxu0 }
 0x391   :  { %3600 = vst [vmem:[%s8188_s3 + $0x50] sm:$0xff] %v3551_v44  ;;  %v4051_v49 = vadd.f32 %v4050_v45, %v3352_v46 }
 0x392   :  { %v2117_v50 = vpop.f32.mrb[24].mxu1 }
 0x393   :  { %v3552_v51 = vmax.f32 %v4051_v49, 0.0  ;;  %v4052_v52 = vadd.f32 %v7987_v29, %v2117_v50  ;;  %v3357_v53 = vpop.f32.mrb[24].mxu0  ;;  %v2119_v54 = vpop.f32.mrb[25].mxu1 }
 0x394   :  { %v3359_v55 = vpop.f32.mrb[25].mxu0 }
 0x395   :  { %3601 = vst [vmem:[%s8188_s3 + $0x58] sm:$0xff] %v3552_v51  ;;  %v4053_v56 = vadd.f32 %v4052_v52, %v3357_v53 }
 0x396   :  { %v2122_v57 = vpop.f32.mrb[26].mxu1 }
 0x397   :  { %v3553_v58 = vmax.f32 %v4053_v56, 0.0  ;;  %v4054_v59 = vadd.f32 %v7987_v29, %v2122_v57  ;;  %v3362_v60 = vpop.f32.mrb[26].mxu0  ;;  %v2124_v61 = vpop.f32.mrb[27].mxu1 }
 0x398   :  { %v3364_v62 = vpop.f32.mrb[27].mxu0 }
 0x399   :  { %3602 = vst [vmem:[%s8188_s3 + $0x60] sm:$0xff] %v3553_v58  ;;  %v4055_v63 = vadd.f32 %v4054_v59, %v3362_v60 }
 0x39a   :  { %v2127_v1 = vpop.f32.mrb[28].mxu1 }
 0x39b   :  { %v3554_v2 = vmax.f32 %v4055_v63, 0.0  ;;  %v4056_v3 = vadd.f32 %v7987_v29, %v2127_v1  ;;  %v3367_v4 = vpop.f32.mrb[28].mxu0  ;;  %v2129_v5 = vpop.f32.mrb[29].mxu1 }
 0x39c   :  { %v3369_v6 = vpop.f32.mrb[29].mxu0 }
 0x39d   :  { %3603 = vst [vmem:[%s8188_s3 + $0x68] sm:$0xff] %v3554_v2  ;;  %v4057_v7 = vadd.f32 %v4056_v3, %v3367_v4 }
 0x39e   :  { %v2132_v8 = vpop.f32.mrb[30].mxu1 }
 0x39f   :  { %v3555_v9 = vmax.f32 %v4057_v7, 0.0  ;;  %v4058_v10 = vadd.f32 %v7987_v29, %v2132_v8  ;;  %v3372_v11 = vpop.f32.mrb[30].mxu0  ;;  %v2134_v12 = vpop.f32.mrb[31].mxu1 }
 0x3a0   :  { %v3374_v13 = vpop.f32.mrb[31].mxu0 }
 0x3a1   :  { %3604 = vst [vmem:[%s8188_s3 + $0x70] sm:$0xff] %v3555_v9  ;;  %v4059_v14 = vadd.f32 %v4058_v10, %v3372_v11 }
 0x3a2   :  { %v2137_v15 = vpop.f32.mrb[32].mxu1 }
 0x3a3   :  { %v3556_v16 = vmax.f32 %v4059_v14, 0.0  ;;  %v4060_v17 = vadd.f32 %v7987_v29, %v2137_v15  ;;  %v3377_v18 = vpop.f32.mrb[32].mxu0  ;;  %v2139_v19 = vpop.f32.mrb[33].mxu1 }
 0x3a4   :  { %v3379_v20 = vpop.f32.mrb[33].mxu0 }
 0x3a5   :  { %3605 = vst [vmem:[%s8188_s3 + $0x78] sm:$0xff] %v3556_v16  ;;  %v4061_v21 = vadd.f32 %v4060_v17, %v3377_v18 }
 0x3a6   :  { %v2142_v22 = vpop.f32.mrb[34].mxu1 }
 0x3a7   :  { %v3557_v23 = vmax.f32 %v4061_v21, 0.0  ;;  %v4062_v24 = vadd.f32 %v7987_v29, %v2142_v22  ;;  %v3382_v25 = vpop.f32.mrb[34].mxu0  ;;  %v2144_v26 = vpop.f32.mrb[35].mxu1 }
 0x3a8   :  { %v3384_v0 = vpop.f32.mrb[35].mxu0 }
 0x3a9   :  { %3606 = vst [vmem:[%s8188_s3 + $0x80] sm:$0xff] %v3557_v23  ;;  %v4063_v27 = vadd.f32 %v4062_v24, %v3382_v25 }
 0x3aa   :  { %v2147_v28 = vpop.f32.mrb[36].mxu1 }
 0x3ab   :  { %v3558_v30 = vmax.f32 %v4063_v27, 0.0  ;;  %v4064_v31 = vadd.f32 %v7987_v29, %v2147_v28  ;;  %v3387_v32 = vpop.f32.mrb[36].mxu0  ;;  %v2149_v33 = vpop.f32.mrb[37].mxu1 }
 0x3ac   :  { %v3389_v34 = vpop.f32.mrb[37].mxu0 }
 0x3ad   :  { %3607 = vst [vmem:[%s8188_s3 + $0x88] sm:$0xff] %v3558_v30  ;;  %v4065_v35 = vadd.f32 %v4064_v31, %v3387_v32 }
 0x3ae   :  { %v2152_v36 = vpop.f32.mrb[38].mxu1 }
 0x3af   :  { %v3559_v37 = vmax.f32 %v4065_v35, 0.0  ;;  %v4066_v38 = vadd.f32 %v7987_v29, %v2152_v36  ;;  %v3392_v39 = vpop.f32.mrb[38].mxu0  ;;  %v2154_v40 = vpop.f32.mrb[39].mxu1 }
 0x3b0   :  { %v3394_v41 = vpop.f32.mrb[39].mxu0 }
 0x3b1   :  { %3608 = vst [vmem:[%s8188_s3 + $0x90] sm:$0xff] %v3559_v37  ;;  %v4067_v42 = vadd.f32 %v4066_v38, %v3392_v39 }
 0x3b2   :  { %v2157_v43 = vpop.f32.mrb[40].mxu1 }
 0x3b3   :  { %v3560_v44 = vmax.f32 %v4067_v42, 0.0  ;;  %v4068_v45 = vadd.f32 %v7987_v29, %v2157_v43  ;;  %v3397_v46 = vpop.f32.mrb[40].mxu0  ;;  %v2159_v47 = vpop.f32.mrb[41].mxu1 }
 0x3b4   :  { %v3399_v48 = vpop.f32.mrb[41].mxu0 }
 0x3b5   :  { %3609 = vst [vmem:[%s8188_s3 + $0x98] sm:$0xff] %v3560_v44  ;;  %v4069_v49 = vadd.f32 %v4068_v45, %v3397_v46 }
 0x3b6   :  { %v2162_v50 = vpop.f32.mrb[42].mxu1 }
 0x3b7   :  { %v3561_v51 = vmax.f32 %v4069_v49, 0.0  ;;  %v4070_v52 = vadd.f32 %v7987_v29, %v2162_v50  ;;  %v3402_v53 = vpop.f32.mrb[42].mxu0  ;;  %v2164_v54 = vpop.f32.mrb[43].mxu1 }
 0x3b8   :  { %v3404_v55 = vpop.f32.mrb[43].mxu0 }
 0x3b9   :  { %3610 = vst [vmem:[%s8188_s3 + $0xa0] sm:$0xff] %v3561_v51  ;;  %v4071_v56 = vadd.f32 %v4070_v52, %v3402_v53 }
 0x3ba   :  { %v2167_v57 = vpop.f32.mrb[44].mxu1 }
 0x3bb   :  { %v3562_v58 = vmax.f32 %v4071_v56, 0.0  ;;  %v4072_v59 = vadd.f32 %v7987_v29, %v2167_v57  ;;  %v3407_v60 = vpop.f32.mrb[44].mxu0  ;;  %v2169_v61 = vpop.f32.mrb[45].mxu1 }
 0x3bc   :  { %v3409_v62 = vpop.f32.mrb[45].mxu0 }
 0x3bd   :  { %3611 = vst [vmem:[%s8188_s3 + $0xa8] sm:$0xff] %v3562_v58  ;;  %v4073_v63 = vadd.f32 %v4072_v59, %v3407_v60 }
 0x3be   :  { %v2172_v1 = vpop.f32.mrb[46].mxu1 }
 0x3bf   :  { %v3563_v2 = vmax.f32 %v4073_v63, 0.0  ;;  %v4074_v3 = vadd.f32 %v7987_v29, %v2172_v1  ;;  %v3412_v4 = vpop.f32.mrb[46].mxu0  ;;  %v2174_v5 = vpop.f32.mrb[47].mxu1 }
 0x3c0   :  { %v3414_v6 = vpop.f32.mrb[47].mxu0 }
 0x3c1   :  { %3612 = vst [vmem:[%s8188_s3 + $0xb0] sm:$0xff] %v3563_v2  ;;  %v4075_v7 = vadd.f32 %v4074_v3, %v3412_v4 }
 0x3c2   :  { %v2177_v8 = vpop.f32.mrb[48].mxu1 }
 0x3c3   :  { %v3564_v9 = vmax.f32 %v4075_v7, 0.0  ;;  %v4076_v10 = vadd.f32 %v7987_v29, %v2177_v8  ;;  %v3417_v11 = vpop.f32.mrb[48].mxu0  ;;  %v2179_v12 = vpop.f32.mrb[49].mxu1 }
 0x3c4   :  { %v3419_v13 = vpop.f32.mrb[49].mxu0 }
 0x3c5   :  { %3613 = vst [vmem:[%s8188_s3 + $0xb8] sm:$0xff] %v3564_v9  ;;  %v4077_v14 = vadd.f32 %v4076_v10, %v3417_v11 }
 0x3c6   :  { %v2182_v15 = vpop.f32.mrb[50].mxu1 }
 0x3c7   :  { %v3565_v16 = vmax.f32 %v4077_v14, 0.0  ;;  %v4078_v17 = vadd.f32 %v7987_v29, %v2182_v15  ;;  %v3422_v18 = vpop.f32.mrb[50].mxu0  ;;  %v2184_v19 = vpop.f32.mrb[51].mxu1 }
 0x3c8   :  { %v3424_v20 = vpop.f32.mrb[51].mxu0 }
 0x3c9   :  { %3614 = vst [vmem:[%s8188_s3 + $0xc0] sm:$0xff] %v3565_v16  ;;  %v4079_v21 = vadd.f32 %v4078_v17, %v3422_v18 }
 0x3ca   :  { %v2187_v22 = vpop.f32.mrb[52].mxu1 }
 0x3cb   :  { %v3566_v23 = vmax.f32 %v4079_v21, 0.0  ;;  %v4080_v24 = vadd.f32 %v7987_v29, %v2187_v22  ;;  %v3427_v25 = vpop.f32.mrb[52].mxu0  ;;  %v2189_v26 = vpop.f32.mrb[53].mxu1 }
 0x3cc   :  { %v3429_v0 = vpop.f32.mrb[53].mxu0 }
 0x3cd   :  { %3615 = vst [vmem:[%s8188_s3 + $0xc8] sm:$0xff] %v3566_v23  ;;  %v4081_v27 = vadd.f32 %v4080_v24, %v3427_v25 }
 0x3ce   :  { %v2192_v28 = vpop.f32.mrb[54].mxu1 }
 0x3cf   :  { %v3567_v30 = vmax.f32 %v4081_v27, 0.0  ;;  %v4082_v31 = vadd.f32 %v7987_v29, %v2192_v28  ;;  %v3432_v32 = vpop.f32.mrb[54].mxu0  ;;  %v2194_v33 = vpop.f32.mrb[55].mxu1 }
 0x3d0   :  { %v3434_v34 = vpop.f32.mrb[55].mxu0 }
 0x3d1   :  { %3616 = vst [vmem:[%s8188_s3 + $0xd0] sm:$0xff] %v3567_v30  ;;  %v4083_v35 = vadd.f32 %v4082_v31, %v3432_v32 }
 0x3d2   :  { %v2197_v36 = vpop.f32.mrb[56].mxu1 }
 0x3d3   :  { %v3568_v37 = vmax.f32 %v4083_v35, 0.0  ;;  %v4084_v38 = vadd.f32 %v7987_v29, %v2197_v36  ;;  %v3437_v39 = vpop.f32.mrb[56].mxu0  ;;  %v2199_v40 = vpop.f32.mrb[57].mxu1 }
 0x3d4   :  { %v3439_v41 = vpop.f32.mrb[57].mxu0 }
 0x3d5   :  { %3617 = vst [vmem:[%s8188_s3 + $0xd8] sm:$0xff] %v3568_v37  ;;  %v4085_v42 = vadd.f32 %v4084_v38, %v3437_v39 }
 0x3d6   :  { %v2202_v43 = vpop.f32.mrb[58].mxu1 }
 0x3d7   :  { %v3569_v44 = vmax.f32 %v4085_v42, 0.0  ;;  %v4086_v45 = vadd.f32 %v7987_v29, %v2202_v43  ;;  %v3442_v46 = vpop.f32.mrb[58].mxu0  ;;  %v2204_v47 = vpop.f32.mrb[59].mxu1 }
 0x3d8   :  { %v3444_v48 = vpop.f32.mrb[59].mxu0 }
 0x3d9   :  { %3618 = vst [vmem:[%s8188_s3 + $0xe0] sm:$0xff] %v3569_v44  ;;  %v4087_v49 = vadd.f32 %v4086_v45, %v3442_v46 }
 0x3da   :  { %v2207_v50 = vpop.f32.mrb[60].mxu1 }
 0x3db   :  { %v3570_v51 = vmax.f32 %v4087_v49, 0.0  ;;  %v4088_v52 = vadd.f32 %v7987_v29, %v2207_v50  ;;  %v3447_v53 = vpop.f32.mrb[60].mxu0  ;;  %v2209_v54 = vpop.f32.mrb[61].mxu1 }
 0x3dc   :  { %v3449_v55 = vpop.f32.mrb[61].mxu0 }
 0x3dd   :  { %3619 = vst [vmem:[%s8188_s3 + $0xe8] sm:$0xff] %v3570_v51  ;;  %v4089_v56 = vadd.f32 %v4088_v52, %v3447_v53 }
 0x3de   :  { %v2212_v57 = vpop.f32.mrb[62].mxu1 }
 0x3df   :  { %v3571_v58 = vmax.f32 %v4089_v56, 0.0  ;;  %v4090_v59 = vadd.f32 %v7987_v29, %v2212_v57  ;;  %v3452_v60 = vpop.f32.mrb[62].mxu0  ;;  %v2214_v61 = vpop.f32.mrb[63].mxu1 }
 0x3e0   :  { %v3454_v62 = vpop.f32.mrb[63].mxu0 }
 0x3e1   :  { %3620 = vst [vmem:[%s8188_s3 + $0xf0] sm:$0xff] %v3571_v58  ;;  %v4091_v63 = vadd.f32 %v4090_v59, %v3452_v60 }
 0x3e2   :  { %v2217_v1 = vpop.f32.mrb[64].mxu1 }
 0x3e3   :  { %v3572_v2 = vmax.f32 %v4091_v63, 0.0  ;;  %v4092_v3 = vadd.f32 %v7987_v29, %v2217_v1  ;;  %v3457_v4 = vpop.f32.mrb[64].mxu0  ;;  %v2219_v5 = vpop.f32.mrb[65].mxu1 }
 0x3e4   :  { %v3459_v6 = vpop.f32.mrb[65].mxu0 }
 0x3e5   :  { %3621 = vst [vmem:[%s8188_s3 + $0xf8] sm:$0xff] %v3572_v2  ;;  %v4093_v7 = vadd.f32 %v4092_v3, %v3457_v4 }
 0x3e6   :  { %v2222_v8 = vpop.f32.mrb[66].mxu1 }
 0x3e7   :  { %v3573_v9 = vmax.f32 %v4093_v7, 0.0  ;;  %v4094_v10 = vadd.f32 %v7987_v29, %v2222_v8  ;;  %v3462_v11 = vpop.f32.mrb[66].mxu0  ;;  %v2224_v12 = vpop.f32.mrb[67].mxu1 }
 0x3e8   :  { %v3464_v13 = vpop.f32.mrb[67].mxu0 }
 0x3e9   :  { %3622 = vst [vmem:[%s8188_s3 + $0x100] sm:$0xff] %v3573_v9  ;;  %v4095_v14 = vadd.f32 %v4094_v10, %v3462_v11 }
 0x3ea   :  { %v2227_v15 = vpop.f32.mrb[68].mxu1 }
 0x3eb   :  { %v3574_v16 = vmax.f32 %v4095_v14, 0.0  ;;  %v4096_v17 = vadd.f32 %v7987_v29, %v2227_v15  ;;  %v3467_v18 = vpop.f32.mrb[68].mxu0  ;;  %v2229_v19 = vpop.f32.mrb[69].mxu1 }
 0x3ec   :  { %v3469_v20 = vpop.f32.mrb[69].mxu0 }
 0x3ed   :  { %3623 = vst [vmem:[%s8188_s3 + $0x108] sm:$0xff] %v3574_v16  ;;  %v4097_v21 = vadd.f32 %v4096_v17, %v3467_v18 }
 0x3ee   :  { %v2232_v22 = vpop.f32.mrb[70].mxu1 }
 0x3ef   :  { %v3575_v23 = vmax.f32 %v4097_v21, 0.0  ;;  %v4098_v24 = vadd.f32 %v7987_v29, %v2232_v22  ;;  %v3472_v25 = vpop.f32.mrb[70].mxu0  ;;  %v2234_v26 = vpop.f32.mrb[71].mxu1 }
 0x3f0   :  { %v3474_v0 = vpop.f32.mrb[71].mxu0 }
 0x3f1   :  { %3624 = vst [vmem:[%s8188_s3 + $0x110] sm:$0xff] %v3575_v23  ;;  %v4099_v27 = vadd.f32 %v4098_v24, %v3472_v25 }
 0x3f2   :  { %v2237_v28 = vpop.f32.mrb[72].mxu1 }
 0x3f3   :  { %v3576_v30 = vmax.f32 %v4099_v27, 0.0  ;;  %v4100_v31 = vadd.f32 %v7987_v29, %v2237_v28  ;;  %v3477_v32 = vpop.f32.mrb[72].mxu0  ;;  %v2239_v33 = vpop.f32.mrb[73].mxu1 }
 0x3f4   :  { %v3479_v34 = vpop.f32.mrb[73].mxu0 }
 0x3f5   :  { %3625 = vst [vmem:[%s8188_s3 + $0x118] sm:$0xff] %v3576_v30  ;;  %v4101_v35 = vadd.f32 %v4100_v31, %v3477_v32 }
 0x3f6   :  { %v2242_v36 = vpop.f32.mrb[74].mxu1 }
 0x3f7   :  { %v3577_v37 = vmax.f32 %v4101_v35, 0.0  ;;  %v4102_v38 = vadd.f32 %v7987_v29, %v2242_v36  ;;  %v3482_v39 = vpop.f32.mrb[74].mxu0  ;;  %v2244_v40 = vpop.f32.mrb[75].mxu1 }
 0x3f8   :  { %v3484_v41 = vpop.f32.mrb[75].mxu0 }
 0x3f9   :  { %3626 = vst [vmem:[%s8188_s3 + $0x120] sm:$0xff] %v3577_v37  ;;  %v4103_v42 = vadd.f32 %v4102_v38, %v3482_v39 }
 0x3fa   :  { %v2247_v43 = vpop.f32.mrb[76].mxu1 }
 0x3fb   :  { %v3578_v44 = vmax.f32 %v4103_v42, 0.0  ;;  %v4104_v45 = vadd.f32 %v7987_v29, %v2247_v43  ;;  %v3487_v46 = vpop.f32.mrb[76].mxu0  ;;  %v2249_v47 = vpop.f32.mrb[77].mxu1 }
 0x3fc   :  { %v3489_v48 = vpop.f32.mrb[77].mxu0 }
 0x3fd   :  { %3627 = vst [vmem:[%s8188_s3 + $0x128] sm:$0xff] %v3578_v44  ;;  %v4105_v49 = vadd.f32 %v4104_v45, %v3487_v46 }
 0x3fe   :  { %v2252_v50 = vpop.f32.mrb[78].mxu1 }
 0x3ff   :  { %v3579_v51 = vmax.f32 %v4105_v49, 0.0  ;;  %v4106_v52 = vadd.f32 %v7987_v29, %v2252_v50  ;;  %v3492_v53 = vpop.f32.mrb[78].mxu0  ;;  %v2254_v54 = vpop.f32.mrb[79].mxu1 }
 0x400   :  { %v3494_v55 = vpop.f32.mrb[79].mxu0 }
 0x401   :  { %3628 = vst [vmem:[%s8188_s3 + $0x130] sm:$0xff] %v3579_v51  ;;  %v4107_v56 = vadd.f32 %v4106_v52, %v3492_v53 }
 0x402   :  { %v2257_v57 = vpop.f32.mrb[80].mxu1 }
 0x403   :  { %v3580_v58 = vmax.f32 %v4107_v56, 0.0  ;;  %v4108_v59 = vadd.f32 %v7987_v29, %v2257_v57  ;;  %v3497_v60 = vpop.f32.mrb[80].mxu0  ;;  %v2259_v61 = vpop.f32.mrb[81].mxu1 }
 0x404   :  { %v3499_v62 = vpop.f32.mrb[81].mxu0 }
 0x405   :  { %3629 = vst [vmem:[%s8188_s3 + $0x138] sm:$0xff] %v3580_v58  ;;  %v4109_v63 = vadd.f32 %v4108_v59, %v3497_v60 }
 0x406   :  { %v2262_v1 = vpop.f32.mrb[82].mxu1 }
 0x407   :  { %v3581_v2 = vmax.f32 %v4109_v63, 0.0  ;;  %v4110_v3 = vadd.f32 %v7987_v29, %v2262_v1  ;;  %v3502_v4 = vpop.f32.mrb[82].mxu0  ;;  %v2264_v5 = vpop.f32.mrb[83].mxu1 }
 0x408   :  { %v3504_v6 = vpop.f32.mrb[83].mxu0 }
 0x409   :  { %3630 = vst [vmem:[%s8188_s3 + $0x140] sm:$0xff] %v3581_v2  ;;  %v4111_v7 = vadd.f32 %v4110_v3, %v3502_v4 }
 0x40a   :  { %v2267_v8 = vpop.f32.mrb[84].mxu1 }
 0x40b   :  { %v3582_v9 = vmax.f32 %v4111_v7, 0.0  ;;  %v4112_v10 = vadd.f32 %v7987_v29, %v2267_v8  ;;  %v3507_v11 = vpop.f32.mrb[84].mxu0  ;;  %v2269_v12 = vpop.f32.mrb[85].mxu1 }
 0x40c   :  { %v3509_v13 = vpop.f32.mrb[85].mxu0 }
 0x40d   :  { %3631 = vst [vmem:[%s8188_s3 + $0x148] sm:$0xff] %v3582_v9  ;;  %v4113_v14 = vadd.f32 %v4112_v10, %v3507_v11 }
 0x40e   :  { %v2272_v15 = vpop.f32.mrb[86].mxu1 }
 0x40f   :  { %v3583_v16 = vmax.f32 %v4113_v14, 0.0  ;;  %v4114_v17 = vadd.f32 %v7987_v29, %v2272_v15  ;;  %v3512_v18 = vpop.f32.mrb[86].mxu0  ;;  %v2274_v19 = vpop.f32.mrb[87].mxu1 }
 0x410   :  { %v3514_v20 = vpop.f32.mrb[87].mxu0 }
 0x411   :  { %3632 = vst [vmem:[%s8188_s3 + $0x150] sm:$0xff] %v3583_v16  ;;  %v4115_v21 = vadd.f32 %v4114_v17, %v3512_v18 }
 0x412   :  { %v2277_v22 = vpop.f32.mrb[88].mxu1 }
 0x413   :  { %v3584_v23 = vmax.f32 %v4115_v21, 0.0  ;;  %v4116_v24 = vadd.f32 %v7987_v29, %v2277_v22  ;;  %v3517_v25 = vpop.f32.mrb[88].mxu0  ;;  %v2279_v26 = vpop.f32.mrb[89].mxu1 }
 0x414   :  { %v3519_v0 = vpop.f32.mrb[89].mxu0 }
 0x415   :  { %3633 = vst [vmem:[%s8188_s3 + $0x158] sm:$0xff] %v3584_v23  ;;  %v4117_v27 = vadd.f32 %v4116_v24, %v3517_v25 }
 0x416   :  { %v2282_v28 = vpop.f32.mrb[90].mxu1 }
 0x417   :  { %v3585_v30 = vmax.f32 %v4117_v27, 0.0  ;;  %v4118_v31 = vadd.f32 %v7987_v29, %v2282_v28  ;;  %v3522_v32 = vpop.f32.mrb[90].mxu0  ;;  %v2284_v33 = vpop.f32.mrb[91].mxu1 }
 0x418   :  { %v3524_v34 = vpop.f32.mrb[91].mxu0 }
 0x419   :  { %3634 = vst [vmem:[%s8188_s3 + $0x160] sm:$0xff] %v3585_v30  ;;  %v4119_v35 = vadd.f32 %v4118_v31, %v3522_v32 }
 0x41a   :  { %v2287_v36 = vpop.f32.mrb[92].mxu1 }
 0x41b   :  { %v3586_v37 = vmax.f32 %v4119_v35, 0.0  ;;  %v4120_v38 = vadd.f32 %v7987_v29, %v2287_v36  ;;  %v3527_v39 = vpop.f32.mrb[92].mxu0  ;;  %v2289_v40 = vpop.f32.mrb[93].mxu1 }
 0x41c   :  { %v3529_v41 = vpop.f32.mrb[93].mxu0 }
 0x41d   :  { %3635 = vst [vmem:[%s8188_s3 + $0x168] sm:$0xff] %v3586_v37  ;;  %v4121_v42 = vadd.f32 %v4120_v38, %v3527_v39 }
 0x41e   :  { %v2292_v43 = vpop.f32.mrb[94].mxu1 }
 0x41f   :  { %v3587_v44 = vmax.f32 %v4121_v42, 0.0  ;;  %v4122_v45 = vadd.f32 %v7987_v29, %v2292_v43  ;;  %v3532_v46 = vpop.f32.mrb[94].mxu0  ;;  %v2294_v47 = vpop.f32.mrb[95].mxu1 }
 0x420   :  { %v3534_v48 = vpop.f32.mrb[95].mxu0 }
 0x421   :  { %3636 = vst [vmem:[%s8188_s3 + $0x170] sm:$0xff] %v3587_v44  ;;  %v4123_v49 = vadd.f32 %v4122_v45, %v3532_v46 }
 0x422   :  { %v2297_v50 = vpop.f32.mrb[96].mxu1 }
 0x423   :  { %v3588_v51 = vmax.f32 %v4123_v49, 0.0  ;;  %v4124_v52 = vadd.f32 %v7987_v29, %v2297_v50  ;;  %v3537_v53 = vpop.f32.mrb[96].mxu0  ;;  %v2299_v54 = vpop.f32.mrb[97].mxu1 }
 0x424   :  { %v3539_v55 = vpop.f32.mrb[97].mxu0 }
 0x425   :  { %3637 = vst [vmem:[%s8188_s3 + $0x178] sm:$0xff] %v3588_v51  ;;  %v4125_v56 = vadd.f32 %v4124_v52, %v3537_v53 }
 0x427   :  { %v3589_v57 = vmax.f32 %v4125_v56, 0.0 }
 0x429   :  { %3638 = vst [vmem:[%s8188_s3 + $0x180] sm:$0xff] %v3589_v57 }

// kernel: forward.6
= control target key start
LH: loop header
LB: loop body
LE: loop exit
PB: predicated region body
PF: predicated region fallthrough
CT: control target
= control target key end

     0   :  { %s3394_s1 = inlined_call_operand.vmem [shape: f32[2048,128], index: 1, kind: input, shape index: {}]   ;;  %s3395_s0 = inlined_call_operand.vmem [shape: f32[72,2048], index: 0, kind: input, shape index: {}]   ;;  %s3396_s2 = inlined_call_operand.vmem [shape: f32[1,128], index: 2, kind: input, shape index: {}]   ;;  %s3397_s3 = inlined_call_operand.vmem [shape: f32[72,128], index: 3, kind: output, shape index: {}]  }
   0x1   :  { %v174_v0 = vld [vmem:[%s3394_s1 + $0x80] sm:$0xff]  ;;  %v175_v1 = vld [vmem:[%s3394_s1 + $0x88] sm:$0xff]  ;;  %v176_v11 = vld [vmem:[%s3394_s1 + $0x90] sm:$0xff] }
   0x2   :  { %v158_v2 = vld [vmem:[%s3394_s1] sm:$0xff]  ;;  %v1796_v3 = vpack.c.bf16 %v175_v1, %v174_v0  ;;  %v159_v4 = vld [vmem:[%s3394_s1 + $0x8] sm:$0xff]  ;;  %v177_v13 = vld [vmem:[%s3394_s1 + $0x98] sm:$0xff] }
   0x3   :  { %v206_v5 = vld [vmem:[%s3394_s1 + $0x180] sm:$0xff]  ;;  %v207_v6 = vld [vmem:[%s3394_s1 + $0x188] sm:$0xff]  ;;  %v1798_v7 = vpack.c.bf16 %v159_v4, %v158_v2  ;;  %v160_v14 = vld [vmem:[%s3394_s1 + $0x10] sm:$0xff]  ;;  %v1800_v16 = vpack.c.bf16 %v177_v13, %v176_v11 }
   0x4   :  { %v1828_v8 = vpack.c.bf16 %v207_v6, %v206_v5  ;;  %v190_v9 = vld [vmem:[%s3394_s1 + $0x100] sm:$0xff]  ;;  %v191_v10 = vld [vmem:[%s3394_s1 + $0x108] sm:$0xff]  ;;  %1797 = vmatprep.subr.bf16.mxu0 %v1796_v3  ;;  %v161_v15 = vld [vmem:[%s3394_s1 + $0x18] sm:$0xff] }
   0x5   :  { %v1830_v12 = vpack.c.bf16 %v191_v10, %v190_v9  ;;  %1799 = vmatpush3.bf16.msra.mxu0 %v1798_v7  ;;  %v1802_v17 = vpack.c.bf16 %v161_v15, %v160_v14  ;;  %v208_v18 = vld [vmem:[%s3394_s1 + $0x190] sm:$0xff]  ;;  %v209_v19 = vld [vmem:[%s3394_s1 + $0x198] sm:$0xff]  ;;  %v178_v23 = vld [vmem:[%s3394_s1 + $0xa0] sm:$0xff] }
   0x6   :  { %1829 = vmatprep.subr.bf16.mxu1 %v1828_v8  ;;  %v192_v20 = vld [vmem:[%s3394_s1 + $0x110] sm:$0xff]  ;;  %v1832_v21 = vpack.c.bf16 %v209_v19, %v208_v18  ;;  %v193_v22 = vld [vmem:[%s3394_s1 + $0x118] sm:$0xff]  ;;  %v179_v24 = vld [vmem:[%s3394_s1 + $0xa8] sm:$0xff]  ;;  %1801 = vmatprep.subr.bf16.mxu0 %v1800_v16 }
   0x7   :  { %1831 = vmatpush3.bf16.msra.mxu1 %v1830_v12  ;;  %v1834_v25 = vpack.c.bf16 %v193_v22, %v192_v20  ;;  %v1804_v26 = vpack.c.bf16 %v179_v24, %v178_v23  ;;  %v162_v27 = vld [vmem:[%s3394_s1 + $0x20] sm:$0xff]  ;;  %v163_v28 = vld [vmem:[%s3394_s1 + $0x28] sm:$0xff]  ;;  %v180_v35 = vld [vmem:[%s3394_s1 + $0xb0] sm:$0xff] }
   0x8   :  { %v210_v29 = vld [vmem:[%s3394_s1 + $0x1a0] sm:$0xff]  ;;  %1833 = vmatprep.subr.bf16.mxu1 %v1832_v21  ;;  %v211_v30 = vld [vmem:[%s3394_s1 + $0x1a8] sm:$0xff]  ;;  %v1806_v33 = vpack.c.bf16 %v163_v28, %v162_v27  ;;  %v181_v36 = vld [vmem:[%s3394_s1 + $0xb8] sm:$0xff] }
   0x9   :  { %v194_v31 = vld [vmem:[%s3394_s1 + $0x120] sm:$0xff]  ;;  %v195_v32 = vld [vmem:[%s3394_s1 + $0x128] sm:$0xff]  ;;  %1803 = vmatpush3.bf16.msra.mxu0 %v1802_v17  ;;  %v1836_v34 = vpack.c.bf16 %v211_v30, %v210_v29  ;;  %v164_v37 = vld [vmem:[%s3394_s1 + $0x30] sm:$0xff]  ;;  %v1808_v39 = vpack.c.bf16 %v181_v36, %v180_v35 }
   0xa   :  { %1805 = vmatprep.subr.bf16.mxu0 %v1804_v26  ;;  %v1838_v38 = vpack.c.bf16 %v195_v32, %v194_v31  ;;  %v165_v40 = vld [vmem:[%s3394_s1 + $0x38] sm:$0xff]  ;;  %v212_v41 = vld [vmem:[%s3394_s1 + $0x1b0] sm:$0xff]  ;;  %v182_v46 = vld [vmem:[%s3394_s1 + $0xc0] sm:$0xff] }
   0xb   :  { %1835 = vmatpush3.bf16.msra.mxu1 %v1834_v25  ;;  %v213_v42 = vld [vmem:[%s3394_s1 + $0x1b8] sm:$0xff]  ;;  %v196_v44 = vld [vmem:[%s3394_s1 + $0x130] sm:$0xff]  ;;  %v183_v47 = vld [vmem:[%s3394_s1 + $0xc8] sm:$0xff]  ;;  %v1810_v48 = vpack.c.bf16 %v165_v40, %v164_v37 }
   0xc   :  { %1837 = vmatprep.subr.bf16.mxu1 %v1836_v34  ;;  %v1840_v43 = vpack.c.bf16 %v213_v42, %v212_v41  ;;  %v197_v45 = vld [vmem:[%s3394_s1 + $0x138] sm:$0xff]  ;;  %v214_v49 = vld [vmem:[%s3394_s1 + $0x1c0] sm:$0xff]  ;;  %v215_v50 = vld [vmem:[%s3394_s1 + $0x1c8] sm:$0xff]  ;;  %v1812_v52 = vpack.c.bf16 %v183_v47, %v182_v46 }
   0xd   :  { %1807 = vmatpush3.bf16.msra.mxu0 %v1806_v33  ;;  %v1842_v51 = vpack.c.bf16 %v197_v45, %v196_v44  ;;  %v166_v53 = vld [vmem:[%s3394_s1 + $0x40] sm:$0xff]  ;;  %v167_v54 = vld [vmem:[%s3394_s1 + $0x48] sm:$0xff]  ;;  %v1844_v56 = vpack.c.bf16 %v215_v50, %v214_v49  ;;  %v184_v58 = vld [vmem:[%s3394_s1 + $0xd0] sm:$0xff] }
   0xe   :  { %1809 = vmatprep.subr.bf16.mxu0 %v1808_v39  ;;  %v198_v55 = vld [vmem:[%s3394_s1 + $0x140] sm:$0xff]  ;;  %v199_v57 = vld [vmem:[%s3394_s1 + $0x148] sm:$0xff]  ;;  %v185_v59 = vld [vmem:[%s3394_s1 + $0xd8] sm:$0xff]  ;;  %v1814_v62 = vpack.c.bf16 %v167_v54, %v166_v53 }
   0xf   :  { %1839 = vmatpush3.bf16.msra.mxu1 %v1838_v38  ;;  %v216_v60 = vld [vmem:[%s3394_s1 + $0x1d0] sm:$0xff]  ;;  %v217_v61 = vld [vmem:[%s3394_s1 + $0x1d8] sm:$0xff]  ;;  %v1846_v63 = vpack.c.bf16 %v199_v57, %v198_v55  ;;  %v1816_v0 = vpack.c.bf16 %v185_v59, %v184_v58  ;;  %v186_v6 = vld [vmem:[%s3394_s1 + $0xe0] sm:$0xff] }
  0x10   :  { %1841 = vmatprep.subr.bf16.mxu1 %v1840_v43  ;;  %v168_v1 = vld [vmem:[%s3394_s1 + $0x50] sm:$0xff]  ;;  %v169_v2 = vld [vmem:[%s3394_s1 + $0x58] sm:$0xff]  ;;  %v1848_v4 = vpack.c.bf16 %v217_v61, %v216_v60  ;;  %v187_v7 = vld [vmem:[%s3394_s1 + $0xe8] sm:$0xff] }
  0x11   :  { %1811 = vmatpush3.bf16.msra.mxu0 %v1810_v48  ;;  %v200_v3 = vld [vmem:[%s3394_s1 + $0x150] sm:$0xff]  ;;  %v201_v5 = vld [vmem:[%s3394_s1 + $0x158] sm:$0xff]  ;;  %v218_v8 = vld [vmem:[%s3394_s1 + $0x1e0] sm:$0xff]  ;;  %v1818_v10 = vpack.c.bf16 %v169_v2, %v168_v1  ;;  %v1820_v14 = vpack.c.bf16 %v187_v7, %v186_v6 }
  0x12   :  { %1813 = vmatprep.subr.bf16.mxu0 %v1812_v52  ;;  %v219_v9 = vld [vmem:[%s3394_s1 + $0x1e8] sm:$0xff]  ;;  %v170_v11 = vld [vmem:[%s3394_s1 + $0x60] sm:$0xff]  ;;  %v1850_v13 = vpack.c.bf16 %v201_v5, %v200_v3  ;;  %v188_v19 = vld [vmem:[%s3394_s1 + $0xf0] sm:$0xff] }
  0x13   :  { %1843 = vmatpush3.bf16.msra.mxu1 %v1842_v51  ;;  %v15_v12 = vld [vmem:[%s3395_s0 + $0x8] sm:$0xff]  ;;  %v202_v16 = vld [vmem:[%s3394_s1 + $0x160] sm:$0xff]  ;;  %v1852_v18 = vpack.c.bf16 %v219_v9, %v218_v8  ;;  %v189_v20 = vld [vmem:[%s3394_s1 + $0xf8] sm:$0xff] }
  0x14   :  { %1845 = vmatprep.subr.bf16.mxu1 %v1844_v56  ;;  %v171_v15 = vld [vmem:[%s3394_s1 + $0x68] sm:$0xff]  ;;  %485 = vmatprep.mubr.f32.mxu0 %v15_v12  ;;  %v17_v21 = vld [vmem:[%s3395_s0 + $0x18] sm:$0xff]  ;;  %v220_v22 = vld [vmem:[%s3394_s1 + $0x1f0] sm:$0xff]  ;;  %v1824_v26 = vpack.c.bf16 %v189_v20, %v188_v19 }
  0x15   :  { %1815 = vmatpush3.bf16.msra.mxu0 %v1814_v62  ;;  %v203_v17 = vld [vmem:[%s3394_s1 + $0x168] sm:$0xff]  ;;  %v221_v23 = vld [vmem:[%s3394_s1 + $0x1f8] sm:$0xff]  ;;  %595 = vmatprep.mubr.f32.mxu1 %v17_v21  ;;  %v1822_v24 = vpack.c.bf16 %v171_v15, %v170_v11  ;;  %v172_v27 = vld [vmem:[%s3394_s1 + $0x70] sm:$0xff] }
  0x16   :  { %1817 = vmatprep.subr.bf16.mxu0 %v1816_v0  ;;  %v1854_v25 = vpack.c.bf16 %v203_v17, %v202_v16  ;;  %v173_v28 = vld [vmem:[%s3394_s1 + $0x78] sm:$0xff]  ;;  %v204_v29 = vld [vmem:[%s3394_s1 + $0x170] sm:$0xff]  ;;  %v1856_v30 = vpack.c.bf16 %v221_v23, %v220_v22  ;;  %v238_v32 = vld [vmem:[%s3394_s1 + $0x280] sm:$0xff] }
  0x17   :  { %1847 = vmatpush3.bf16.msra.mxu1 %v1846_v63  ;;  %v205_v31 = vld [vmem:[%s3394_s1 + $0x178] sm:$0xff]  ;;  %v239_v33 = vld [vmem:[%s3394_s1 + $0x288] sm:$0xff]  ;;  %v270_v34 = vld [vmem:[%s3394_s1 + $0x380] sm:$0xff]  ;;  %v1826_v36 = vpack.c.bf16 %v173_v28, %v172_v27 }
  0x18   :  { %1849 = vmatprep.subr.bf16.mxu1 %v1848_v4  ;;  %v271_v35 = vld [vmem:[%s3394_s1 + $0x388] sm:$0xff]  ;;  %v1858_v37 = vpack.c.bf16 %v205_v31, %v204_v29  ;;  %v1860_v38 = vpack.c.bf16 %v239_v33, %v238_v32  ;;  %v222_v39 = vld [vmem:[%s3394_s1 + $0x200] sm:$0xff]  ;;  %v240_v44 = vld [vmem:[%s3394_s1 + $0x290] sm:$0xff] }
  0x19   :  { %1819 = vmatpush3.bf16.msra.mxu0 %v1818_v10  ;;  %v223_v40 = vld [vmem:[%s3394_s1 + $0x208] sm:$0xff]  ;;  %v1892_v41 = vpack.c.bf16 %v271_v35, %v270_v34  ;;  %v254_v42 = vld [vmem:[%s3394_s1 + $0x300] sm:$0xff]  ;;  %v241_v45 = vld [vmem:[%s3394_s1 + $0x298] sm:$0xff] }
  0x1a   :  { %1821 = vmatprep.subr.bf16.mxu0 %v1820_v14  ;;  %v255_v43 = vld [vmem:[%s3394_s1 + $0x308] sm:$0xff]  ;;  %v14_v46 = vld [vmem:[%s3395_s0] sm:$0xff]  ;;  %v1862_v47 = vpack.c.bf16 %v223_v40, %v222_v39  ;;  %v272_v48 = vld [vmem:[%s3394_s1 + $0x390] sm:$0xff]  ;;  %v1864_v55 = vpack.c.bf16 %v241_v45, %v240_v44 }
  0x1b   :  { %1851 = vmatpush3.bf16.msra.mxu1 %v1850_v13  ;;  %v273_v49 = vld [vmem:[%s3394_s1 + $0x398] sm:$0xff]  ;;  %v16_v50 = vld [vmem:[%s3395_s0 + $0x10] sm:$0xff]  ;;  %v1894_v51 = vpack.c.bf16 %v255_v43, %v254_v42  ;;  %v31_v54 = vld [vmem:[%s3395_s0 + $0x88] sm:$0xff] }
  0x1c   :  { %1853 = vmatprep.subr.bf16.mxu1 %v1852_v18  ;;  %v224_v52 = vld [vmem:[%s3394_s1 + $0x210] sm:$0xff]  ;;  %v225_v53 = vld [vmem:[%s3394_s1 + $0x218] sm:$0xff]  ;;  %v1896_v59 = vpack.c.bf16 %v273_v49, %v272_v48  ;;  %v242_v60 = vld [vmem:[%s3394_s1 + $0x2a0] sm:$0xff] }
  0x1d   :  { %1823 = vmatpush3.bf16.msra.mxu0 %v1822_v24  ;;  %v256_v56 = vld [vmem:[%s3394_s1 + $0x310] sm:$0xff]  ;;  %v257_v57 = vld [vmem:[%s3394_s1 + $0x318] sm:$0xff]  ;;  %v243_v61 = vld [vmem:[%s3394_s1 + $0x2a8] sm:$0xff]  ;;  %v1866_v63 = vpack.c.bf16 %v225_v53, %v224_v52 }
  0x1e   :  { %1825 = vmatprep.subr.bf16.mxu0 %v1824_v26  ;;  %v33_v58 = vld [vmem:[%s3395_s0 + $0x98] sm:$0xff]  ;;  %v30_v62 = vld [vmem:[%s3395_s0 + $0x80] sm:$0xff]  ;;  %v275_v1 = vld [vmem:[%s3394_s1 + $0x3a8] sm:$0xff]  ;;  %v1898_v3 = vpack.c.bf16 %v257_v57, %v256_v56  ;;  %v1868_v7 = vpack.c.bf16 %v243_v61, %v242_v60 }
  0x1f   :  { %1855 = vmatpush3.bf16.msra.mxu1 %v1854_v25  ;;  %v274_v0 = vld [vmem:[%s3394_s1 + $0x3a0] sm:$0xff]  ;;  %v32_v2 = vld [vmem:[%s3395_s0 + $0x90] sm:$0xff]  ;;  %v227_v5 = vld [vmem:[%s3394_s1 + $0x228] sm:$0xff] }
  0x20   :  { %1857 = vmatprep.subr.bf16.mxu1 %v1856_v30  ;;  %v226_v4 = vld [vmem:[%s3394_s1 + $0x220] sm:$0xff]  ;;  %v47_v6 = vld [vmem:[%s3395_s0 + $0x108] sm:$0xff]  ;;  %v49_v10 = vld [vmem:[%s3395_s0 + $0x118] sm:$0xff]  ;;  %v1900_v11 = vpack.c.bf16 %v275_v1, %v274_v0 }
  0x21   :  { %1827 = vmatpush3.bf16.msra.mxu0 %v1826_v36  ;;  %v258_v8 = vld [vmem:[%s3394_s1 + $0x320] sm:$0xff]  ;;  %v259_v9 = vld [vmem:[%s3394_s1 + $0x328] sm:$0xff]  ;;  %v244_v12 = vld [vmem:[%s3394_s1 + $0x2b0] sm:$0xff]  ;;  %v1870_v15 = vpack.c.bf16 %v227_v5, %v226_v4 }
  0x22   :  { %1861 = vmatprep.subr.bf16.mxu0 %v1860_v38  ;;  %v245_v13 = vld [vmem:[%s3394_s1 + $0x2b8] sm:$0xff]  ;;  %v46_v14 = vld [vmem:[%s3395_s0 + $0x100] sm:$0xff]  ;;  %v276_v16 = vld [vmem:[%s3394_s1 + $0x3b0] sm:$0xff]  ;;  %v1902_v20 = vpack.c.bf16 %v259_v9, %v258_v8 }
  0x23   :  { %1859 = vmatpush3.bf16.msra.mxu1 %v1858_v37  ;;  %v277_v17 = vld [vmem:[%s3394_s1 + $0x3b8] sm:$0xff]  ;;  %v48_v18 = vld [vmem:[%s3395_s0 + $0x110] sm:$0xff]  ;;  %v63_v19 = vld [vmem:[%s3395_s0 + $0x188] sm:$0xff]  ;;  %v1872_v22 = vpack.c.bf16 %v245_v13, %v244_v12 }
  0x24   :  { %1893 = vmatprep.subr.bf16.mxu1 %v1892_v41  ;;  %486 = vmatmul.mubr.f32.vlgmr.msra.gmra.mrb[0].mxu0 %v14_v46  ;;  %v65_v21 = vld [vmem:[%s3395_s0 + $0x198] sm:$0xff]  ;;  %v228_v23 = vld [vmem:[%s3394_s1 + $0x230] sm:$0xff]  ;;  %v1904_v26 = vpack.c.bf16 %v277_v17, %v276_v16  ;;  %v246_v28 = vld [vmem:[%s3394_s1 + $0x2c0] sm:$0xff] }
  0x25   :  { %1863 = vmatpush3.bf16.msra.mxu0 %v1862_v47  ;;  %490 = vmatprep.mubr.f32.mxu0 %v31_v54  ;;  %v229_v24 = vld [vmem:[%s3394_s1 + $0x238] sm:$0xff]  ;;  %v260_v25 = vld [vmem:[%s3394_s1 + $0x330] sm:$0xff]  ;;  %v247_v29 = vld [vmem:[%s3394_s1 + $0x2c8] sm:$0xff] }
  0x26   :  { %596 = vmatmul.mubr.f32.vlgmr.msra.gmra.mrb[0].mxu1 %v16_v50  ;;  %1865 = vmatprep.subr.bf16.mxu0 %v1864_v55  ;;  %v261_v27 = vld [vmem:[%s3394_s1 + $0x338] sm:$0xff]  ;;  %v62_v30 = vld [vmem:[%s3395_s0 + $0x180] sm:$0xff]  ;;  %v279_v32 = vld [vmem:[%s3394_s1 + $0x3c8] sm:$0xff]  ;;  %v1874_v35 = vpack.c.bf16 %v229_v24, %v228_v23  ;;  %v1876_v38 = vpack.c.bf16 %v247_v29, %v246_v28 }
  0x27   :  { %1895 = vmatpush3.bf16.msra.mxu1 %v1894_v51  ;;  %600 = vmatprep.mubr.f32.mxu1 %v33_v58  ;;  %v278_v31 = vld [vmem:[%s3394_s1 + $0x3c0] sm:$0xff]  ;;  %v64_v33 = vld [vmem:[%s3395_s0 + $0x190] sm:$0xff]  ;;  %v79_v34 = vld [vmem:[%s3395_s0 + $0x208] sm:$0xff]  ;;  %v1906_v37 = vpack.c.bf16 %v261_v27, %v260_v25 }
  0x28   :  { %491 = vmatmul.mubr.f32.gmra.mrb[2].mxu0 %v30_v62  ;;  %1897 = vmatprep.subr.bf16.mxu1 %v1896_v59  ;;  %v81_v36 = vld [vmem:[%s3395_s0 + $0x218] sm:$0xff]  ;;  %v230_v39 = vld [vmem:[%s3394_s1 + $0x240] sm:$0xff]  ;;  %v231_v40 = vld [vmem:[%s3394_s1 + $0x248] sm:$0xff]  ;;  %v1908_v42 = vpack.c.bf16 %v279_v32, %v278_v31 }
  0x29   :  { %1867 = vmatpush3.bf16.msra.mxu0 %v1866_v63  ;;  %495 = vmatprep.mubr.f32.mxu0 %v47_v6  ;;  %v262_v41 = vld [vmem:[%s3394_s1 + $0x340] sm:$0xff]  ;;  %v263_v43 = vld [vmem:[%s3394_s1 + $0x348] sm:$0xff]  ;;  %v248_v44 = vld [vmem:[%s3394_s1 + $0x2d0] sm:$0xff]  ;;  %v1878_v51 = vpack.c.bf16 %v231_v40, %v230_v39 }
  0x2a   :  { %601 = vmatmul.mubr.f32.gmra.mrb[2].mxu1 %v32_v2  ;;  %1869 = vmatprep.subr.bf16.mxu0 %v1868_v7  ;;  %v249_v45 = vld [vmem:[%s3394_s1 + $0x2d8] sm:$0xff]  ;;  %v78_v46 = vld [vmem:[%s3395_s0 + $0x200] sm:$0xff]  ;;  %v280_v47 = vld [vmem:[%s3394_s1 + $0x3d0] sm:$0xff]  ;;  %v1910_v53 = vpack.c.bf16 %v263_v43, %v262_v41 }
  0x2b   :  { %1899 = vmatpush3.bf16.msra.mxu1 %v1898_v3  ;;  %605 = vmatprep.mubr.f32.mxu1 %v49_v10  ;;  %v281_v48 = vld [vmem:[%s3394_s1 + $0x3d8] sm:$0xff]  ;;  %v80_v49 = vld [vmem:[%s3395_s0 + $0x210] sm:$0xff]  ;;  %v95_v50 = vld [vmem:[%s3395_s0 + $0x288] sm:$0xff]  ;;  %v1880_v54 = vpack.c.bf16 %v249_v45, %v248_v44 }
  0x2c   :  { %496 = vmatmul.mubr.f32.gmra.mrb[4].mxu0 %v46_v14  ;;  %1901 = vmatprep.subr.bf16.mxu1 %v1900_v11  ;;  %v97_v52 = vld [vmem:[%s3395_s0 + $0x298] sm:$0xff]  ;;  %v232_v55 = vld [vmem:[%s3394_s1 + $0x250] sm:$0xff]  ;;  %v1912_v58 = vpack.c.bf16 %v281_v48, %v280_v47  ;;  %v250_v60 = vld [vmem:[%s3394_s1 + $0x2e0] sm:$0xff] }
  0x2d   :  { %1871 = vmatpush3.bf16.msra.mxu0 %v1870_v15  ;;  %500 = vmatprep.mubr.f32.mxu0 %v63_v19  ;;  %v233_v56 = vld [vmem:[%s3394_s1 + $0x258] sm:$0xff]  ;;  %v264_v57 = vld [vmem:[%s3394_s1 + $0x350] sm:$0xff]  ;;  %v251_v61 = vld [vmem:[%s3394_s1 + $0x2e8] sm:$0xff] }
  0x2e   :  { %606 = vmatmul.mubr.f32.gmra.mrb[4].mxu1 %v48_v18  ;;  %1873 = vmatprep.subr.bf16.mxu0 %v1872_v22  ;;  %v265_v59 = vld [vmem:[%s3394_s1 + $0x358] sm:$0xff]  ;;  %v94_v62 = vld [vmem:[%s3395_s0 + $0x280] sm:$0xff]  ;;  %v283_v0 = vld [vmem:[%s3394_s1 + $0x3e8] sm:$0xff]  ;;  %v1882_v3 = vpack.c.bf16 %v233_v56, %v232_v55  ;;  %v1884_v6 = vpack.c.bf16 %v251_v61, %v250_v60 }
  0x2f   :  { %1903 = vmatpush3.bf16.msra.mxu1 %v1902_v20  ;;  %610 = vmatprep.mubr.f32.mxu1 %v65_v21  ;;  %v282_v63 = vld [vmem:[%s3394_s1 + $0x3e0] sm:$0xff]  ;;  %v96_v1 = vld [vmem:[%s3395_s0 + $0x290] sm:$0xff]  ;;  %v111_v2 = vld [vmem:[%s3395_s0 + $0x308] sm:$0xff]  ;;  %v1914_v5 = vpack.c.bf16 %v265_v59, %v264_v57 }
  0x30   :  { %501 = vmatmul.mubr.f32.gmra.mrb[6].mxu0 %v62_v30  ;;  %1905 = vmatprep.subr.bf16.mxu1 %v1904_v26  ;;  %v113_v4 = vld [vmem:[%s3395_s0 + $0x318] sm:$0xff]  ;;  %v234_v7 = vld [vmem:[%s3394_s1 + $0x260] sm:$0xff]  ;;  %v235_v8 = vld [vmem:[%s3394_s1 + $0x268] sm:$0xff]  ;;  %v1916_v10 = vpack.c.bf16 %v283_v0, %v282_v63 }
  0x31   :  { %505 = vmatprep.mubr.f32.mxu0 %v79_v34  ;;  %1875 = vmatpush3.bf16.msra.mxu0 %v1874_v35  ;;  %v266_v9 = vld [vmem:[%s3394_s1 + $0x360] sm:$0xff]  ;;  %v267_v11 = vld [vmem:[%s3394_s1 + $0x368] sm:$0xff]  ;;  %v252_v12 = vld [vmem:[%s3394_s1 + $0x2f0] sm:$0xff]  ;;  %v1886_v19 = vpack.c.bf16 %v235_v8, %v234_v7 }
  0x32   :  { %611 = vmatmul.mubr.f32.gmra.mrb[6].mxu1 %v64_v33  ;;  %1877 = vmatprep.subr.bf16.mxu0 %v1876_v38  ;;  %v253_v13 = vld [vmem:[%s3394_s1 + $0x2f8] sm:$0xff]  ;;  %v110_v14 = vld [vmem:[%s3395_s0 + $0x300] sm:$0xff]  ;;  %v284_v15 = vld [vmem:[%s3394_s1 + $0x3f0] sm:$0xff]  ;;  %v1918_v21 = vpack.c.bf16 %v267_v11, %v266_v9 }
  0x33   :  { %615 = vmatprep.mubr.f32.mxu1 %v81_v36  ;;  %1907 = vmatpush3.bf16.msra.mxu1 %v1906_v37  ;;  %v285_v16 = vld [vmem:[%s3394_s1 + $0x3f8] sm:$0xff]  ;;  %v112_v17 = vld [vmem:[%s3395_s0 + $0x310] sm:$0xff]  ;;  %v127_v18 = vld [vmem:[%s3395_s0 + $0x388] sm:$0xff]  ;;  %v1888_v22 = vpack.c.bf16 %v253_v13, %v252_v12 }
  0x34   :  { %506 = vmatmul.mubr.f32.gmra.mrb[8].mxu0 %v78_v46  ;;  %1909 = vmatprep.subr.bf16.mxu1 %v1908_v42  ;;  %v129_v20 = vld [vmem:[%s3395_s0 + $0x398] sm:$0xff]  ;;  %v236_v23 = vld [vmem:[%s3394_s1 + $0x270] sm:$0xff]  ;;  %v1920_v26 = vpack.c.bf16 %v285_v16, %v284_v15  ;;  %v302_v28 = vld [vmem:[%s3394_s1 + $0x480] sm:$0xff] }
  0x35   :  { %510 = vmatprep.mubr.f32.mxu0 %v95_v50  ;;  %1879 = vmatpush3.bf16.msra.mxu0 %v1878_v51  ;;  %v237_v24 = vld [vmem:[%s3394_s1 + $0x278] sm:$0xff]  ;;  %v268_v25 = vld [vmem:[%s3394_s1 + $0x370] sm:$0xff]  ;;  %v303_v29 = vld [vmem:[%s3394_s1 + $0x488] sm:$0xff] }
  0x36   :  { %616 = vmatmul.mubr.f32.gmra.mrb[8].mxu1 %v80_v49  ;;  %1881 = vmatprep.subr.bf16.mxu0 %v1880_v54  ;;  %v269_v27 = vld [vmem:[%s3394_s1 + $0x378] sm:$0xff]  ;;  %v126_v30 = vld [vmem:[%s3395_s0 + $0x380] sm:$0xff]  ;;  %v335_v32 = vld [vmem:[%s3394_s1 + $0x588] sm:$0xff]  ;;  %v1890_v35 = vpack.c.bf16 %v237_v24, %v236_v23  ;;  %v1924_v38 = vpack.c.bf16 %v303_v29, %v302_v28 }
  0x37   :  { %620 = vmatprep.mubr.f32.mxu1 %v97_v52  ;;  %1911 = vmatpush3.bf16.msra.mxu1 %v1910_v53  ;;  %v334_v31 = vld [vmem:[%s3394_s1 + $0x580] sm:$0xff]  ;;  %v128_v33 = vld [vmem:[%s3395_s0 + $0x390] sm:$0xff]  ;;  %v143_v34 = vld [vmem:[%s3395_s0 + $0x408] sm:$0xff]  ;;  %v1922_v37 = vpack.c.bf16 %v269_v27, %v268_v25 }
  0x38   :  { %511 = vmatmul.mubr.f32.gmra.mrb[10].mxu0 %v94_v62  ;;  %1913 = vmatprep.subr.bf16.mxu1 %v1912_v58  ;;  %v145_v36 = vld [vmem:[%s3395_s0 + $0x418] sm:$0xff]  ;;  %v1956_v39 = vpack.c.bf16 %v335_v32, %v334_v31  ;;  %v142_v40 = vld [vmem:[%s3395_s0 + $0x400] sm:$0xff]  ;;  %v144_v41 = vld [vmem:[%s3395_s0 + $0x410] sm:$0xff] }
  0x39   :  { %515 = vmatprep.mubr.f32.mxu0 %v111_v2  ;;  %1883 = vmatpush3.bf16.msra.mxu0 %v1882_v3  ;;  %v19_v42 = vld [vmem:[%s3395_s0 + $0x28] sm:$0xff]  ;;  %v286_v43 = vld [vmem:[%s3394_s1 + $0x400] sm:$0xff]  ;;  %v21_v45 = vld [vmem:[%s3395_s0 + $0x38] sm:$0xff] }
  0x3a   :  { %621 = vmatmul.mubr.f32.gmra.mrb[10].mxu1 %v96_v1  ;;  %1885 = vmatprep.subr.bf16.mxu0 %v1884_v6  ;;  %v287_v44 = vld [vmem:[%s3394_s1 + $0x408] sm:$0xff]  ;;  %v318_v46 = vld [vmem:[%s3394_s1 + $0x500] sm:$0xff]  ;;  %v304_v48 = vld [vmem:[%s3394_s1 + $0x490] sm:$0xff] }
  0x3b   :  { %625 = vmatprep.mubr.f32.mxu1 %v113_v4  ;;  %1915 = vmatpush3.bf16.msra.mxu1 %v1914_v5  ;;  %v319_v47 = vld [vmem:[%s3394_s1 + $0x508] sm:$0xff]  ;;  %v305_v49 = vld [vmem:[%s3394_s1 + $0x498] sm:$0xff]  ;;  %v18_v50 = vld [vmem:[%s3395_s0 + $0x20] sm:$0xff]  ;;  %v1926_v51 = vpack.c.bf16 %v287_v44, %v286_v43 }
  0x3c   :  { %516 = vmatmul.mubr.f32.gmra.mrb[12].mxu0 %v110_v14  ;;  %1917 = vmatprep.subr.bf16.mxu1 %v1916_v10  ;;  %v336_v52 = vld [vmem:[%s3394_s1 + $0x590] sm:$0xff]  ;;  %v337_v53 = vld [vmem:[%s3394_s1 + $0x598] sm:$0xff]  ;;  %v1958_v55 = vpack.c.bf16 %v319_v47, %v318_v46  ;;  %v35_v58 = vld [vmem:[%s3395_s0 + $0xa8] sm:$0xff]  ;;  %v1928_v59 = vpack.c.bf16 %v305_v49, %v304_v48 }
  0x3d   :  { %520 = vmatprep.mubr.f32.mxu0 %v127_v18  ;;  %1887 = vmatpush3.bf16.msra.mxu0 %v1886_v19  ;;  %v20_v54 = vld [vmem:[%s3395_s0 + $0x30] sm:$0xff]  ;;  %v289_v57 = vld [vmem:[%s3394_s1 + $0x418] sm:$0xff]  ;;  %v1960_v63 = vpack.c.bf16 %v337_v53, %v336_v52  ;;  %v306_v0 = vld [vmem:[%s3394_s1 + $0x4a0] sm:$0xff] }
  0x3e   :  { %626 = vmatmul.mubr.f32.gmra.mrb[12].mxu1 %v112_v17  ;;  %1889 = vmatprep.subr.bf16.mxu0 %v1888_v22  ;;  %v288_v56 = vld [vmem:[%s3394_s1 + $0x410] sm:$0xff]  ;;  %v321_v61 = vld [vmem:[%s3394_s1 + $0x518] sm:$0xff]  ;;  %v307_v1 = vld [vmem:[%s3394_s1 + $0x4a8] sm:$0xff] }
  0x3f   :  { %630 = vmatprep.mubr.f32.mxu1 %v129_v20  ;;  %1919 = vmatpush3.bf16.msra.mxu1 %v1918_v21  ;;  %v320_v60 = vld [vmem:[%s3394_s1 + $0x510] sm:$0xff]  ;;  %v37_v62 = vld [vmem:[%s3395_s0 + $0xb8] sm:$0xff]  ;;  %v34_v2 = vld [vmem:[%s3395_s0 + $0xa0] sm:$0xff]  ;;  %v1930_v3 = vpack.c.bf16 %v289_v57, %v288_v56  ;;  %v1932_v11 = vpack.c.bf16 %v307_v1, %v306_v0 }
  0x40   :  { %521 = vmatmul.mubr.f32.gmra.mrb[14].mxu0 %v126_v30  ;;  %1921 = vmatprep.subr.bf16.mxu1 %v1920_v26  ;;  %v338_v4 = vld [vmem:[%s3394_s1 + $0x5a0] sm:$0xff]  ;;  %v339_v5 = vld [vmem:[%s3394_s1 + $0x5a8] sm:$0xff]  ;;  %v36_v6 = vld [vmem:[%s3395_s0 + $0xb0] sm:$0xff]  ;;  %v1962_v7 = vpack.c.bf16 %v321_v61, %v320_v60 }
  0x41   :  { %525 = vmatprep.mubr.f32.mxu0 %v143_v34  ;;  %1891 = vmatpush3.bf16.msra.mxu0 %v1890_v35  ;;  %v290_v8 = vld [vmem:[%s3394_s1 + $0x420] sm:$0xff]  ;;  %v291_v9 = vld [vmem:[%s3394_s1 + $0x428] sm:$0xff]  ;;  %v53_v14 = vld [vmem:[%s3395_s0 + $0x138] sm:$0xff]  ;;  %v1964_v15 = vpack.c.bf16 %v339_v5, %v338_v4 }
  0x42   :  { %631 = vmatmul.mubr.f32.gmra.mrb[14].mxu1 %v128_v33  ;;  %1925 = vmatprep.subr.bf16.mxu0 %v1924_v38  ;;  %v51_v10 = vld [vmem:[%s3395_s0 + $0x128] sm:$0xff]  ;;  %v322_v12 = vld [vmem:[%s3394_s1 + $0x520] sm:$0xff]  ;;  %v308_v16 = vld [vmem:[%s3394_s1 + $0x4b0] sm:$0xff]  ;;  %v1934_v19 = vpack.c.bf16 %v291_v9, %v290_v8 }
  0x43   :  { %635 = vmatprep.mubr.f32.mxu1 %v145_v36  ;;  %1923 = vmatpush3.bf16.msra.mxu1 %v1922_v37  ;;  %v323_v13 = vld [vmem:[%s3394_s1 + $0x528] sm:$0xff]  ;;  %v309_v17 = vld [vmem:[%s3394_s1 + $0x4b8] sm:$0xff]  ;;  %v50_v18 = vld [vmem:[%s3395_s0 + $0x120] sm:$0xff] }
  0x44   :  { %526 = vmatmul.mubr.f32.gmra.mrb[16].mxu0 %v142_v40  ;;  %1957 = vmatprep.subr.bf16.mxu1 %v1956_v39  ;;  %v340_v20 = vld [vmem:[%s3394_s1 + $0x5b0] sm:$0xff]  ;;  %v341_v21 = vld [vmem:[%s3394_s1 + $0x5b8] sm:$0xff]  ;;  %v67_v23 = vld [vmem:[%s3395_s0 + $0x1a8] sm:$0xff]  ;;  %v1966_v24 = vpack.c.bf16 %v323_v13, %v322_v12  ;;  %v1936_v26 = vpack.c.bf16 %v309_v17, %v308_v16 }
  0x45   :  { %705 = vmatprep.mubr.f32.mxu0 %v19_v42  ;;  %v52_v22 = vld [vmem:[%s3395_s0 + $0x130] sm:$0xff]  ;;  %v69_v25 = vld [vmem:[%s3395_s0 + $0x1b8] sm:$0xff]  ;;  %v1968_v30 = vpack.c.bf16 %v341_v21, %v340_v20  ;;  %v310_v32 = vld [vmem:[%s3394_s1 + $0x4c0] sm:$0xff] }
  0x46   :  { %636 = vmatmul.mubr.f32.gmra.mrb[16].mxu1 %v144_v41  ;;  %v292_v27 = vld [vmem:[%s3394_s1 + $0x430] sm:$0xff]  ;;  %v293_v28 = vld [vmem:[%s3394_s1 + $0x438] sm:$0xff]  ;;  %v311_v33 = vld [vmem:[%s3394_s1 + $0x4c8] sm:$0xff] }
  0x47   :  { %815 = vmatprep.mubr.f32.mxu1 %v21_v45  ;;  %v324_v29 = vld [vmem:[%s3394_s1 + $0x530] sm:$0xff]  ;;  %v325_v31 = vld [vmem:[%s3394_s1 + $0x538] sm:$0xff]  ;;  %v66_v34 = vld [vmem:[%s3395_s0 + $0x1a0] sm:$0xff]  ;;  %v1938_v39 = vpack.c.bf16 %v293_v28, %v292_v27  ;;  %v1940_v42 = vpack.c.bf16 %v311_v33, %v310_v32 }
  0x48   :  { %706 = vmatmul.mubr.f32.vlgmr.msra.gmra.mrb[18].mxu0 %v18_v50  ;;  %v342_v35 = vld [vmem:[%s3394_s1 + $0x5c0] sm:$0xff]  ;;  %v343_v36 = vld [vmem:[%s3394_s1 + $0x5c8] sm:$0xff]  ;;  %v68_v37 = vld [vmem:[%s3395_s0 + $0x1b0] sm:$0xff]  ;;  %v1970_v41 = vpack.c.bf16 %v325_v31, %v324_v29 }
  0x49   :  { %1927 = vmatpush3.bf16.msra.mxu0 %v1926_v51  ;;  %710 = vmatprep.mubr.f32.mxu0 %v35_v58  ;;  %v83_v38 = vld [vmem:[%s3395_s0 + $0x228] sm:$0xff]  ;;  %v85_v40 = vld [vmem:[%s3395_s0 + $0x238] sm:$0xff]  ;;  %v294_v43 = vld [vmem:[%s3394_s1 + $0x440] sm:$0xff]  ;;  %v1972_v46 = vpack.c.bf16 %v343_v36, %v342_v35 }
  0x4a   :  { %816 = vmatmul.mubr.f32.vlgmr.msra.gmra.mrb[18].mxu1 %v20_v54  ;;  %1929 = vmatprep.subr.bf16.mxu0 %v1928_v59  ;;  %v295_v44 = vld [vmem:[%s3394_s1 + $0x448] sm:$0xff]  ;;  %v326_v45 = vld [vmem:[%s3394_s1 + $0x540] sm:$0xff]  ;;  %v312_v48 = vld [vmem:[%s3394_s1 + $0x4d0] sm:$0xff] }
  0x4b   :  { %1959 = vmatpush3.bf16.msra.mxu1 %v1958_v55  ;;  %820 = vmatprep.mubr.f32.mxu1 %v37_v62  ;;  %v327_v47 = vld [vmem:[%s3394_s1 + $0x548] sm:$0xff]  ;;  %v313_v49 = vld [vmem:[%s3394_s1 + $0x4d8] sm:$0xff]  ;;  %v82_v50 = vld [vmem:[%s3395_s0 + $0x220] sm:$0xff]  ;;  %v1942_v55 = vpack.c.bf16 %v295_v44, %v294_v43 }
  0x4c   :  { %711 = vmatmul.mubr.f32.gmra.mrb[20].mxu0 %v34_v2  ;;  %1961 = vmatprep.subr.bf16.mxu1 %v1960_v63  ;;  %v344_v51 = vld [vmem:[%s3394_s1 + $0x5d0] sm:$0xff]  ;;  %v345_v52 = vld [vmem:[%s3394_s1 + $0x5d8] sm:$0xff]  ;;  %v99_v54 = vld [vmem:[%s3395_s0 + $0x2a8] sm:$0xff]  ;;  %v1974_v57 = vpack.c.bf16 %v327_v47, %v326_v45  ;;  %v1944_v58 = vpack.c.bf16 %v313_v49, %v312_v48 }
  0x4d   :  { %1931 = vmatpush3.bf16.msra.mxu0 %v1930_v3  ;;  %715 = vmatprep.mubr.f32.mxu0 %v51_v10  ;;  %v84_v53 = vld [vmem:[%s3395_s0 + $0x230] sm:$0xff]  ;;  %v101_v56 = vld [vmem:[%s3395_s0 + $0x2b8] sm:$0xff]  ;;  %v1976_v62 = vpack.c.bf16 %v345_v52, %v344_v51  ;;  %v314_v0 = vld [vmem:[%s3394_s1 + $0x4e0] sm:$0xff] }
  0x4e   :  { %821 = vmatmul.mubr.f32.gmra.mrb[20].mxu1 %v36_v6  ;;  %1933 = vmatprep.subr.bf16.mxu0 %v1932_v11  ;;  %v296_v59 = vld [vmem:[%s3394_s1 + $0x450] sm:$0xff]  ;;  %v297_v60 = vld [vmem:[%s3394_s1 + $0x458] sm:$0xff]  ;;  %v315_v1 = vld [vmem:[%s3394_s1 + $0x4e8] sm:$0xff] }
  0x4f   :  { %1963 = vmatpush3.bf16.msra.mxu1 %v1962_v7  ;;  %825 = vmatprep.mubr.f32.mxu1 %v53_v14  ;;  %v328_v61 = vld [vmem:[%s3394_s1 + $0x550] sm:$0xff]  ;;  %v329_v63 = vld [vmem:[%s3394_s1 + $0x558] sm:$0xff]  ;;  %v98_v2 = vld [vmem:[%s3395_s0 + $0x2a0] sm:$0xff]  ;;  %v1946_v7 = vpack.c.bf16 %v297_v60, %v296_v59  ;;  %v1948_v10 = vpack.c.bf16 %v315_v1, %v314_v0 }
  0x50   :  { %716 = vmatmul.mubr.f32.gmra.mrb[22].mxu0 %v50_v18  ;;  %1965 = vmatprep.subr.bf16.mxu1 %v1964_v15  ;;  %v346_v3 = vld [vmem:[%s3394_s1 + $0x5e0] sm:$0xff]  ;;  %v347_v4 = vld [vmem:[%s3394_s1 + $0x5e8] sm:$0xff]  ;;  %v100_v5 = vld [vmem:[%s3395_s0 + $0x2b0] sm:$0xff]  ;;  %v1978_v9 = vpack.c.bf16 %v329_v63, %v328_v61 }
  0x51   :  { %1935 = vmatpush3.bf16.msra.mxu0 %v1934_v19  ;;  %720 = vmatprep.mubr.f32.mxu0 %v67_v23  ;;  %v115_v6 = vld [vmem:[%s3395_s0 + $0x328] sm:$0xff]  ;;  %v117_v8 = vld [vmem:[%s3395_s0 + $0x338] sm:$0xff]  ;;  %v298_v11 = vld [vmem:[%s3394_s1 + $0x460] sm:$0xff]  ;;  %v1980_v14 = vpack.c.bf16 %v347_v4, %v346_v3 }
  0x52   :  { %826 = vmatmul.mubr.f32.gmra.mrb[22].mxu1 %v52_v22  ;;  %1937 = vmatprep.subr.bf16.mxu0 %v1936_v26  ;;  %v299_v12 = vld [vmem:[%s3394_s1 + $0x468] sm:$0xff]  ;;  %v330_v13 = vld [vmem:[%s3394_s1 + $0x560] sm:$0xff]  ;;  %v316_v16 = vld [vmem:[%s3394_s1 + $0x4f0] sm:$0xff] }
  0x53   :  { %1967 = vmatpush3.bf16.msra.mxu1 %v1966_v24  ;;  %830 = vmatprep.mubr.f32.mxu1 %v69_v25  ;;  %v331_v15 = vld [vmem:[%s3394_s1 + $0x568] sm:$0xff]  ;;  %v317_v17 = vld [vmem:[%s3394_s1 + $0x4f8] sm:$0xff]  ;;  %v114_v18 = vld [vmem:[%s3395_s0 + $0x320] sm:$0xff]  ;;  %v1950_v23 = vpack.c.bf16 %v299_v12, %v298_v11 }
  0x54   :  { %721 = vmatmul.mubr.f32.gmra.mrb[24].mxu0 %v66_v34  ;;  %1969 = vmatprep.subr.bf16.mxu1 %v1968_v30  ;;  %v348_v19 = vld [vmem:[%s3394_s1 + $0x5f0] sm:$0xff]  ;;  %v349_v20 = vld [vmem:[%s3394_s1 + $0x5f8] sm:$0xff]  ;;  %v131_v22 = vld [vmem:[%s3395_s0 + $0x3a8] sm:$0xff]  ;;  %v1982_v25 = vpack.c.bf16 %v331_v15, %v330_v13  ;;  %v1952_v26 = vpack.c.bf16 %v317_v17, %v316_v16 }
  0x55   :  { %725 = vmatprep.mubr.f32.mxu0 %v83_v38  ;;  %1939 = vmatpush3.bf16.msra.mxu0 %v1938_v39  ;;  %v116_v21 = vld [vmem:[%s3395_s0 + $0x330] sm:$0xff]  ;;  %v133_v24 = vld [vmem:[%s3395_s0 + $0x3b8] sm:$0xff]  ;;  %v1984_v30 = vpack.c.bf16 %v349_v20, %v348_v19  ;;  %v366_v32 = vld [vmem:[%s3394_s1 + $0x680] sm:$0xff] }
  0x56   :  { %831 = vmatmul.mubr.f32.gmra.mrb[24].mxu1 %v68_v37  ;;  %1941 = vmatprep.subr.bf16.mxu0 %v1940_v42  ;;  %v300_v27 = vld [vmem:[%s3394_s1 + $0x470] sm:$0xff]  ;;  %v301_v28 = vld [vmem:[%s3394_s1 + $0x478] sm:$0xff]  ;;  %v367_v33 = vld [vmem:[%s3394_s1 + $0x688] sm:$0xff] }
  0x57   :  { %835 = vmatprep.mubr.f32.mxu1 %v85_v40  ;;  %1971 = vmatpush3.bf16.msra.mxu1 %v1970_v41  ;;  %v332_v29 = vld [vmem:[%s3394_s1 + $0x570] sm:$0xff]  ;;  %v333_v31 = vld [vmem:[%s3394_s1 + $0x578] sm:$0xff]  ;;  %v130_v34 = vld [vmem:[%s3395_s0 + $0x3a0] sm:$0xff]  ;;  %v1954_v39 = vpack.c.bf16 %v301_v28, %v300_v27  ;;  %v1988_v42 = vpack.c.bf16 %v367_v33, %v366_v32 }
  0x58   :  { %726 = vmatmul.mubr.f32.gmra.mrb[26].mxu0 %v82_v50  ;;  %1973 = vmatprep.subr.bf16.mxu1 %v1972_v46  ;;  %v398_v35 = vld [vmem:[%s3394_s1 + $0x780] sm:$0xff]  ;;  %v399_v36 = vld [vmem:[%s3394_s1 + $0x788] sm:$0xff]  ;;  %v132_v37 = vld [vmem:[%s3395_s0 + $0x3b0] sm:$0xff]  ;;  %v1986_v41 = vpack.c.bf16 %v333_v31, %v332_v29 }
  0x59   :  { %730 = vmatprep.mubr.f32.mxu0 %v99_v54  ;;  %1943 = vmatpush3.bf16.msra.mxu0 %v1942_v55  ;;  %v147_v38 = vld [vmem:[%s3395_s0 + $0x428] sm:$0xff]  ;;  %v149_v40 = vld [vmem:[%s3395_s0 + $0x438] sm:$0xff]  ;;  %v2020_v43 = vpack.c.bf16 %v399_v36, %v398_v35  ;;  %v146_v44 = vld [vmem:[%s3395_s0 + $0x420] sm:$0xff] }
  0x5a   :  { %836 = vmatmul.mubr.f32.gmra.mrb[26].mxu1 %v84_v53  ;;  %1945 = vmatprep.subr.bf16.mxu0 %v1944_v58  ;;  %v148_v45 = vld [vmem:[%s3395_s0 + $0x430] sm:$0xff]  ;;  %v23_v46 = vld [vmem:[%s3395_s0 + $0x48] sm:$0xff]  ;;  %v350_v47 = vld [vmem:[%s3394_s1 + $0x600] sm:$0xff] }
  0x5b   :  { %840 = vmatprep.mubr.f32.mxu1 %v101_v56  ;;  %1975 = vmatpush3.bf16.msra.mxu1 %v1974_v57  ;;  %v351_v48 = vld [vmem:[%s3394_s1 + $0x608] sm:$0xff]  ;;  %v25_v49 = vld [vmem:[%s3395_s0 + $0x58] sm:$0xff]  ;;  %v382_v50 = vld [vmem:[%s3394_s1 + $0x700] sm:$0xff] }
  0x5c   :  { %731 = vmatmul.mubr.f32.gmra.mrb[28].mxu0 %v98_v2  ;;  %1977 = vmatprep.subr.bf16.mxu1 %v1976_v62  ;;  %v383_v51 = vld [vmem:[%s3394_s1 + $0x708] sm:$0xff]  ;;  %v368_v52 = vld [vmem:[%s3394_s1 + $0x690] sm:$0xff]  ;;  %v369_v53 = vld [vmem:[%s3394_s1 + $0x698] sm:$0xff]  ;;  %v1990_v55 = vpack.c.bf16 %v351_v48, %v350_v47 }
  0x5d   :  { %735 = vmatprep.mubr.f32.mxu0 %v115_v6  ;;  %1947 = vmatpush3.bf16.msra.mxu0 %v1946_v7  ;;  %v22_v54 = vld [vmem:[%s3395_s0 + $0x40] sm:$0xff]  ;;  %v400_v56 = vld [vmem:[%s3394_s1 + $0x790] sm:$0xff]  ;;  %v401_v57 = vld [vmem:[%s3394_s1 + $0x798] sm:$0xff]  ;;  %v2022_v59 = vpack.c.bf16 %v383_v51, %v382_v50  ;;  %v1992_v63 = vpack.c.bf16 %v369_v53, %v368_v52 }
  0x5e   :  { %841 = vmatmul.mubr.f32.gmra.mrb[28].mxu1 %v100_v5  ;;  %1949 = vmatprep.subr.bf16.mxu0 %v1948_v10  ;;  %v24_v58 = vld [vmem:[%s3395_s0 + $0x50] sm:$0xff]  ;;  %v353_v61 = vld [vmem:[%s3394_s1 + $0x618] sm:$0xff]  ;;  %v39_v62 = vld [vmem:[%s3395_s0 + $0xc8] sm:$0xff]  ;;  %v2024_v3 = vpack.c.bf16 %v401_v57, %v400_v56 }
  0x5f   :  { %845 = vmatprep.mubr.f32.mxu1 %v117_v8  ;;  %1979 = vmatpush3.bf16.msra.mxu1 %v1978_v9  ;;  %v352_v60 = vld [vmem:[%s3394_s1 + $0x610] sm:$0xff]  ;;  %v385_v1 = vld [vmem:[%s3394_s1 + $0x718] sm:$0xff]  ;;  %v370_v4 = vld [vmem:[%s3394_s1 + $0x6a0] sm:$0xff] }
  0x60   :  { %736 = vmatmul.mubr.f32.gmra.mrb[30].mxu0 %v114_v18  ;;  %1981 = vmatprep.subr.bf16.mxu1 %v1980_v14  ;;  %v384_v0 = vld [vmem:[%s3394_s1 + $0x710] sm:$0xff]  ;;  %v41_v2 = vld [vmem:[%s3395_s0 + $0xd8] sm:$0xff]  ;;  %v371_v5 = vld [vmem:[%s3394_s1 + $0x6a8] sm:$0xff]  ;;  %v1994_v7 = vpack.c.bf16 %v353_v61, %v352_v60 }
  0x61   :  { %740 = vmatprep.mubr.f32.mxu0 %v131_v22  ;;  %1951 = vmatpush3.bf16.msra.mxu0 %v1950_v23  ;;  %v38_v6 = vld [vmem:[%s3395_s0 + $0xc0] sm:$0xff]  ;;  %v403_v9 = vld [vmem:[%s3394_s1 + $0x7a8] sm:$0xff]  ;;  %v40_v10 = vld [vmem:[%s3395_s0 + $0xd0] sm:$0xff]  ;;  %v2026_v11 = vpack.c.bf16 %v385_v1, %v384_v0  ;;  %v1996_v15 = vpack.c.bf16 %v371_v5, %v370_v4 }
  0x62   :  { %846 = vmatmul.mubr.f32.gmra.mrb[30].mxu1 %v116_v21  ;;  %1953 = vmatprep.subr.bf16.mxu0 %v1952_v26  ;;  %v402_v8 = vld [vmem:[%s3394_s1 + $0x7a0] sm:$0xff]  ;;  %v355_v13 = vld [vmem:[%s3394_s1 + $0x628] sm:$0xff]  ;;  %v57_v18 = vld [vmem:[%s3395_s0 + $0x158] sm:$0xff] }
  0x63   :  { %850 = vmatprep.mubr.f32.mxu1 %v133_v24  ;;  %1983 = vmatpush3.bf16.msra.mxu1 %v1982_v25  ;;  %v354_v12 = vld [vmem:[%s3394_s1 + $0x620] sm:$0xff]  ;;  %v55_v14 = vld [vmem:[%s3395_s0 + $0x148] sm:$0xff]  ;;  %v2028_v19 = vpack.c.bf16 %v403_v9, %v402_v8  ;;  %v372_v20 = vld [vmem:[%s3394_s1 + $0x6b0] sm:$0xff] }
  0x64   :  { %741 = vmatmul.mubr.f32.gmra.mrb[32].mxu0 %v130_v34  ;;  %1985 = vmatprep.subr.bf16.mxu1 %v1984_v30  ;;  %v386_v16 = vld [vmem:[%s3394_s1 + $0x720] sm:$0xff]  ;;  %v387_v17 = vld [vmem:[%s3394_s1 + $0x728] sm:$0xff]  ;;  %v373_v21 = vld [vmem:[%s3394_s1 + $0x6b8] sm:$0xff]  ;;  %v1998_v23 = vpack.c.bf16 %v355_v13, %v354_v12 }
  0x65   :  { %745 = vmatprep.mubr.f32.mxu0 %v147_v38  ;;  %1955 = vmatpush3.bf16.msra.mxu0 %v1954_v39  ;;  %v54_v22 = vld [vmem:[%s3395_s0 + $0x140] sm:$0xff]  ;;  %v404_v24 = vld [vmem:[%s3394_s1 + $0x7b0] sm:$0xff]  ;;  %v405_v25 = vld [vmem:[%s3394_s1 + $0x7b8] sm:$0xff]  ;;  %v2030_v28 = vpack.c.bf16 %v387_v17, %v386_v16  ;;  %v2000_v30 = vpack.c.bf16 %v373_v21, %v372_v20 }
  0x66   :  { %851 = vmatmul.mubr.f32.gmra.mrb[32].mxu1 %v132_v37  ;;  %1989 = vmatprep.subr.bf16.mxu0 %v1988_v42  ;;  %v56_v26 = vld [vmem:[%s3395_s0 + $0x150] sm:$0xff]  ;;  %v71_v27 = vld [vmem:[%s3395_s0 + $0x1c8] sm:$0xff]  ;;  %v73_v29 = vld [vmem:[%s3395_s0 + $0x1d8] sm:$0xff]  ;;  %v2032_v34 = vpack.c.bf16 %v405_v25, %v404_v24 }
  0x67   :  { %855 = vmatprep.mubr.f32.mxu1 %v149_v40  ;;  %1987 = vmatpush3.bf16.msra.mxu1 %v1986_v41  ;;  %v356_v31 = vld [vmem:[%s3394_s1 + $0x630] sm:$0xff]  ;;  %v357_v32 = vld [vmem:[%s3394_s1 + $0x638] sm:$0xff]  ;;  %v374_v36 = vld [vmem:[%s3394_s1 + $0x6c0] sm:$0xff] }
  0x68   :  { %746 = vmatmul.mubr.f32.gmra.mrb[34].mxu0 %v146_v44  ;;  %2021 = vmatprep.subr.bf16.mxu1 %v2020_v43  ;;  %v388_v33 = vld [vmem:[%s3394_s1 + $0x730] sm:$0xff]  ;;  %v389_v35 = vld [vmem:[%s3394_s1 + $0x738] sm:$0xff]  ;;  %v375_v37 = vld [vmem:[%s3394_s1 + $0x6c8] sm:$0xff]  ;;  %v2002_v43 = vpack.c.bf16 %v357_v32, %v356_v31 }
  0x69   :  { %925 = vmatprep.mubr.f32.mxu0 %v23_v46  ;;  %v70_v38 = vld [vmem:[%s3395_s0 + $0x1c0] sm:$0xff]  ;;  %v407_v40 = vld [vmem:[%s3394_s1 + $0x7c8] sm:$0xff]  ;;  %v72_v41 = vld [vmem:[%s3395_s0 + $0x1d0] sm:$0xff]  ;;  %v2004_v46 = vpack.c.bf16 %v375_v37, %v374_v36 }
  0x6a   :  { %856 = vmatmul.mubr.f32.gmra.mrb[34].mxu1 %v148_v45  ;;  %v406_v39 = vld [vmem:[%s3394_s1 + $0x7c0] sm:$0xff]  ;;  %v87_v42 = vld [vmem:[%s3395_s0 + $0x248] sm:$0xff]  ;;  %v89_v44 = vld [vmem:[%s3395_s0 + $0x258] sm:$0xff]  ;;  %v2034_v45 = vpack.c.bf16 %v389_v35, %v388_v33 }
  0x6b   :  { %1035 = vmatprep.mubr.f32.mxu1 %v25_v49  ;;  %v358_v47 = vld [vmem:[%s3394_s1 + $0x640] sm:$0xff]  ;;  %v359_v48 = vld [vmem:[%s3394_s1 + $0x648] sm:$0xff]  ;;  %v2036_v50 = vpack.c.bf16 %v407_v40, %v406_v39  ;;  %v376_v52 = vld [vmem:[%s3394_s1 + $0x6d0] sm:$0xff] }
  0x6c   :  { %926 = vmatmul.mubr.f32.vlgmr.msra.gmra.mrb[36].mxu0 %v22_v54  ;;  %v390_v49 = vld [vmem:[%s3394_s1 + $0x740] sm:$0xff]  ;;  %v391_v51 = vld [vmem:[%s3394_s1 + $0x748] sm:$0xff]  ;;  %v377_v53 = vld [vmem:[%s3394_s1 + $0x6d8] sm:$0xff] }
  0x6d   :  { %1991 = vmatpush3.bf16.msra.mxu0 %v1990_v55  ;;  %930 = vmatprep.mubr.f32.mxu0 %v39_v62  ;;  %v86_v54 = vld [vmem:[%s3395_s0 + $0x240] sm:$0xff]  ;;  %v408_v55 = vld [vmem:[%s3394_s1 + $0x7d0] sm:$0xff]  ;;  %v409_v56 = vld [vmem:[%s3394_s1 + $0x7d8] sm:$0xff]  ;;  %v2038_v61 = vpack.c.bf16 %v391_v51, %v390_v49  ;;  %v2008_v62 = vpack.c.bf16 %v377_v53, %v376_v52 }
  0x6e   :  { %1036 = vmatmul.mubr.f32.vlgmr.msra.gmra.mrb[36].mxu1 %v24_v58  ;;  %1993 = vmatprep.subr.bf16.mxu0 %v1992_v63  ;;  %v88_v57 = vld [vmem:[%s3395_s0 + $0x250] sm:$0xff]  ;;  %v103_v58 = vld [vmem:[%s3395_s0 + $0x2c8] sm:$0xff]  ;;  %v105_v60 = vld [vmem:[%s3395_s0 + $0x2d8] sm:$0xff] }
  0x6f   :  { %2023 = vmatpush3.bf16.msra.mxu1 %v2022_v59  ;;  %1040 = vmatprep.mubr.f32.mxu1 %v41_v2  ;;  %v2006_v59 = vpack.c.bf16 %v359_v48, %v358_v47  ;;  %v360_v63 = vld [vmem:[%s3394_s1 + $0x650] sm:$0xff]  ;;  %v361_v0 = vld [vmem:[%s3394_s1 + $0x658] sm:$0xff]  ;;  %v2040_v2 = vpack.c.bf16 %v409_v56, %v408_v55  ;;  %v378_v4 = vld [vmem:[%s3394_s1 + $0x6e0] sm:$0xff] }
  0x70   :  { %931 = vmatmul.mubr.f32.gmra.mrb[38].mxu0 %v38_v6  ;;  %2025 = vmatprep.subr.bf16.mxu1 %v2024_v3  ;;  %v392_v1 = vld [vmem:[%s3394_s1 + $0x750] sm:$0xff]  ;;  %v393_v3 = vld [vmem:[%s3394_s1 + $0x758] sm:$0xff]  ;;  %v379_v5 = vld [vmem:[%s3394_s1 + $0x6e8] sm:$0xff] }
  0x71   :  { %1995 = vmatpush3.bf16.msra.mxu0 %v1994_v7  ;;  %935 = vmatprep.mubr.f32.mxu0 %v55_v14  ;;  %v102_v6 = vld [vmem:[%s3395_s0 + $0x2c0] sm:$0xff]  ;;  %v411_v8 = vld [vmem:[%s3394_s1 + $0x7e8] sm:$0xff]  ;;  %v104_v9 = vld [vmem:[%s3395_s0 + $0x2d0] sm:$0xff]  ;;  %v2042_v13 = vpack.c.bf16 %v393_v3, %v392_v1  ;;  %v2012_v14 = vpack.c.bf16 %v379_v5, %v378_v4 }
  0x72   :  { %1041 = vmatmul.mubr.f32.gmra.mrb[38].mxu1 %v40_v10  ;;  %1997 = vmatprep.subr.bf16.mxu0 %v1996_v15  ;;  %v410_v7 = vld [vmem:[%s3394_s1 + $0x7e0] sm:$0xff]  ;;  %v119_v10 = vld [vmem:[%s3395_s0 + $0x348] sm:$0xff]  ;;  %v121_v12 = vld [vmem:[%s3395_s0 + $0x358] sm:$0xff] }
  0x73   :  { %2027 = vmatpush3.bf16.msra.mxu1 %v2026_v11  ;;  %1045 = vmatprep.mubr.f32.mxu1 %v57_v18  ;;  %v2010_v11 = vpack.c.bf16 %v361_v0, %v360_v63  ;;  %v362_v15 = vld [vmem:[%s3394_s1 + $0x660] sm:$0xff]  ;;  %v363_v16 = vld [vmem:[%s3394_s1 + $0x668] sm:$0xff]  ;;  %v2044_v18 = vpack.c.bf16 %v411_v8, %v410_v7  ;;  %v380_v20 = vld [vmem:[%s3394_s1 + $0x6f0] sm:$0xff] }
  0x74   :  { %936 = vmatmul.mubr.f32.gmra.mrb[40].mxu0 %v54_v22  ;;  %2029 = vmatprep.subr.bf16.mxu1 %v2028_v19  ;;  %v394_v17 = vld [vmem:[%s3394_s1 + $0x760] sm:$0xff]  ;;  %v395_v19 = vld [vmem:[%s3394_s1 + $0x768] sm:$0xff]  ;;  %v381_v21 = vld [vmem:[%s3394_s1 + $0x6f8] sm:$0xff] }
  0x75   :  { %1999 = vmatpush3.bf16.msra.mxu0 %v1998_v23  ;;  %940 = vmatprep.mubr.f32.mxu0 %v71_v27  ;;  %v118_v22 = vld [vmem:[%s3395_s0 + $0x340] sm:$0xff]  ;;  %v412_v23 = vld [vmem:[%s3394_s1 + $0x7f0] sm:$0xff]  ;;  %v413_v24 = vld [vmem:[%s3394_s1 + $0x7f8] sm:$0xff]  ;;  %v2014_v27 = vpack.c.bf16 %v363_v16, %v362_v15 }
  0x76   :  { %1046 = vmatmul.mubr.f32.gmra.mrb[40].mxu1 %v56_v26  ;;  %2001 = vmatprep.subr.bf16.mxu0 %v2000_v30  ;;  %v120_v25 = vld [vmem:[%s3395_s0 + $0x350] sm:$0xff]  ;;  %v135_v26 = vld [vmem:[%s3395_s0 + $0x3c8] sm:$0xff]  ;;  %v2016_v30 = vpack.c.bf16 %v381_v21, %v380_v20  ;;  %v365_v32 = vld [vmem:[%s3394_s1 + $0x678] sm:$0xff]  ;;  %v2048_v33 = vpack.c.bf16 %v413_v24, %v412_v23 }
  0x77   :  { %2031 = vmatpush3.bf16.msra.mxu1 %v2030_v28  ;;  %1050 = vmatprep.mubr.f32.mxu1 %v73_v29  ;;  %v137_v28 = vld [vmem:[%s3395_s0 + $0x3d8] sm:$0xff]  ;;  %v2046_v29 = vpack.c.bf16 %v395_v19, %v394_v17  ;;  %v364_v31 = vld [vmem:[%s3394_s1 + $0x670] sm:$0xff]  ;;  %v134_v36 = vld [vmem:[%s3395_s0 + $0x3c0] sm:$0xff] }
  0x78   :  { %941 = vmatmul.mubr.f32.gmra.mrb[42].mxu0 %v70_v38  ;;  %2033 = vmatprep.subr.bf16.mxu1 %v2032_v34  ;;  %v396_v34 = vld [vmem:[%s3394_s1 + $0x770] sm:$0xff]  ;;  %v397_v35 = vld [vmem:[%s3394_s1 + $0x778] sm:$0xff]  ;;  %v151_v38 = vld [vmem:[%s3395_s0 + $0x448] sm:$0xff]  ;;  %v2018_v39 = vpack.c.bf16 %v365_v32, %v364_v31 }
  0x79   :  { %945 = vmatprep.mubr.f32.mxu0 %v87_v42  ;;  %2003 = vmatpush3.bf16.msra.mxu0 %v2002_v43  ;;  %v136_v37 = vld [vmem:[%s3395_s0 + $0x3d0] sm:$0xff]  ;;  %v153_v40 = vld [vmem:[%s3395_s0 + $0x458] sm:$0xff]  ;;  %v150_v42 = vld [vmem:[%s3395_s0 + $0x440] sm:$0xff] }
  0x7a   :  { %1051 = vmatmul.mubr.f32.gmra.mrb[42].mxu1 %v72_v41  ;;  %2005 = vmatprep.subr.bf16.mxu0 %v2004_v46  ;;  %v2050_v41 = vpack.c.bf16 %v397_v35, %v396_v34  ;;  %v152_v43 = vld [vmem:[%s3395_s0 + $0x450] sm:$0xff]  ;;  %v26_v46 = vld [vmem:[%s3395_s0 + $0x60] sm:$0xff]  ;;  %v43_v48 = vld [vmem:[%s3395_s0 + $0xe8] sm:$0xff] }
  0x7b   :  { %1055 = vmatprep.mubr.f32.mxu1 %v89_v44  ;;  %2035 = vmatpush3.bf16.msra.mxu1 %v2034_v45  ;;  %v27_v44 = vld [vmem:[%s3395_s0 + $0x68] sm:$0xff]  ;;  %v29_v45 = vld [vmem:[%s3395_s0 + $0x78] sm:$0xff]  ;;  %v28_v47 = vld [vmem:[%s3395_s0 + $0x70] sm:$0xff] }
  0x7c   :  { %946 = vmatmul.mubr.f32.gmra.mrb[44].mxu0 %v86_v54  ;;  %2037 = vmatprep.subr.bf16.mxu1 %v2036_v50  ;;  %v45_v49 = vld [vmem:[%s3395_s0 + $0xf8] sm:$0xff]  ;;  %v42_v50 = vld [vmem:[%s3395_s0 + $0xe0] sm:$0xff]  ;;  %v44_v51 = vld [vmem:[%s3395_s0 + $0xf0] sm:$0xff] }
  0x7d   :  { %950 = vmatprep.mubr.f32.mxu0 %v103_v58  ;;  %2007 = vmatpush3.bf16.msra.mxu0 %v2006_v59  ;;  %v59_v52 = vld [vmem:[%s3395_s0 + $0x168] sm:$0xff]  ;;  %v61_v53 = vld [vmem:[%s3395_s0 + $0x178] sm:$0xff]  ;;  %v58_v54 = vld [vmem:[%s3395_s0 + $0x160] sm:$0xff] }
  0x7e   :  { %1056 = vmatmul.mubr.f32.gmra.mrb[44].mxu1 %v88_v57  ;;  %2009 = vmatprep.subr.bf16.mxu0 %v2008_v62  ;;  %v60_v55 = vld [vmem:[%s3395_s0 + $0x170] sm:$0xff]  ;;  %v75_v56 = vld [vmem:[%s3395_s0 + $0x1e8] sm:$0xff]  ;;  %v77_v57 = vld [vmem:[%s3395_s0 + $0x1f8] sm:$0xff] }
  0x7f   :  { %1060 = vmatprep.mubr.f32.mxu1 %v105_v60  ;;  %2039 = vmatpush3.bf16.msra.mxu1 %v2038_v61  ;;  %v74_v58 = vld [vmem:[%s3395_s0 + $0x1e0] sm:$0xff]  ;;  %v76_v59 = vld [vmem:[%s3395_s0 + $0x1f0] sm:$0xff]  ;;  %v91_v60 = vld [vmem:[%s3395_s0 + $0x268] sm:$0xff] }
  0x80   :  { %951 = vmatmul.mubr.f32.gmra.mrb[46].mxu0 %v102_v6  ;;  %2041 = vmatprep.subr.bf16.mxu1 %v2040_v2  ;;  %v93_v61 = vld [vmem:[%s3395_s0 + $0x278] sm:$0xff]  ;;  %v90_v62 = vld [vmem:[%s3395_s0 + $0x260] sm:$0xff]  ;;  %v92_v63 = vld [vmem:[%s3395_s0 + $0x270] sm:$0xff] }
  0x81   :  { %955 = vmatprep.mubr.f32.mxu0 %v119_v10  ;;  %2011 = vmatpush3.bf16.msra.mxu0 %v2010_v11  ;;  %v107_v0 = vld [vmem:[%s3395_s0 + $0x2e8] sm:$0xff]  ;;  %v109_v1 = vld [vmem:[%s3395_s0 + $0x2f8] sm:$0xff]  ;;  %v106_v2 = vld [vmem:[%s3395_s0 + $0x2e0] sm:$0xff] }
  0x82   :  { %1061 = vmatmul.mubr.f32.gmra.mrb[46].mxu1 %v104_v9  ;;  %2013 = vmatprep.subr.bf16.mxu0 %v2012_v14  ;;  %v108_v3 = vld [vmem:[%s3395_s0 + $0x2f0] sm:$0xff]  ;;  %v123_v4 = vld [vmem:[%s3395_s0 + $0x368] sm:$0xff]  ;;  %v125_v5 = vld [vmem:[%s3395_s0 + $0x378] sm:$0xff] }
  0x83   :  { %1065 = vmatprep.mubr.f32.mxu1 %v121_v12  ;;  %2043 = vmatpush3.bf16.msra.mxu1 %v2042_v13  ;;  %v122_v6 = vld [vmem:[%s3395_s0 + $0x360] sm:$0xff]  ;;  %v124_v7 = vld [vmem:[%s3395_s0 + $0x370] sm:$0xff]  ;;  %v139_v8 = vld [vmem:[%s3395_s0 + $0x3e8] sm:$0xff] }
  0x84   :  { %956 = vmatmul.mubr.f32.gmra.mrb[48].mxu0 %v118_v22  ;;  %2045 = vmatprep.subr.bf16.mxu1 %v2044_v18  ;;  %v141_v9 = vld [vmem:[%s3395_s0 + $0x3f8] sm:$0xff]  ;;  %v138_v10 = vld [vmem:[%s3395_s0 + $0x3e0] sm:$0xff]  ;;  %v140_v11 = vld [vmem:[%s3395_s0 + $0x3f0] sm:$0xff] }
  0x85   :  { %960 = vmatprep.mubr.f32.mxu0 %v135_v26  ;;  %2015 = vmatpush3.bf16.msra.mxu0 %v2014_v27  ;;  %v155_v12 = vld [vmem:[%s3395_s0 + $0x468] sm:$0xff]  ;;  %v157_v13 = vld [vmem:[%s3395_s0 + $0x478] sm:$0xff]  ;;  %v154_v14 = vld [vmem:[%s3395_s0 + $0x460] sm:$0xff] }
  0x86   :  { %1066 = vmatmul.mubr.f32.gmra.mrb[48].mxu1 %v120_v25  ;;  %2017 = vmatprep.subr.bf16.mxu0 %v2016_v30  ;;  %v156_v15 = vld [vmem:[%s3395_s0 + $0x470] sm:$0xff]  ;;  %v3275_v17 = vld [vmem:[%s3396_s2] ss:$0 sm:$0xff] }
  0x87   :  { %1070 = vmatprep.mubr.f32.mxu1 %v137_v28  ;;  %2047 = vmatpush3.bf16.msra.mxu1 %v2046_v29 }
  0x88   :  { %961 = vmatmul.mubr.f32.gmra.mrb[50].mxu0 %v134_v36  ;;  %2049 = vmatprep.subr.bf16.mxu1 %v2048_v33 }
  0x89   :  { %965 = vmatprep.mubr.f32.mxu0 %v151_v38  ;;  %2019 = vmatpush3.bf16.msra.mxu0 %v2018_v39 }
  0x8a   :  { %1071 = vmatmul.mubr.f32.gmra.mrb[50].mxu1 %v136_v37 }
  0x8b   :  { %1075 = vmatprep.mubr.f32.mxu1 %v153_v40  ;;  %2051 = vmatpush3.bf16.msra.mxu1 %v2050_v41 }
  0x8c   :  { %966 = vmatmul.mubr.f32.gmra.mrb[52].mxu0 %v150_v42 }
  0x8d   :  { %1145 = vmatprep.mubr.f32.mxu0 %v27_v44 }
  0x8e   :  { %1076 = vmatmul.mubr.f32.gmra.mrb[52].mxu1 %v152_v43 }
  0x8f   :  { %1255 = vmatprep.mubr.f32.mxu1 %v29_v45 }
  0x90   :  { %1146 = vmatmul.mubr.f32.vlgmr.msra.gmra.mrb[54].mxu0 %v26_v46 }
  0x91   :  { %1150 = vmatprep.mubr.f32.mxu0 %v43_v48 }
  0x92   :  { %1256 = vmatmul.mubr.f32.vlgmr.msra.gmra.mrb[54].mxu1 %v28_v47 }
  0x93   :  { %1260 = vmatprep.mubr.f32.mxu1 %v45_v49 }
  0x94   :  { %1151 = vmatmul.mubr.f32.gmra.mrb[56].mxu0 %v42_v50 }
  0x95   :  { %1155 = vmatprep.mubr.f32.mxu0 %v59_v52 }
  0x96   :  { %1261 = vmatmul.mubr.f32.gmra.mrb[56].mxu1 %v44_v51 }
  0x97   :  { %1265 = vmatprep.mubr.f32.mxu1 %v61_v53 }
  0x98   :  { %1156 = vmatmul.mubr.f32.gmra.mrb[58].mxu0 %v58_v54 }
  0x99   :  { %1160 = vmatprep.mubr.f32.mxu0 %v75_v56 }
  0x9a   :  { %1266 = vmatmul.mubr.f32.gmra.mrb[58].mxu1 %v60_v55 }
  0x9b   :  { %1270 = vmatprep.mubr.f32.mxu1 %v77_v57 }
  0x9c   :  { %1161 = vmatmul.mubr.f32.gmra.mrb[60].mxu0 %v74_v58 }
  0x9d   :  { %1165 = vmatprep.mubr.f32.mxu0 %v91_v60 }
  0x9e   :  { %1271 = vmatmul.mubr.f32.gmra.mrb[60].mxu1 %v76_v59 }
  0x9f   :  { %1275 = vmatprep.mubr.f32.mxu1 %v93_v61 }
  0xa0   :  { %1166 = vmatmul.mubr.f32.gmra.mrb[62].mxu0 %v90_v62 }
  0xa1   :  { %1170 = vmatprep.mubr.f32.mxu0 %v107_v0 }
  0xa2   :  { %1276 = vmatmul.mubr.f32.gmra.mrb[62].mxu1 %v92_v63 }
  0xa3   :  { %1280 = vmatprep.mubr.f32.mxu1 %v109_v1 }
  0xa4   :  { %1171 = vmatmul.mubr.f32.gmra.mrb[64].mxu0 %v106_v2 }
  0xa5   :  { %1175 = vmatprep.mubr.f32.mxu0 %v123_v4 }
  0xa6   :  { %1281 = vmatmul.mubr.f32.gmra.mrb[64].mxu1 %v108_v3 }
  0xa7   :  { %1285 = vmatprep.mubr.f32.mxu1 %v125_v5 }
  0xa8   :  { %1176 = vmatmul.mubr.f32.gmra.mrb[66].mxu0 %v122_v6 }
  0xa9   :  { %1180 = vmatprep.mubr.f32.mxu0 %v139_v8 }
  0xaa   :  { %1286 = vmatmul.mubr.f32.gmra.mrb[66].mxu1 %v124_v7 }
  0xab   :  { %1290 = vmatprep.mubr.f32.mxu1 %v141_v9 }
  0xac   :  { %1181 = vmatmul.mubr.f32.gmra.mrb[68].mxu0 %v138_v10 }
  0xad   :  { %1185 = vmatprep.mubr.f32.mxu0 %v155_v12 }
  0xae   :  { %1291 = vmatmul.mubr.f32.gmra.mrb[68].mxu1 %v140_v11 }
  0xaf   :  { %1295 = vmatprep.mubr.f32.mxu1 %v157_v13 }
  0xb0   :  { %1186 = vmatmul.mubr.f32.gmra.mrb[70].mxu0 %v154_v14 }
  0xb2   :  { %1296 = vmatmul.mubr.f32.gmra.mrb[70].mxu1 %v156_v15 }
  0xf7   :  { %v1356_v16 = vpop.f32.mrb[0].mxu0 }
  0xf8   :  { %v1357_v18 = vpop.f32.mrb[1].mxu0 }
  0xf9   :  { %v1415_v19 = vpop.f32.mrb[0].mxu1  ;;  %v1358_v20 = vadd.f32 %v1357_v18, %v1356_v16 }
  0xfa   :  { %v1416_v21 = vpop.f32.mrb[1].mxu1 }
  0xfb   :  { %v1417_v22 = vadd.f32 %v1416_v21, %v1415_v19  ;;  %v488_v23 = vadd.f32 %v1358_v20, %v3275_v17  ;;  %v1359_v24 = vpop.f32.mrb[2].mxu0 }
  0xfc   :  { %v1360_v25 = vpop.f32.mrb[3].mxu0 }
  0xfd   :  { %v1418_v26 = vpop.f32.mrb[2].mxu1  ;;  %v3278_v27 = vadd.f32 %v1417_v22, %v488_v23  ;;  %v1361_v28 = vadd.f32 %v1360_v25, %v1359_v24 }
  0xfe   :  { %v1419_v29 = vpop.f32.mrb[3].mxu1 }
  0xff   :  { %v1420_v30 = vadd.f32 %v1419_v29, %v1418_v26  ;;  %v493_v31 = vadd.f32 %v1361_v28, %v3275_v17  ;;  %v1362_v32 = vpop.f32.mrb[4].mxu0 }
 0x100   :  { %v1363_v33 = vpop.f32.mrb[5].mxu0 }
 0x101   :  { %v1421_v34 = vpop.f32.mrb[4].mxu1  ;;  %v3281_v35 = vadd.f32 %v1420_v30, %v493_v31  ;;  %v1364_v36 = vadd.f32 %v1363_v33, %v1362_v32 }
 0x102   :  { %v1422_v37 = vpop.f32.mrb[5].mxu1 }
 0x103   :  { %v1423_v38 = vadd.f32 %v1422_v37, %v1421_v34  ;;  %v498_v39 = vadd.f32 %v1364_v36, %v3275_v17  ;;  %v1365_v40 = vpop.f32.mrb[6].mxu0 }
 0x104   :  { %v1366_v41 = vpop.f32.mrb[7].mxu0 }
 0x105   :  { %v1424_v42 = vpop.f32.mrb[6].mxu1  ;;  %v3284_v43 = vadd.f32 %v1423_v38, %v498_v39  ;;  %v1367_v44 = vadd.f32 %v1366_v41, %v1365_v40 }
 0x106   :  { %v1425_v45 = vpop.f32.mrb[7].mxu1 }
 0x107   :  { %v1426_v46 = vadd.f32 %v1425_v45, %v1424_v42  ;;  %v503_v47 = vadd.f32 %v1367_v44, %v3275_v17  ;;  %v1368_v48 = vpop.f32.mrb[8].mxu0 }
 0x108   :  { %v1369_v49 = vpop.f32.mrb[9].mxu0 }
 0x109   :  { %v1427_v50 = vpop.f32.mrb[8].mxu1  ;;  %v3287_v51 = vadd.f32 %v1426_v46, %v503_v47  ;;  %v1370_v52 = vadd.f32 %v1369_v49, %v1368_v48 }
 0x10a   :  { %v1428_v53 = vpop.f32.mrb[9].mxu1 }
 0x10b   :  { %v1429_v54 = vadd.f32 %v1428_v53, %v1427_v50  ;;  %v508_v55 = vadd.f32 %v1370_v52, %v3275_v17  ;;  %v1371_v56 = vpop.f32.mrb[10].mxu0 }
 0x10c   :  { %v1372_v57 = vpop.f32.mrb[11].mxu0 }
 0x10d   :  { %v1430_v58 = vpop.f32.mrb[10].mxu1  ;;  %v3290_v59 = vadd.f32 %v1429_v54, %v508_v55  ;;  %v1373_v60 = vadd.f32 %v1372_v57, %v1371_v56 }
 0x10e   :  { %v1431_v61 = vpop.f32.mrb[11].mxu1 }
 0x10f   :  { %v1432_v62 = vadd.f32 %v1431_v61, %v1430_v58  ;;  %v513_v63 = vadd.f32 %v1373_v60, %v3275_v17  ;;  %v1374_v0 = vpop.f32.mrb[12].mxu0 }
 0x110   :  { %v1375_v1 = vpop.f32.mrb[13].mxu0 }
 0x111   :  { %v1433_v2 = vpop.f32.mrb[12].mxu1  ;;  %v3293_v3 = vadd.f32 %v1432_v62, %v513_v63  ;;  %v1376_v4 = vadd.f32 %v1375_v1, %v1374_v0 }
 0x112   :  { %v1434_v5 = vpop.f32.mrb[13].mxu1 }
 0x113   :  { %v1435_v6 = vadd.f32 %v1434_v5, %v1433_v2  ;;  %v518_v7 = vadd.f32 %v1376_v4, %v3275_v17  ;;  %v1377_v8 = vpop.f32.mrb[14].mxu0 }
 0x114   :  { %v1378_v9 = vpop.f32.mrb[15].mxu0 }
 0x115   :  { %v1436_v10 = vpop.f32.mrb[14].mxu1  ;;  %v3296_v11 = vadd.f32 %v1435_v6, %v518_v7  ;;  %v1379_v12 = vadd.f32 %v1378_v9, %v1377_v8 }
 0x116   :  { %v1437_v13 = vpop.f32.mrb[15].mxu1 }
 0x117   :  { %v1438_v14 = vadd.f32 %v1437_v13, %v1436_v10  ;;  %v523_v15 = vadd.f32 %v1379_v12, %v3275_v17  ;;  %v1380_v16 = vpop.f32.mrb[16].mxu0 }
 0x118   :  { %v1381_v18 = vpop.f32.mrb[17].mxu0 }
 0x119   :  { %v1439_v19 = vpop.f32.mrb[16].mxu1  ;;  %v3299_v20 = vadd.f32 %v1438_v14, %v523_v15  ;;  %v1382_v21 = vadd.f32 %v1381_v18, %v1380_v16 }
 0x11a   :  { %v1440_v22 = vpop.f32.mrb[17].mxu1 }
 0x11b   :  { %v1441_v23 = vadd.f32 %v1440_v22, %v1439_v19  ;;  %v528_v24 = vadd.f32 %v1382_v21, %v3275_v17  ;;  %v1474_v25 = vpop.f32.mrb[18].mxu0 }
 0x11c   :  { %v1475_v26 = vpop.f32.mrb[19].mxu0 }
 0x11d   :  { %v1533_v28 = vpop.f32.mrb[18].mxu1  ;;  %v3302_v29 = vadd.f32 %v1441_v23, %v528_v24  ;;  %v1476_v30 = vadd.f32 %v1475_v26, %v1474_v25 }
 0x11e   :  { %v1534_v31 = vpop.f32.mrb[19].mxu1 }
 0x11f   :  { %v1535_v32 = vadd.f32 %v1534_v31, %v1533_v28  ;;  %v708_v33 = vadd.f32 %v1476_v30, %v3278_v27  ;;  %v1477_v34 = vpop.f32.mrb[20].mxu0 }
 0x120   :  { %v1478_v36 = vpop.f32.mrb[21].mxu0 }
 0x121   :  { %v1536_v37 = vpop.f32.mrb[20].mxu1  ;;  %v3305_v38 = vadd.f32 %v1535_v32, %v708_v33  ;;  %v1479_v39 = vadd.f32 %v1478_v36, %v1477_v34 }
 0x122   :  { %v1537_v40 = vpop.f32.mrb[21].mxu1 }
 0x123   :  { %v1538_v41 = vadd.f32 %v1537_v40, %v1536_v37  ;;  %v713_v17 = vadd.f32 %v1479_v39, %v3281_v35  ;;  %v1480_v42 = vpop.f32.mrb[22].mxu0 }
 0x124   :  { %v1481_v44 = vpop.f32.mrb[23].mxu0 }
 0x125   :  { %v1539_v45 = vpop.f32.mrb[22].mxu1  ;;  %v3308_v46 = vadd.f32 %v1538_v41, %v713_v17  ;;  %v1482_v47 = vadd.f32 %v1481_v44, %v1480_v42 }
 0x126   :  { %v1540_v48 = vpop.f32.mrb[23].mxu1 }
 0x127   :  { %v1541_v49 = vadd.f32 %v1540_v48, %v1539_v45  ;;  %v718_v27 = vadd.f32 %v1482_v47, %v3284_v43  ;;  %v1483_v50 = vpop.f32.mrb[24].mxu0 }
 0x128   :  { %v1484_v52 = vpop.f32.mrb[25].mxu0 }
 0x129   :  { %v1542_v53 = vpop.f32.mrb[24].mxu1  ;;  %v3311_v54 = vadd.f32 %v1541_v49, %v718_v27  ;;  %v1485_v55 = vadd.f32 %v1484_v52, %v1483_v50 }
 0x12a   :  { %v1543_v56 = vpop.f32.mrb[25].mxu1 }
 0x12b   :  { %v1544_v57 = vadd.f32 %v1543_v56, %v1542_v53  ;;  %v723_v35 = vadd.f32 %v1485_v55, %v3287_v51  ;;  %v1486_v58 = vpop.f32.mrb[26].mxu0 }
 0x12c   :  { %v1487_v60 = vpop.f32.mrb[27].mxu0 }
 0x12d   :  { %v1545_v61 = vpop.f32.mrb[26].mxu1  ;;  %v3314_v62 = vadd.f32 %v1544_v57, %v723_v35  ;;  %v1488_v63 = vadd.f32 %v1487_v60, %v1486_v58 }
 0x12e   :  { %v1546_v0 = vpop.f32.mrb[27].mxu1 }
 0x12f   :  { %v1547_v1 = vadd.f32 %v1546_v0, %v1545_v61  ;;  %v728_v43 = vadd.f32 %v1488_v63, %v3290_v59  ;;  %v1489_v2 = vpop.f32.mrb[28].mxu0 }
 0x130   :  { %v1490_v4 = vpop.f32.mrb[29].mxu0 }
 0x131   :  { %v1548_v5 = vpop.f32.mrb[28].mxu1  ;;  %v3317_v6 = vadd.f32 %v1547_v1, %v728_v43  ;;  %v1491_v7 = vadd.f32 %v1490_v4, %v1489_v2 }
 0x132   :  { %v1549_v8 = vpop.f32.mrb[29].mxu1 }
 0x133   :  { %v1550_v9 = vadd.f32 %v1549_v8, %v1548_v5  ;;  %v733_v51 = vadd.f32 %v1491_v7, %v3293_v3  ;;  %v1492_v10 = vpop.f32.mrb[30].mxu0 }
 0x134   :  { %v1493_v12 = vpop.f32.mrb[31].mxu0 }
 0x135   :  { %v1551_v13 = vpop.f32.mrb[30].mxu1  ;;  %v3320_v14 = vadd.f32 %v1550_v9, %v733_v51  ;;  %v1494_v15 = vadd.f32 %v1493_v12, %v1492_v10 }
 0x136   :  { %v1552_v16 = vpop.f32.mrb[31].mxu1 }
 0x137   :  { %v1553_v18 = vadd.f32 %v1552_v16, %v1551_v13  ;;  %v738_v59 = vadd.f32 %v1494_v15, %v3296_v11  ;;  %v1495_v19 = vpop.f32.mrb[32].mxu0 }
 0x138   :  { %v1496_v21 = vpop.f32.mrb[33].mxu0 }
 0x139   :  { %v1554_v22 = vpop.f32.mrb[32].mxu1  ;;  %v3323_v23 = vadd.f32 %v1553_v18, %v738_v59  ;;  %v1497_v24 = vadd.f32 %v1496_v21, %v1495_v19 }
 0x13a   :  { %v1555_v25 = vpop.f32.mrb[33].mxu1 }
 0x13b   :  { %v1556_v26 = vadd.f32 %v1555_v25, %v1554_v22  ;;  %v743_v3 = vadd.f32 %v1497_v24, %v3299_v20  ;;  %v1498_v28 = vpop.f32.mrb[34].mxu0 }
 0x13c   :  { %v1499_v30 = vpop.f32.mrb[35].mxu0 }
 0x13d   :  { %v1557_v31 = vpop.f32.mrb[34].mxu1  ;;  %v3326_v32 = vadd.f32 %v1556_v26, %v743_v3  ;;  %v1500_v33 = vadd.f32 %v1499_v30, %v1498_v28 }
 0x13e   :  { %v1558_v34 = vpop.f32.mrb[35].mxu1 }
 0x13f   :  { %v1559_v36 = vadd.f32 %v1558_v34, %v1557_v31  ;;  %v748_v11 = vadd.f32 %v1500_v33, %v3302_v29  ;;  %v1592_v37 = vpop.f32.mrb[36].mxu0 }
 0x140   :  { %v1593_v39 = vpop.f32.mrb[37].mxu0 }
 0x141   :  { %v1651_v40 = vpop.f32.mrb[36].mxu1  ;;  %v3329_v41 = vadd.f32 %v1559_v36, %v748_v11  ;;  %v1594_v17 = vadd.f32 %v1593_v39, %v1592_v37 }
 0x142   :  { %v1652_v42 = vpop.f32.mrb[37].mxu1 }
 0x143   :  { %v1653_v44 = vadd.f32 %v1652_v42, %v1651_v40  ;;  %v928_v20 = vadd.f32 %v1594_v17, %v3305_v38  ;;  %v1595_v45 = vpop.f32.mrb[38].mxu0 }
 0x144   :  { %v1596_v47 = vpop.f32.mrb[39].mxu0 }
 0x145   :  { %v1654_v48 = vpop.f32.mrb[38].mxu1  ;;  %v3332_v49 = vadd.f32 %v1653_v44, %v928_v20  ;;  %v1597_v27 = vadd.f32 %v1596_v47, %v1595_v45 }
 0x146   :  { %v1655_v50 = vpop.f32.mrb[39].mxu1 }
 0x147   :  { %v1656_v52 = vadd.f32 %v1655_v50, %v1654_v48  ;;  %v933_v29 = vadd.f32 %v1597_v27, %v3308_v46  ;;  %v1598_v53 = vpop.f32.mrb[40].mxu0 }
 0x148   :  { %v1599_v55 = vpop.f32.mrb[41].mxu0 }
 0x149   :  { %v1657_v56 = vpop.f32.mrb[40].mxu1  ;;  %v3335_v57 = vadd.f32 %v1656_v52, %v933_v29  ;;  %v1600_v35 = vadd.f32 %v1599_v55, %v1598_v53 }
 0x14a   :  { %v1658_v58 = vpop.f32.mrb[41].mxu1 }
 0x14b   :  { %v1659_v60 = vadd.f32 %v1658_v58, %v1657_v56  ;;  %v938_v38 = vadd.f32 %v1600_v35, %v3311_v54  ;;  %v1601_v61 = vpop.f32.mrb[42].mxu0 }
 0x14c   :  { %v1602_v63 = vpop.f32.mrb[43].mxu0 }
 0x14d   :  { %v1660_v0 = vpop.f32.mrb[42].mxu1  ;;  %v3338_v1 = vadd.f32 %v1659_v60, %v938_v38  ;;  %v1603_v43 = vadd.f32 %v1602_v63, %v1601_v61 }
 0x14e   :  { %v1661_v2 = vpop.f32.mrb[43].mxu1 }
 0x14f   :  { %v1662_v4 = vadd.f32 %v1661_v2, %v1660_v0  ;;  %v943_v46 = vadd.f32 %v1603_v43, %v3314_v62  ;;  %v1604_v5 = vpop.f32.mrb[44].mxu0 }
 0x150   :  { %v1605_v7 = vpop.f32.mrb[45].mxu0 }
 0x151   :  { %v1663_v8 = vpop.f32.mrb[44].mxu1  ;;  %v3341_v9 = vadd.f32 %v1662_v4, %v943_v46  ;;  %v1606_v51 = vadd.f32 %v1605_v7, %v1604_v5 }
 0x152   :  { %v1664_v10 = vpop.f32.mrb[45].mxu1 }
 0x153   :  { %v1665_v12 = vadd.f32 %v1664_v10, %v1663_v8  ;;  %v948_v54 = vadd.f32 %v1606_v51, %v3317_v6  ;;  %v1607_v13 = vpop.f32.mrb[46].mxu0 }
 0x154   :  { %v1608_v15 = vpop.f32.mrb[47].mxu0 }
 0x155   :  { %v1666_v16 = vpop.f32.mrb[46].mxu1  ;;  %v3344_v18 = vadd.f32 %v1665_v12, %v948_v54  ;;  %v1609_v59 = vadd.f32 %v1608_v15, %v1607_v13 }
 0x156   :  { %v1667_v19 = vpop.f32.mrb[47].mxu1 }
 0x157   :  { %v1668_v21 = vadd.f32 %v1667_v19, %v1666_v16  ;;  %v953_v62 = vadd.f32 %v1609_v59, %v3320_v14  ;;  %v1610_v22 = vpop.f32.mrb[48].mxu0 }
 0x158   :  { %v1611_v24 = vpop.f32.mrb[49].mxu0 }
 0x159   :  { %v1669_v25 = vpop.f32.mrb[48].mxu1  ;;  %v3347_v26 = vadd.f32 %v1668_v21, %v953_v62  ;;  %v1612_v3 = vadd.f32 %v1611_v24, %v1610_v22 }
 0x15a   :  { %v1670_v28 = vpop.f32.mrb[49].mxu1 }
 0x15b   :  { %v1671_v30 = vadd.f32 %v1670_v28, %v1669_v25  ;;  %v958_v6 = vadd.f32 %v1612_v3, %v3323_v23  ;;  %v1613_v31 = vpop.f32.mrb[50].mxu0 }
 0x15c   :  { %v1614_v33 = vpop.f32.mrb[51].mxu0 }
 0x15d   :  { %v1672_v34 = vpop.f32.mrb[50].mxu1  ;;  %v3350_v36 = vadd.f32 %v1671_v30, %v958_v6  ;;  %v1615_v11 = vadd.f32 %v1614_v33, %v1613_v31 }
 0x15e   :  { %v1673_v37 = vpop.f32.mrb[51].mxu1 }
 0x15f   :  { %v1674_v39 = vadd.f32 %v1673_v37, %v1672_v34  ;;  %v963_v14 = vadd.f32 %v1615_v11, %v3326_v32  ;;  %v1616_v40 = vpop.f32.mrb[52].mxu0 }
 0x160   :  { %v1617_v17 = vpop.f32.mrb[53].mxu0 }
 0x161   :  { %v1675_v42 = vpop.f32.mrb[52].mxu1  ;;  %v3353_v44 = vadd.f32 %v1674_v39, %v963_v14  ;;  %v1618_v20 = vadd.f32 %v1617_v17, %v1616_v40 }
 0x162   :  { %v1676_v45 = vpop.f32.mrb[53].mxu1 }
 0x163   :  { %v1677_v47 = vadd.f32 %v1676_v45, %v1675_v42  ;;  %v968_v23 = vadd.f32 %v1618_v20, %v3329_v41  ;;  %v1710_v48 = vpop.f32.mrb[54].mxu0 }
 0x164   :  { %v1711_v27 = vpop.f32.mrb[55].mxu0 }
 0x165   :  { %v1769_v50 = vpop.f32.mrb[54].mxu1  ;;  %v3356_v52 = vadd.f32 %v1677_v47, %v968_v23  ;;  %v1712_v29 = vadd.f32 %v1711_v27, %v1710_v48 }
 0x166   :  { %v1770_v53 = vpop.f32.mrb[55].mxu1 }
 0x167   :  { %v1771_v55 = vadd.f32 %v1770_v53, %v1769_v50  ;;  %v1148_v32 = vadd.f32 %v1712_v29, %v3332_v49  ;;  %v1713_v56 = vpop.f32.mrb[56].mxu0 }
 0x168   :  { %v1714_v35 = vpop.f32.mrb[57].mxu0 }
 0x169   :  { %v1772_v58 = vpop.f32.mrb[56].mxu1  ;;  %v1258_v60 = vadd.f32 %v1771_v55, %v1148_v32  ;;  %v1715_v38 = vadd.f32 %v1714_v35, %v1713_v56 }
 0x16a   :  { %v1773_v61 = vpop.f32.mrb[57].mxu1 }
 0x16b   :  { %v1774_v63 = vadd.f32 %v1773_v61, %v1772_v58  ;;  %v1301_v0 = vmax.f32 %v1258_v60, 0.0  ;;  %v1153_v41 = vadd.f32 %v1715_v38, %v3335_v57  ;;  %v1716_v43 = vpop.f32.mrb[58].mxu0 }
 0x16c   :  { %v1717_v2 = vpop.f32.mrb[59].mxu0 }
 0x16d   :  { %v1775_v4 = vpop.f32.mrb[58].mxu1  ;;  %1310 = vst [vmem:[%s3397_s3] sm:$0xff] %v1301_v0  ;;  %v1263_v46 = vadd.f32 %v1774_v63, %v1153_v41  ;;  %v1718_v5 = vadd.f32 %v1717_v2, %v1716_v43 }
 0x16e   :  { %v1776_v49 = vpop.f32.mrb[59].mxu1 }
 0x16f   :  { %v1777_v7 = vadd.f32 %v1776_v49, %v1775_v4  ;;  %v1302_v8 = vmax.f32 %v1263_v46, 0.0  ;;  %v1158_v51 = vadd.f32 %v1718_v5, %v3338_v1  ;;  %v1719_v10 = vpop.f32.mrb[60].mxu0 }
 0x170   :  { %v1720_v12 = vpop.f32.mrb[61].mxu0 }
 0x171   :  { %v1778_v54 = vpop.f32.mrb[60].mxu1  ;;  %1311 = vst [vmem:[%s3397_s3 + $0x8] sm:$0xff] %v1302_v8  ;;  %v1268_v57 = vadd.f32 %v1777_v7, %v1158_v51  ;;  %v1721_v13 = vadd.f32 %v1720_v12, %v1719_v10 }
 0x172   :  { %v1779_v15 = vpop.f32.mrb[61].mxu1 }
 0x173   :  { %v1780_v16 = vadd.f32 %v1779_v15, %v1778_v54  ;;  %v1303_v59 = vmax.f32 %v1268_v57, 0.0  ;;  %v1163_v19 = vadd.f32 %v1721_v13, %v3341_v9  ;;  %v1722_v21 = vpop.f32.mrb[62].mxu0 }
 0x174   :  { %v1723_v62 = vpop.f32.mrb[63].mxu0 }
 0x175   :  { %v1781_v22 = vpop.f32.mrb[62].mxu1  ;;  %1312 = vst [vmem:[%s3397_s3 + $0x10] sm:$0xff] %v1303_v59  ;;  %v1273_v1 = vadd.f32 %v1780_v16, %v1163_v19  ;;  %v1724_v24 = vadd.f32 %v1723_v62, %v1722_v21 }
 0x176   :  { %v1782_v25 = vpop.f32.mrb[63].mxu1 }
 0x177   :  { %v1783_v3 = vadd.f32 %v1782_v25, %v1781_v22  ;;  %v1304_v28 = vmax.f32 %v1273_v1, 0.0  ;;  %v1168_v30 = vadd.f32 %v1724_v24, %v3344_v18  ;;  %v1725_v6 = vpop.f32.mrb[64].mxu0 }
 0x178   :  { %v1726_v31 = vpop.f32.mrb[65].mxu0 }
 0x179   :  { %v1784_v33 = vpop.f32.mrb[64].mxu1  ;;  %1313 = vst [vmem:[%s3397_s3 + $0x18] sm:$0xff] %v1304_v28  ;;  %v1278_v9 = vadd.f32 %v1783_v3, %v1168_v30  ;;  %v1727_v34 = vadd.f32 %v1726_v31, %v1725_v6 }
 0x17a   :  { %v1785_v11 = vpop.f32.mrb[65].mxu1 }
 0x17b   :  { %v1786_v37 = vadd.f32 %v1785_v11, %v1784_v33  ;;  %v1305_v39 = vmax.f32 %v1278_v9, 0.0  ;;  %v1173_v14 = vadd.f32 %v1727_v34, %v3347_v26  ;;  %v1728_v40 = vpop.f32.mrb[66].mxu0 }
 0x17c   :  { %v1729_v17 = vpop.f32.mrb[67].mxu0 }
 0x17d   :  { %v1787_v42 = vpop.f32.mrb[66].mxu1  ;;  %1314 = vst [vmem:[%s3397_s3 + $0x20] sm:$0xff] %v1305_v39  ;;  %v1283_v18 = vadd.f32 %v1786_v37, %v1173_v14  ;;  %v1730_v20 = vadd.f32 %v1729_v17, %v1728_v40 }
 0x17e   :  { %v1788_v45 = vpop.f32.mrb[67].mxu1 }
 0x17f   :  { %v1789_v47 = vadd.f32 %v1788_v45, %v1787_v42  ;;  %v1306_v23 = vmax.f32 %v1283_v18, 0.0  ;;  %v1178_v48 = vadd.f32 %v1730_v20, %v3350_v36  ;;  %v1731_v27 = vpop.f32.mrb[68].mxu0 }
 0x180   :  { %v1732_v50 = vpop.f32.mrb[69].mxu0 }
 0x181   :  { %v1790_v29 = vpop.f32.mrb[68].mxu1  ;;  %1315 = vst [vmem:[%s3397_s3 + $0x28] sm:$0xff] %v1306_v23  ;;  %v1288_v26 = vadd.f32 %v1789_v47, %v1178_v48  ;;  %v1733_v53 = vadd.f32 %v1732_v50, %v1731_v27 }
 0x182   :  { %v1791_v55 = vpop.f32.mrb[69].mxu1 }
 0x183   :  { %v1792_v32 = vadd.f32 %v1791_v55, %v1790_v29  ;;  %v1307_v56 = vmax.f32 %v1288_v26, 0.0  ;;  %v1183_v35 = vadd.f32 %v1733_v53, %v3353_v44  ;;  %v1734_v58 = vpop.f32.mrb[70].mxu0 }
 0x184   :  { %v1735_v60 = vpop.f32.mrb[71].mxu0 }
 0x185   :  { %v1793_v38 = vpop.f32.mrb[70].mxu1  ;;  %1316 = vst [vmem:[%s3397_s3 + $0x30] sm:$0xff] %v1307_v56  ;;  %v1293_v36 = vadd.f32 %v1792_v32, %v1183_v35  ;;  %v1736_v61 = vadd.f32 %v1735_v60, %v1734_v58 }
 0x186   :  { %v1794_v63 = vpop.f32.mrb[71].mxu1 }
 0x187   :  { %v1795_v0 = vadd.f32 %v1794_v63, %v1793_v38  ;;  %v1308_v41 = vmax.f32 %v1293_v36, 0.0  ;;  %v1188_v43 = vadd.f32 %v1736_v61, %v3356_v52 }
 0x189   :  { %1317 = vst [vmem:[%s3397_s3 + $0x38] sm:$0xff] %v1308_v41  ;;  %v1298_v2 = vadd.f32 %v1795_v0, %v1188_v43 }
 0x18b   :  { %v1309_v44 = vmax.f32 %v1298_v2, 0.0 }
 0x18d   :  { %1318 = vst [vmem:[%s3397_s3 + $0x40] sm:$0xff] %v1309_v44 }

// kernel: forward.7
= control target key start
LH: loop header
LB: loop body
LE: loop exit
PB: predicated region body
PF: predicated region fallthrough
CT: control target
= control target key end

     0   :  { %s4762_s1 = inlined_call_operand.vmem [shape: f32[2048,256], index: 1, kind: input, shape index: {}]   ;;  %s4763_s0 = inlined_call_operand.vmem [shape: f32[32,2048], index: 0, kind: input, shape index: {}]   ;;  %s4764_s3 = inlined_call_operand.vmem [shape: f32[1024,128], index: 3, kind: input, shape index: {}]   ;;  %s4765_s2 = inlined_call_operand.vmem [shape: f32[1,256], index: 2, kind: input, shape index: {}]   ;;  %s4766_s4 = inlined_call_operand.vmem [shape: f32[1,128], index: 4, kind: input, shape index: {}]   ;;  %s4767_s5 = inlined_call_operand.vmem [shape: f32[8,128], index: 5, kind: output, shape index: {}]  }
   0x1   :  { %v85_v0 = vld [vmem:[%s4762_s1 + $0x8] sm:$0xff]  ;;  %v87_v1 = vld [vmem:[%s4762_s1 + $0x18] sm:$0xff]  ;;  %v84_v5 = vld [vmem:[%s4762_s1] sm:$0xff] }
   0x2   :  { %v277_v2 = vld [vmem:[%s4762_s1 + $0x608] sm:$0xff]  ;;  %v1892_v3 = vpack.c.bf16 %v87_v1, %v85_v0  ;;  %v279_v4 = vld [vmem:[%s4762_s1 + $0x618] sm:$0xff]  ;;  %v86_v6 = vld [vmem:[%s4762_s1 + $0x10] sm:$0xff] }
   0x3   :  { %v2084_v7 = vpack.c.bf16 %v279_v4, %v277_v2  ;;  %v1894_v8 = vpack.c.bf16 %v86_v6, %v84_v5  ;;  %v276_v9 = vld [vmem:[%s4762_s1 + $0x600] sm:$0xff]  ;;  %v278_v10 = vld [vmem:[%s4762_s1 + $0x610] sm:$0xff]  ;;  %v89_v11 = vld [vmem:[%s4762_s1 + $0x28] sm:$0xff] }
   0x4   :  { %1893 = vmatprep.subr.bf16.mxu1 %v1892_v3  ;;  %v2086_v12 = vpack.c.bf16 %v278_v10, %v276_v9  ;;  %v91_v13 = vld [vmem:[%s4762_s1 + $0x38] sm:$0xff]  ;;  %v281_v14 = vld [vmem:[%s4762_s1 + $0x628] sm:$0xff]  ;;  %v88_v18 = vld [vmem:[%s4762_s1 + $0x20] sm:$0xff] }
   0x5   :  { %v283_v15 = vld [vmem:[%s4762_s1 + $0x638] sm:$0xff]  ;;  %2085 = vmatprep.subr.bf16.mxu0 %v2084_v7  ;;  %1895 = vmatpush1.bf16.msra.mxu1 %v1894_v8  ;;  %v1896_v16 = vpack.c.bf16 %v91_v13, %v89_v11  ;;  %v90_v19 = vld [vmem:[%s4762_s1 + $0x30] sm:$0xff]  ;;  %v280_v20 = vld [vmem:[%s4762_s1 + $0x620] sm:$0xff] }
   0x6   :  { %v2088_v17 = vpack.c.bf16 %v283_v15, %v281_v14  ;;  %2087 = vmatpush1.bf16.msra.mxu0 %v2086_v12  ;;  %v1898_v21 = vpack.c.bf16 %v90_v19, %v88_v18  ;;  %v282_v22 = vld [vmem:[%s4762_s1 + $0x630] sm:$0xff]  ;;  %v93_v23 = vld [vmem:[%s4762_s1 + $0x48] sm:$0xff]  ;;  %v95_v24 = vld [vmem:[%s4762_s1 + $0x58] sm:$0xff] }
   0x7   :  { %1897 = vmatprep.subr.bf16.mxu1 %v1896_v16  ;;  %v2090_v25 = vpack.c.bf16 %v282_v22, %v280_v20  ;;  %v1900_v26 = vpack.c.bf16 %v95_v24, %v93_v23  ;;  %v285_v27 = vld [vmem:[%s4762_s1 + $0x648] sm:$0xff]  ;;  %v287_v28 = vld [vmem:[%s4762_s1 + $0x658] sm:$0xff]  ;;  %v92_v29 = vld [vmem:[%s4762_s1 + $0x40] sm:$0xff] }
   0x8   :  { %2089 = vmatprep.subr.bf16.mxu0 %v2088_v17  ;;  %v2092_v30 = vpack.c.bf16 %v287_v28, %v285_v27  ;;  %v94_v31 = vld [vmem:[%s4762_s1 + $0x50] sm:$0xff]  ;;  %v284_v32 = vld [vmem:[%s4762_s1 + $0x640] sm:$0xff]  ;;  %v97_v35 = vld [vmem:[%s4762_s1 + $0x68] sm:$0xff] }
   0x9   :  { %v286_v33 = vld [vmem:[%s4762_s1 + $0x650] sm:$0xff]  ;;  %1899 = vmatpush1.bf16.msra.mxu1 %v1898_v21  ;;  %v1902_v34 = vpack.c.bf16 %v94_v31, %v92_v29  ;;  %v99_v36 = vld [vmem:[%s4762_s1 + $0x78] sm:$0xff]  ;;  %v289_v37 = vld [vmem:[%s4762_s1 + $0x668] sm:$0xff] }
   0xa   :  { %2091 = vmatpush1.bf16.msra.mxu0 %v2090_v25  ;;  %1901 = vmatprep.subr.bf16.mxu1 %v1900_v26  ;;  %v2094_v38 = vpack.c.bf16 %v286_v33, %v284_v32  ;;  %v1904_v39 = vpack.c.bf16 %v99_v36, %v97_v35  ;;  %v291_v40 = vld [vmem:[%s4762_s1 + $0x678] sm:$0xff]  ;;  %v96_v41 = vld [vmem:[%s4762_s1 + $0x60] sm:$0xff]  ;;  %v98_v42 = vld [vmem:[%s4762_s1 + $0x70] sm:$0xff] }
   0xb   :  { %2093 = vmatprep.subr.bf16.mxu0 %v2092_v30  ;;  %v2096_v43 = vpack.c.bf16 %v291_v40, %v289_v37  ;;  %v288_v44 = vld [vmem:[%s4762_s1 + $0x660] sm:$0xff]  ;;  %v290_v45 = vld [vmem:[%s4762_s1 + $0x670] sm:$0xff]  ;;  %v101_v46 = vld [vmem:[%s4762_s1 + $0x88] sm:$0xff]  ;;  %v1906_v50 = vpack.c.bf16 %v98_v42, %v96_v41 }
   0xc   :  { %v103_v47 = vld [vmem:[%s4762_s1 + $0x98] sm:$0xff]  ;;  %v293_v48 = vld [vmem:[%s4762_s1 + $0x688] sm:$0xff]  ;;  %v2098_v51 = vpack.c.bf16 %v290_v45, %v288_v44  ;;  %v100_v53 = vld [vmem:[%s4762_s1 + $0x80] sm:$0xff] }
   0xd   :  { %v295_v49 = vld [vmem:[%s4762_s1 + $0x698] sm:$0xff]  ;;  %1903 = vmatpush1.bf16.msra.mxu1 %v1902_v34  ;;  %v1908_v52 = vpack.c.bf16 %v103_v47, %v101_v46  ;;  %v102_v54 = vld [vmem:[%s4762_s1 + $0x90] sm:$0xff]  ;;  %v292_v55 = vld [vmem:[%s4762_s1 + $0x680] sm:$0xff] }
   0xe   :  { %2095 = vmatpush1.bf16.msra.mxu0 %v2094_v38  ;;  %1905 = vmatprep.subr.bf16.mxu1 %v1904_v39  ;;  %v2100_v56 = vpack.c.bf16 %v295_v49, %v293_v48  ;;  %v294_v57 = vld [vmem:[%s4762_s1 + $0x690] sm:$0xff]  ;;  %v105_v58 = vld [vmem:[%s4762_s1 + $0xa8] sm:$0xff]  ;;  %v107_v59 = vld [vmem:[%s4762_s1 + $0xb8] sm:$0xff]  ;;  %v1910_v62 = vpack.c.bf16 %v102_v54, %v100_v53 }
   0xf   :  { %2097 = vmatprep.subr.bf16.mxu0 %v2096_v43  ;;  %v297_v60 = vld [vmem:[%s4762_s1 + $0x6a8] sm:$0xff]  ;;  %v299_v61 = vld [vmem:[%s4762_s1 + $0x6b8] sm:$0xff]  ;;  %v2102_v63 = vpack.c.bf16 %v294_v57, %v292_v55  ;;  %v1912_v0 = vpack.c.bf16 %v107_v59, %v105_v58  ;;  %v104_v1 = vld [vmem:[%s4762_s1 + $0xa0] sm:$0xff] }
  0x10   :  { %v106_v2 = vld [vmem:[%s4762_s1 + $0xb0] sm:$0xff]  ;;  %v296_v3 = vld [vmem:[%s4762_s1 + $0x6a0] sm:$0xff]  ;;  %v2104_v4 = vpack.c.bf16 %v299_v61, %v297_v60  ;;  %v109_v6 = vld [vmem:[%s4762_s1 + $0xc8] sm:$0xff] }
  0x11   :  { %1907 = vmatpush1.bf16.msra.mxu1 %v1906_v50  ;;  %v298_v5 = vld [vmem:[%s4762_s1 + $0x6b0] sm:$0xff]  ;;  %v111_v7 = vld [vmem:[%s4762_s1 + $0xd8] sm:$0xff]  ;;  %v301_v8 = vld [vmem:[%s4762_s1 + $0x6c8] sm:$0xff]  ;;  %v1914_v10 = vpack.c.bf16 %v106_v2, %v104_v1 }
  0x12   :  { %2099 = vmatpush1.bf16.msra.mxu0 %v2098_v51  ;;  %1909 = vmatprep.subr.bf16.mxu1 %v1908_v52  ;;  %v303_v9 = vld [vmem:[%s4762_s1 + $0x6d8] sm:$0xff]  ;;  %v2106_v11 = vpack.c.bf16 %v298_v5, %v296_v3  ;;  %v1916_v12 = vpack.c.bf16 %v111_v7, %v109_v6  ;;  %v108_v13 = vld [vmem:[%s4762_s1 + $0xc0] sm:$0xff]  ;;  %v110_v14 = vld [vmem:[%s4762_s1 + $0xd0] sm:$0xff] }
  0x13   :  { %2101 = vmatprep.subr.bf16.mxu0 %v2100_v56  ;;  %v300_v15 = vld [vmem:[%s4762_s1 + $0x6c0] sm:$0xff]  ;;  %v2108_v16 = vpack.c.bf16 %v303_v9, %v301_v8  ;;  %v302_v17 = vld [vmem:[%s4762_s1 + $0x6d0] sm:$0xff]  ;;  %v113_v18 = vld [vmem:[%s4762_s1 + $0xe8] sm:$0xff]  ;;  %v1918_v22 = vpack.c.bf16 %v110_v14, %v108_v13 }
  0x14   :  { %v115_v19 = vld [vmem:[%s4762_s1 + $0xf8] sm:$0xff]  ;;  %v305_v20 = vld [vmem:[%s4762_s1 + $0x6e8] sm:$0xff]  ;;  %v2110_v23 = vpack.c.bf16 %v302_v17, %v300_v15  ;;  %v112_v25 = vld [vmem:[%s4762_s1 + $0xe0] sm:$0xff] }
  0x15   :  { %1911 = vmatpush1.bf16.msra.mxu1 %v1910_v62  ;;  %v307_v21 = vld [vmem:[%s4762_s1 + $0x6f8] sm:$0xff]  ;;  %v1920_v24 = vpack.c.bf16 %v115_v19, %v113_v18  ;;  %v114_v26 = vld [vmem:[%s4762_s1 + $0xf0] sm:$0xff]  ;;  %v304_v27 = vld [vmem:[%s4762_s1 + $0x6e0] sm:$0xff] }
  0x16   :  { %2103 = vmatpush1.bf16.msra.mxu0 %v2102_v63  ;;  %1913 = vmatprep.subr.bf16.mxu1 %v1912_v0  ;;  %v2112_v28 = vpack.c.bf16 %v307_v21, %v305_v20  ;;  %v306_v29 = vld [vmem:[%s4762_s1 + $0x6f0] sm:$0xff]  ;;  %v117_v30 = vld [vmem:[%s4762_s1 + $0x108] sm:$0xff]  ;;  %v119_v31 = vld [vmem:[%s4762_s1 + $0x118] sm:$0xff]  ;;  %v1922_v34 = vpack.c.bf16 %v114_v26, %v112_v25 }
  0x17   :  { %2105 = vmatprep.subr.bf16.mxu0 %v2104_v4  ;;  %v309_v32 = vld [vmem:[%s4762_s1 + $0x708] sm:$0xff]  ;;  %v311_v33 = vld [vmem:[%s4762_s1 + $0x718] sm:$0xff]  ;;  %v2114_v35 = vpack.c.bf16 %v306_v29, %v304_v27  ;;  %v1924_v36 = vpack.c.bf16 %v119_v31, %v117_v30  ;;  %v116_v37 = vld [vmem:[%s4762_s1 + $0x100] sm:$0xff] }
  0x18   :  { %v118_v38 = vld [vmem:[%s4762_s1 + $0x110] sm:$0xff]  ;;  %v308_v39 = vld [vmem:[%s4762_s1 + $0x700] sm:$0xff]  ;;  %v2116_v40 = vpack.c.bf16 %v311_v33, %v309_v32  ;;  %v121_v42 = vld [vmem:[%s4762_s1 + $0x128] sm:$0xff] }
  0x19   :  { %1915 = vmatpush1.bf16.msra.mxu1 %v1914_v10  ;;  %v310_v41 = vld [vmem:[%s4762_s1 + $0x710] sm:$0xff]  ;;  %v123_v43 = vld [vmem:[%s4762_s1 + $0x138] sm:$0xff]  ;;  %v313_v44 = vld [vmem:[%s4762_s1 + $0x728] sm:$0xff]  ;;  %v1926_v46 = vpack.c.bf16 %v118_v38, %v116_v37 }
  0x1a   :  { %2107 = vmatpush1.bf16.msra.mxu0 %v2106_v11  ;;  %1917 = vmatprep.subr.bf16.mxu1 %v1916_v12  ;;  %v315_v45 = vld [vmem:[%s4762_s1 + $0x738] sm:$0xff]  ;;  %v2118_v47 = vpack.c.bf16 %v310_v41, %v308_v39  ;;  %v1928_v48 = vpack.c.bf16 %v123_v43, %v121_v42  ;;  %v120_v49 = vld [vmem:[%s4762_s1 + $0x120] sm:$0xff]  ;;  %v122_v50 = vld [vmem:[%s4762_s1 + $0x130] sm:$0xff] }
  0x1b   :  { %2109 = vmatprep.subr.bf16.mxu0 %v2108_v16  ;;  %v312_v51 = vld [vmem:[%s4762_s1 + $0x720] sm:$0xff]  ;;  %v2120_v52 = vpack.c.bf16 %v315_v45, %v313_v44  ;;  %v314_v53 = vld [vmem:[%s4762_s1 + $0x730] sm:$0xff]  ;;  %v125_v54 = vld [vmem:[%s4762_s1 + $0x148] sm:$0xff]  ;;  %v1930_v58 = vpack.c.bf16 %v122_v50, %v120_v49 }
  0x1c   :  { %v127_v55 = vld [vmem:[%s4762_s1 + $0x158] sm:$0xff]  ;;  %v317_v56 = vld [vmem:[%s4762_s1 + $0x748] sm:$0xff]  ;;  %v2122_v59 = vpack.c.bf16 %v314_v53, %v312_v51  ;;  %v124_v61 = vld [vmem:[%s4762_s1 + $0x140] sm:$0xff] }
  0x1d   :  { %1919 = vmatpush1.bf16.msra.mxu1 %v1918_v22  ;;  %v319_v57 = vld [vmem:[%s4762_s1 + $0x758] sm:$0xff]  ;;  %v1932_v60 = vpack.c.bf16 %v127_v55, %v125_v54  ;;  %v126_v62 = vld [vmem:[%s4762_s1 + $0x150] sm:$0xff]  ;;  %v316_v63 = vld [vmem:[%s4762_s1 + $0x740] sm:$0xff] }
  0x1e   :  { %2111 = vmatpush1.bf16.msra.mxu0 %v2110_v23  ;;  %1921 = vmatprep.subr.bf16.mxu1 %v1920_v24  ;;  %v2124_v0 = vpack.c.bf16 %v319_v57, %v317_v56  ;;  %v318_v1 = vld [vmem:[%s4762_s1 + $0x750] sm:$0xff]  ;;  %v129_v2 = vld [vmem:[%s4762_s1 + $0x168] sm:$0xff]  ;;  %v131_v3 = vld [vmem:[%s4762_s1 + $0x178] sm:$0xff]  ;;  %v1934_v6 = vpack.c.bf16 %v126_v62, %v124_v61 }
  0x1f   :  { %2113 = vmatprep.subr.bf16.mxu0 %v2112_v28  ;;  %v321_v4 = vld [vmem:[%s4762_s1 + $0x768] sm:$0xff]  ;;  %v323_v5 = vld [vmem:[%s4762_s1 + $0x778] sm:$0xff]  ;;  %v128_v7 = vld [vmem:[%s4762_s1 + $0x160] sm:$0xff]  ;;  %v2126_v8 = vpack.c.bf16 %v318_v1, %v316_v63  ;;  %v1936_v9 = vpack.c.bf16 %v131_v3, %v129_v2 }
  0x20   :  { %v130_v10 = vld [vmem:[%s4762_s1 + $0x170] sm:$0xff]  ;;  %v320_v11 = vld [vmem:[%s4762_s1 + $0x760] sm:$0xff]  ;;  %v2128_v13 = vpack.c.bf16 %v323_v5, %v321_v4  ;;  %v133_v14 = vld [vmem:[%s4762_s1 + $0x188] sm:$0xff] }
  0x21   :  { %1923 = vmatpush1.bf16.msra.mxu1 %v1922_v34  ;;  %v322_v12 = vld [vmem:[%s4762_s1 + $0x770] sm:$0xff]  ;;  %v135_v15 = vld [vmem:[%s4762_s1 + $0x198] sm:$0xff]  ;;  %v21_v16 = vld [vmem:[%s4763_s0 + $0x8] sm:$0xff]  ;;  %v1938_v20 = vpack.c.bf16 %v130_v10, %v128_v7 }
  0x22   :  { %2115 = vmatpush1.bf16.msra.mxu0 %v2114_v35  ;;  %1925 = vmatprep.subr.bf16.mxu1 %v1924_v36  ;;  %v325_v17 = vld [vmem:[%s4762_s1 + $0x788] sm:$0xff]  ;;  %v327_v18 = vld [vmem:[%s4762_s1 + $0x798] sm:$0xff]  ;;  %v2130_v21 = vpack.c.bf16 %v322_v12, %v320_v11  ;;  %v1940_v22 = vpack.c.bf16 %v135_v15, %v133_v14  ;;  %v132_v23 = vld [vmem:[%s4762_s1 + $0x180] sm:$0xff] }
  0x23   :  { %2117 = vmatprep.subr.bf16.mxu0 %v2116_v40  ;;  %672 = vmatprep.mubr.f32.mxu1 %v21_v16  ;;  %v27_v19 = vld [vmem:[%s4763_s0 + $0x38] sm:$0xff]  ;;  %v134_v24 = vld [vmem:[%s4762_s1 + $0x190] sm:$0xff]  ;;  %v324_v25 = vld [vmem:[%s4762_s1 + $0x780] sm:$0xff]  ;;  %v2132_v26 = vpack.c.bf16 %v327_v18, %v325_v17 }
  0x24   :  { %939 = vmatprep.mubr.f32.mxu0 %v27_v19  ;;  %v326_v27 = vld [vmem:[%s4762_s1 + $0x790] sm:$0xff]  ;;  %v137_v28 = vld [vmem:[%s4762_s1 + $0x1a8] sm:$0xff]  ;;  %v139_v29 = vld [vmem:[%s4762_s1 + $0x1b8] sm:$0xff]  ;;  %v1942_v32 = vpack.c.bf16 %v134_v24, %v132_v23 }
  0x25   :  { %1927 = vmatpush1.bf16.msra.mxu1 %v1926_v46  ;;  %v329_v30 = vld [vmem:[%s4762_s1 + $0x7a8] sm:$0xff]  ;;  %v331_v31 = vld [vmem:[%s4762_s1 + $0x7b8] sm:$0xff]  ;;  %v2134_v33 = vpack.c.bf16 %v326_v27, %v324_v25  ;;  %v1944_v34 = vpack.c.bf16 %v139_v29, %v137_v28  ;;  %v136_v35 = vld [vmem:[%s4762_s1 + $0x1a0] sm:$0xff] }
  0x26   :  { %2119 = vmatpush1.bf16.msra.mxu0 %v2118_v47  ;;  %1929 = vmatprep.subr.bf16.mxu1 %v1928_v48  ;;  %v138_v36 = vld [vmem:[%s4762_s1 + $0x1b0] sm:$0xff]  ;;  %v328_v37 = vld [vmem:[%s4762_s1 + $0x7a0] sm:$0xff]  ;;  %v2136_v38 = vpack.c.bf16 %v331_v31, %v329_v30  ;;  %v141_v40 = vld [vmem:[%s4762_s1 + $0x1c8] sm:$0xff] }
  0x27   :  { %2121 = vmatprep.subr.bf16.mxu0 %v2120_v52  ;;  %v330_v39 = vld [vmem:[%s4762_s1 + $0x7b0] sm:$0xff]  ;;  %v143_v41 = vld [vmem:[%s4762_s1 + $0x1d8] sm:$0xff]  ;;  %v333_v42 = vld [vmem:[%s4762_s1 + $0x7c8] sm:$0xff]  ;;  %v1946_v44 = vpack.c.bf16 %v138_v36, %v136_v35 }
  0x28   :  { %v335_v43 = vld [vmem:[%s4762_s1 + $0x7d8] sm:$0xff]  ;;  %v2138_v45 = vpack.c.bf16 %v330_v39, %v328_v37  ;;  %v1948_v46 = vpack.c.bf16 %v143_v41, %v141_v40  ;;  %v140_v47 = vld [vmem:[%s4762_s1 + $0x1c0] sm:$0xff]  ;;  %v142_v48 = vld [vmem:[%s4762_s1 + $0x1d0] sm:$0xff] }
  0x29   :  { %1931 = vmatpush1.bf16.msra.mxu1 %v1930_v58  ;;  %v332_v49 = vld [vmem:[%s4762_s1 + $0x7c0] sm:$0xff]  ;;  %v2140_v50 = vpack.c.bf16 %v335_v43, %v333_v42  ;;  %v334_v51 = vld [vmem:[%s4762_s1 + $0x7d0] sm:$0xff]  ;;  %v145_v52 = vld [vmem:[%s4762_s1 + $0x1e8] sm:$0xff]  ;;  %v1950_v56 = vpack.c.bf16 %v142_v48, %v140_v47 }
  0x2a   :  { %2123 = vmatpush1.bf16.msra.mxu0 %v2122_v59  ;;  %1933 = vmatprep.subr.bf16.mxu1 %v1932_v60  ;;  %v147_v53 = vld [vmem:[%s4762_s1 + $0x1f8] sm:$0xff]  ;;  %v337_v54 = vld [vmem:[%s4762_s1 + $0x7e8] sm:$0xff]  ;;  %v2142_v57 = vpack.c.bf16 %v334_v51, %v332_v49  ;;  %v144_v59 = vld [vmem:[%s4762_s1 + $0x1e0] sm:$0xff] }
  0x2b   :  { %2125 = vmatprep.subr.bf16.mxu0 %v2124_v0  ;;  %v339_v55 = vld [vmem:[%s4762_s1 + $0x7f8] sm:$0xff]  ;;  %v1952_v58 = vpack.c.bf16 %v147_v53, %v145_v52  ;;  %v146_v60 = vld [vmem:[%s4762_s1 + $0x1f0] sm:$0xff]  ;;  %v336_v61 = vld [vmem:[%s4762_s1 + $0x7e0] sm:$0xff] }
  0x2c   :  { %v2144_v62 = vpack.c.bf16 %v339_v55, %v337_v54  ;;  %v338_v63 = vld [vmem:[%s4762_s1 + $0x7f0] sm:$0xff]  ;;  %v149_v0 = vld [vmem:[%s4762_s1 + $0x208] sm:$0xff]  ;;  %v151_v1 = vld [vmem:[%s4762_s1 + $0x218] sm:$0xff]  ;;  %v1954_v4 = vpack.c.bf16 %v146_v60, %v144_v59 }
  0x2d   :  { %1935 = vmatpush1.bf16.msra.mxu1 %v1934_v6  ;;  %v341_v2 = vld [vmem:[%s4762_s1 + $0x808] sm:$0xff]  ;;  %v343_v3 = vld [vmem:[%s4762_s1 + $0x818] sm:$0xff]  ;;  %v2146_v5 = vpack.c.bf16 %v338_v63, %v336_v61  ;;  %v1956_v6 = vpack.c.bf16 %v151_v1, %v149_v0  ;;  %v148_v7 = vld [vmem:[%s4762_s1 + $0x200] sm:$0xff] }
  0x2e   :  { %2127 = vmatpush1.bf16.msra.mxu0 %v2126_v8  ;;  %1937 = vmatprep.subr.bf16.mxu1 %v1936_v9  ;;  %v150_v8 = vld [vmem:[%s4762_s1 + $0x210] sm:$0xff]  ;;  %v340_v9 = vld [vmem:[%s4762_s1 + $0x800] sm:$0xff]  ;;  %v2148_v10 = vpack.c.bf16 %v343_v3, %v341_v2  ;;  %v153_v12 = vld [vmem:[%s4762_s1 + $0x228] sm:$0xff] }
  0x2f   :  { %2129 = vmatprep.subr.bf16.mxu0 %v2128_v13  ;;  %v342_v11 = vld [vmem:[%s4762_s1 + $0x810] sm:$0xff]  ;;  %v155_v13 = vld [vmem:[%s4762_s1 + $0x238] sm:$0xff]  ;;  %v345_v14 = vld [vmem:[%s4762_s1 + $0x828] sm:$0xff]  ;;  %v1958_v17 = vpack.c.bf16 %v150_v8, %v148_v7 }
  0x30   :  { %v347_v15 = vld [vmem:[%s4762_s1 + $0x838] sm:$0xff]  ;;  %v20_v16 = vld [vmem:[%s4763_s0] sm:$0xff]  ;;  %v26_v18 = vld [vmem:[%s4763_s0 + $0x30] sm:$0xff]  ;;  %v2150_v19 = vpack.c.bf16 %v342_v11, %v340_v9 }
  0x31   :  { %1939 = vmatpush1.bf16.msra.mxu1 %v1938_v20  ;;  %v1960_v20 = vpack.c.bf16 %v155_v13, %v153_v12  ;;  %v344_v23 = vld [vmem:[%s4762_s1 + $0x820] sm:$0xff]  ;;  %v2152_v24 = vpack.c.bf16 %v347_v15, %v345_v14  ;;  %v346_v25 = vld [vmem:[%s4762_s1 + $0x830] sm:$0xff]  ;;  %v159_v27 = vld [vmem:[%s4762_s1 + $0x258] sm:$0xff] }
  0x32   :  { %2131 = vmatpush1.bf16.msra.mxu0 %v2130_v21  ;;  %1941 = vmatprep.subr.bf16.mxu1 %v1940_v22  ;;  %v152_v21 = vld [vmem:[%s4762_s1 + $0x220] sm:$0xff]  ;;  %v154_v22 = vld [vmem:[%s4762_s1 + $0x230] sm:$0xff]  ;;  %v349_v28 = vld [vmem:[%s4762_s1 + $0x848] sm:$0xff]  ;;  %v2154_v31 = vpack.c.bf16 %v346_v25, %v344_v23 }
  0x33   :  { %2133 = vmatprep.subr.bf16.mxu0 %v2132_v26  ;;  %v157_v26 = vld [vmem:[%s4762_s1 + $0x248] sm:$0xff]  ;;  %v351_v29 = vld [vmem:[%s4762_s1 + $0x858] sm:$0xff]  ;;  %v1962_v30 = vpack.c.bf16 %v154_v22, %v152_v21  ;;  %v348_v35 = vld [vmem:[%s4762_s1 + $0x840] sm:$0xff] }
  0x34   :  { %v2156_v36 = vpack.c.bf16 %v351_v29, %v349_v28  ;;  %v350_v37 = vld [vmem:[%s4762_s1 + $0x850] sm:$0xff]  ;;  %v163_v39 = vld [vmem:[%s4762_s1 + $0x278] sm:$0xff]  ;;  %v353_v40 = vld [vmem:[%s4762_s1 + $0x868] sm:$0xff] }
  0x35   :  { %1943 = vmatpush1.bf16.msra.mxu1 %v1942_v32  ;;  %v1964_v32 = vpack.c.bf16 %v159_v27, %v157_v26  ;;  %v355_v41 = vld [vmem:[%s4762_s1 + $0x878] sm:$0xff]  ;;  %v2158_v43 = vpack.c.bf16 %v350_v37, %v348_v35  ;;  %v352_v47 = vld [vmem:[%s4762_s1 + $0x860] sm:$0xff]  ;;  %v354_v49 = vld [vmem:[%s4762_s1 + $0x870] sm:$0xff] }
  0x36   :  { %2135 = vmatpush1.bf16.msra.mxu0 %v2134_v33  ;;  %1945 = vmatprep.subr.bf16.mxu1 %v1944_v34  ;;  %v156_v33 = vld [vmem:[%s4762_s1 + $0x240] sm:$0xff]  ;;  %v158_v34 = vld [vmem:[%s4762_s1 + $0x250] sm:$0xff]  ;;  %v2160_v48 = vpack.c.bf16 %v355_v41, %v353_v40  ;;  %v167_v51 = vld [vmem:[%s4762_s1 + $0x298] sm:$0xff] }
  0x37   :  { %2137 = vmatprep.subr.bf16.mxu0 %v2136_v38  ;;  %v161_v38 = vld [vmem:[%s4762_s1 + $0x268] sm:$0xff]  ;;  %v1966_v42 = vpack.c.bf16 %v158_v34, %v156_v33  ;;  %v359_v53 = vld [vmem:[%s4762_s1 + $0x898] sm:$0xff]  ;;  %v164_v55 = vld [vmem:[%s4762_s1 + $0x280] sm:$0xff] }
  0x38   :  { %v357_v52 = vld [vmem:[%s4762_s1 + $0x888] sm:$0xff]  ;;  %v356_v59 = vld [vmem:[%s4762_s1 + $0x880] sm:$0xff]  ;;  %v358_v60 = vld [vmem:[%s4762_s1 + $0x890] sm:$0xff] }
  0x39   :  { %1947 = vmatpush1.bf16.msra.mxu1 %v1946_v44  ;;  %v1968_v44 = vpack.c.bf16 %v163_v39, %v161_v38  ;;  %v2164_v61 = vpack.c.bf16 %v359_v53, %v357_v52  ;;  %v171_v63 = vld [vmem:[%s4762_s1 + $0x2b8] sm:$0xff]  ;;  %v37_v0 = vld [vmem:[%s4763_s0 + $0x88] sm:$0xff]  ;;  %v36_v7 = vld [vmem:[%s4763_s0 + $0x80] sm:$0xff]  ;;  %v2166_v8 = vpack.c.bf16 %v358_v60, %v356_v59 }
  0x3a   :  { %2139 = vmatpush1.bf16.msra.mxu0 %v2138_v45  ;;  %1949 = vmatprep.subr.bf16.mxu1 %v1948_v46  ;;  %v160_v45 = vld [vmem:[%s4762_s1 + $0x260] sm:$0xff]  ;;  %v162_v46 = vld [vmem:[%s4762_s1 + $0x270] sm:$0xff]  ;;  %v361_v1 = vld [vmem:[%s4762_s1 + $0x8a8] sm:$0xff] }
  0x3b   :  { %2141 = vmatprep.subr.bf16.mxu0 %v2140_v50  ;;  %v165_v50 = vld [vmem:[%s4762_s1 + $0x288] sm:$0xff]  ;;  %v1970_v54 = vpack.c.bf16 %v162_v46, %v160_v45  ;;  %v363_v2 = vld [vmem:[%s4762_s1 + $0x8b8] sm:$0xff]  ;;  %v362_v11 = vld [vmem:[%s4762_s1 + $0x8b0] sm:$0xff] }
  0x3c   :  { %v43_v3 = vld [vmem:[%s4763_s0 + $0xb8] sm:$0xff]  ;;  %v42_v12 = vld [vmem:[%s4763_s0 + $0xb0] sm:$0xff]  ;;  %v2168_v13 = vpack.c.bf16 %v363_v2, %v361_v1  ;;  %v173_v14 = vld [vmem:[%s4762_s1 + $0x2c8] sm:$0xff] }
  0x3d   :  { %1951 = vmatpush1.bf16.msra.mxu1 %v1950_v56  ;;  %v2162_v56 = vpack.c.bf16 %v354_v49, %v352_v47  ;;  %v175_v15 = vld [vmem:[%s4762_s1 + $0x2d8] sm:$0xff]  ;;  %v172_v21 = vld [vmem:[%s4762_s1 + $0x2c0] sm:$0xff]  ;;  %v174_v22 = vld [vmem:[%s4762_s1 + $0x2d0] sm:$0xff] }
  0x3e   :  { %2143 = vmatpush1.bf16.msra.mxu0 %v2142_v57  ;;  %1953 = vmatprep.subr.bf16.mxu1 %v1952_v58  ;;  %v1972_v57 = vpack.c.bf16 %v167_v51, %v165_v50  ;;  %v166_v58 = vld [vmem:[%s4762_s1 + $0x290] sm:$0xff]  ;;  %v52_v23 = vld [vmem:[%s4763_s0 + $0x100] sm:$0xff]  ;;  %v1980_v25 = vpack.c.bf16 %v175_v15, %v173_v14  ;;  %v369_v33 = vld [vmem:[%s4762_s1 + $0x8e8] sm:$0xff] }
  0x3f   :  { %2145 = vmatprep.subr.bf16.mxu0 %v2144_v62  ;;  %v169_v62 = vld [vmem:[%s4762_s1 + $0x2a8] sm:$0xff]  ;;  %v364_v26 = vld [vmem:[%s4762_s1 + $0x8c0] sm:$0xff]  ;;  %v366_v27 = vld [vmem:[%s4762_s1 + $0x8d0] sm:$0xff] }
  0x40   :  { %v1976_v9 = vpack.c.bf16 %v171_v63, %v169_v62  ;;  %v58_v28 = vld [vmem:[%s4763_s0 + $0x130] sm:$0xff]  ;;  %v371_v34 = vld [vmem:[%s4762_s1 + $0x8f8] sm:$0xff]  ;;  %v176_v37 = vld [vmem:[%s4762_s1 + $0x2e0] sm:$0xff]  ;;  %v2174_v40 = vpack.c.bf16 %v366_v27, %v364_v26 }
  0x41   :  { %1955 = vmatpush1.bf16.msra.mxu1 %v1954_v4  ;;  %v1974_v4 = vpack.c.bf16 %v166_v58, %v164_v55  ;;  %v75_v35 = vld [vmem:[%s4763_s0 + $0x1b8] sm:$0xff]  ;;  %v178_v38 = vld [vmem:[%s4762_s1 + $0x2f0] sm:$0xff]  ;;  %v68_v39 = vld [vmem:[%s4763_s0 + $0x180] sm:$0xff]  ;;  %v2176_v45 = vpack.c.bf16 %v371_v34, %v369_v33 }
  0x42   :  { %2147 = vmatpush1.bf16.msra.mxu0 %v2146_v5  ;;  %1957 = vmatprep.subr.bf16.mxu1 %v1956_v6  ;;  %v168_v5 = vld [vmem:[%s4762_s1 + $0x2a0] sm:$0xff]  ;;  %v170_v6 = vld [vmem:[%s4762_s1 + $0x2b0] sm:$0xff]  ;;  %v181_v46 = vld [vmem:[%s4762_s1 + $0x308] sm:$0xff]  ;;  %v1986_v52 = vpack.c.bf16 %v178_v38, %v176_v37 }
  0x43   :  { %2149 = vmatprep.subr.bf16.mxu0 %v2148_v10  ;;  %v360_v10 = vld [vmem:[%s4762_s1 + $0x8a0] sm:$0xff]  ;;  %v183_v47 = vld [vmem:[%s4762_s1 + $0x318] sm:$0xff]  ;;  %v373_v49 = vld [vmem:[%s4762_s1 + $0x908] sm:$0xff] }
  0x44   :  { %673 = vmatmul.mubr.f32.vlgmr.msra.gmra.mrb[0].mxu1 %v20_v16  ;;  %v53_v16 = vld [vmem:[%s4763_s0 + $0x108] sm:$0xff]  ;;  %v375_v50 = vld [vmem:[%s4762_s1 + $0x918] sm:$0xff]  ;;  %v180_v55 = vld [vmem:[%s4762_s1 + $0x300] sm:$0xff] }
  0x45   :  { %1959 = vmatpush1.bf16.msra.mxu1 %v1958_v17  ;;  %940 = vmatmul.mubr.f32.vlgmr.msra.gmra.mrb[0].mxu0 %v26_v18  ;;  %v365_v17 = vld [vmem:[%s4762_s1 + $0x8c8] sm:$0xff]  ;;  %v367_v18 = vld [vmem:[%s4762_s1 + $0x8d8] sm:$0xff]  ;;  %v2180_v58 = vpack.c.bf16 %v375_v50, %v373_v49  ;;  %v374_v59 = vld [vmem:[%s4762_s1 + $0x910] sm:$0xff] }
  0x46   :  { %2151 = vmatpush1.bf16.msra.mxu0 %v2150_v19  ;;  %1961 = vmatprep.subr.bf16.mxu1 %v1960_v20  ;;  %v59_v19 = vld [vmem:[%s4763_s0 + $0x138] sm:$0xff]  ;;  %v1978_v20 = vpack.c.bf16 %v170_v6, %v168_v5  ;;  %v2172_v29 = vpack.c.bf16 %v367_v18, %v365_v17  ;;  %v29_v51 = vld [vmem:[%s4763_s0 + $0x48] sm:$0xff]  ;;  %v376_v5 = vld [vmem:[%s4762_s1 + $0x920] sm:$0xff] }
  0x47   :  { %2153 = vmatprep.subr.bf16.mxu0 %v2152_v24  ;;  %678 = vmatprep.mubr.f32.mxu1 %v37_v0  ;;  %v2170_v24 = vpack.c.bf16 %v362_v11, %v360_v10  ;;  %v185_v60 = vld [vmem:[%s4762_s1 + $0x328] sm:$0xff]  ;;  %v379_v63 = vld [vmem:[%s4762_s1 + $0x938] sm:$0xff]  ;;  %v188_v15 = vld [vmem:[%s4762_s1 + $0x340] sm:$0xff] }
  0x48   :  { %945 = vmatprep.mubr.f32.mxu0 %v43_v3  ;;  %679 = vmatmul.mubr.f32.gmra.mrb[2].mxu1 %v36_v7  ;;  %v377_v62 = vld [vmem:[%s4762_s1 + $0x928] sm:$0xff]  ;;  %v184_v3 = vld [vmem:[%s4762_s1 + $0x320] sm:$0xff]  ;;  %v378_v7 = vld [vmem:[%s4762_s1 + $0x930] sm:$0xff] }
  0x49   :  { %1963 = vmatpush1.bf16.msra.mxu1 %v1962_v30  ;;  %946 = vmatmul.mubr.f32.gmra.mrb[2].mxu0 %v42_v12  ;;  %v177_v30 = vld [vmem:[%s4762_s1 + $0x2e8] sm:$0xff]  ;;  %v2184_v6 = vpack.c.bf16 %v379_v63, %v377_v62  ;;  %v383_v11 = vld [vmem:[%s4762_s1 + $0x958] sm:$0xff]  ;;  %v380_v17 = vld [vmem:[%s4762_s1 + $0x940] sm:$0xff] }
  0x4a   :  { %2155 = vmatpush1.bf16.msra.mxu0 %v2154_v31  ;;  %1965 = vmatprep.subr.bf16.mxu1 %v1964_v32  ;;  %v179_v31 = vld [vmem:[%s4762_s1 + $0x2f8] sm:$0xff]  ;;  %v69_v32 = vld [vmem:[%s4763_s0 + $0x188] sm:$0xff]  ;;  %v192_v27 = vld [vmem:[%s4762_s1 + $0x360] sm:$0xff] }
  0x4b   :  { %2157 = vmatprep.subr.bf16.mxu0 %v2156_v36  ;;  %684 = vmatprep.mubr.f32.mxu1 %v53_v16  ;;  %v1982_v36 = vpack.c.bf16 %v174_v22, %v172_v21  ;;  %v1984_v41 = vpack.c.bf16 %v179_v31, %v177_v30  ;;  %v381_v10 = vld [vmem:[%s4762_s1 + $0x948] sm:$0xff]  ;;  %v190_v16 = vld [vmem:[%s4762_s1 + $0x350] sm:$0xff]  ;;  %v195_v21 = vld [vmem:[%s4762_s1 + $0x378] sm:$0xff] }
  0x4c   :  { %951 = vmatprep.mubr.f32.mxu0 %v59_v19  ;;  %685 = vmatmul.mubr.f32.gmra.mrb[4].mxu1 %v52_v23  ;;  %v2188_v18 = vpack.c.bf16 %v383_v11, %v381_v10  ;;  %v382_v19 = vld [vmem:[%s4762_s1 + $0x950] sm:$0xff]  ;;  %v385_v22 = vld [vmem:[%s4762_s1 + $0x968] sm:$0xff]  ;;  %v387_v23 = vld [vmem:[%s4762_s1 + $0x978] sm:$0xff] }
  0x4d   :  { %1967 = vmatpush1.bf16.msra.mxu1 %v1966_v42  ;;  %952 = vmatmul.mubr.f32.gmra.mrb[4].mxu0 %v58_v28  ;;  %v368_v42 = vld [vmem:[%s4762_s1 + $0x8e0] sm:$0xff]  ;;  %v194_v28 = vld [vmem:[%s4762_s1 + $0x370] sm:$0xff]  ;;  %v2192_v30 = vpack.c.bf16 %v387_v23, %v385_v22  ;;  %v199_v33 = vld [vmem:[%s4762_s1 + $0x398] sm:$0xff] }
  0x4e   :  { %2159 = vmatpush1.bf16.msra.mxu0 %v2158_v43  ;;  %1969 = vmatprep.subr.bf16.mxu1 %v1968_v44  ;;  %v370_v43 = vld [vmem:[%s4762_s1 + $0x8f0] sm:$0xff]  ;;  %v389_v34 = vld [vmem:[%s4762_s1 + $0x988] sm:$0xff]  ;;  %v204_v63 = vld [vmem:[%s4762_s1 + $0x3c0] sm:$0xff] }
  0x4f   :  { %2161 = vmatprep.subr.bf16.mxu0 %v2160_v48  ;;  %690 = vmatprep.mubr.f32.mxu1 %v69_v32  ;;  %v74_v44 = vld [vmem:[%s4763_s0 + $0x1b0] sm:$0xff]  ;;  %v23_v48 = vld [vmem:[%s4763_s0 + $0x18] sm:$0xff]  ;;  %v2178_v53 = vpack.c.bf16 %v370_v43, %v368_v42  ;;  %v197_v32 = vld [vmem:[%s4762_s1 + $0x388] sm:$0xff] }
  0x50   :  { %957 = vmatprep.mubr.f32.mxu0 %v75_v35  ;;  %691 = vmatmul.mubr.f32.gmra.mrb[6].mxu1 %v68_v39  ;;  %v386_v31 = vld [vmem:[%s4762_s1 + $0x970] sm:$0xff]  ;;  %v391_v35 = vld [vmem:[%s4762_s1 + $0x998] sm:$0xff]  ;;  %v2004_v38 = vpack.c.bf16 %v199_v33, %v197_v32  ;;  %v196_v39 = vld [vmem:[%s4762_s1 + $0x380] sm:$0xff] }
  0x51   :  { %1971 = vmatpush1.bf16.msra.mxu1 %v1970_v54  ;;  %958 = vmatmul.mubr.f32.gmra.mrb[6].mxu0 %v74_v44  ;;  %v1988_v54 = vpack.c.bf16 %v183_v47, %v181_v46  ;;  %v2196_v42 = vpack.c.bf16 %v391_v35, %v389_v34  ;;  %v390_v43 = vld [vmem:[%s4762_s1 + $0x990] sm:$0xff]  ;;  %v201_v44 = vld [vmem:[%s4762_s1 + $0x3a8] sm:$0xff]  ;;  %v395_v47 = vld [vmem:[%s4762_s1 + $0x9b8] sm:$0xff] }
  0x52   :  { %2163 = vmatpush1.bf16.msra.mxu0 %v2162_v56  ;;  %1973 = vmatprep.subr.bf16.mxu1 %v1972_v57  ;;  %v182_v56 = vld [vmem:[%s4762_s1 + $0x310] sm:$0xff]  ;;  %v372_v57 = vld [vmem:[%s4762_s1 + $0x900] sm:$0xff]  ;;  %v393_v46 = vld [vmem:[%s4762_s1 + $0x9a8] sm:$0xff] }
  0x53   :  { %2165 = vmatprep.subr.bf16.mxu0 %v2164_v61  ;;  %761 = vmatprep.mubr.f32.mxu1 %v23_v48  ;;  %v187_v61 = vld [vmem:[%s4762_s1 + $0x338] sm:$0xff]  ;;  %v1990_v0 = vpack.c.bf16 %v182_v56, %v180_v55  ;;  %v2182_v1 = vpack.c.bf16 %v374_v59, %v372_v57  ;;  %v394_v55 = vld [vmem:[%s4762_s1 + $0x9b0] sm:$0xff]  ;;  %v205_v56 = vld [vmem:[%s4762_s1 + $0x3c8] sm:$0xff] }
  0x54   :  { %1028 = vmatprep.mubr.f32.mxu0 %v29_v51  ;;  %v1992_v2 = vpack.c.bf16 %v187_v61, %v185_v60  ;;  %v200_v51 = vld [vmem:[%s4762_s1 + $0x3a0] sm:$0xff]  ;;  %v207_v57 = vld [vmem:[%s4762_s1 + $0x3d8] sm:$0xff]  ;;  %v22_v32 = vld [vmem:[%s4763_s0 + $0x10] sm:$0xff] }
  0x55   :  { %1975 = vmatpush1.bf16.msra.mxu1 %v1974_v4  ;;  %v186_v4 = vld [vmem:[%s4762_s1 + $0x330] sm:$0xff]  ;;  %v399_v59 = vld [vmem:[%s4762_s1 + $0x9d8] sm:$0xff]  ;;  %v2012_v62 = vpack.c.bf16 %v207_v57, %v205_v56  ;;  %v208_v11 = vld [vmem:[%s4762_s1 + $0x3e0] sm:$0xff] }
  0x56   :  { %2167 = vmatpush1.bf16.msra.mxu0 %v2166_v8  ;;  %1977 = vmatprep.subr.bf16.mxu1 %v1976_v9  ;;  %v189_v8 = vld [vmem:[%s4762_s1 + $0x348] sm:$0xff]  ;;  %v191_v9 = vld [vmem:[%s4762_s1 + $0x358] sm:$0xff]  ;;  %v1994_v12 = vpack.c.bf16 %v186_v4, %v184_v3  ;;  %v398_v3 = vld [vmem:[%s4762_s1 + $0x9d0] sm:$0xff] }
  0x57   :  { %2169 = vmatprep.subr.bf16.mxu0 %v2168_v13  ;;  %v2186_v13 = vpack.c.bf16 %v378_v7, %v376_v5  ;;  %v1996_v14 = vpack.c.bf16 %v191_v9, %v189_v8  ;;  %v209_v4 = vld [vmem:[%s4762_s1 + $0x3e8] sm:$0xff]  ;;  %v211_v5 = vld [vmem:[%s4762_s1 + $0x3f8] sm:$0xff]  ;;  %v212_v23 = vld [vmem:[%s4762_s1 + $0x400] sm:$0xff] }
  0x58   :  { %v403_v7 = vld [vmem:[%s4762_s1 + $0x9f8] sm:$0xff]  ;;  %v2016_v10 = vpack.c.bf16 %v211_v5, %v209_v4  ;;  %v28_v34 = vld [vmem:[%s4763_s0 + $0x40] sm:$0xff]  ;;  %v414_v57 = vld [vmem:[%s4762_s1 + $0xa50] sm:$0xff] }
  0x59   :  { %1979 = vmatpush1.bf16.msra.mxu1 %v1978_v20  ;;  %v193_v20 = vld [vmem:[%s4762_s1 + $0x368] sm:$0xff]  ;;  %v226_v5 = vld [vmem:[%s4762_s1 + $0x470] sm:$0xff] }
  0x5a   :  { %2171 = vmatpush1.bf16.msra.mxu0 %v2170_v24  ;;  %1981 = vmatprep.subr.bf16.mxu1 %v1980_v25  ;;  %v1998_v24 = vpack.c.bf16 %v190_v16, %v188_v15  ;;  %v2190_v25 = vpack.c.bf16 %v382_v19, %v380_v17  ;;  %v2000_v26 = vpack.c.bf16 %v195_v21, %v193_v20  ;;  %v402_v15 = vld [vmem:[%s4762_s1 + $0x9f0] sm:$0xff]  ;;  %v213_v16 = vld [vmem:[%s4762_s1 + $0x408] sm:$0xff]  ;;  %v215_v17 = vld [vmem:[%s4762_s1 + $0x418] sm:$0xff] }
  0x5b   :  { %2173 = vmatprep.subr.bf16.mxu0 %v2172_v29  ;;  %v384_v29 = vld [vmem:[%s4762_s1 + $0x960] sm:$0xff]  ;;  %v407_v19 = vld [vmem:[%s4762_s1 + $0xa18] sm:$0xff]  ;;  %v2020_v22 = vpack.c.bf16 %v215_v17, %v213_v16  ;;  %v70_v17 = vld [vmem:[%s4763_s0 + $0x190] sm:$0xff] }
  0x5c   :  { %v2194_v37 = vpack.c.bf16 %v386_v31, %v384_v29  ;;  %v219_v29 = vld [vmem:[%s4762_s1 + $0x438] sm:$0xff]  ;;  %v228_v16 = vld [vmem:[%s4762_s1 + $0x480] sm:$0xff] }
  0x5d   :  { %1983 = vmatpush1.bf16.msra.mxu1 %v1982_v36  ;;  %v2002_v36 = vpack.c.bf16 %v194_v28, %v192_v27  ;;  %v406_v27 = vld [vmem:[%s4762_s1 + $0xa10] sm:$0xff]  ;;  %v217_v28 = vld [vmem:[%s4762_s1 + $0x428] sm:$0xff]  ;;  %v411_v31 = vld [vmem:[%s4762_s1 + $0xa38] sm:$0xff] }
  0x5e   :  { %2175 = vmatpush1.bf16.msra.mxu0 %v2174_v40  ;;  %1985 = vmatprep.subr.bf16.mxu1 %v1984_v41  ;;  %v198_v40 = vld [vmem:[%s4762_s1 + $0x390] sm:$0xff]  ;;  %v388_v41 = vld [vmem:[%s4762_s1 + $0x980] sm:$0xff] }
  0x5f   :  { %2177 = vmatprep.subr.bf16.mxu0 %v2176_v45  ;;  %v203_v45 = vld [vmem:[%s4762_s1 + $0x3b8] sm:$0xff]  ;;  %v2006_v48 = vpack.c.bf16 %v198_v40, %v196_v39  ;;  %v2198_v49 = vpack.c.bf16 %v390_v43, %v388_v41  ;;  %v408_v39 = vld [vmem:[%s4762_s1 + $0xa20] sm:$0xff]  ;;  %v410_v41 = vld [vmem:[%s4762_s1 + $0xa30] sm:$0xff] }
  0x60   :  { %v2008_v50 = vpack.c.bf16 %v203_v45, %v201_v44  ;;  %v223_v43 = vld [vmem:[%s4762_s1 + $0x458] sm:$0xff]  ;;  %v413_v44 = vld [vmem:[%s4762_s1 + $0xa48] sm:$0xff] }
  0x61   :  { %1987 = vmatpush1.bf16.msra.mxu1 %v1986_v52  ;;  %v202_v52 = vld [vmem:[%s4762_s1 + $0x3b0] sm:$0xff]  ;;  %v415_v45 = vld [vmem:[%s4762_s1 + $0xa58] sm:$0xff] }
  0x62   :  { %2179 = vmatpush1.bf16.msra.mxu0 %v2178_v53  ;;  %1989 = vmatprep.subr.bf16.mxu1 %v1988_v54  ;;  %v392_v53 = vld [vmem:[%s4762_s1 + $0x9a0] sm:$0xff]  ;;  %v2200_v54 = vpack.c.bf16 %v395_v47, %v393_v46  ;;  %v2010_v60 = vpack.c.bf16 %v202_v52, %v200_v51  ;;  %v39_v46 = vld [vmem:[%s4763_s0 + $0x98] sm:$0xff]  ;;  %v2218_v51 = vpack.c.bf16 %v410_v41, %v408_v39  ;;  %v426_v39 = vld [vmem:[%s4762_s1 + $0xab0] sm:$0xff] }
  0x63   :  { %2181 = vmatprep.subr.bf16.mxu0 %v2180_v58  ;;  %v397_v58 = vld [vmem:[%s4762_s1 + $0x9c8] sm:$0xff]  ;;  %v2202_v61 = vpack.c.bf16 %v394_v55, %v392_v53  ;;  %v222_v53 = vld [vmem:[%s4762_s1 + $0x450] sm:$0xff]  ;;  %v44_v55 = vld [vmem:[%s4763_s0 + $0xc0] sm:$0xff]  ;;  %v2220_v56 = vpack.c.bf16 %v415_v45, %v413_v44 }
  0x64   :  { %v239_v41 = vld [vmem:[%s4762_s1 + $0x4d8] sm:$0xff] }
  0x65   :  { %1991 = vmatpush1.bf16.msra.mxu1 %v1990_v0  ;;  %v206_v0 = vld [vmem:[%s4762_s1 + $0x3d0] sm:$0xff] }
  0x66   :  { %2183 = vmatpush1.bf16.msra.mxu0 %v2182_v1  ;;  %1993 = vmatprep.subr.bf16.mxu1 %v1992_v2  ;;  %v396_v1 = vld [vmem:[%s4762_s1 + $0x9c0] sm:$0xff]  ;;  %v2204_v2 = vpack.c.bf16 %v399_v59, %v397_v58  ;;  %v2014_v8 = vpack.c.bf16 %v206_v0, %v204_v63  ;;  %v225_v58 = vld [vmem:[%s4762_s1 + $0x468] sm:$0xff]  ;;  %v227_v59 = vld [vmem:[%s4762_s1 + $0x478] sm:$0xff] }
  0x67   :  { %2185 = vmatprep.subr.bf16.mxu0 %v2184_v6  ;;  %v401_v6 = vld [vmem:[%s4762_s1 + $0x9e8] sm:$0xff]  ;;  %v2206_v9 = vpack.c.bf16 %v398_v3, %v396_v1  ;;  %v224_v0 = vld [vmem:[%s4762_s1 + $0x460] sm:$0xff]  ;;  %v54_v1 = vld [vmem:[%s4763_s0 + $0x110] sm:$0xff]  ;;  %v2032_v4 = vpack.c.bf16 %v227_v59, %v225_v58 }
  0x68   :  { %v240_v59 = vld [vmem:[%s4762_s1 + $0x4e0] sm:$0xff] }
  0x69   :  { %1995 = vmatpush1.bf16.msra.mxu1 %v1994_v12  ;;  %v210_v12 = vld [vmem:[%s4762_s1 + $0x3f0] sm:$0xff] }
  0x6a   :  { %2187 = vmatpush1.bf16.msra.mxu0 %v2186_v13  ;;  %1997 = vmatprep.subr.bf16.mxu1 %v1996_v14  ;;  %v400_v13 = vld [vmem:[%s4762_s1 + $0x9e0] sm:$0xff]  ;;  %v2208_v14 = vpack.c.bf16 %v403_v7, %v401_v6  ;;  %v2018_v20 = vpack.c.bf16 %v210_v12, %v208_v11  ;;  %v231_v11 = vld [vmem:[%s4762_s1 + $0x498] sm:$0xff]  ;;  %v421_v12 = vld [vmem:[%s4762_s1 + $0xa88] sm:$0xff] }
  0x6b   :  { %2189 = vmatprep.subr.bf16.mxu0 %v2188_v18  ;;  %v405_v18 = vld [vmem:[%s4762_s1 + $0xa08] sm:$0xff]  ;;  %v2210_v21 = vpack.c.bf16 %v402_v15, %v400_v13  ;;  %v416_v6 = vld [vmem:[%s4762_s1 + $0xa60] sm:$0xff]  ;;  %v423_v13 = vld [vmem:[%s4762_s1 + $0xa98] sm:$0xff]  ;;  %v2034_v15 = vpack.c.bf16 %v226_v5, %v224_v0 }
  0x6c   :  { %v60_v7 = vld [vmem:[%s4763_s0 + $0x140] sm:$0xff]  ;;  %v245_v0 = vld [vmem:[%s4762_s1 + $0x508] sm:$0xff] }
  0x6d   :  { %1999 = vmatpush1.bf16.msra.mxu1 %v1998_v24  ;;  %v214_v24 = vld [vmem:[%s4762_s1 + $0x410] sm:$0xff] }
  0x6e   :  { %2191 = vmatpush1.bf16.msra.mxu0 %v2190_v25  ;;  %2001 = vmatprep.subr.bf16.mxu1 %v2000_v26  ;;  %v404_v25 = vld [vmem:[%s4762_s1 + $0xa00] sm:$0xff]  ;;  %v2212_v26 = vpack.c.bf16 %v407_v19, %v405_v18  ;;  %v2022_v33 = vpack.c.bf16 %v214_v24, %v212_v23  ;;  %v77_v18 = vld [vmem:[%s4763_s0 + $0x1c8] sm:$0xff]  ;;  %v2228_v24 = vpack.c.bf16 %v423_v13, %v421_v12  ;;  %v251_v13 = vld [vmem:[%s4762_s1 + $0x538] sm:$0xff] }
  0x6f   :  { %2193 = vmatprep.subr.bf16.mxu0 %v2192_v30  ;;  %v409_v30 = vld [vmem:[%s4762_s1 + $0xa28] sm:$0xff]  ;;  %v2214_v35 = vpack.c.bf16 %v406_v27, %v404_v25  ;;  %v76_v23 = vld [vmem:[%s4763_s0 + $0x1c0] sm:$0xff]  ;;  %v422_v25 = vld [vmem:[%s4762_s1 + $0xa90] sm:$0xff] }
  0x70   :  { %v2216_v40 = vpack.c.bf16 %v411_v31, %v409_v30  ;;  %v235_v27 = vld [vmem:[%s4762_s1 + $0x4b8] sm:$0xff]  ;;  %v25_v30 = vld [vmem:[%s4763_s0 + $0x28] sm:$0xff] }
  0x71   :  { %2003 = vmatpush1.bf16.msra.mxu1 %v2002_v36  ;;  %v2024_v36 = vpack.c.bf16 %v219_v29, %v217_v28  ;;  %v425_v28 = vld [vmem:[%s4762_s1 + $0xaa8] sm:$0xff]  ;;  %v427_v29 = vld [vmem:[%s4762_s1 + $0xab8] sm:$0xff] }
  0x72   :  { %2195 = vmatpush1.bf16.msra.mxu0 %v2194_v37  ;;  %2005 = vmatprep.subr.bf16.mxu1 %v2004_v38  ;;  %v216_v37 = vld [vmem:[%s4762_s1 + $0x420] sm:$0xff]  ;;  %v218_v38 = vld [vmem:[%s4762_s1 + $0x430] sm:$0xff]  ;;  %v249_v12 = vld [vmem:[%s4762_s1 + $0x528] sm:$0xff] }
  0x73   :  { %2197 = vmatprep.subr.bf16.mxu0 %v2196_v42  ;;  %v221_v42 = vld [vmem:[%s4762_s1 + $0x448] sm:$0xff]  ;;  %v2026_v47 = vpack.c.bf16 %v218_v38, %v216_v37  ;;  %v424_v37 = vld [vmem:[%s4762_s1 + $0xaa0] sm:$0xff]  ;;  %v2232_v38 = vpack.c.bf16 %v427_v29, %v425_v28 }
  0x74   :  { %v2028_v52 = vpack.c.bf16 %v223_v43, %v221_v42  ;;  %v429_v42 = vld [vmem:[%s4762_s1 + $0xac8] sm:$0xff]  ;;  %v431_v43 = vld [vmem:[%s4762_s1 + $0xad8] sm:$0xff]  ;;  %v2234_v45 = vpack.c.bf16 %v426_v39, %v424_v37 }
  0x75   :  { %2007 = vmatpush1.bf16.msra.mxu1 %v2006_v48  ;;  %v220_v48 = vld [vmem:[%s4762_s1 + $0x440] sm:$0xff]  ;;  %v259_v37 = vld [vmem:[%s4762_s1 + $0x578] sm:$0xff] }
  0x76   :  { %2199 = vmatpush1.bf16.msra.mxu0 %v2198_v49  ;;  %2009 = vmatprep.subr.bf16.mxu1 %v2008_v50  ;;  %v38_v49 = vld [vmem:[%s4763_s0 + $0x90] sm:$0xff]  ;;  %v45_v50 = vld [vmem:[%s4763_s0 + $0xc8] sm:$0xff]  ;;  %v2030_v63 = vpack.c.bf16 %v222_v53, %v220_v48  ;;  %v243_v53 = vld [vmem:[%s4762_s1 + $0x4f8] sm:$0xff] }
  0x77   :  { %2201 = vmatprep.subr.bf16.mxu0 %v2200_v54  ;;  %v412_v54 = vld [vmem:[%s4762_s1 + $0xa40] sm:$0xff]  ;;  %v238_v48 = vld [vmem:[%s4762_s1 + $0x4d0] sm:$0xff]  ;;  %v451_v39 = vld [vmem:[%s4762_s1 + $0xb78] sm:$0xff] }
  0x78   :  { %v2222_v3 = vpack.c.bf16 %v414_v57, %v412_v54  ;;  %v433_v54 = vld [vmem:[%s4762_s1 + $0xae8] sm:$0xff] }
  0x79   :  { %2011 = vmatpush1.bf16.msra.mxu1 %v2010_v60  ;;  %v417_v60 = vld [vmem:[%s4762_s1 + $0xa68] sm:$0xff] }
  0x7a   :  { %2203 = vmatpush1.bf16.msra.mxu0 %v2202_v61  ;;  %2013 = vmatprep.subr.bf16.mxu1 %v2012_v62  ;;  %v419_v61 = vld [vmem:[%s4762_s1 + $0xa78] sm:$0xff] }
  0x7b   :  { %2205 = vmatprep.subr.bf16.mxu0 %v2204_v2  ;;  %v55_v62 = vld [vmem:[%s4763_s0 + $0x118] sm:$0xff]  ;;  %v61_v2 = vld [vmem:[%s4763_s0 + $0x148] sm:$0xff] }
  0x7d   :  { %2015 = vmatpush1.bf16.msra.mxu1 %v2014_v8  ;;  %v2224_v8 = vpack.c.bf16 %v419_v61, %v417_v60  ;;  %v242_v60 = vld [vmem:[%s4762_s1 + $0x4f0] sm:$0xff]  ;;  %v432_v61 = vld [vmem:[%s4762_s1 + $0xae0] sm:$0xff] }
  0x7e   :  { %2207 = vmatpush1.bf16.msra.mxu0 %v2206_v9  ;;  %2017 = vmatprep.subr.bf16.mxu1 %v2016_v10  ;;  %v418_v9 = vld [vmem:[%s4762_s1 + $0xa70] sm:$0xff]  ;;  %v229_v10 = vld [vmem:[%s4762_s1 + $0x488] sm:$0xff] }
  0x7f   :  { %2209 = vmatprep.subr.bf16.mxu0 %v2208_v14  ;;  %v71_v14 = vld [vmem:[%s4763_s0 + $0x198] sm:$0xff]  ;;  %v2226_v19 = vpack.c.bf16 %v418_v9, %v416_v6  ;;  %v436_v9 = vld [vmem:[%s4762_s1 + $0xb00] sm:$0xff] }
  0x81   :  { %2019 = vmatpush1.bf16.msra.mxu1 %v2018_v20  ;;  %v2036_v20 = vpack.c.bf16 %v231_v11, %v229_v10  ;;  %v438_v11 = vld [vmem:[%s4762_s1 + $0xb10] sm:$0xff] }
  0x82   :  { %2211 = vmatpush1.bf16.msra.mxu0 %v2210_v21  ;;  %2021 = vmatprep.subr.bf16.mxu1 %v2020_v22  ;;  %v230_v21 = vld [vmem:[%s4762_s1 + $0x490] sm:$0xff]  ;;  %v420_v22 = vld [vmem:[%s4762_s1 + $0xa80] sm:$0xff] }
  0x83   :  { %2213 = vmatprep.subr.bf16.mxu0 %v2212_v26  ;;  %v233_v26 = vld [vmem:[%s4762_s1 + $0x4a8] sm:$0xff]  ;;  %v2038_v31 = vpack.c.bf16 %v230_v21, %v228_v16  ;;  %v440_v21 = vld [vmem:[%s4762_s1 + $0xb20] sm:$0xff] }
  0x84   :  { %762 = vmatmul.mubr.f32.vlgmr.msra.gmra.mrb[0].mxu1 %v22_v32  ;;  %v31_v32 = vld [vmem:[%s4763_s0 + $0x58] sm:$0xff] }
  0x85   :  { %2023 = vmatpush1.bf16.msra.mxu1 %v2022_v33  ;;  %1029 = vmatmul.mubr.f32.vlgmr.msra.gmra.mrb[0].mxu0 %v28_v34  ;;  %v2230_v33 = vpack.c.bf16 %v422_v25, %v420_v22  ;;  %v2040_v34 = vpack.c.bf16 %v235_v27, %v233_v26  ;;  %v255_v25 = vld [vmem:[%s4762_s1 + $0x558] sm:$0xff]  ;;  %v445_v26 = vld [vmem:[%s4762_s1 + $0xb48] sm:$0xff] }
  0x86   :  { %2215 = vmatpush1.bf16.msra.mxu0 %v2214_v35  ;;  %2025 = vmatprep.subr.bf16.mxu1 %v2024_v36  ;;  %v232_v35 = vld [vmem:[%s4762_s1 + $0x4a0] sm:$0xff]  ;;  %v234_v36 = vld [vmem:[%s4762_s1 + $0x4b0] sm:$0xff]  ;;  %v447_v27 = vld [vmem:[%s4762_s1 + $0xb58] sm:$0xff] }
  0x87   :  { %2217 = vmatprep.subr.bf16.mxu0 %v2216_v40  ;;  %767 = vmatprep.mubr.f32.mxu1 %v39_v46  ;;  %v237_v40 = vld [vmem:[%s4762_s1 + $0x4c8] sm:$0xff]  ;;  %v2042_v44 = vpack.c.bf16 %v234_v36, %v232_v35  ;;  %v446_v35 = vld [vmem:[%s4762_s1 + $0xb50] sm:$0xff] }
  0x88   :  { %768 = vmatmul.mubr.f32.gmra.mrb[2].mxu1 %v38_v49  ;;  %1034 = vmatprep.mubr.f32.mxu0 %v45_v50  ;;  %v2044_v46 = vpack.c.bf16 %v239_v41, %v237_v40  ;;  %v428_v49 = vld [vmem:[%s4762_s1 + $0xac0] sm:$0xff]  ;;  %v2236_v50 = vpack.c.bf16 %v431_v43, %v429_v42  ;;  %v257_v36 = vld [vmem:[%s4762_s1 + $0x568] sm:$0xff] }
  0x89   :  { %2027 = vmatpush1.bf16.msra.mxu1 %v2026_v47  ;;  %1035 = vmatmul.mubr.f32.gmra.mrb[2].mxu0 %v44_v55  ;;  %v236_v47 = vld [vmem:[%s4762_s1 + $0x4c0] sm:$0xff]  ;;  %v435_v55 = vld [vmem:[%s4762_s1 + $0xaf8] sm:$0xff]  ;;  %v2064_v42 = vpack.c.bf16 %v259_v37, %v257_v36 }
  0x8a   :  { %2219 = vmatpush1.bf16.msra.mxu0 %v2218_v51  ;;  %2029 = vmatprep.subr.bf16.mxu1 %v2028_v52  ;;  %v430_v51 = vld [vmem:[%s4762_s1 + $0xad0] sm:$0xff]  ;;  %v241_v52 = vld [vmem:[%s4762_s1 + $0x4e8] sm:$0xff]  ;;  %v256_v43 = vld [vmem:[%s4762_s1 + $0x560] sm:$0xff] }
  0x8b   :  { %2221 = vmatprep.subr.bf16.mxu0 %v2220_v56  ;;  %773 = vmatprep.mubr.f32.mxu1 %v55_v62  ;;  %v2046_v56 = vpack.c.bf16 %v238_v48, %v236_v47  ;;  %v2238_v57 = vpack.c.bf16 %v430_v51, %v428_v49  ;;  %v2048_v58 = vpack.c.bf16 %v243_v53, %v241_v52  ;;  %v450_v47 = vld [vmem:[%s4762_s1 + $0xb70] sm:$0xff]  ;;  %v261_v48 = vld [vmem:[%s4762_s1 + $0x588] sm:$0xff]  ;;  %v263_v49 = vld [vmem:[%s4762_s1 + $0x598] sm:$0xff] }
  0x8c   :  { %774 = vmatmul.mubr.f32.gmra.mrb[4].mxu1 %v54_v1  ;;  %1040 = vmatprep.mubr.f32.mxu0 %v61_v2  ;;  %v2240_v62 = vpack.c.bf16 %v435_v55, %v433_v54  ;;  %v247_v1 = vld [vmem:[%s4762_s1 + $0x518] sm:$0xff]  ;;  %v437_v2 = vld [vmem:[%s4762_s1 + $0xb08] sm:$0xff]  ;;  %v2068_v54 = vpack.c.bf16 %v263_v49, %v261_v48  ;;  %v260_v55 = vld [vmem:[%s4762_s1 + $0x580] sm:$0xff] }
  0x8d   :  { %2031 = vmatpush1.bf16.msra.mxu1 %v2030_v63  ;;  %1041 = vmatmul.mubr.f32.gmra.mrb[4].mxu0 %v60_v7  ;;  %v434_v63 = vld [vmem:[%s4762_s1 + $0xaf0] sm:$0xff]  ;;  %v2052_v6 = vpack.c.bf16 %v247_v1, %v245_v0  ;;  %v244_v7 = vld [vmem:[%s4762_s1 + $0x500] sm:$0xff]  ;;  %v455_v51 = vld [vmem:[%s4762_s1 + $0xb98] sm:$0xff] }
  0x8e   :  { %2223 = vmatpush1.bf16.msra.mxu0 %v2222_v3  ;;  %2033 = vmatprep.subr.bf16.mxu1 %v2032_v4  ;;  %v439_v3 = vld [vmem:[%s4762_s1 + $0xb18] sm:$0xff]  ;;  %v2050_v4 = vpack.c.bf16 %v242_v60, %v240_v59  ;;  %v2242_v5 = vpack.c.bf16 %v434_v63, %v432_v61  ;;  %v454_v59 = vld [vmem:[%s4762_s1 + $0xb90] sm:$0xff]  ;;  %v265_v60 = vld [vmem:[%s4762_s1 + $0x5a8] sm:$0xff] }
  0x8f   :  { %2225 = vmatprep.subr.bf16.mxu0 %v2224_v8  ;;  %779 = vmatprep.mubr.f32.mxu1 %v71_v14  ;;  %v246_v8 = vld [vmem:[%s4762_s1 + $0x510] sm:$0xff]  ;;  %v2244_v10 = vpack.c.bf16 %v439_v3, %v437_v2  ;;  %v441_v14 = vld [vmem:[%s4762_s1 + $0xb28] sm:$0xff]  ;;  %v267_v61 = vld [vmem:[%s4762_s1 + $0x5b8] sm:$0xff] }
  0x90   :  { %780 = vmatmul.mubr.f32.gmra.mrb[6].mxu1 %v70_v17  ;;  %1046 = vmatprep.mubr.f32.mxu0 %v77_v18  ;;  %v2054_v16 = vpack.c.bf16 %v246_v8, %v244_v7  ;;  %v2246_v17 = vpack.c.bf16 %v438_v11, %v436_v9  ;;  %v2056_v18 = vpack.c.bf16 %v251_v13, %v249_v12  ;;  %v459_v63 = vld [vmem:[%s4762_s1 + $0xbb8] sm:$0xff]  ;;  %v264_v3 = vld [vmem:[%s4762_s1 + $0x5a0] sm:$0xff]  ;;  %v458_v7 = vld [vmem:[%s4762_s1 + $0xbb0] sm:$0xff] }
  0x91   :  { %2035 = vmatpush1.bf16.msra.mxu1 %v2034_v15  ;;  %1047 = vmatmul.mubr.f32.gmra.mrb[6].mxu0 %v76_v23  ;;  %v443_v15 = vld [vmem:[%s4762_s1 + $0xb38] sm:$0xff]  ;;  %v442_v23 = vld [vmem:[%s4762_s1 + $0xb30] sm:$0xff]  ;;  %v2072_v2 = vpack.c.bf16 %v267_v61, %v265_v60  ;;  %v269_v8 = vld [vmem:[%s4762_s1 + $0x5c8] sm:$0xff] }
  0x92   :  { %2227 = vmatpush1.bf16.msra.mxu0 %v2226_v19  ;;  %2037 = vmatprep.subr.bf16.mxu1 %v2036_v20  ;;  %v248_v19 = vld [vmem:[%s4762_s1 + $0x520] sm:$0xff]  ;;  %v250_v20 = vld [vmem:[%s4762_s1 + $0x530] sm:$0xff]  ;;  %v2248_v22 = vpack.c.bf16 %v443_v15, %v441_v14  ;;  %v2250_v29 = vpack.c.bf16 %v442_v23, %v440_v21  ;;  %v271_v9 = vld [vmem:[%s4762_s1 + $0x5d8] sm:$0xff] }
  0x93   :  { %2229 = vmatprep.subr.bf16.mxu0 %v2228_v24  ;;  %850 = vmatprep.mubr.f32.mxu1 %v25_v30  ;;  %v253_v24 = vld [vmem:[%s4762_s1 + $0x548] sm:$0xff]  ;;  %v2058_v28 = vpack.c.bf16 %v250_v20, %v248_v19  ;;  %v463_v11 = vld [vmem:[%s4762_s1 + $0xbd8] sm:$0xff]  ;;  %v2076_v14 = vpack.c.bf16 %v271_v9, %v269_v8  ;;  %v268_v15 = vld [vmem:[%s4762_s1 + $0x5c0] sm:$0xff] }
  0x94   :  { %1117 = vmatprep.mubr.f32.mxu0 %v31_v32  ;;  %v2060_v30 = vpack.c.bf16 %v255_v25, %v253_v24  ;;  %v254_v32 = vld [vmem:[%s4762_s1 + $0x550] sm:$0xff]  ;;  %v273_v20 = vld [vmem:[%s4762_s1 + $0x5e8] sm:$0xff]  ;;  %v275_v21 = vld [vmem:[%s4762_s1 + $0x5f8] sm:$0xff] }
  0x95   :  { %2039 = vmatpush1.bf16.msra.mxu1 %v2038_v31  ;;  %v252_v31 = vld [vmem:[%s4762_s1 + $0x540] sm:$0xff]  ;;  %v462_v19 = vld [vmem:[%s4762_s1 + $0xbd0] sm:$0xff]  ;;  %v467_v23 = vld [vmem:[%s4762_s1 + $0xbf8] sm:$0xff] }
  0x96   :  { %2231 = vmatpush1.bf16.msra.mxu0 %v2230_v33  ;;  %2041 = vmatprep.subr.bf16.mxu1 %v2040_v34  ;;  %v444_v33 = vld [vmem:[%s4762_s1 + $0xb40] sm:$0xff]  ;;  %v2252_v34 = vpack.c.bf16 %v447_v27, %v445_v26  ;;  %v2062_v40 = vpack.c.bf16 %v254_v32, %v252_v31  ;;  %v2080_v26 = vpack.c.bf16 %v275_v21, %v273_v20  ;;  %v466_v31 = vld [vmem:[%s4762_s1 + $0xbf0] sm:$0xff]  ;;  %v469_v32 = vld [vmem:[%s4762_s1 + $0xc08] sm:$0xff] }
  0x97   :  { %2233 = vmatprep.subr.bf16.mxu0 %v2232_v38  ;;  %v449_v38 = vld [vmem:[%s4762_s1 + $0xb68] sm:$0xff]  ;;  %v2254_v41 = vpack.c.bf16 %v446_v35, %v444_v33  ;;  %v272_v27 = vld [vmem:[%s4762_s1 + $0x5e0] sm:$0xff]  ;;  %v471_v33 = vld [vmem:[%s4762_s1 + $0xc18] sm:$0xff] }
  0x98   :  { %v2276_v36 = vpack.c.bf16 %v471_v33, %v469_v32  ;;  %v468_v37 = vld [vmem:[%s4762_s1 + $0xc00] sm:$0xff]  ;;  %v47_v48 = vld [vmem:[%s4763_s0 + $0xd8] sm:$0xff]  ;;  %v477_v49 = vld [vmem:[%s4762_s1 + $0xc48] sm:$0xff] }
  0x99   :  { %2043 = vmatpush1.bf16.msra.mxu1 %v2042_v44  ;;  %v258_v44 = vld [vmem:[%s4762_s1 + $0x570] sm:$0xff]  ;;  %v483_v60 = vld [vmem:[%s4762_s1 + $0xc78] sm:$0xff]  ;;  %v56_v61 = vld [vmem:[%s4763_s0 + $0x120] sm:$0xff] }
  0x9a   :  { %2235 = vmatpush1.bf16.msra.mxu0 %v2234_v45  ;;  %2045 = vmatprep.subr.bf16.mxu1 %v2044_v46  ;;  %v448_v45 = vld [vmem:[%s4762_s1 + $0xb60] sm:$0xff]  ;;  %v2256_v46 = vpack.c.bf16 %v451_v39, %v449_v38  ;;  %v2066_v52 = vpack.c.bf16 %v258_v44, %v256_v43  ;;  %v470_v38 = vld [vmem:[%s4762_s1 + $0xc10] sm:$0xff]  ;;  %v473_v39 = vld [vmem:[%s4762_s1 + $0xc28] sm:$0xff] }
  0x9b   :  { %2237 = vmatprep.subr.bf16.mxu0 %v2236_v50  ;;  %v453_v50 = vld [vmem:[%s4762_s1 + $0xb88] sm:$0xff]  ;;  %v2258_v53 = vpack.c.bf16 %v450_v47, %v448_v45  ;;  %v2278_v43 = vpack.c.bf16 %v470_v38, %v468_v37  ;;  %v474_v47 = vld [vmem:[%s4762_s1 + $0xc30] sm:$0xff]  ;;  %v495_v21 = vld [vmem:[%s4762_s1 + $0xcd8] sm:$0xff] }
  0x9c   :  { %v41_v44 = vld [vmem:[%s4763_s0 + $0xa8] sm:$0xff]  ;;  %v78_v9 = vld [vmem:[%s4763_s0 + $0x1d0] sm:$0xff]  ;;  %v503_v33 = vld [vmem:[%s4762_s1 + $0xd18] sm:$0xff] }
  0x9d   :  { %2047 = vmatpush1.bf16.msra.mxu1 %v2046_v56  ;;  %v262_v56 = vld [vmem:[%s4762_s1 + $0x590] sm:$0xff]  ;;  %v493_v20 = vld [vmem:[%s4762_s1 + $0xcc8] sm:$0xff] }
  0x9e   :  { %2239 = vmatpush1.bf16.msra.mxu0 %v2238_v57  ;;  %2049 = vmatprep.subr.bf16.mxu1 %v2048_v58  ;;  %v452_v57 = vld [vmem:[%s4762_s1 + $0xb80] sm:$0xff]  ;;  %v2260_v58 = vpack.c.bf16 %v455_v51, %v453_v50  ;;  %v2070_v0 = vpack.c.bf16 %v262_v56, %v260_v55  ;;  %v479_v50 = vld [vmem:[%s4762_s1 + $0xc58] sm:$0xff]  ;;  %v501_v32 = vld [vmem:[%s4762_s1 + $0xd08] sm:$0xff] }
  0x9f   :  { %2241 = vmatprep.subr.bf16.mxu0 %v2240_v62  ;;  %v457_v62 = vld [vmem:[%s4762_s1 + $0xba8] sm:$0xff]  ;;  %v2262_v1 = vpack.c.bf16 %v454_v59, %v452_v57  ;;  %v40_v51 = vld [vmem:[%s4763_s0 + $0xa0] sm:$0xff]  ;;  %v2284_v55 = vpack.c.bf16 %v479_v50, %v477_v49  ;;  %v478_v57 = vld [vmem:[%s4762_s1 + $0xc50] sm:$0xff] }
  0xa0   :  { %v476_v56 = vld [vmem:[%s4762_s1 + $0xc40] sm:$0xff]  ;;  %v481_v59 = vld [vmem:[%s4762_s1 + $0xc68] sm:$0xff]  ;;  %v502_v37 = vld [vmem:[%s4762_s1 + $0xd10] sm:$0xff] }
  0xa1   :  { %2051 = vmatpush1.bf16.msra.mxu1 %v2050_v4  ;;  %v266_v4 = vld [vmem:[%s4762_s1 + $0x5b0] sm:$0xff]  ;;  %v505_v38 = vld [vmem:[%s4762_s1 + $0xd28] sm:$0xff] }
  0xa2   :  { %2243 = vmatpush1.bf16.msra.mxu0 %v2242_v5  ;;  %2053 = vmatprep.subr.bf16.mxu1 %v2052_v6  ;;  %v456_v5 = vld [vmem:[%s4762_s1 + $0xba0] sm:$0xff]  ;;  %v2264_v6 = vpack.c.bf16 %v459_v63, %v457_v62  ;;  %v2074_v12 = vpack.c.bf16 %v266_v4, %v264_v3  ;;  %v2286_v62 = vpack.c.bf16 %v478_v57, %v476_v56  ;;  %v73_v63 = vld [vmem:[%s4763_s0 + $0x1a8] sm:$0xff]  ;;  %v482_v3 = vld [vmem:[%s4762_s1 + $0xc70] sm:$0xff] }
  0xa3   :  { %2245 = vmatprep.subr.bf16.mxu0 %v2244_v10  ;;  %v461_v10 = vld [vmem:[%s4762_s1 + $0xbc8] sm:$0xff]  ;;  %v2266_v13 = vpack.c.bf16 %v458_v7, %v456_v5  ;;  %v79_v4 = vld [vmem:[%s4763_s0 + $0x1d8] sm:$0xff]  ;;  %v72_v7 = vld [vmem:[%s4763_s0 + $0x1a0] sm:$0xff] }
  0xa4   :  { %v485_v5 = vld [vmem:[%s4762_s1 + $0xc88] sm:$0xff]  ;;  %v510_v49 = vld [vmem:[%s4762_s1 + $0xd50] sm:$0xff]  ;;  %v519_v57 = vld [vmem:[%s4762_s1 + $0xd98] sm:$0xff] }
  0xa5   :  { %2055 = vmatpush1.bf16.msra.mxu1 %v2054_v16  ;;  %v270_v16 = vld [vmem:[%s4762_s1 + $0x5d0] sm:$0xff]  ;;  %v513_v50 = vld [vmem:[%s4762_s1 + $0xd68] sm:$0xff] }
  0xa6   :  { %2247 = vmatpush1.bf16.msra.mxu0 %v2246_v17  ;;  %2057 = vmatprep.subr.bf16.mxu1 %v2056_v18  ;;  %v460_v17 = vld [vmem:[%s4762_s1 + $0xbc0] sm:$0xff]  ;;  %v2268_v18 = vpack.c.bf16 %v463_v11, %v461_v10  ;;  %v2078_v24 = vpack.c.bf16 %v270_v16, %v268_v15  ;;  %v491_v15 = vld [vmem:[%s4762_s1 + $0xcb8] sm:$0xff]  ;;  %v517_v56 = vld [vmem:[%s4762_s1 + $0xd88] sm:$0xff] }
  0xa7   :  { %2249 = vmatprep.subr.bf16.mxu0 %v2248_v22  ;;  %v465_v22 = vld [vmem:[%s4762_s1 + $0xbe8] sm:$0xff]  ;;  %v2270_v25 = vpack.c.bf16 %v462_v19, %v460_v17  ;;  %v484_v11 = vld [vmem:[%s4762_s1 + $0xc80] sm:$0xff]  ;;  %v490_v19 = vld [vmem:[%s4762_s1 + $0xcb0] sm:$0xff] }
  0xa9   :  { %2059 = vmatpush1.bf16.msra.mxu1 %v2058_v28  ;;  %v274_v28 = vld [vmem:[%s4762_s1 + $0x5f0] sm:$0xff] }
  0xaa   :  { %2251 = vmatpush1.bf16.msra.mxu0 %v2250_v29  ;;  %2061 = vmatprep.subr.bf16.mxu1 %v2060_v30  ;;  %v2272_v29 = vpack.c.bf16 %v467_v23, %v465_v22  ;;  %v464_v30 = vld [vmem:[%s4762_s1 + $0xbe0] sm:$0xff]  ;;  %v2300_v23 = vpack.c.bf16 %v495_v21, %v493_v20  ;;  %v534_v21 = vld [vmem:[%s4762_s1 + $0xe10] sm:$0xff] }
  0xab   :  { %2253 = vmatprep.subr.bf16.mxu0 %v2252_v34  ;;  %v2082_v34 = vpack.c.bf16 %v274_v28, %v272_v27  ;;  %v2274_v35 = vpack.c.bf16 %v466_v31, %v464_v30  ;;  %v499_v27 = vld [vmem:[%s4762_s1 + $0xcf8] sm:$0xff]  ;;  %v496_v30 = vld [vmem:[%s4762_s1 + $0xce0] sm:$0xff]  ;;  %v498_v31 = vld [vmem:[%s4762_s1 + $0xcf0] sm:$0xff] }
  0xac   :  { %v532_v20 = vld [vmem:[%s4762_s1 + $0xe00] sm:$0xff] }
  0xad   :  { %2063 = vmatpush1.bf16.msra.mxu1 %v2062_v40  ;;  %v475_v40 = vld [vmem:[%s4762_s1 + $0xc38] sm:$0xff] }
  0xae   :  { %2255 = vmatpush1.bf16.msra.mxu0 %v2254_v41  ;;  %2065 = vmatprep.subr.bf16.mxu1 %v2064_v42  ;;  %v24_v41 = vld [vmem:[%s4763_s0 + $0x20] sm:$0xff]  ;;  %v30_v42 = vld [vmem:[%s4763_s0 + $0x50] sm:$0xff]  ;;  %v2280_v45 = vpack.c.bf16 %v475_v40, %v473_v39  ;;  %v507_v39 = vld [vmem:[%s4762_s1 + $0xd38] sm:$0xff] }
  0xaf   :  { %2257 = vmatprep.subr.bf16.mxu0 %v2256_v46  ;;  %v472_v46 = vld [vmem:[%s4762_s1 + $0xc20] sm:$0xff] }
  0xb1   :  { %2067 = vmatpush1.bf16.msra.mxu1 %v2066_v52  ;;  %v2282_v52 = vpack.c.bf16 %v474_v47, %v472_v46 }
  0xb2   :  { %2259 = vmatpush1.bf16.msra.mxu0 %v2258_v53  ;;  %2069 = vmatprep.subr.bf16.mxu1 %v2068_v54  ;;  %v57_v53 = vld [vmem:[%s4763_s0 + $0x128] sm:$0xff]  ;;  %v46_v54 = vld [vmem:[%s4763_s0 + $0xd0] sm:$0xff] }
  0xb3   :  { %2261 = vmatprep.subr.bf16.mxu0 %v2260_v58  ;;  %v63_v58 = vld [vmem:[%s4763_s0 + $0x158] sm:$0xff] }
  0xb5   :  { %2071 = vmatpush1.bf16.msra.mxu1 %v2070_v0  ;;  %v62_v0 = vld [vmem:[%s4763_s0 + $0x150] sm:$0xff] }
  0xb6   :  { %2263 = vmatpush1.bf16.msra.mxu0 %v2262_v1  ;;  %2073 = vmatprep.subr.bf16.mxu1 %v2072_v2  ;;  %v2288_v1 = vpack.c.bf16 %v483_v60, %v481_v59  ;;  %v480_v2 = vld [vmem:[%s4762_s1 + $0xc60] sm:$0xff]  ;;  %v2324_v59 = vpack.c.bf16 %v519_v57, %v517_v56 }
  0xb7   :  { %2265 = vmatprep.subr.bf16.mxu0 %v2264_v6  ;;  %v487_v6 = vld [vmem:[%s4762_s1 + $0xc98] sm:$0xff]  ;;  %v2290_v8 = vpack.c.bf16 %v482_v3, %v480_v2  ;;  %v516_v60 = vld [vmem:[%s4762_s1 + $0xd80] sm:$0xff]  ;;  %v522_v3 = vld [vmem:[%s4762_s1 + $0xdb0] sm:$0xff] }
  0xb8   :  { %v2292_v10 = vpack.c.bf16 %v487_v6, %v485_v5  ;;  %v520_v2 = vld [vmem:[%s4762_s1 + $0xda0] sm:$0xff]  ;;  %v527_v5 = vld [vmem:[%s4762_s1 + $0xdd8] sm:$0xff] }
  0xb9   :  { %2075 = vmatpush1.bf16.msra.mxu1 %v2074_v12  ;;  %v486_v12 = vld [vmem:[%s4762_s1 + $0xc90] sm:$0xff]  ;;  %v2330_v6 = vpack.c.bf16 %v522_v3, %v520_v2  ;;  %v561_v2 = vld [vmem:[%s4762_s1 + $0xee8] sm:$0xff]  ;;  %v563_v3 = vld [vmem:[%s4762_s1 + $0xef8] sm:$0xff] }
  0xba   :  { %2267 = vmatpush1.bf16.msra.mxu0 %v2266_v13  ;;  %2077 = vmatprep.subr.bf16.mxu1 %v2076_v14  ;;  %v33_v13 = vld [vmem:[%s4763_s0 + $0x68] sm:$0xff]  ;;  %v2294_v16 = vpack.c.bf16 %v486_v12, %v484_v11  ;;  %v531_v11 = vld [vmem:[%s4762_s1 + $0xdf8] sm:$0xff] }
  0xbb   :  { %2269 = vmatprep.subr.bf16.mxu0 %v2268_v18  ;;  %v489_v14 = vld [vmem:[%s4762_s1 + $0xca8] sm:$0xff]  ;;  %v488_v18 = vld [vmem:[%s4762_s1 + $0xca0] sm:$0xff] }
  0xbc   :  { %v2296_v17 = vpack.c.bf16 %v491_v15, %v489_v14  ;;  %v2298_v22 = vpack.c.bf16 %v490_v19, %v488_v18  ;;  %v528_v14 = vld [vmem:[%s4762_s1 + $0xde0] sm:$0xff]  ;;  %v530_v15 = vld [vmem:[%s4762_s1 + $0xdf0] sm:$0xff] }
  0xbd   :  { %2079 = vmatpush1.bf16.msra.mxu1 %v2078_v24  ;;  %v492_v24 = vld [vmem:[%s4762_s1 + $0xcc0] sm:$0xff]  ;;  %v2338_v18 = vpack.c.bf16 %v530_v15, %v528_v14  ;;  %v569_v14 = vld [vmem:[%s4762_s1 + $0xf28] sm:$0xff]  ;;  %v571_v15 = vld [vmem:[%s4762_s1 + $0xf38] sm:$0xff] }
  0xbe   :  { %2271 = vmatpush1.bf16.msra.mxu0 %v2270_v25  ;;  %2081 = vmatprep.subr.bf16.mxu1 %v2080_v26  ;;  %v494_v25 = vld [vmem:[%s4762_s1 + $0xcd0] sm:$0xff]  ;;  %v497_v26 = vld [vmem:[%s4762_s1 + $0xce8] sm:$0xff] }
  0xbf   :  { %2273 = vmatprep.subr.bf16.mxu0 %v2272_v29  ;;  %v2302_v28 = vpack.c.bf16 %v494_v25, %v492_v24  ;;  %v2304_v29 = vpack.c.bf16 %v499_v27, %v497_v26  ;;  %v32_v24 = vld [vmem:[%s4763_s0 + $0x60] sm:$0xff]  ;;  %v2342_v25 = vpack.c.bf16 %v534_v21, %v532_v20  ;;  %v573_v20 = vld [vmem:[%s4762_s1 + $0xf48] sm:$0xff]  ;;  %v575_v21 = vld [vmem:[%s4762_s1 + $0xf58] sm:$0xff] }
  0xc0   :  { %v536_v27 = vld [vmem:[%s4762_s1 + $0xe20] sm:$0xff] }
  0xc1   :  { %2083 = vmatpush1.bf16.msra.mxu1 %v2082_v34  ;;  %v2306_v34 = vpack.c.bf16 %v498_v31, %v496_v30  ;;  %v541_v30 = vld [vmem:[%s4762_s1 + $0xe48] sm:$0xff]  ;;  %v543_v31 = vld [vmem:[%s4762_s1 + $0xe58] sm:$0xff] }
  0xc2   :  { %2275 = vmatpush1.bf16.msra.mxu0 %v2274_v35  ;;  %v2308_v35 = vpack.c.bf16 %v503_v33, %v501_v32  ;;  %v48_v33 = vld [vmem:[%s4763_s0 + $0xe0] sm:$0xff] }
  0xc3   :  { %2277 = vmatprep.subr.bf16.mxu0 %v2276_v36  ;;  %v500_v36 = vld [vmem:[%s4762_s1 + $0xd00] sm:$0xff] }
  0xc4   :  { %851 = vmatmul.mubr.f32.vlgmr.msra.gmra.mrb[0].mxu1 %v24_v41  ;;  %v2310_v40 = vpack.c.bf16 %v502_v37, %v500_v36  ;;  %v2312_v41 = vpack.c.bf16 %v507_v39, %v505_v38  ;;  %v542_v36 = vld [vmem:[%s4762_s1 + $0xe50] sm:$0xff]  ;;  %v65_v37 = vld [vmem:[%s4763_s0 + $0x168] sm:$0xff]  ;;  %v547_v39 = vld [vmem:[%s4762_s1 + $0xe78] sm:$0xff] }
  0xc5   :  { %1118 = vmatmul.mubr.f32.vlgmr.msra.gmra.mrb[0].mxu0 %v30_v42  ;;  %856 = vmatprep.mubr.f32.mxu1 %v41_v44  ;;  %v504_v42 = vld [vmem:[%s4762_s1 + $0xd20] sm:$0xff]  ;;  %v509_v44 = vld [vmem:[%s4762_s1 + $0xd48] sm:$0xff] }
  0xc6   :  { %2279 = vmatpush1.bf16.msra.mxu0 %v2278_v43  ;;  %1123 = vmatprep.mubr.f32.mxu0 %v47_v48  ;;  %v506_v43 = vld [vmem:[%s4762_s1 + $0xd30] sm:$0xff]  ;;  %v508_v48 = vld [vmem:[%s4762_s1 + $0xd40] sm:$0xff]  ;;  %v545_v38 = vld [vmem:[%s4762_s1 + $0xe68] sm:$0xff] }
  0xc7   :  { %2281 = vmatprep.subr.bf16.mxu0 %v2280_v45  ;;  %v511_v45 = vld [vmem:[%s4762_s1 + $0xd58] sm:$0xff]  ;;  %v2314_v46 = vpack.c.bf16 %v506_v43, %v504_v42  ;;  %v2352_v42 = vpack.c.bf16 %v547_v39, %v545_v38  ;;  %v544_v43 = vld [vmem:[%s4762_s1 + $0xe60] sm:$0xff] }
  0xc8   :  { %857 = vmatmul.mubr.f32.gmra.mrb[2].mxu1 %v40_v51  ;;  %v2316_v47 = vpack.c.bf16 %v511_v45, %v509_v44  ;;  %v515_v51 = vld [vmem:[%s4762_s1 + $0xd78] sm:$0xff]  ;;  %v546_v44 = vld [vmem:[%s4762_s1 + $0xe70] sm:$0xff]  ;;  %v81_v45 = vld [vmem:[%s4763_s0 + $0x1e8] sm:$0xff] }
  0xc9   :  { %862 = vmatprep.mubr.f32.mxu1 %v57_v53  ;;  %1124 = vmatmul.mubr.f32.gmra.mrb[2].mxu0 %v46_v54  ;;  %v2320_v53 = vpack.c.bf16 %v515_v51, %v513_v50  ;;  %v512_v54 = vld [vmem:[%s4762_s1 + $0xd60] sm:$0xff]  ;;  %v1363_v38 = vld [vmem:[%s4764_s3 + $0x118] sm:$0xff] }
  0xca   :  { %2283 = vmatpush1.bf16.msra.mxu0 %v2282_v52  ;;  %1129 = vmatprep.mubr.f32.mxu0 %v63_v58  ;;  %v2318_v52 = vpack.c.bf16 %v510_v49, %v508_v48  ;;  %v2354_v48 = vpack.c.bf16 %v546_v44, %v544_v43  ;;  %v80_v49 = vld [vmem:[%s4763_s0 + $0x1e0] sm:$0xff]  ;;  %v578_v43 = vld [vmem:[%s4762_s1 + $0xf70] sm:$0xff] }
  0xcb   :  { %2285 = vmatprep.subr.bf16.mxu0 %v2284_v55  ;;  %v514_v55 = vld [vmem:[%s4762_s1 + $0xd70] sm:$0xff]  ;;  %v548_v51 = vld [vmem:[%s4762_s1 + $0xe80] sm:$0xff] }
  0xcc   :  { %863 = vmatmul.mubr.f32.gmra.mrb[4].mxu1 %v56_v61  ;;  %v2322_v58 = vpack.c.bf16 %v514_v55, %v512_v54  ;;  %v518_v61 = vld [vmem:[%s4762_s1 + $0xd90] sm:$0xff]  ;;  %v553_v54 = vld [vmem:[%s4762_s1 + $0xea8] sm:$0xff]  ;;  %v555_v55 = vld [vmem:[%s4762_s1 + $0xeb8] sm:$0xff] }
  0xcd   :  { %868 = vmatprep.mubr.f32.mxu1 %v73_v63  ;;  %1130 = vmatmul.mubr.f32.gmra.mrb[4].mxu0 %v62_v0  ;;  %v523_v63 = vld [vmem:[%s4762_s1 + $0xdb8] sm:$0xff]  ;;  %v2326_v0 = vpack.c.bf16 %v518_v61, %v516_v60  ;;  %v2360_v57 = vpack.c.bf16 %v555_v55, %v553_v54  ;;  %v557_v60 = vld [vmem:[%s4762_s1 + $0xec8] sm:$0xff]  ;;  %v1380_v39 = vld [vmem:[%s4764_s3 + $0x1a0] sm:$0xff] }
  0xce   :  { %2287 = vmatpush1.bf16.msra.mxu0 %v2286_v62  ;;  %1135 = vmatprep.mubr.f32.mxu0 %v79_v4  ;;  %v521_v62 = vld [vmem:[%s4762_s1 + $0xda8] sm:$0xff]  ;;  %v559_v61 = vld [vmem:[%s4762_s1 + $0xed8] sm:$0xff]  ;;  %v580_v54 = vld [vmem:[%s4762_s1 + $0xf80] sm:$0xff] }
  0xcf   :  { %2289 = vmatprep.subr.bf16.mxu0 %v2288_v1  ;;  %v2328_v1 = vpack.c.bf16 %v523_v63, %v521_v62  ;;  %v525_v4 = vld [vmem:[%s4762_s1 + $0xdc8] sm:$0xff]  ;;  %v2364_v63 = vpack.c.bf16 %v559_v61, %v557_v60  ;;  %v582_v55 = vld [vmem:[%s4762_s1 + $0xf90] sm:$0xff]  ;;  %v1367_v61 = vld [vmem:[%s4764_s3 + $0x138] sm:$0xff] }
  0xd0   :  { %869 = vmatmul.mubr.f32.gmra.mrb[6].mxu1 %v72_v7  ;;  %v2332_v7 = vpack.c.bf16 %v527_v5, %v525_v4  ;;  %v2368_v5 = vpack.c.bf16 %v563_v3, %v561_v2  ;;  %v1366_v60 = vld [vmem:[%s4764_s3 + $0x130] sm:$0xff]  ;;  %v584_v2 = vld [vmem:[%s4762_s1 + $0xfa0] sm:$0xff] }
  0xd1   :  { %1136 = vmatmul.mubr.f32.gmra.mrb[6].mxu0 %v78_v9  ;;  %v526_v9 = vld [vmem:[%s4762_s1 + $0xdd0] sm:$0xff] }
  0xd2   :  { %2291 = vmatpush1.bf16.msra.mxu0 %v2290_v8  ;;  %1206 = vmatprep.mubr.f32.mxu0 %v33_v13  ;;  %v524_v8 = vld [vmem:[%s4762_s1 + $0xdc0] sm:$0xff]  ;;  %v586_v3 = vld [vmem:[%s4762_s1 + $0xfb0] sm:$0xff] }
  0xd3   :  { %2293 = vmatprep.subr.bf16.mxu0 %v2292_v10  ;;  %v529_v10 = vld [vmem:[%s4762_s1 + $0xde8] sm:$0xff]  ;;  %v2334_v12 = vpack.c.bf16 %v526_v9, %v524_v8  ;;  %v567_v9 = vld [vmem:[%s4762_s1 + $0xf18] sm:$0xff] }
  0xd4   :  { %v2336_v13 = vpack.c.bf16 %v531_v11, %v529_v10  ;;  %v565_v8 = vld [vmem:[%s4762_s1 + $0xf08] sm:$0xff] }
  0xd5   :  { %v2372_v11 = vpack.c.bf16 %v567_v9, %v565_v8  ;;  %v1368_v8 = vld [vmem:[%s4764_s3 + $0x140] sm:$0xff]  ;;  %v1369_v9 = vld [vmem:[%s4764_s3 + $0x148] sm:$0xff] }
  0xd6   :  { %2295 = vmatpush1.bf16.msra.mxu0 %v2294_v16  ;;  %v533_v16 = vld [vmem:[%s4762_s1 + $0xe08] sm:$0xff] }
  0xd7   :  { %2297 = vmatprep.subr.bf16.mxu0 %v2296_v17  ;;  %v535_v17 = vld [vmem:[%s4762_s1 + $0xe18] sm:$0xff] }
  0xd8   :  { %v2340_v19 = vpack.c.bf16 %v535_v17, %v533_v16  ;;  %v2376_v17 = vpack.c.bf16 %v571_v15, %v569_v14  ;;  %v588_v14 = vld [vmem:[%s4762_s1 + $0xfc0] sm:$0xff]  ;;  %v2422_v15 = vpack.c.bf16 %v1369_v9, %v1368_v8 }
  0xda   :  { %2299 = vmatpush1.bf16.msra.mxu0 %v2298_v22  ;;  %v537_v22 = vld [vmem:[%s4762_s1 + $0xe28] sm:$0xff] }
  0xdb   :  { %2301 = vmatprep.subr.bf16.mxu0 %v2300_v23  ;;  %v539_v23 = vld [vmem:[%s4762_s1 + $0xe38] sm:$0xff] }
  0xdc   :  { %v2344_v26 = vpack.c.bf16 %v539_v23, %v537_v22  ;;  %v572_v22 = vld [vmem:[%s4762_s1 + $0xf40] sm:$0xff]  ;;  %v574_v23 = vld [vmem:[%s4762_s1 + $0xf50] sm:$0xff] }
  0xde   :  { %2303 = vmatpush1.bf16.msra.mxu0 %v2302_v28  ;;  %v538_v28 = vld [vmem:[%s4762_s1 + $0xe30] sm:$0xff] }
  0xdf   :  { %2305 = vmatprep.subr.bf16.mxu0 %v2304_v29  ;;  %v49_v29 = vld [vmem:[%s4763_s0 + $0xe8] sm:$0xff]  ;;  %v2346_v32 = vpack.c.bf16 %v538_v28, %v536_v27  ;;  %v1376_v27 = vld [vmem:[%s4764_s3 + $0x180] sm:$0xff] }
  0xe0   :  { %v1377_v28 = vld [vmem:[%s4764_s3 + $0x188] sm:$0xff] }
  0xe2   :  { %2307 = vmatpush1.bf16.msra.mxu0 %v2306_v34  ;;  %v2348_v34 = vpack.c.bf16 %v543_v31, %v541_v30  ;;  %v2380_v30 = vpack.c.bf16 %v575_v21, %v573_v20  ;;  %v2404_v31 = vpack.c.bf16 %v1377_v28, %v1376_v27  ;;  %v1371_v20 = vld [vmem:[%s4764_s3 + $0x158] sm:$0xff]  ;;  %v593_v21 = vld [vmem:[%s4762_s1 + $0xfe8] sm:$0xff]  ;;  %v594_v27 = vld [vmem:[%s4762_s1 + $0xff0] sm:$0xff] }
  0xe3   :  { %2309 = vmatprep.subr.bf16.mxu0 %v2308_v35  ;;  %v540_v35 = vld [vmem:[%s4762_s1 + $0xe40] sm:$0xff] }
  0xe4   :  { %2405 = vmatprep.subr.bf16.mxu1 %v2404_v31  ;;  %v50_v31 = vld [vmem:[%s4763_s0 + $0xf0] sm:$0xff] }
  0xe6   :  { %2311 = vmatpush1.bf16.msra.mxu0 %v2310_v40  ;;  %v2350_v40 = vpack.c.bf16 %v542_v36, %v540_v35 }
  0xe7   :  { %2313 = vmatprep.subr.bf16.mxu0 %v2312_v41  ;;  %v64_v41 = vld [vmem:[%s4763_s0 + $0x160] sm:$0xff] }
  0xea   :  { %2315 = vmatpush1.bf16.msra.mxu0 %v2314_v46  ;;  %v549_v46 = vld [vmem:[%s4762_s1 + $0xe88] sm:$0xff] }
  0xeb   :  { %2317 = vmatprep.subr.bf16.mxu0 %v2316_v47  ;;  %v551_v47 = vld [vmem:[%s4762_s1 + $0xe98] sm:$0xff] }
  0xec   :  { %v2356_v50 = vpack.c.bf16 %v551_v47, %v549_v46  ;;  %v581_v46 = vld [vmem:[%s4762_s1 + $0xf88] sm:$0xff] }
  0xee   :  { %2319 = vmatpush1.bf16.msra.mxu0 %v2318_v52  ;;  %v550_v52 = vld [vmem:[%s4762_s1 + $0xe90] sm:$0xff] }
  0xef   :  { %2321 = vmatprep.subr.bf16.mxu0 %v2320_v53  ;;  %v35_v53 = vld [vmem:[%s4763_s0 + $0x78] sm:$0xff]  ;;  %v2358_v56 = vpack.c.bf16 %v550_v52, %v548_v51  ;;  %v1382_v51 = vld [vmem:[%s4764_s3 + $0x1b0] sm:$0xff] }
  0xf0   :  { %v1383_v52 = vld [vmem:[%s4764_s3 + $0x1b8] sm:$0xff] }
  0xf2   :  { %2323 = vmatpush1.bf16.msra.mxu0 %v2322_v58  ;;  %v552_v58 = vld [vmem:[%s4762_s1 + $0xea0] sm:$0xff] }
  0xf3   :  { %2325 = vmatprep.subr.bf16.mxu0 %v2324_v59  ;;  %v554_v59 = vld [vmem:[%s4762_s1 + $0xeb0] sm:$0xff] }
  0xf4   :  { %v2362_v62 = vpack.c.bf16 %v554_v59, %v552_v58  ;;  %v585_v58 = vld [vmem:[%s4762_s1 + $0xfa8] sm:$0xff]  ;;  %v2416_v59 = vpack.c.bf16 %v1383_v52, %v1382_v51 }
  0xf6   :  { %2327 = vmatpush1.bf16.msra.mxu0 %v2326_v0  ;;  %v556_v0 = vld [vmem:[%s4762_s1 + $0xec0] sm:$0xff] }
  0xf7   :  { %2329 = vmatprep.subr.bf16.mxu0 %v2328_v1  ;;  %v558_v1 = vld [vmem:[%s4762_s1 + $0xed0] sm:$0xff] }
  0xf8   :  { %v2366_v4 = vpack.c.bf16 %v558_v1, %v556_v0  ;;  %v1385_v0 = vld [vmem:[%s4764_s3 + $0x1c8] sm:$0xff]  ;;  %v2390_v1 = vpack.c.bf16 %v582_v55, %v580_v54  ;;  %v1375_v54 = vld [vmem:[%s4764_s3 + $0x178] sm:$0xff] }
  0xfa   :  { %2331 = vmatpush1.bf16.msra.mxu0 %v2330_v6  ;;  %v560_v6 = vld [vmem:[%s4762_s1 + $0xee0] sm:$0xff] }
  0xfb   :  { %2333 = vmatprep.subr.bf16.mxu0 %v2332_v7  ;;  %v562_v7 = vld [vmem:[%s4762_s1 + $0xef0] sm:$0xff] }
  0xfc   :  { %v2370_v10 = vpack.c.bf16 %v562_v7, %v560_v6  ;;  %v589_v6 = vld [vmem:[%s4762_s1 + $0xfc8] sm:$0xff] }
  0xfe   :  { %2335 = vmatpush1.bf16.msra.mxu0 %v2334_v12  ;;  %v564_v12 = vld [vmem:[%s4762_s1 + $0xf00] sm:$0xff] }
  0xff   :  { %2337 = vmatprep.subr.bf16.mxu0 %v2336_v13  ;;  %v566_v13 = vld [vmem:[%s4762_s1 + $0xf10] sm:$0xff] }
 0x100   :  { %v2374_v16 = vpack.c.bf16 %v566_v13, %v564_v12  ;;  %v1387_v12 = vld [vmem:[%s4764_s3 + $0x1d8] sm:$0xff]  ;;  %v2394_v13 = vpack.c.bf16 %v586_v3, %v584_v2 }
 0x102   :  { %2339 = vmatpush1.bf16.msra.mxu0 %v2338_v18  ;;  %v568_v18 = vld [vmem:[%s4762_s1 + $0xf20] sm:$0xff] }
 0x103   :  { %2341 = vmatprep.subr.bf16.mxu0 %v2340_v19  ;;  %v570_v19 = vld [vmem:[%s4762_s1 + $0xf30] sm:$0xff] }
 0x105   :  { %1207 = vmatmul.mubr.f32.vlgmr.msra.gmra.mrb[0].mxu0 %v32_v24  ;;  %v2378_v24 = vpack.c.bf16 %v570_v19, %v568_v18  ;;  %v1370_v19 = vld [vmem:[%s4764_s3 + $0x150] sm:$0xff] }
 0x106   :  { %2343 = vmatpush1.bf16.msra.mxu0 %v2342_v25  ;;  %1212 = vmatprep.mubr.f32.mxu0 %v49_v29  ;;  %v577_v25 = vld [vmem:[%s4762_s1 + $0xf68] sm:$0xff]  ;;  %v1360_v29 = vld [vmem:[%s4764_s3 + $0x100] sm:$0xff] }
 0x107   :  { %2345 = vmatprep.subr.bf16.mxu0 %v2344_v26  ;;  %v579_v26 = vld [vmem:[%s4762_s1 + $0xf78] sm:$0xff] }
 0x109   :  { %1213 = vmatmul.mubr.f32.gmra.mrb[2].mxu0 %v48_v33  ;;  %v1378_v33 = vld [vmem:[%s4764_s3 + $0x190] sm:$0xff] }
 0x10a   :  { %2347 = vmatpush1.bf16.msra.mxu0 %v2346_v32  ;;  %1218 = vmatprep.mubr.f32.mxu0 %v65_v37  ;;  %v1361_v32 = vld [vmem:[%s4764_s3 + $0x108] sm:$0xff]  ;;  %v1362_v37 = vld [vmem:[%s4764_s3 + $0x110] sm:$0xff] }
 0x10b   :  { %2349 = vmatprep.subr.bf16.mxu0 %v2348_v34  ;;  %v1379_v34 = vld [vmem:[%s4764_s3 + $0x198] sm:$0xff]  ;;  %v2406_v35 = vpack.c.bf16 %v1361_v32, %v1360_v29  ;;  %v2410_v44 = vpack.c.bf16 %v1363_v38, %v1362_v37  ;;  %v34_v29 = vld [vmem:[%s4763_s0 + $0x70] sm:$0xff] }
 0x10c   :  { %v2408_v36 = vpack.c.bf16 %v1379_v34, %v1378_v33  ;;  %v67_v32 = vld [vmem:[%s4763_s0 + $0x178] sm:$0xff]  ;;  %v66_v33 = vld [vmem:[%s4763_s0 + $0x170] sm:$0xff] }
 0x10d   :  { %1219 = vmatmul.mubr.f32.gmra.mrb[4].mxu0 %v64_v41  ;;  %v2382_v41 = vpack.c.bf16 %v574_v23, %v572_v22  ;;  %2407 = vmatpush3.bf16.msra.mxu1 %v2406_v35  ;;  %v595_v22 = vld [vmem:[%s4762_s1 + $0xff8] sm:$0xff]  ;;  %v82_v35 = vld [vmem:[%s4763_s0 + $0x1f0] sm:$0xff] }
 0x10e   :  { %2351 = vmatpush1.bf16.msra.mxu0 %v2350_v40  ;;  %1224 = vmatprep.mubr.f32.mxu0 %v81_v45  ;;  %v1381_v40 = vld [vmem:[%s4764_s3 + $0x1a8] sm:$0xff]  ;;  %v2384_v45 = vpack.c.bf16 %v579_v26, %v577_v25  ;;  %v2400_v25 = vpack.c.bf16 %v595_v22, %v593_v21  ;;  %v592_v26 = vld [vmem:[%s4762_s1 + $0xfe0] sm:$0xff]  ;;  %v83_v34 = vld [vmem:[%s4763_s0 + $0x1f8] sm:$0xff] }
 0x10f   :  { %2353 = vmatprep.subr.bf16.mxu0 %v2352_v42  ;;  %v576_v42 = vld [vmem:[%s4762_s1 + $0xf60] sm:$0xff]  ;;  %2409 = vmatprep.subr.bf16.mxu1 %v2408_v36  ;;  %v2412_v47 = vpack.c.bf16 %v1381_v40, %v1380_v39  ;;  %v2402_v28 = vpack.c.bf16 %v594_v27, %v592_v26  ;;  %v598_v36 = vlaneseq  ;;  %v1389_v40 = vld [vmem:[%s4764_s3 + $0x1e8] sm:$0xff] }
 0x110   :  { %v1388_v39 = vld [vmem:[%s4764_s3 + $0x1e0] sm:$0xff] }
 0x111   :  { %1225 = vmatmul.mubr.f32.gmra.mrb[6].mxu0 %v80_v49  ;;  %v1365_v49 = vld [vmem:[%s4764_s3 + $0x128] sm:$0xff]  ;;  %2411 = vmatpush3.bf16.msra.mxu1 %v2410_v44  ;;  %v599_v37 = vshrl.u32 %v598_v36, 7 }
 0x112   :  { %2355 = vmatpush1.bf16.msra.mxu0 %v2354_v48  ;;  %1295 = vmatprep.mubr.f32.mxu0 %v35_v53  ;;  %v1364_v48 = vld [vmem:[%s4764_s3 + $0x120] sm:$0xff]  ;;  %v2386_v53 = vpack.c.bf16 %v578_v43, %v576_v42  ;;  %v2428_v42 = vpack.c.bf16 %v1389_v40, %v1388_v39  ;;  %v1373_v44 = vld [vmem:[%s4764_s3 + $0x168] sm:$0xff] }
 0x113   :  { %2357 = vmatprep.subr.bf16.mxu0 %v2356_v50  ;;  %v583_v50 = vld [vmem:[%s4762_s1 + $0xf98] sm:$0xff]  ;;  %2413 = vmatprep.subr.bf16.mxu1 %v2412_v47  ;;  %v1372_v43 = vld [vmem:[%s4764_s3 + $0x160] sm:$0xff] }
 0x114   :  { %v596_v47 = vld [vmem:[%s4765_s2] sm:$0x3] }
 0x115   :  { %v1332_v40 = vld [vmem:[%s4764_s3 + $0x20] sm:$0xff] }
 0x116   :  { %2359 = vmatpush1.bf16.msra.mxu0 %v2358_v56  ;;  %v2414_v56 = vpack.c.bf16 %v1365_v49, %v1364_v48  ;;  %v1390_v49 = vld [vmem:[%s4764_s3 + $0x1f0] sm:$0xff] }
 0x117   :  { %2361 = vmatprep.subr.bf16.mxu0 %v2360_v57  ;;  %v2388_v57 = vpack.c.bf16 %v583_v50, %v581_v46  ;;  %v600_v46 = vsub.s32 0, %v599_v37  ;;  %v1391_v50 = vld [vmem:[%s4764_s3 + $0x1f8] sm:$0xff] }
 0x118   :  { %2415 = vmatpush3.bf16.msra.mxu1 %v2414_v56  ;;  %v2432_v52 = vpack.c.bf16 %v1391_v50, %v1390_v49  ;;  %v1352_v49 = vld [vmem:[%s4764_s3 + $0xc0] sm:$0xff]  ;;  %v1353_v50 = vld [vmem:[%s4764_s3 + $0xc8] sm:$0xff] }
 0x119   :  { %2417 = vmatprep.subr.bf16.mxu1 %v2416_v59  ;;  %v601_v56 = vrot.slane %v596_v47, %v600_v46  ;;  %v1344_v59 = vld [vmem:[%s4764_s3 + $0x80] sm:$0xff] }
 0x11a   :  { %2363 = vmatpush1.bf16.msra.mxu0 %v2362_v62  ;;  %v587_v62 = vld [vmem:[%s4762_s1 + $0xfb8] sm:$0xff] }
 0x11b   :  { %2365 = vmatprep.subr.bf16.mxu0 %v2364_v63  ;;  %v1384_v63 = vld [vmem:[%s4764_s3 + $0x1c0] sm:$0xff] }
 0x11c   :  { %v2420_v7 = vpack.c.bf16 %v1385_v0, %v1384_v63 }
 0x11e   :  { %2367 = vmatpush1.bf16.msra.mxu0 %v2366_v4  ;;  %v2418_v4 = vpack.c.bf16 %v1367_v61, %v1366_v60  ;;  %v1345_v60 = vld [vmem:[%s4764_s3 + $0x88] sm:$0xff] }
 0x11f   :  { %2369 = vmatprep.subr.bf16.mxu0 %v2368_v5  ;;  %v2392_v5 = vpack.c.bf16 %v587_v62, %v585_v58  ;;  %v2436_v63 = vpack.c.bf16 %v1345_v60, %v1344_v59  ;;  %v1338_v59 = vld [vmem:[%s4764_s3 + $0x50] sm:$0xff]  ;;  %v1339_v60 = vld [vmem:[%s4764_s3 + $0x58] sm:$0xff] }
 0x120   :  { %2419 = vmatpush3.bf16.msra.mxu1 %v2418_v4 }
 0x121   :  { %2421 = vmatprep.subr.bf16.mxu1 %v2420_v7 }
 0x122   :  { %2371 = vmatpush1.bf16.msra.mxu0 %v2370_v10  ;;  %v591_v10 = vld [vmem:[%s4762_s1 + $0xfd8] sm:$0xff] }
 0x123   :  { %2373 = vmatprep.subr.bf16.mxu0 %v2372_v11  ;;  %v1386_v11 = vld [vmem:[%s4764_s3 + $0x1d0] sm:$0xff] }
 0x124   :  { %v2424_v18 = vpack.c.bf16 %v1387_v12, %v1386_v11  ;;  %2423 = vmatpush3.bf16.msra.mxu1 %v2422_v15 }
 0x126   :  { %2375 = vmatpush1.bf16.msra.mxu0 %v2374_v16  ;;  %v2396_v16 = vpack.c.bf16 %v591_v10, %v589_v6  ;;  %2425 = vmatprep.subr.bf16.mxu1 %v2424_v18 }
 0x127   :  { %2377 = vmatprep.subr.bf16.mxu0 %v2376_v17  ;;  %v590_v17 = vld [vmem:[%s4762_s1 + $0xfd0] sm:$0xff] }
 0x128   :  { %v2398_v23 = vpack.c.bf16 %v590_v17, %v588_v14  ;;  %v1329_v17 = vld [vmem:[%s4764_s3 + $0x8] sm:$0xff] }
 0x12a   :  { %2379 = vmatpush1.bf16.msra.mxu0 %v2378_v24  ;;  %v2426_v24 = vpack.c.bf16 %v1371_v20, %v1370_v19  ;;  %v1346_v19 = vld [vmem:[%s4764_s3 + $0x90] sm:$0xff]  ;;  %v1347_v20 = vld [vmem:[%s4764_s3 + $0x98] sm:$0xff] }
 0x12b   :  { %2381 = vmatprep.subr.bf16.mxu0 %v2380_v30  ;;  %v51_v30 = vld [vmem:[%s4763_s0 + $0xf8] sm:$0xff] }
 0x12c   :  { %2427 = vmatpush3.bf16.msra.mxu1 %v2426_v24 }
 0x12d   :  { %2429 = vmatprep.subr.bf16.mxu1 %v2428_v42 }
 0x12e   :  { %2383 = vmatpush1.bf16.msra.mxu0 %v2382_v41 }
 0x12f   :  { %2385 = vmatprep.subr.bf16.mxu0 %v2384_v45  ;;  %v2430_v45 = vpack.c.bf16 %v1373_v44, %v1372_v43  ;;  %v1350_v43 = vld [vmem:[%s4764_s3 + $0xb0] sm:$0xff]  ;;  %v1351_v44 = vld [vmem:[%s4764_s3 + $0xb8] sm:$0xff] }
 0x130   :  { %v2448_v46 = vpack.c.bf16 %v1351_v44, %v1350_v43  ;;  %v1541_v43 = vld [vmem:[%s4764_s3 + $0x248] sm:$0xff]  ;;  %v1558_v44 = vld [vmem:[%s4764_s3 + $0x2d0] sm:$0xff] }
 0x131   :  { %2431 = vmatpush3.bf16.msra.mxu1 %v2430_v45 }
 0x132   :  { %2387 = vmatpush1.bf16.msra.mxu0 %v2386_v53  ;;  %v1374_v53 = vld [vmem:[%s4764_s3 + $0x170] sm:$0xff]  ;;  %2433 = vmatprep.subr.bf16.mxu1 %v2432_v52  ;;  %v2452_v52 = vpack.c.bf16 %v1353_v50, %v1352_v49  ;;  %v1543_v49 = vld [vmem:[%s4764_s3 + $0x258] sm:$0xff]  ;;  %v1560_v50 = vld [vmem:[%s4764_s3 + $0x2e0] sm:$0xff] }
 0x133   :  { %2389 = vmatprep.subr.bf16.mxu0 %v2388_v57  ;;  %v2434_v55 = vpack.c.bf16 %v1375_v54, %v1374_v53  ;;  %v604_v57 = vsub.s32 1, %v599_v37  ;;  %v1336_v53 = vld [vmem:[%s4764_s3 + $0x40] sm:$0xff]  ;;  %v1337_v54 = vld [vmem:[%s4764_s3 + $0x48] sm:$0xff] }
 0x135   :  { %2435 = vmatpush3.bf16.msra.mxu1 %v2434_v55  ;;  %v605_v0 = vrot.slane %v596_v47, %v604_v57  ;;  %v1334_v47 = vld [vmem:[%s4764_s3 + $0x30] sm:$0xff]  ;;  %v2454_v57 = vpack.c.bf16 %v1337_v54, %v1336_v53  ;;  %v1544_v54 = vld [vmem:[%s4764_s3 + $0x260] sm:$0xff] }
 0x136   :  { %2391 = vmatpush1.bf16.msra.mxu0 %v2390_v1  ;;  %2437 = vmatprep.subr.bf16.mxu1 %v2436_v63  ;;  %v1354_v55 = vld [vmem:[%s4764_s3 + $0xd0] sm:$0xff]  ;;  %v2458_v63 = vpack.c.bf16 %v1339_v60, %v1338_v59 }
 0x137   :  { %2393 = vmatprep.subr.bf16.mxu0 %v2392_v5  ;;  %v1546_v60 = vld [vmem:[%s4764_s3 + $0x270] sm:$0xff] }
 0x13a   :  { %2395 = vmatpush1.bf16.msra.mxu0 %v2394_v13 }
 0x13b   :  { %2397 = vmatprep.subr.bf16.mxu0 %v2396_v16  ;;  %v1328_v16 = vld [vmem:[%s4764_s3] sm:$0xff] }
 0x13c   :  { %v2438_v24 = vpack.c.bf16 %v1329_v17, %v1328_v16  ;;  %v1550_v16 = vld [vmem:[%s4764_s3 + $0x290] sm:$0xff]  ;;  %v1551_v17 = vld [vmem:[%s4764_s3 + $0x298] sm:$0xff] }
 0x13e   :  { %2399 = vmatpush1.bf16.msra.mxu0 %v2398_v23 }
 0x13f   :  { %2401 = vmatprep.subr.bf16.mxu0 %v2400_v25 }
 0x142   :  { %2403 = vmatpush1.bf16.msra.mxu0 %v2402_v28  ;;  %v2440_v28 = vpack.c.bf16 %v1347_v20, %v1346_v19  ;;  %v2472_v20 = vpack.c.bf16 %v1551_v17, %v1550_v16  ;;  %v1639_v16 = vld [vmem:[%s4764_s3 + $0x320] sm:$0xff]  ;;  %v1657_v17 = vld [vmem:[%s4764_s3 + $0x3b0] sm:$0xff] }
 0x145   :  { %1296 = vmatmul.mubr.f32.vlgmr.msra.gmra.mrb[0].mxu0 %v34_v29  ;;  %v1330_v29 = vld [vmem:[%s4764_s3 + $0x10] sm:$0xff] }
 0x146   :  { %1301 = vmatprep.mubr.f32.mxu0 %v51_v30  ;;  %v1331_v30 = vld [vmem:[%s4764_s3 + $0x18] sm:$0xff] }
 0x147   :  { %v2442_v36 = vpack.c.bf16 %v1331_v30, %v1330_v29  ;;  %v1537_v29 = vld [vmem:[%s4764_s3 + $0x228] sm:$0xff]  ;;  %v1554_v30 = vld [vmem:[%s4764_s3 + $0x2b0] sm:$0xff] }
 0x149   :  { %1302 = vmatmul.mubr.f32.gmra.mrb[2].mxu0 %v50_v31 }
 0x14a   :  { %1307 = vmatprep.mubr.f32.mxu0 %v67_v32 }
 0x14d   :  { %1308 = vmatmul.mubr.f32.gmra.mrb[4].mxu0 %v66_v33  ;;  %v1348_v33 = vld [vmem:[%s4764_s3 + $0xa0] sm:$0xff] }
 0x14e   :  { %1313 = vmatprep.mubr.f32.mxu0 %v83_v34  ;;  %v1349_v34 = vld [vmem:[%s4764_s3 + $0xa8] sm:$0xff] }
 0x14f   :  { %v2444_v39 = vpack.c.bf16 %v1349_v34, %v1348_v33  ;;  %v1538_v34 = vld [vmem:[%s4764_s3 + $0x230] sm:$0xff] }
 0x151   :  { %1314 = vmatmul.mubr.f32.gmra.mrb[6].mxu0 %v82_v35 }
 0x197   :  { %v852_v38 = vpop.f32.mrb[0].mxu1 }
 0x198   :  { %v854_v41 = vpop.f32.mrb[1].mxu1  ;;  %v2532_v5 = vadd.f32 %v852_v38, %v601_v56 }
 0x199   :  { %v2534_v6 = vadd.f32 %v854_v41, %v605_v0  ;;  %v1333_v41 = vld [vmem:[%s4764_s3 + $0x28] sm:$0xff] }
 0x19a   :  { %v2446_v45 = vpack.c.bf16 %v1333_v41, %v1332_v40  ;;  %v1540_v41 = vld [vmem:[%s4764_s3 + $0x240] sm:$0xff] }
 0x19b   :  { %v858_v48 = vpop.f32.mrb[2].mxu1 }
 0x19c   :  { %v860_v51 = vpop.f32.mrb[3].mxu1  ;;  %v2536_v11 = vadd.f32 %v858_v48, %v601_v56  ;;  %v1335_v48 = vld [vmem:[%s4764_s3 + $0x38] sm:$0xff] }
 0x19d   :  { %v2538_v12 = vadd.f32 %v860_v51, %v605_v0  ;;  %v2450_v51 = vpack.c.bf16 %v1335_v48, %v1334_v47  ;;  %v1542_v48 = vld [vmem:[%s4764_s3 + $0x250] sm:$0xff] }
 0x19f   :  { %v864_v58 = vpop.f32.mrb[4].mxu1 }
 0x1a0   :  { %v2540_v61 = vadd.f32 %v864_v58, %v601_v56  ;;  %v866_v62 = vpop.f32.mrb[5].mxu1 }
 0x1a1   :  { %v2542_v21 = vadd.f32 %v866_v62, %v605_v0  ;;  %v1357_v62 = vld [vmem:[%s4764_s3 + $0xe8] sm:$0xff] }
 0x1a3   :  { %v870_v1 = vpop.f32.mrb[6].mxu1 }
 0x1a4   :  { %v2544_v2 = vadd.f32 %v870_v1, %v601_v56  ;;  %v872_v3 = vpop.f32.mrb[7].mxu1  ;;  %v1355_v56 = vld [vmem:[%s4764_s3 + $0xd8] sm:$0xff]  ;;  %v1340_v1 = vld [vmem:[%s4764_s3 + $0x60] sm:$0xff] }
 0x1a5   :  { %v2546_v4 = vadd.f32 %v872_v3, %v605_v0  ;;  %v2456_v58 = vpack.c.bf16 %v1355_v56, %v1354_v55  ;;  %v1358_v3 = vld [vmem:[%s4764_s3 + $0xf0] sm:$0xff]  ;;  %v1545_v55 = vld [vmem:[%s4764_s3 + $0x268] sm:$0xff] }
 0x1a6   :  { %v1562_v56 = vld [vmem:[%s4764_s3 + $0x2f0] sm:$0xff] }
 0x218   :  { %v1297_v7 = vpop.f32.mrb[0].mxu0 }
 0x219   :  { %v4459_v8 = vadd.f32 %v2532_v5, %v1297_v7  ;;  %v1299_v9 = vpop.f32.mrb[1].mxu0  ;;  %v1342_v7 = vld [vmem:[%s4764_s3 + $0x70] sm:$0xff] }
 0x21a   :  { %v2535_v10 = vadd.f32 %v2534_v6, %v1299_v9  ;;  %v1343_v9 = vld [vmem:[%s4764_s3 + $0x78] sm:$0xff] }
 0x21b   :  { %v1320_v19 = vmax.f32 %v4459_v8, 0.0  ;;  %v1553_v8 = vld [vmem:[%s4764_s3 + $0x2a8] sm:$0xff] }
 0x21c   :  { %v1303_v13 = vpop.f32.mrb[2].mxu0  ;;  %v1321_v31 = vmax.f32 %v2535_v10, 0.0  ;;  %v1548_v10 = vld [vmem:[%s4764_s3 + $0x280] sm:$0xff] }
 0x21d   :  { %v2537_v14 = vadd.f32 %v2536_v11, %v1303_v13  ;;  %v1305_v15 = vpop.f32.mrb[3].mxu0  ;;  %v1549_v11 = vld [vmem:[%s4764_s3 + $0x288] sm:$0xff] }
 0x21e   :  { %v2539_v18 = vadd.f32 %v2538_v12, %v1305_v15  ;;  %v2466_v12 = vpack.c.bf16 %v1343_v9, %v1342_v7  ;;  %v2468_v13 = vpack.c.bf16 %v1549_v11, %v1548_v10  ;;  %v1533_v15 = vld [vmem:[%s4764_s3 + $0x208] sm:$0xff]  ;;  %v1637_v10 = vld [vmem:[%s4764_s3 + $0x310] sm:$0xff]  ;;  %v1638_v11 = vld [vmem:[%s4764_s3 + $0x318] sm:$0xff] }
 0x21f   :  { %v1322_v25 = vmax.f32 %v2537_v14, 0.0  ;;  %v1532_v14 = vld [vmem:[%s4764_s3 + $0x200] sm:$0xff] }
 0x220   :  { %v1323_v22 = vmax.f32 %v2539_v18, 0.0  ;;  %v1309_v23 = vpop.f32.mrb[4].mxu0  ;;  %v2470_v18 = vpack.c.bf16 %v1533_v15, %v1532_v14  ;;  %v2506_v14 = vpack.c.bf16 %v1638_v11, %v1637_v10 }
 0x221   :  { %v4473_v26 = vadd.f32 %v2540_v61, %v1309_v23  ;;  %v1311_v27 = vpop.f32.mrb[5].mxu0  ;;  %v1356_v61 = vld [vmem:[%s4764_s3 + $0xe0] sm:$0xff] }
 0x222   :  { %v4481_v32 = vadd.f32 %v2542_v21, %v1311_v27  ;;  %1456 = vmatprep.mubr.f32.mxu1 %v1323_v22  ;;  %v2460_v0 = vpack.c.bf16 %v1357_v62, %v1356_v61  ;;  %v1534_v21 = vld [vmem:[%s4764_s3 + $0x210] sm:$0xff]  ;;  %v1535_v22 = vld [vmem:[%s4764_s3 + $0x218] sm:$0xff]  ;;  %v1651_v62 = vld [vmem:[%s4764_s3 + $0x380] sm:$0xff] }
 0x223   :  { %1457 = vmatmul.mubr.f32.vlgmr.msra.gmra.mrb[8].mxu1 %v1322_v25  ;;  %v2474_v25 = vpack.c.bf16 %v1535_v22, %v1534_v21  ;;  %v1547_v61 = vld [vmem:[%s4764_s3 + $0x278] sm:$0xff]  ;;  %v1324_v7 = vmax.f32 %v4473_v26, 0.0  ;;  %v1656_v26 = vld [vmem:[%s4764_s3 + $0x3a8] sm:$0xff]  ;;  %v1641_v21 = vld [vmem:[%s4764_s3 + $0x330] sm:$0xff] }
 0x224   :  { %2439 = vmatpush3.bf16.msra.mxu1 %v2438_v24  ;;  %v1315_v35 = vpop.f32.mrb[6].mxu0  ;;  %1526 = vmatprep.mubr.f32.mxu1 %v1321_v31  ;;  %v1325_v23 = vmax.f32 %v4481_v32, 0.0  ;;  %v1552_v24 = vld [vmem:[%s4764_s3 + $0x2a0] sm:$0xff]  ;;  %v1555_v31 = vld [vmem:[%s4764_s3 + $0x2b8] sm:$0xff] }
 0x225   :  { %v4489_v37 = vadd.f32 %v2544_v2, %v1315_v35  ;;  %v1317_v38 = vpop.f32.mrb[7].mxu0  ;;  %2441 = vmatprep.subr.bf16.mxu1 %v2440_v28  ;;  %v1341_v2 = vld [vmem:[%s4764_s3 + $0x68] sm:$0xff]  ;;  %v2476_v27 = vpack.c.bf16 %v1553_v8, %v1552_v24  ;;  %v1536_v28 = vld [vmem:[%s4764_s3 + $0x220] sm:$0xff]  ;;  %v2480_v33 = vpack.c.bf16 %v1555_v31, %v1554_v30  ;;  %v1539_v35 = vld [vmem:[%s4764_s3 + $0x238] sm:$0xff] }
 0x226   :  { %v4497_v42 = vadd.f32 %v2546_v4, %v1317_v38  ;;  %v1359_v4 = vld [vmem:[%s4764_s3 + $0xf8] sm:$0xff]  ;;  %v2462_v5 = vpack.c.bf16 %v1341_v2, %v1340_v1  ;;  %v2478_v32 = vpack.c.bf16 %v1537_v29, %v1536_v28  ;;  %v1557_v38 = vld [vmem:[%s4764_s3 + $0x2c8] sm:$0xff]  ;;  %v1635_v2 = vld [vmem:[%s4764_s3 + $0x300] sm:$0xff] }
 0x227   :  { %v2464_v6 = vpack.c.bf16 %v1359_v4, %v1358_v3  ;;  %v1636_v3 = vld [vmem:[%s4764_s3 + $0x308] sm:$0xff]  ;;  %v1653_v4 = vld [vmem:[%s4764_s3 + $0x390] sm:$0xff]  ;;  %v1642_v22 = vld [vmem:[%s4764_s3 + $0x338] sm:$0xff] }
 0x228   :  { %2443 = vmatpush3.bf16.msra.mxu1 %v2442_v36  ;;  %v1556_v36 = vld [vmem:[%s4764_s3 + $0x2c0] sm:$0xff]  ;;  %v1660_v24 = vld [vmem:[%s4764_s3 + $0x3c8] sm:$0xff]  ;;  %v2514_v8 = vpack.c.bf16 %v1642_v22, %v1641_v21  ;;  %v1661_v29 = vld [vmem:[%s4764_s3 + $0x3d0] sm:$0xff] }
 0x229   :  { %2445 = vmatprep.subr.bf16.mxu1 %v2444_v39  ;;  %v2482_v39 = vpack.c.bf16 %v1539_v35, %v1538_v34  ;;  %v2484_v40 = vpack.c.bf16 %v1557_v38, %v1556_v36  ;;  %v1644_v28 = vld [vmem:[%s4764_s3 + $0x348] sm:$0xff]  ;;  %v1662_v30 = vld [vmem:[%s4764_s3 + $0x3d8] sm:$0xff]  ;;  %v1663_v35 = vld [vmem:[%s4764_s3 + $0x3e0] sm:$0xff] }
 0x22a   :  { %v1646_v34 = vld [vmem:[%s4764_s3 + $0x358] sm:$0xff]  ;;  %v1664_v36 = vld [vmem:[%s4764_s3 + $0x3e8] sm:$0xff] }
 0x22c   :  { %2447 = vmatpush3.bf16.msra.mxu1 %v2446_v45  ;;  %v1559_v45 = vld [vmem:[%s4764_s3 + $0x2d8] sm:$0xff] }
 0x22d   :  { %2449 = vmatprep.subr.bf16.mxu1 %v2448_v46  ;;  %v2486_v46 = vpack.c.bf16 %v1541_v43, %v1540_v41  ;;  %v2488_v47 = vpack.c.bf16 %v1559_v45, %v1558_v44  ;;  %v1648_v41 = vld [vmem:[%s4764_s3 + $0x368] sm:$0xff]  ;;  %v1665_v43 = vld [vmem:[%s4764_s3 + $0x3f0] sm:$0xff]  ;;  %v1666_v44 = vld [vmem:[%s4764_s3 + $0x3f8] sm:$0xff] }
 0x230   :  { %2451 = vmatpush3.bf16.msra.mxu1 %v2450_v51  ;;  %v1561_v51 = vld [vmem:[%s4764_s3 + $0x2e8] sm:$0xff] }
 0x231   :  { %2453 = vmatprep.subr.bf16.mxu1 %v2452_v52  ;;  %v2490_v52 = vpack.c.bf16 %v1543_v49, %v1542_v48  ;;  %v2492_v53 = vpack.c.bf16 %v1561_v51, %v1560_v50  ;;  %v1650_v48 = vld [vmem:[%s4764_s3 + $0x378] sm:$0xff]  ;;  %v1326_v50 = vmax.f32 %v4489_v37, 0.0 }
 0x234   :  { %2455 = vmatpush3.bf16.msra.mxu1 %v2454_v57  ;;  %v1563_v57 = vld [vmem:[%s4764_s3 + $0x2f8] sm:$0xff] }
 0x235   :  { %2457 = vmatprep.subr.bf16.mxu1 %v2456_v58  ;;  %v2494_v58 = vpack.c.bf16 %v1545_v55, %v1544_v54  ;;  %v2496_v59 = vpack.c.bf16 %v1563_v57, %v1562_v56 }
 0x238   :  { %2459 = vmatpush3.bf16.msra.mxu1 %v2458_v63  ;;  %v1652_v63 = vld [vmem:[%s4764_s3 + $0x388] sm:$0xff] }
 0x239   :  { %2461 = vmatprep.subr.bf16.mxu1 %v2460_v0  ;;  %v2498_v0 = vpack.c.bf16 %v1547_v61, %v1546_v60  ;;  %v2500_v1 = vpack.c.bf16 %v1652_v63, %v1651_v62 }
 0x23c   :  { %2463 = vmatpush3.bf16.msra.mxu1 %v2462_v5  ;;  %v1654_v5 = vld [vmem:[%s4764_s3 + $0x398] sm:$0xff] }
 0x23d   :  { %2465 = vmatprep.subr.bf16.mxu1 %v2464_v6  ;;  %v2502_v6 = vpack.c.bf16 %v1636_v3, %v1635_v2  ;;  %v2504_v9 = vpack.c.bf16 %v1654_v5, %v1653_v4 }
 0x240   :  { %2467 = vmatpush3.bf16.msra.mxu1 %v2466_v12  ;;  %v1327_v12 = vmax.f32 %v4497_v42, 0.0  ;;  %v1640_v42 = vld [vmem:[%s4764_s3 + $0x328] sm:$0xff] }
 0x241   :  { %2469 = vmatprep.subr.bf16.mxu1 %v2468_v13  ;;  %v1655_v13 = vld [vmem:[%s4764_s3 + $0x3a0] sm:$0xff] }
 0x242   :  { %v2508_v15 = vpack.c.bf16 %v1656_v26, %v1655_v13 }
 0x243   :  { %1527 = vmatmul.mubr.f32.vlgmr.msra.gmra.mrb[10].mxu1 %v1320_v19  ;;  %v2510_v19 = vpack.c.bf16 %v1640_v42, %v1639_v16 }
 0x244   :  { %2471 = vmatpush3.bf16.msra.mxu1 %v2470_v18  ;;  %1628 = vmatprep.mubr.f32.mxu1 %v1325_v23  ;;  %v1658_v18 = vld [vmem:[%s4764_s3 + $0x3b8] sm:$0xff]  ;;  %v1659_v23 = vld [vmem:[%s4764_s3 + $0x3c0] sm:$0xff] }
 0x245   :  { %2473 = vmatprep.subr.bf16.mxu1 %v2472_v20  ;;  %v2512_v20 = vpack.c.bf16 %v1658_v18, %v1657_v17 }
 0x248   :  { %2475 = vmatpush3.bf16.msra.mxu1 %v2474_v25  ;;  %v2516_v25 = vpack.c.bf16 %v1660_v24, %v1659_v23 }
 0x249   :  { %2477 = vmatprep.subr.bf16.mxu1 %v2476_v27  ;;  %v1643_v27 = vld [vmem:[%s4764_s3 + $0x340] sm:$0xff] }
 0x24a   :  { %v2518_v31 = vpack.c.bf16 %v1644_v28, %v1643_v27 }
 0x24c   :  { %2479 = vmatpush3.bf16.msra.mxu1 %v2478_v32  ;;  %v2520_v32 = vpack.c.bf16 %v1662_v30, %v1661_v29 }
 0x24d   :  { %2481 = vmatprep.subr.bf16.mxu1 %v2480_v33  ;;  %v1645_v33 = vld [vmem:[%s4764_s3 + $0x350] sm:$0xff] }
 0x24e   :  { %v2522_v38 = vpack.c.bf16 %v1646_v34, %v1645_v33 }
 0x250   :  { %2483 = vmatpush3.bf16.msra.mxu1 %v2482_v39  ;;  %v2524_v39 = vpack.c.bf16 %v1664_v36, %v1663_v35 }
 0x251   :  { %2485 = vmatprep.subr.bf16.mxu1 %v2484_v40  ;;  %v1647_v40 = vld [vmem:[%s4764_s3 + $0x360] sm:$0xff] }
 0x252   :  { %v2526_v45 = vpack.c.bf16 %v1648_v41, %v1647_v40 }
 0x254   :  { %2487 = vmatpush3.bf16.msra.mxu1 %v2486_v46  ;;  %v2528_v46 = vpack.c.bf16 %v1666_v44, %v1665_v43 }
 0x255   :  { %2489 = vmatprep.subr.bf16.mxu1 %v2488_v47  ;;  %v1649_v47 = vld [vmem:[%s4764_s3 + $0x370] sm:$0xff] }
 0x256   :  { %v2530_v49 = vpack.c.bf16 %v1650_v48, %v1649_v47 }
 0x258   :  { %2491 = vmatpush3.bf16.msra.mxu1 %v2490_v52 }
 0x259   :  { %2493 = vmatprep.subr.bf16.mxu1 %v2492_v53 }
 0x25c   :  { %2495 = vmatpush3.bf16.msra.mxu1 %v2494_v58 }
 0x25d   :  { %2497 = vmatprep.subr.bf16.mxu1 %v2496_v59 }
 0x260   :  { %2499 = vmatpush3.bf16.msra.mxu1 %v2498_v0 }
 0x261   :  { %2501 = vmatprep.subr.bf16.mxu1 %v2500_v1  ;;  %v1751_v1 = vld [vmem:[%s4766_s4] ss:$0 sm:$0xff] }
 0x263   :  { %1629 = vmatmul.mubr.f32.vlgmr.msra.gmra.mrb[12].mxu1 %v1324_v7 }
 0x264   :  { %2503 = vmatpush3.bf16.msra.mxu1 %v2502_v6  ;;  %1731 = vmatprep.mubr.f32.mxu1 %v1327_v12 }
 0x265   :  { %2505 = vmatprep.subr.bf16.mxu1 %v2504_v9 }
 0x268   :  { %2507 = vmatpush3.bf16.msra.mxu1 %v2506_v14 }
 0x269   :  { %2509 = vmatprep.subr.bf16.mxu1 %v2508_v15 }
 0x26c   :  { %2511 = vmatpush3.bf16.msra.mxu1 %v2510_v19 }
 0x26d   :  { %2513 = vmatprep.subr.bf16.mxu1 %v2512_v20 }
 0x270   :  { %2515 = vmatpush3.bf16.msra.mxu1 %v2514_v8 }
 0x271   :  { %2517 = vmatprep.subr.bf16.mxu1 %v2516_v25 }
 0x274   :  { %2519 = vmatpush3.bf16.msra.mxu1 %v2518_v31 }
 0x275   :  { %2521 = vmatprep.subr.bf16.mxu1 %v2520_v32 }
 0x278   :  { %2523 = vmatpush3.bf16.msra.mxu1 %v2522_v38 }
 0x279   :  { %2525 = vmatprep.subr.bf16.mxu1 %v2524_v39 }
 0x27c   :  { %2527 = vmatpush3.bf16.msra.mxu1 %v2526_v45 }
 0x27d   :  { %2529 = vmatprep.subr.bf16.mxu1 %v2528_v46 }
 0x280   :  { %2531 = vmatpush3.bf16.msra.mxu1 %v2530_v49 }
 0x283   :  { %1732 = vmatmul.mubr.f32.vlgmr.msra.gmra.mrb[14].mxu1 %v1326_v50 }
 0x2f6   :  { %v1784_v51 = vpop.f32.mrb[8].mxu1 }
 0x2f7   :  { %v1785_v52 = vpop.f32.mrb[9].mxu1 }
 0x2f8   :  { %v1786_v53 = vadd.f32 %v1785_v52, %v1784_v51 }
 0x316   :  { %v1819_v54 = vpop.f32.mrb[10].mxu1 }
 0x317   :  { %v1820_v55 = vpop.f32.mrb[11].mxu1 }
 0x318   :  { %v1821_v56 = vadd.f32 %v1820_v55, %v1819_v54 }
 0x31a   :  { %v1529_v57 = vadd.f32 %v1821_v56, %v1786_v53 }
 0x336   :  { %v1854_v58 = vpop.f32.mrb[12].mxu1 }
 0x337   :  { %v1855_v59 = vpop.f32.mrb[13].mxu1 }
 0x338   :  { %v1856_v60 = vadd.f32 %v1855_v59, %v1854_v58 }
 0x33a   :  { %v1634_v61 = vadd.f32 %v1856_v60, %v1529_v57 }
 0x356   :  { %v1889_v62 = vpop.f32.mrb[14].mxu1 }
 0x357   :  { %v1890_v63 = vpop.f32.mrb[15].mxu1 }
 0x358   :  { %v1891_v0 = vadd.f32 %v1890_v63, %v1889_v62 }
 0x35a   :  { %v1737_v37 = vadd.f32 %v1891_v0, %v1634_v61 }
 0x35c   :  { %v1745_v2 = vadd.f32 %v1751_v1, %v1737_v37 }
 0x35e   :  { %1746 = vst [vmem:[%s4767_s5] sm:$0xff] %v1745_v2 }

</bundles_post_ra>
